<compile_context>
chip_gen: v5e
topology: v5e:2x2
jax: 0.10.0
libtpu: 0.0.40
codegen_flags: <defaults>
</compile_context>

<pallas_src>
import functools

import jax
import jax.numpy as jnp
from jax import lax
from jax.experimental import pallas as pl
from jax.experimental.pallas import tpu as pltpu

FEAT = 256          # TinycarEncoder.FEATURE_VEC_SIZE
M_DIM = 4           # DEFAULT_M_DIM
A_DIM = 1           # DEFAULT_A_DIM
HID1 = 512
GATE = 4 * FEAT
SUBLANE = 8


# ----------------------------------------------------------------------------
# Single fused kernel: LSTM (last hidden) + head (fcm, fca, fc1, fc2)
# Runs once per batch tile (grid axis 0, "parallel").
# ----------------------------------------------------------------------------
def fused_kernel(T, TB,
                 x_ref, ma_ref,
                 wih_ref, whh_ref, bl_ref,
                 wm_ref, bm_ref, wa_ref, ba_ref,
                 w1h_ref, w1m_ref, w1a_ref, b1_ref,
                 w2_ref, b2_ref,
                 out_ref,
                 xproj_ref):
    f32 = jnp.float32
    bf16 = jnp.bfloat16

    # --- 1. Hoisted input projection for all timesteps (one bf16 matmul). ---
    # Result goes straight to a VMEM scratch ref; bias is NOT added here
    # (added per step on the small gate slice instead).
    xproj_ref[...] = jnp.dot(x_ref[...], wih_ref[...],
                             preferred_element_type=f32)       # (T*TB, 4*FEAT)

    # --- 2. Serial LSTM recurrence (fori_loop carries (h, c) in f32). -------
    def step(t, carry):
        h, c = carry
        row0 = pl.multiple_of(t * TB, SUBLANE)
        gates = (xproj_ref[pl.ds(row0, TB), :]
                 + jnp.dot(h.astype(bf16), whh_ref[...],
                           preferred_element_type=f32)
                 + bl_ref[...])                                # (TB, 4*FEAT)
        i_g = jax.nn.sigmoid(gates[:, 0 * FEAT:1 * FEAT])
        f_g = jax.nn.sigmoid(gates[:, 1 * FEAT:2 * FEAT])
        g_g = jnp.tanh(gates[:, 2 * FEAT:3 * FEAT])
        o_g = jax.nn.sigmoid(gates[:, 3 * FEAT:4 * FEAT])
        c = f_g * c + i_g * g_g                                # f32 state
        h = o_g * jnp.tanh(c)                                  # f32 state
        return (h, c)

    h0 = jnp.zeros((TB, FEAT), f32)
    c0 = jnp.zeros((TB, FEAT), f32)
    h, _ = lax.fori_loop(0, T, step, (h0, c0), unroll=True)

    # --- 3. fcm (K=4) / fca (K=1) on the VPU; m & a arrive packed (TB, 8). --
    ma = ma_ref[...]                                           # (TB, 8) f32
    mf = bm_ref[...]
    for k in range(M_DIM):
        mf = mf + ma[:, k:k + 1] * wm_ref[k:k + 1, :]
    mf = jnp.maximum(mf, 0.0)                                  # (TB, FEAT)
    af = jnp.maximum(ma[:, M_DIM:M_DIM + 1] * wa_ref[...] + ba_ref[...],
                     0.0)                                      # (TB, FEAT)

    # --- 4. fc1 over concat([h, mf, af]) as three partial bf16 matmuls. -----
    hid = (jnp.dot(h.astype(bf16), w1h_ref[...], preferred_element_type=f32)
           + jnp.dot(mf.astype(bf16), w1m_ref[...], preferred_element_type=f32)
           + jnp.dot(af.astype(bf16), w1a_ref[...], preferred_element_type=f32)
           + b1_ref[...])
    hid = jnp.maximum(hid, 0.0)                                # (TB, HID1)

    # --- 5. fc2 (N=1): VPU multiply + lane reduction instead of MXU. --------
    out_ref[...] = (jnp.sum(hid * w2_ref[...], axis=-1, keepdims=True)
                    + b2_ref[...])                             # (TB, 1)


# ----------------------------------------------------------------------------
# Wrapper
# ----------------------------------------------------------------------------
def tinycar_critic_lstm(f, m, a, params, *, max_batch_tile=128):
    B, T, _ = f.shape

    # Batch tile: multiple of 8 sublanes, capped; pad the batch to a multiple.
    tb = min(max(B, SUBLANE), max_batch_tile)
    tb = ((tb + SUBLANE - 1) // SUBLANE) * SUBLANE
    b_pad = ((B + tb - 1) // tb) * tb
    pad = b_pad - B
    if pad:
        f = jnp.pad(f, ((0, pad), (0, 0), (0, 0)))
        m = jnp.pad(m, ((0, pad), (0, 0)))
        a = jnp.pad(a, ((0, pad), (0, 0)))
    n_tiles = b_pad // tb

    # Per-batch-tile, time-major 2-D bf16 layout for the hoisted projection:
    # rows [t*tb, (t+1)*tb) of tile i hold timestep t of that batch tile.
    xt = jnp.swapaxes(f, 0, 1).reshape(T, n_tiles, tb, FEAT)
    x_tm = (jnp.transpose(xt, (1, 0, 2, 3))
            .reshape(n_tiles, T * tb, FEAT)
            .astype(jnp.bfloat16))                             # (n_tiles, T*tb, FEAT)

    # m and a packed into a single lane-dense (b_pad, 8) f32 tile.
    ma = jnp.concatenate(
        [m.astype(jnp.float32), a.astype(jnp.float32),
         jnp.zeros((b_pad, SUBLANE - M_DIM - A_DIM), jnp.float32)],
        axis=1)                                                # (b_pad, 8)

    def const(shape):
        return pl.BlockSpec(shape, lambda i, _s=shape: (0,) * len(_s))

    grid_spec = pltpu.PrefetchScalarGridSpec(
        num_scalar_prefetch=0,
        grid=(n_tiles,),
        in_specs=[
            pl.BlockSpec((None, T * tb, FEAT), lambda i: (i, 0, 0)),   # x
            pl.BlockSpec((tb, SUBLANE), lambda i: (i, 0)),             # ma
            const((FEAT, GATE)),        # wih_t
            const((FEAT, GATE)),        # whh_t
            const((1, GATE)),           # b_lstm_row
            const((M_DIM, FEAT)),       # wm_t
            const((1, FEAT)),           # bm_row
            const((A_DIM, FEAT)),       # wa_row
            const((1, FEAT)),           # ba_row
            const((FEAT, HID1)),        # w1h
            const((FEAT, HID1)),        # w1m
            const((FEAT, HID1)),        # w1a
            const((1, HID1)),           # b1_row
            const((1, HID1)),           # w2_row
            const((1, 1)),              # b2_row
        ],
        out_specs=pl.BlockSpec((tb, 1), lambda i: (i, 0)),
        # xproj scratch: f32 here (fits easily at these shapes). For very large
        # T*tb on v7x (64 MiB VMEM) store it in bf16 / tile T instead.
        scratch_shapes=[pltpu.VMEM((T * tb, GATE), jnp.float32)],
    )

    out = pl.pallas_call(
        functools.partial(fused_kernel, T, tb),
        out_shape=jax.ShapeDtypeStruct((b_pad, 1), jnp.float32),
        grid_spec=grid_spec,
        compiler_params=pltpu.CompilerParams(
            dimension_semantics=("parallel",)),
    )(x_tm, ma,
      params["wih_t"], params["whh_t"], params["b_lstm_row"],
      params["wm_t"], params["bm_row"], params["wa_row"], params["ba_row"],
      params["w1h"], params["w1m"], params["w1a"], params["b1_row"],
      params["w2_row"], params["b2_row"])
    return out[:B]


# ----------------------------------------------------------------------------
# Parameter init (deterministic, synthetic) -> kernel-side layouts
# ----------------------------------------------------------------------------
def init_params(key):
    ks = jax.random.split(key, 12)
    s = 0.05
    # fcm: Linear(M_DIM, FEAT); fca: Linear(A_DIM, FEAT)
    wm = jax.random.normal(ks[0], (FEAT, M_DIM), jnp.float32) * s
    bm = jax.random.normal(ks[1], (FEAT,), jnp.float32) * s
    wa = jax.random.normal(ks[2], (FEAT, A_DIM), jnp.float32) * s
    ba = jax.random.normal(ks[3], (FEAT,), jnp.float32) * s
    # LSTM(FEAT, FEAT, 1)
    wih = jax.random.normal(ks[4], (4 * FEAT, FEAT), jnp.float32) * s
    whh = jax.random.normal(ks[5], (4 * FEAT, FEAT), jnp.float32) * s
    bih = jax.random.normal(ks[6], (4 * FEAT,), jnp.float32) * s
    bhh = jax.random.normal(ks[7], (4 * FEAT,), jnp.float32) * s
    # fc1: Linear(3*FEAT, 512); fc2: Linear(512, 1)
    w1 = jax.random.normal(ks[8], (HID1, 3 * FEAT), jnp.float32) * s
    b1 = jax.random.normal(ks[9], (HID1,), jnp.float32) * s
    w2 = jax.random.normal(ks[10], (1, HID1), jnp.float32) * s
    b2 = jax.random.normal(ks[11], (1,), jnp.float32) * s

    p = {}
    # MXU operands -> bf16; VPU operands / biases / state stay f32
    p["wih_t"] = wih.T.astype(jnp.bfloat16)              # (FEAT, 4*FEAT)
    p["whh_t"] = whh.T.astype(jnp.bfloat16)              # (FEAT, 4*FEAT)
    p["b_lstm_row"] = (bih + bhh)[None, :]                # (1, 4*FEAT) f32

    p["wm_t"] = wm.T                                      # (M_DIM, FEAT) f32 (VPU)
    p["bm_row"] = bm[None, :]                             # (1, FEAT)
    p["wa_row"] = wa.T                                    # (A_DIM=1, FEAT) f32 (VPU)
    p["ba_row"] = ba[None, :]                             # (1, FEAT)

    w1_t = w1.T                                           # (3*FEAT, 512)
    p["w1h"] = w1_t[0 * FEAT:1 * FEAT].astype(jnp.bfloat16)
    p["w1m"] = w1_t[1 * FEAT:2 * FEAT].astype(jnp.bfloat16)
    p["w1a"] = w1_t[2 * FEAT:3 * FEAT].astype(jnp.bfloat16)
    p["b1_row"] = b1[None, :]                             # (1, 512)
    p["w2_row"] = w2                                      # (1, 512) f32 (VPU)
    p["b2_row"] = b2[None, :]                             # (1, 1)

    # raw copies for the pure-JAX f32 reference
    p["_raw"] = dict(wm=wm, bm=bm, wa=wa, ba=ba, wih=wih, whh=whh,
                     bih=bih, bhh=bhh, w1=w1, b1=b1, w2=w2, b2=b2)
    return p


# ----------------------------------------------------------------------------
# Pure-JAX f32 reference (mirrors the PyTorch forward exactly)
# ----------------------------------------------------------------------------
def reference_forward(f, m, a, raw):
    B = f.shape[0]
    mf = jax.nn.relu(m @ raw["wm"].T + raw["bm"])
    af = jax.nn.relu(a @ raw["wa"].T + raw["ba"])

    wih_t, whh_t = raw["wih"].T, raw["whh"].T
    bsum = raw["bih"] + raw["bhh"]

    def step(carry, x_t):
        h, c = carry
        g = x_t @ wih_t + h @ whh_t + bsum
        i_g = jax.nn.sigmoid(g[:, 0 * FEAT:1 * FEAT])
        f_g = jax.nn.sigmoid(g[:, 1 * FEAT:2 * FEAT])
        g_g = jnp.tanh(g[:, 2 * FEAT:3 * FEAT])
        o_g = jax.nn.sigmoid(g[:, 3 * FEAT:4 * FEAT])
        c = f_g * c + i_g * g_g
        h = o_g * jnp.tanh(c)
        return (h, c), None

    h0 = jnp.zeros((B, FEAT), jnp.float32)
    c0 = jnp.zeros((B, FEAT), jnp.float32)
    (h_last, _), _ = jax.lax.scan(step, (h0, c0), jnp.swapaxes(f, 0, 1))

    cat = jnp.concatenate([h_last, mf, af], axis=1)
    hid = jax.nn.relu(cat @ raw["w1"].T + raw["b1"])
    return hid @ raw["w2"].T + raw["b2"]


if __name__ == "__main__":
    key = jax.random.PRNGKey(0)
    kp, kf, km, ka = jax.random.split(key, 4)

    B, T = 2, 8
    params = init_params(kp)
    f = jax.random.normal(kf, (B, T, FEAT), jnp.float32)
    m = jax.random.normal(km, (B, M_DIM), jnp.float32)
    a = jax.random.normal(ka, (B, A_DIM), jnp.float32)

    out = jax.block_until_ready(tinycar_critic_lstm(f, m, a, params))
    ref = jax.block_until_ready(reference_forward(f, m, a, params["_raw"]))

    assert out.shape == (B, 1), out.shape
    # bf16 MXU operands -> relaxed tolerance vs. the f32 reference.
    # NOTE: the bf16 re-cast of h before h@Whh compounds per step; at T=8 this
    # stays well inside 3e-2, but expect drift to grow with T.
    assert jnp.allclose(out, ref, atol=3e-2, rtol=3e-2), (out, ref)
    print("KERNEL_OK")
</pallas_src>

<mosaic_0001>
module attributes {stable_mosaic.version = 11 : i64} {
  func.func @fused_kernel(%arg0: i32, %arg1: memref<1x64x256xbf16, #tpu.memory_space<vmem>>, %arg2: memref<8x8xf32, #tpu.memory_space<vmem>>, %arg3: memref<256x1024xbf16, #tpu.memory_space<vmem>>, %arg4: memref<256x1024xbf16, #tpu.memory_space<vmem>>, %arg5: memref<1x1024xf32, #tpu.memory_space<vmem>>, %arg6: memref<4x256xf32, #tpu.memory_space<vmem>>, %arg7: memref<1x256xf32, #tpu.memory_space<vmem>>, %arg8: memref<1x256xf32, #tpu.memory_space<vmem>>, %arg9: memref<1x256xf32, #tpu.memory_space<vmem>>, %arg10: memref<256x512xbf16, #tpu.memory_space<vmem>>, %arg11: memref<256x512xbf16, #tpu.memory_space<vmem>>, %arg12: memref<256x512xbf16, #tpu.memory_space<vmem>>, %arg13: memref<1x512xf32, #tpu.memory_space<vmem>>, %arg14: memref<1x512xf32, #tpu.memory_space<vmem>>, %arg15: memref<1x1xf32, #tpu.memory_space<vmem>>, %arg16: memref<8x1xf32, #tpu.memory_space<vmem>>, %arg17: memref<64x1024xf32, #tpu.memory_space<vmem>>) attributes {dimension_semantics = [#tpu.dimension_semantics<parallel>], iteration_bounds = array<i64: 1>, scalar_prefetch = 0 : i64, scratch_operands = 1 : i64, tpu.core_type = #tpu.core_type<tc>, window_params = [{transform_indices = @transform_0, window_bounds = array<i64: 1, 64, 256>}, {transform_indices = @transform_1, window_bounds = array<i64: 8, 8>}, {pipeline_mode = #tpu.pipeline_mode<synchronous>, transform_indices = @transform_2, window_bounds = array<i64: 256, 1024>}, {pipeline_mode = #tpu.pipeline_mode<synchronous>, transform_indices = @transform_3, window_bounds = array<i64: 256, 1024>}, {pipeline_mode = #tpu.pipeline_mode<synchronous>, transform_indices = @transform_4, window_bounds = array<i64: 1, 1024>}, {pipeline_mode = #tpu.pipeline_mode<synchronous>, transform_indices = @transform_5, window_bounds = array<i64: 4, 256>}, {pipeline_mode = #tpu.pipeline_mode<synchronous>, transform_indices = @transform_6, window_bounds = array<i64: 1, 256>}, {pipeline_mode = #tpu.pipeline_mode<synchronous>, transform_indices = @transform_7, window_bounds = array<i64: 1, 256>}, {pipeline_mode = #tpu.pipeline_mode<synchronous>, transform_indices = @transform_8, window_bounds = array<i64: 1, 256>}, {pipeline_mode = #tpu.pipeline_mode<synchronous>, transform_indices = @transform_9, window_bounds = array<i64: 256, 512>}, {pipeline_mode = #tpu.pipeline_mode<synchronous>, transform_indices = @transform_10, window_bounds = array<i64: 256, 512>}, {pipeline_mode = #tpu.pipeline_mode<synchronous>, transform_indices = @transform_11, window_bounds = array<i64: 256, 512>}, {pipeline_mode = #tpu.pipeline_mode<synchronous>, transform_indices = @transform_12, window_bounds = array<i64: 1, 512>}, {pipeline_mode = #tpu.pipeline_mode<synchronous>, transform_indices = @transform_13, window_bounds = array<i64: 1, 512>}, {pipeline_mode = #tpu.pipeline_mode<synchronous>, transform_indices = @transform_14, window_bounds = array<i64: 1, 1>}, {transform_indices = @transform_15, window_bounds = array<i64: 8, 1>}]} {
    %c0 = arith.constant 0 : index
    %c0_0 = arith.constant 0 : index
    %c0_1 = arith.constant 0 : index
    %0 = vector.load %arg1[%c0, %c0_0, %c0_1] : memref<1x64x256xbf16, #tpu.memory_space<vmem>>, vector<1x64x256xbf16>
    %1 = vector.shape_cast %0 : vector<1x64x256xbf16> to vector<64x256xbf16>
    %c0_2 = arith.constant 0 : index
    %c0_3 = arith.constant 0 : index
    %2 = vector.load %arg3[%c0_2, %c0_3] : memref<256x1024xbf16, #tpu.memory_space<vmem>>, vector<256x1024xbf16>
    %cst = arith.constant dense<0.000000e+00> : vector<64x1024xf32>
    %3 = tpu.matmul %1, %2, %cst {dimension_numbers = #tpu.dot_dimension_numbers<[1], [0], [0], [1], [0, 0, 1, 1], [], []>} : vector<64x256xbf16>, vector<256x1024xbf16>, vector<64x1024xf32> -> vector<64x1024xf32>
    %c0_4 = arith.constant 0 : index
    %c0_5 = arith.constant 0 : index
    %4 = vector.load %arg17[%c0_4, %c0_5] : memref<64x1024xf32, #tpu.memory_space<vmem>>, vector<64x1024xf32>
    tpu.vector_store %arg17[%c0_4, %c0_5], %3 {strides = array<i32>} : memref<64x1024xf32, #tpu.memory_space<vmem>>, vector<64x1024xf32>,
    %cst_6 = arith.constant 0.000000e+00 : f32
    %5 = vector.broadcast %cst_6 : f32 to vector<8x256xf32>
    %cst_7 = arith.constant 0.000000e+00 : f32
    %6 = vector.broadcast %cst_7 : f32 to vector<8x256xf32>
    %c0_i32 = arith.constant 0 : i32
    %c8_i32 = arith.constant 8 : i32
    %7 = arith.muli %c0_i32, %c8_i32 : i32
    %8 = tpu.assume_multiple %7, 8 : i32
    %9 = arith.index_cast %8 : i32 to index
    %c0_8 = arith.constant 0 : index
    %10 = vector.load %arg17[%9, %c0_8] : memref<64x1024xf32, #tpu.memory_space<vmem>>, vector<8x1024xf32>
    %11 = arith.truncf %5 : vector<8x256xf32> to vector<8x256xbf16>
    %c0_9 = arith.constant 0 : index
    %c0_10 = arith.constant 0 : index
    %12 = vector.load %arg4[%c0_9, %c0_10] : memref<256x1024xbf16, #tpu.memory_space<vmem>>, vector<256x1024xbf16>
    %cst_11 = arith.constant dense<0.000000e+00> : vector<8x1024xf32>
    %13 = tpu.matmul %11, %12, %cst_11 {dimension_numbers = #tpu.dot_dimension_numbers<[1], [0], [0], [1], [0, 0, 1, 1], [], []>} : vector<8x256xbf16>, vector<256x1024xbf16>, vector<8x1024xf32> -> vector<8x1024xf32>
    %14 = arith.addf %10, %13 : vector<8x1024xf32>
    %c0_12 = arith.constant 0 : index
    %c0_13 = arith.constant 0 : index
    %15 = vector.load %arg5[%c0_12, %c0_13] : memref<1x1024xf32, #tpu.memory_space<vmem>>, vector<1x1024xf32>
    %16 = vector.broadcast %15 : vector<1x1024xf32> to vector<8x1024xf32>
    %17 = arith.addf %14, %16 : vector<8x1024xf32>
    %18 = vector.extract_strided_slice %17 {offsets = [0, 0], sizes = [8, 256], strides = [1, 1]} : vector<8x1024xf32> to vector<8x256xf32>
    %19 = arith.negf %18 : vector<8x256xf32>
    %20 = math.exp %19 : vector<8x256xf32>
    %cst_14 = arith.constant 1.000000e+00 : f32
    %21 = vector.broadcast %cst_14 : f32 to vector<8x256xf32>
    %22 = arith.addf %21, %20 : vector<8x256xf32>
    %23 = arith.divf %21, %22 : vector<8x256xf32>
    %24 = vector.extract_strided_slice %17 {offsets = [0, 256], sizes = [8, 256], strides = [1, 1]} : vector<8x1024xf32> to vector<8x256xf32>
    %25 = arith.negf %24 : vector<8x256xf32>
    %26 = math.exp %25 : vector<8x256xf32>
    %cst_15 = arith.constant 1.000000e+00 : f32
    %27 = vector.broadcast %cst_15 : f32 to vector<8x256xf32>
    %28 = arith.addf %27, %26 : vector<8x256xf32>
    %29 = arith.divf %27, %28 : vector<8x256xf32>
    %30 = vector.extract_strided_slice %17 {offsets = [0, 512], sizes = [8, 256], strides = [1, 1]} : vector<8x1024xf32> to vector<8x256xf32>
    %31 = math.tanh %30 : vector<8x256xf32>
    %32 = vector.extract_strided_slice %17 {offsets = [0, 768], sizes = [8, 256], strides = [1, 1]} : vector<8x1024xf32> to vector<8x256xf32>
    %33 = arith.negf %32 : vector<8x256xf32>
    %34 = math.exp %33 : vector<8x256xf32>
    %cst_16 = arith.constant 1.000000e+00 : f32
    %35 = vector.broadcast %cst_16 : f32 to vector<8x256xf32>
    %36 = arith.addf %35, %34 : vector<8x256xf32>
    %37 = arith.divf %35, %36 : vector<8x256xf32>
    %38 = arith.mulf %29, %6 : vector<8x256xf32>
    %39 = arith.mulf %23, %31 : vector<8x256xf32>
    %40 = arith.addf %38, %39 : vector<8x256xf32>
    %41 = math.tanh %40 : vector<8x256xf32>
    %42 = arith.mulf %37, %41 : vector<8x256xf32>
    %c1_i32 = arith.constant 1 : i32
    %c8_i32_17 = arith.constant 8 : i32
    %43 = arith.muli %c1_i32, %c8_i32_17 : i32
    %44 = tpu.assume_multiple %43, 8 : i32
    %45 = arith.index_cast %44 : i32 to index
    %c0_18 = arith.constant 0 : index
    %46 = vector.load %arg17[%45, %c0_18] : memref<64x1024xf32, #tpu.memory_space<vmem>>, vector<8x1024xf32>
    %47 = arith.truncf %42 : vector<8x256xf32> to vector<8x256xbf16>
    %c0_19 = arith.constant 0 : index
    %c0_20 = arith.constant 0 : index
    %48 = vector.load %arg4[%c0_19, %c0_20] : memref<256x1024xbf16, #tpu.memory_space<vmem>>, vector<256x1024xbf16>
    %cst_21 = arith.constant dense<0.000000e+00> : vector<8x1024xf32>
    %49 = tpu.matmul %47, %48, %cst_21 {dimension_numbers = #tpu.dot_dimension_numbers<[1], [0], [0], [1], [0, 0, 1, 1], [], []>} : vector<8x256xbf16>, vector<256x1024xbf16>, vector<8x1024xf32> -> vector<8x1024xf32>
    %50 = arith.addf %46, %49 : vector<8x1024xf32>
    %c0_22 = arith.constant 0 : index
    %c0_23 = arith.constant 0 : index
    %51 = vector.load %arg5[%c0_22, %c0_23] : memref<1x1024xf32, #tpu.memory_space<vmem>>, vector<1x1024xf32>
    %52 = vector.broadcast %51 : vector<1x1024xf32> to vector<8x1024xf32>
    %53 = arith.addf %50, %52 : vector<8x1024xf32>
    %54 = vector.extract_strided_slice %53 {offsets = [0, 0], sizes = [8, 256], strides = [1, 1]} : vector<8x1024xf32> to vector<8x256xf32>
    %55 = arith.negf %54 : vector<8x256xf32>
    %56 = math.exp %55 : vector<8x256xf32>
    %cst_24 = arith.constant 1.000000e+00 : f32
    %57 = vector.broadcast %cst_24 : f32 to vector<8x256xf32>
    %58 = arith.addf %57, %56 : vector<8x256xf32>
    %59 = arith.divf %57, %58 : vector<8x256xf32>
    %60 = vector.extract_strided_slice %53 {offsets = [0, 256], sizes = [8, 256], strides = [1, 1]} : vector<8x1024xf32> to vector<8x256xf32>
    %61 = arith.negf %60 : vector<8x256xf32>
    %62 = math.exp %61 : vector<8x256xf32>
    %cst_25 = arith.constant 1.000000e+00 : f32
    %63 = vector.broadcast %cst_25 : f32 to vector<8x256xf32>
    %64 = arith.addf %63, %62 : vector<8x256xf32>
    %65 = arith.divf %63, %64 : vector<8x256xf32>
    %66 = vector.extract_strided_slice %53 {offsets = [0, 512], sizes = [8, 256], strides = [1, 1]} : vector<8x1024xf32> to vector<8x256xf32>
    %67 = math.tanh %66 : vector<8x256xf32>
    %68 = vector.extract_strided_slice %53 {offsets = [0, 768], sizes = [8, 256], strides = [1, 1]} : vector<8x1024xf32> to vector<8x256xf32>
    %69 = arith.negf %68 : vector<8x256xf32>
    %70 = math.exp %69 : vector<8x256xf32>
    %cst_26 = arith.constant 1.000000e+00 : f32
    %71 = vector.broadcast %cst_26 : f32 to vector<8x256xf32>
    %72 = arith.addf %71, %70 : vector<8x256xf32>
    %73 = arith.divf %71, %72 : vector<8x256xf32>
    %74 = arith.mulf %65, %40 : vector<8x256xf32>
    %75 = arith.mulf %59, %67 : vector<8x256xf32>
    %76 = arith.addf %74, %75 : vector<8x256xf32>
    %77 = math.tanh %76 : vector<8x256xf32>
    %78 = arith.mulf %73, %77 : vector<8x256xf32>
    %c2_i32 = arith.constant 2 : i32
    %c8_i32_27 = arith.constant 8 : i32
    %79 = arith.muli %c2_i32, %c8_i32_27 : i32
    %80 = tpu.assume_multiple %79, 8 : i32
    %81 = arith.index_cast %80 : i32 to index
    %c0_28 = arith.constant 0 : index
    %82 = vector.load %arg17[%81, %c0_28] : memref<64x1024xf32, #tpu.memory_space<vmem>>, vector<8x1024xf32>
    %83 = arith.truncf %78 : vector<8x256xf32> to vector<8x256xbf16>
    %c0_29 = arith.constant 0 : index
    %c0_30 = arith.constant 0 : index
    %84 = vector.load %arg4[%c0_29, %c0_30] : memref<256x1024xbf16, #tpu.memory_space<vmem>>, vector<256x1024xbf16>
    %cst_31 = arith.constant dense<0.000000e+00> : vector<8x1024xf32>
    %85 = tpu.matmul %83, %84, %cst_31 {dimension_numbers = #tpu.dot_dimension_numbers<[1], [0], [0], [1], [0, 0, 1, 1], [], []>} : vector<8x256xbf16>, vector<256x1024xbf16>, vector<8x1024xf32> -> vector<8x1024xf32>
    %86 = arith.addf %82, %85 : vector<8x1024xf32>
    %c0_32 = arith.constant 0 : index
    %c0_33 = arith.constant 0 : index
    %87 = vector.load %arg5[%c0_32, %c0_33] : memref<1x1024xf32, #tpu.memory_space<vmem>>, vector<1x1024xf32>
    %88 = vector.broadcast %87 : vector<1x1024xf32> to vector<8x1024xf32>
    %89 = arith.addf %86, %88 : vector<8x1024xf32>
    %90 = vector.extract_strided_slice %89 {offsets = [0, 0], sizes = [8, 256], strides = [1, 1]} : vector<8x1024xf32> to vector<8x256xf32>
    %91 = arith.negf %90 : vector<8x256xf32>
    %92 = math.exp %91 : vector<8x256xf32>
    %cst_34 = arith.constant 1.000000e+00 : f32
    %93 = vector.broadcast %cst_34 : f32 to vector<8x256xf32>
    %94 = arith.addf %93, %92 : vector<8x256xf32>
    %95 = arith.divf %93, %94 : vector<8x256xf32>
    %96 = vector.extract_strided_slice %89 {offsets = [0, 256], sizes = [8, 256], strides = [1, 1]} : vector<8x1024xf32> to vector<8x256xf32>
    %97 = arith.negf %96 : vector<8x256xf32>
    %98 = math.exp %97 : vector<8x256xf32>
    %cst_35 = arith.constant 1.000000e+00 : f32
    %99 = vector.broadcast %cst_35 : f32 to vector<8x256xf32>
    %100 = arith.addf %99, %98 : vector<8x256xf32>
    %101 = arith.divf %99, %100 : vector<8x256xf32>
    %102 = vector.extract_strided_slice %89 {offsets = [0, 512], sizes = [8, 256], strides = [1, 1]} : vector<8x1024xf32> to vector<8x256xf32>
    %103 = math.tanh %102 : vector<8x256xf32>
    %104 = vector.extract_strided_slice %89 {offsets = [0, 768], sizes = [8, 256], strides = [1, 1]} : vector<8x1024xf32> to vector<8x256xf32>
    %105 = arith.negf %104 : vector<8x256xf32>
    %106 = math.exp %105 : vector<8x256xf32>
    %cst_36 = arith.constant 1.000000e+00 : f32
    %107 = vector.broadcast %cst_36 : f32 to vector<8x256xf32>
    %108 = arith.addf %107, %106 : vector<8x256xf32>
    %109 = arith.divf %107, %108 : vector<8x256xf32>
    %110 = arith.mulf %101, %76 : vector<8x256xf32>
    %111 = arith.mulf %95, %103 : vector<8x256xf32>
    %112 = arith.addf %110, %111 : vector<8x256xf32>
    %113 = math.tanh %112 : vector<8x256xf32>
    %114 = arith.mulf %109, %113 : vector<8x256xf32>
    %c3_i32 = arith.constant 3 : i32
    %c8_i32_37 = arith.constant 8 : i32
    %115 = arith.muli %c3_i32, %c8_i32_37 : i32
    %116 = tpu.assume_multiple %115, 8 : i32
    %117 = arith.index_cast %116 : i32 to index
    %c0_38 = arith.constant 0 : index
    %118 = vector.load %arg17[%117, %c0_38] : memref<64x1024xf32, #tpu.memory_space<vmem>>, vector<8x1024xf32>
    %119 = arith.truncf %114 : vector<8x256xf32> to vector<8x256xbf16>
    %c0_39 = arith.constant 0 : index
    %c0_40 = arith.constant 0 : index
    %120 = vector.load %arg4[%c0_39, %c0_40] : memref<256x1024xbf16, #tpu.memory_space<vmem>>, vector<256x1024xbf16>
    %cst_41 = arith.constant dense<0.000000e+00> : vector<8x1024xf32>
    %121 = tpu.matmul %119, %120, %cst_41 {dimension_numbers = #tpu.dot_dimension_numbers<[1], [0], [0], [1], [0, 0, 1, 1], [], []>} : vector<8x256xbf16>, vector<256x1024xbf16>, vector<8x1024xf32> -> vector<8x1024xf32>
    %122 = arith.addf %118, %121 : vector<8x1024xf32>
    %c0_42 = arith.constant 0 : index
    %c0_43 = arith.constant 0 : index
    %123 = vector.load %arg5[%c0_42, %c0_43] : memref<1x1024xf32, #tpu.memory_space<vmem>>, vector<1x1024xf32>
    %124 = vector.broadcast %123 : vector<1x1024xf32> to vector<8x1024xf32>
    %125 = arith.addf %122, %124 : vector<8x1024xf32>
    %126 = vector.extract_strided_slice %125 {offsets = [0, 0], sizes = [8, 256], strides = [1, 1]} : vector<8x1024xf32> to vector<8x256xf32>
    %127 = arith.negf %126 : vector<8x256xf32>
    %128 = math.exp %127 : vector<8x256xf32>
    %cst_44 = arith.constant 1.000000e+00 : f32
    %129 = vector.broadcast %cst_44 : f32 to vector<8x256xf32>
    %130 = arith.addf %129, %128 : vector<8x256xf32>
    %131 = arith.divf %129, %130 : vector<8x256xf32>
    %132 = vector.extract_strided_slice %125 {offsets = [0, 256], sizes = [8, 256], strides = [1, 1]} : vector<8x1024xf32> to vector<8x256xf32>
    %133 = arith.negf %132 : vector<8x256xf32>
    %134 = math.exp %133 : vector<8x256xf32>
    %cst_45 = arith.constant 1.000000e+00 : f32
    %135 = vector.broadcast %cst_45 : f32 to vector<8x256xf32>
    %136 = arith.addf %135, %134 : vector<8x256xf32>
    %137 = arith.divf %135, %136 : vector<8x256xf32>
    %138 = vector.extract_strided_slice %125 {offsets = [0, 512], sizes = [8, 256], strides = [1, 1]} : vector<8x1024xf32> to vector<8x256xf32>
    %139 = math.tanh %138 : vector<8x256xf32>
    %140 = vector.extract_strided_slice %125 {offsets = [0, 768], sizes = [8, 256], strides = [1, 1]} : vector<8x1024xf32> to vector<8x256xf32>
    %141 = arith.negf %140 : vector<8x256xf32>
    %142 = math.exp %141 : vector<8x256xf32>
    %cst_46 = arith.constant 1.000000e+00 : f32
    %143 = vector.broadcast %cst_46 : f32 to vector<8x256xf32>
    %144 = arith.addf %143, %142 : vector<8x256xf32>
    %145 = arith.divf %143, %144 : vector<8x256xf32>
    %146 = arith.mulf %137, %112 : vector<8x256xf32>
    %147 = arith.mulf %131, %139 : vector<8x256xf32>
    %148 = arith.addf %146, %147 : vector<8x256xf32>
    %149 = math.tanh %148 : vector<8x256xf32>
    %150 = arith.mulf %145, %149 : vector<8x256xf32>
    %c4_i32 = arith.constant 4 : i32
    %c8_i32_47 = arith.constant 8 : i32
    %151 = arith.muli %c4_i32, %c8_i32_47 : i32
    %152 = tpu.assume_multiple %151, 8 : i32
    %153 = arith.index_cast %152 : i32 to index
    %c0_48 = arith.constant 0 : index
    %154 = vector.load %arg17[%153, %c0_48] : memref<64x1024xf32, #tpu.memory_space<vmem>>, vector<8x1024xf32>
    %155 = arith.truncf %150 : vector<8x256xf32> to vector<8x256xbf16>
    %c0_49 = arith.constant 0 : index
    %c0_50 = arith.constant 0 : index
    %156 = vector.load %arg4[%c0_49, %c0_50] : memref<256x1024xbf16, #tpu.memory_space<vmem>>, vector<256x1024xbf16>
    %cst_51 = arith.constant dense<0.000000e+00> : vector<8x1024xf32>
    %157 = tpu.matmul %155, %156, %cst_51 {dimension_numbers = #tpu.dot_dimension_numbers<[1], [0], [0], [1], [0, 0, 1, 1], [], []>} : vector<8x256xbf16>, vector<256x1024xbf16>, vector<8x1024xf32> -> vector<8x1024xf32>
    %158 = arith.addf %154, %157 : vector<8x1024xf32>
    %c0_52 = arith.constant 0 : index
    %c0_53 = arith.constant 0 : index
    %159 = vector.load %arg5[%c0_52, %c0_53] : memref<1x1024xf32, #tpu.memory_space<vmem>>, vector<1x1024xf32>
    %160 = vector.broadcast %159 : vector<1x1024xf32> to vector<8x1024xf32>
    %161 = arith.addf %158, %160 : vector<8x1024xf32>
    %162 = vector.extract_strided_slice %161 {offsets = [0, 0], sizes = [8, 256], strides = [1, 1]} : vector<8x1024xf32> to vector<8x256xf32>
    %163 = arith.negf %162 : vector<8x256xf32>
    %164 = math.exp %163 : vector<8x256xf32>
    %cst_54 = arith.constant 1.000000e+00 : f32
    %165 = vector.broadcast %cst_54 : f32 to vector<8x256xf32>
    %166 = arith.addf %165, %164 : vector<8x256xf32>
    %167 = arith.divf %165, %166 : vector<8x256xf32>
    %168 = vector.extract_strided_slice %161 {offsets = [0, 256], sizes = [8, 256], strides = [1, 1]} : vector<8x1024xf32> to vector<8x256xf32>
    %169 = arith.negf %168 : vector<8x256xf32>
    %170 = math.exp %169 : vector<8x256xf32>
    %cst_55 = arith.constant 1.000000e+00 : f32
    %171 = vector.broadcast %cst_55 : f32 to vector<8x256xf32>
    %172 = arith.addf %171, %170 : vector<8x256xf32>
    %173 = arith.divf %171, %172 : vector<8x256xf32>
    %174 = vector.extract_strided_slice %161 {offsets = [0, 512], sizes = [8, 256], strides = [1, 1]} : vector<8x1024xf32> to vector<8x256xf32>
    %175 = math.tanh %174 : vector<8x256xf32>
    %176 = vector.extract_strided_slice %161 {offsets = [0, 768], sizes = [8, 256], strides = [1, 1]} : vector<8x1024xf32> to vector<8x256xf32>
    %177 = arith.negf %176 : vector<8x256xf32>
    %178 = math.exp %177 : vector<8x256xf32>
    %cst_56 = arith.constant 1.000000e+00 : f32
    %179 = vector.broadcast %cst_56 : f32 to vector<8x256xf32>
    %180 = arith.addf %179, %178 : vector<8x256xf32>
    %181 = arith.divf %179, %180 : vector<8x256xf32>
    %182 = arith.mulf %173, %148 : vector<8x256xf32>
    %183 = arith.mulf %167, %175 : vector<8x256xf32>
    %184 = arith.addf %182, %183 : vector<8x256xf32>
    %185 = math.tanh %184 : vector<8x256xf32>
    %186 = arith.mulf %181, %185 : vector<8x256xf32>
    %c5_i32 = arith.constant 5 : i32
    %c8_i32_57 = arith.constant 8 : i32
    %187 = arith.muli %c5_i32, %c8_i32_57 : i32
    %188 = tpu.assume_multiple %187, 8 : i32
    %189 = arith.index_cast %188 : i32 to index
    %c0_58 = arith.constant 0 : index
    %190 = vector.load %arg17[%189, %c0_58] : memref<64x1024xf32, #tpu.memory_space<vmem>>, vector<8x1024xf32>
    %191 = arith.truncf %186 : vector<8x256xf32> to vector<8x256xbf16>
    %c0_59 = arith.constant 0 : index
    %c0_60 = arith.constant 0 : index
    %192 = vector.load %arg4[%c0_59, %c0_60] : memref<256x1024xbf16, #tpu.memory_space<vmem>>, vector<256x1024xbf16>
    %cst_61 = arith.constant dense<0.000000e+00> : vector<8x1024xf32>
    %193 = tpu.matmul %191, %192, %cst_61 {dimension_numbers = #tpu.dot_dimension_numbers<[1], [0], [0], [1], [0, 0, 1, 1], [], []>} : vector<8x256xbf16>, vector<256x1024xbf16>, vector<8x1024xf32> -> vector<8x1024xf32>
    %194 = arith.addf %190, %193 : vector<8x1024xf32>
    %c0_62 = arith.constant 0 : index
    %c0_63 = arith.constant 0 : index
    %195 = vector.load %arg5[%c0_62, %c0_63] : memref<1x1024xf32, #tpu.memory_space<vmem>>, vector<1x1024xf32>
    %196 = vector.broadcast %195 : vector<1x1024xf32> to vector<8x1024xf32>
    %197 = arith.addf %194, %196 : vector<8x1024xf32>
    %198 = vector.extract_strided_slice %197 {offsets = [0, 0], sizes = [8, 256], strides = [1, 1]} : vector<8x1024xf32> to vector<8x256xf32>
    %199 = arith.negf %198 : vector<8x256xf32>
    %200 = math.exp %199 : vector<8x256xf32>
    %cst_64 = arith.constant 1.000000e+00 : f32
    %201 = vector.broadcast %cst_64 : f32 to vector<8x256xf32>
    %202 = arith.addf %201, %200 : vector<8x256xf32>
    %203 = arith.divf %201, %202 : vector<8x256xf32>
    %204 = vector.extract_strided_slice %197 {offsets = [0, 256], sizes = [8, 256], strides = [1, 1]} : vector<8x1024xf32> to vector<8x256xf32>
    %205 = arith.negf %204 : vector<8x256xf32>
    %206 = math.exp %205 : vector<8x256xf32>
    %cst_65 = arith.constant 1.000000e+00 : f32
    %207 = vector.broadcast %cst_65 : f32 to vector<8x256xf32>
    %208 = arith.addf %207, %206 : vector<8x256xf32>
    %209 = arith.divf %207, %208 : vector<8x256xf32>
    %210 = vector.extract_strided_slice %197 {offsets = [0, 512], sizes = [8, 256], strides = [1, 1]} : vector<8x1024xf32> to vector<8x256xf32>
    %211 = math.tanh %210 : vector<8x256xf32>
    %212 = vector.extract_strided_slice %197 {offsets = [0, 768], sizes = [8, 256], strides = [1, 1]} : vector<8x1024xf32> to vector<8x256xf32>
    %213 = arith.negf %212 : vector<8x256xf32>
    %214 = math.exp %213 : vector<8x256xf32>
    %cst_66 = arith.constant 1.000000e+00 : f32
    %215 = vector.broadcast %cst_66 : f32 to vector<8x256xf32>
    %216 = arith.addf %215, %214 : vector<8x256xf32>
    %217 = arith.divf %215, %216 : vector<8x256xf32>
    %218 = arith.mulf %209, %184 : vector<8x256xf32>
    %219 = arith.mulf %203, %211 : vector<8x256xf32>
    %220 = arith.addf %218, %219 : vector<8x256xf32>
    %221 = math.tanh %220 : vector<8x256xf32>
    %222 = arith.mulf %217, %221 : vector<8x256xf32>
    %c6_i32 = arith.constant 6 : i32
    %c8_i32_67 = arith.constant 8 : i32
    %223 = arith.muli %c6_i32, %c8_i32_67 : i32
    %224 = tpu.assume_multiple %223, 8 : i32
    %225 = arith.index_cast %224 : i32 to index
    %c0_68 = arith.constant 0 : index
    %226 = vector.load %arg17[%225, %c0_68] : memref<64x1024xf32, #tpu.memory_space<vmem>>, vector<8x1024xf32>
    %227 = arith.truncf %222 : vector<8x256xf32> to vector<8x256xbf16>
    %c0_69 = arith.constant 0 : index
    %c0_70 = arith.constant 0 : index
    %228 = vector.load %arg4[%c0_69, %c0_70] : memref<256x1024xbf16, #tpu.memory_space<vmem>>, vector<256x1024xbf16>
    %cst_71 = arith.constant dense<0.000000e+00> : vector<8x1024xf32>
    %229 = tpu.matmul %227, %228, %cst_71 {dimension_numbers = #tpu.dot_dimension_numbers<[1], [0], [0], [1], [0, 0, 1, 1], [], []>} : vector<8x256xbf16>, vector<256x1024xbf16>, vector<8x1024xf32> -> vector<8x1024xf32>
    %230 = arith.addf %226, %229 : vector<8x1024xf32>
    %c0_72 = arith.constant 0 : index
    %c0_73 = arith.constant 0 : index
    %231 = vector.load %arg5[%c0_72, %c0_73] : memref<1x1024xf32, #tpu.memory_space<vmem>>, vector<1x1024xf32>
    %232 = vector.broadcast %231 : vector<1x1024xf32> to vector<8x1024xf32>
    %233 = arith.addf %230, %232 : vector<8x1024xf32>
    %234 = vector.extract_strided_slice %233 {offsets = [0, 0], sizes = [8, 256], strides = [1, 1]} : vector<8x1024xf32> to vector<8x256xf32>
    %235 = arith.negf %234 : vector<8x256xf32>
    %236 = math.exp %235 : vector<8x256xf32>
    %cst_74 = arith.constant 1.000000e+00 : f32
    %237 = vector.broadcast %cst_74 : f32 to vector<8x256xf32>
    %238 = arith.addf %237, %236 : vector<8x256xf32>
    %239 = arith.divf %237, %238 : vector<8x256xf32>
    %240 = vector.extract_strided_slice %233 {offsets = [0, 256], sizes = [8, 256], strides = [1, 1]} : vector<8x1024xf32> to vector<8x256xf32>
    %241 = arith.negf %240 : vector<8x256xf32>
    %242 = math.exp %241 : vector<8x256xf32>
    %cst_75 = arith.constant 1.000000e+00 : f32
    %243 = vector.broadcast %cst_75 : f32 to vector<8x256xf32>
    %244 = arith.addf %243, %242 : vector<8x256xf32>
    %245 = arith.divf %243, %244 : vector<8x256xf32>
    %246 = vector.extract_strided_slice %233 {offsets = [0, 512], sizes = [8, 256], strides = [1, 1]} : vector<8x1024xf32> to vector<8x256xf32>
    %247 = math.tanh %246 : vector<8x256xf32>
    %248 = vector.extract_strided_slice %233 {offsets = [0, 768], sizes = [8, 256], strides = [1, 1]} : vector<8x1024xf32> to vector<8x256xf32>
    %249 = arith.negf %248 : vector<8x256xf32>
    %250 = math.exp %249 : vector<8x256xf32>
    %cst_76 = arith.constant 1.000000e+00 : f32
    %251 = vector.broadcast %cst_76 : f32 to vector<8x256xf32>
    %252 = arith.addf %251, %250 : vector<8x256xf32>
    %253 = arith.divf %251, %252 : vector<8x256xf32>
    %254 = arith.mulf %245, %220 : vector<8x256xf32>
    %255 = arith.mulf %239, %247 : vector<8x256xf32>
    %256 = arith.addf %254, %255 : vector<8x256xf32>
    %257 = math.tanh %256 : vector<8x256xf32>
    %258 = arith.mulf %253, %257 : vector<8x256xf32>
    %c7_i32 = arith.constant 7 : i32
    %c8_i32_77 = arith.constant 8 : i32
    %259 = arith.muli %c7_i32, %c8_i32_77 : i32
    %260 = tpu.assume_multiple %259, 8 : i32
    %261 = arith.index_cast %260 : i32 to index
    %c0_78 = arith.constant 0 : index
    %262 = vector.load %arg17[%261, %c0_78] : memref<64x1024xf32, #tpu.memory_space<vmem>>, vector<8x1024xf32>
    %263 = arith.truncf %258 : vector<8x256xf32> to vector<8x256xbf16>
    %c0_79 = arith.constant 0 : index
    %c0_80 = arith.constant 0 : index
    %264 = vector.load %arg4[%c0_79, %c0_80] : memref<256x1024xbf16, #tpu.memory_space<vmem>>, vector<256x1024xbf16>
    %cst_81 = arith.constant dense<0.000000e+00> : vector<8x1024xf32>
    %265 = tpu.matmul %263, %264, %cst_81 {dimension_numbers = #tpu.dot_dimension_numbers<[1], [0], [0], [1], [0, 0, 1, 1], [], []>} : vector<8x256xbf16>, vector<256x1024xbf16>, vector<8x1024xf32> -> vector<8x1024xf32>
    %266 = arith.addf %262, %265 : vector<8x1024xf32>
    %c0_82 = arith.constant 0 : index
    %c0_83 = arith.constant 0 : index
    %267 = vector.load %arg5[%c0_82, %c0_83] : memref<1x1024xf32, #tpu.memory_space<vmem>>, vector<1x1024xf32>
    %268 = vector.broadcast %267 : vector<1x1024xf32> to vector<8x1024xf32>
    %269 = arith.addf %266, %268 : vector<8x1024xf32>
    %270 = vector.extract_strided_slice %269 {offsets = [0, 0], sizes = [8, 256], strides = [1, 1]} : vector<8x1024xf32> to vector<8x256xf32>
    %271 = arith.negf %270 : vector<8x256xf32>
    %272 = math.exp %271 : vector<8x256xf32>
    %cst_84 = arith.constant 1.000000e+00 : f32
    %273 = vector.broadcast %cst_84 : f32 to vector<8x256xf32>
    %274 = arith.addf %273, %272 : vector<8x256xf32>
    %275 = arith.divf %273, %274 : vector<8x256xf32>
    %276 = vector.extract_strided_slice %269 {offsets = [0, 256], sizes = [8, 256], strides = [1, 1]} : vector<8x1024xf32> to vector<8x256xf32>
    %277 = arith.negf %276 : vector<8x256xf32>
    %278 = math.exp %277 : vector<8x256xf32>
    %cst_85 = arith.constant 1.000000e+00 : f32
    %279 = vector.broadcast %cst_85 : f32 to vector<8x256xf32>
    %280 = arith.addf %279, %278 : vector<8x256xf32>
    %281 = arith.divf %279, %280 : vector<8x256xf32>
    %282 = vector.extract_strided_slice %269 {offsets = [0, 512], sizes = [8, 256], strides = [1, 1]} : vector<8x1024xf32> to vector<8x256xf32>
    %283 = math.tanh %282 : vector<8x256xf32>
    %284 = vector.extract_strided_slice %269 {offsets = [0, 768], sizes = [8, 256], strides = [1, 1]} : vector<8x1024xf32> to vector<8x256xf32>
    %285 = arith.negf %284 : vector<8x256xf32>
    %286 = math.exp %285 : vector<8x256xf32>
    %cst_86 = arith.constant 1.000000e+00 : f32
    %287 = vector.broadcast %cst_86 : f32 to vector<8x256xf32>
    %288 = arith.addf %287, %286 : vector<8x256xf32>
    %289 = arith.divf %287, %288 : vector<8x256xf32>
    %290 = arith.mulf %281, %256 : vector<8x256xf32>
    %291 = arith.mulf %275, %283 : vector<8x256xf32>
    %292 = arith.addf %290, %291 : vector<8x256xf32>
    %293 = math.tanh %292 : vector<8x256xf32>
    %294 = arith.mulf %289, %293 : vector<8x256xf32>
    %c8_i32_87 = arith.constant 8 : i32
    %c0_88 = arith.constant 0 : index
    %c0_89 = arith.constant 0 : index
    %295 = vector.load %arg2[%c0_88, %c0_89] : memref<8x8xf32, #tpu.memory_space<vmem>>, vector<8x8xf32>
    %c0_90 = arith.constant 0 : index
    %c0_91 = arith.constant 0 : index
    %296 = vector.load %arg7[%c0_90, %c0_91] : memref<1x256xf32, #tpu.memory_space<vmem>>, vector<1x256xf32>
    %297 = vector.extract_strided_slice %295 {offsets = [0, 0], sizes = [8, 1], strides = [1, 1]} : vector<8x8xf32> to vector<8x1xf32>
    %c0_92 = arith.constant 0 : index
    %c0_93 = arith.constant 0 : index
    %298 = vector.load %arg6[%c0_92, %c0_93] : memref<4x256xf32, #tpu.memory_space<vmem>>, vector<1x256xf32>
    %299 = vector.broadcast %297 : vector<8x1xf32> to vector<8x256xf32>
    %300 = vector.broadcast %298 : vector<1x256xf32> to vector<8x256xf32>
    %301 = arith.mulf %299, %300 : vector<8x256xf32>
    %302 = vector.broadcast %296 : vector<1x256xf32> to vector<8x256xf32>
    %303 = arith.addf %302, %301 : vector<8x256xf32>
    %304 = vector.extract_strided_slice %295 {offsets = [0, 1], sizes = [8, 1], strides = [1, 1]} : vector<8x8xf32> to vector<8x1xf32>
    %c1 = arith.constant 1 : index
    %c0_94 = arith.constant 0 : index
    %305 = vector.load %arg6[%c1, %c0_94] : memref<4x256xf32, #tpu.memory_space<vmem>>, vector<1x256xf32>
    %306 = vector.broadcast %304 : vector<8x1xf32> to vector<8x256xf32>
    %307 = vector.broadcast %305 : vector<1x256xf32> to vector<8x256xf32>
    %308 = arith.mulf %306, %307 : vector<8x256xf32>
    %309 = arith.addf %303, %308 : vector<8x256xf32>
    %310 = vector.extract_strided_slice %295 {offsets = [0, 2], sizes = [8, 1], strides = [1, 1]} : vector<8x8xf32> to vector<8x1xf32>
    %c2 = arith.constant 2 : index
    %c0_95 = arith.constant 0 : index
    %311 = vector.load %arg6[%c2, %c0_95] : memref<4x256xf32, #tpu.memory_space<vmem>>, vector<1x256xf32>
    %312 = vector.broadcast %310 : vector<8x1xf32> to vector<8x256xf32>
    %313 = vector.broadcast %311 : vector<1x256xf32> to vector<8x256xf32>
    %314 = arith.mulf %312, %313 : vector<8x256xf32>
    %315 = arith.addf %309, %314 : vector<8x256xf32>
    %316 = vector.extract_strided_slice %295 {offsets = [0, 3], sizes = [8, 1], strides = [1, 1]} : vector<8x8xf32> to vector<8x1xf32>
    %c3 = arith.constant 3 : index
    %c0_96 = arith.constant 0 : index
    %317 = vector.load %arg6[%c3, %c0_96] : memref<4x256xf32, #tpu.memory_space<vmem>>, vector<1x256xf32>
    %318 = vector.broadcast %316 : vector<8x1xf32> to vector<8x256xf32>
    %319 = vector.broadcast %317 : vector<1x256xf32> to vector<8x256xf32>
    %320 = arith.mulf %318, %319 : vector<8x256xf32>
    %321 = arith.addf %315, %320 : vector<8x256xf32>
    %cst_97 = arith.constant 0.000000e+00 : f32
    %322 = vector.broadcast %cst_97 : f32 to vector<8x256xf32>
    %323 = arith.maximumf %321, %322 : vector<8x256xf32>
    %324 = vector.extract_strided_slice %295 {offsets = [0, 4], sizes = [8, 1], strides = [1, 1]} : vector<8x8xf32> to vector<8x1xf32>
    %c0_98 = arith.constant 0 : index
    %c0_99 = arith.constant 0 : index
    %325 = vector.load %arg8[%c0_98, %c0_99] : memref<1x256xf32, #tpu.memory_space<vmem>>, vector<1x256xf32>
    %326 = vector.broadcast %324 : vector<8x1xf32> to vector<8x256xf32>
    %327 = vector.broadcast %325 : vector<1x256xf32> to vector<8x256xf32>
    %328 = arith.mulf %326, %327 : vector<8x256xf32>
    %c0_100 = arith.constant 0 : index
    %c0_101 = arith.constant 0 : index
    %329 = vector.load %arg9[%c0_100, %c0_101] : memref<1x256xf32, #tpu.memory_space<vmem>>, vector<1x256xf32>
    %330 = vector.broadcast %329 : vector<1x256xf32> to vector<8x256xf32>
    %331 = arith.addf %328, %330 : vector<8x256xf32>
    %cst_102 = arith.constant 0.000000e+00 : f32
    %332 = vector.broadcast %cst_102 : f32 to vector<8x256xf32>
    %333 = arith.maximumf %331, %332 : vector<8x256xf32>
    %334 = arith.truncf %294 : vector<8x256xf32> to vector<8x256xbf16>
    %c0_103 = arith.constant 0 : index
    %c0_104 = arith.constant 0 : index
    %335 = vector.load %arg10[%c0_103, %c0_104] : memref<256x512xbf16, #tpu.memory_space<vmem>>, vector<256x512xbf16>
    %cst_105 = arith.constant dense<0.000000e+00> : vector<8x512xf32>
    %336 = tpu.matmul %334, %335, %cst_105 {dimension_numbers = #tpu.dot_dimension_numbers<[1], [0], [0], [1], [0, 0, 1, 1], [], []>} : vector<8x256xbf16>, vector<256x512xbf16>, vector<8x512xf32> -> vector<8x512xf32>
    %337 = arith.truncf %323 : vector<8x256xf32> to vector<8x256xbf16>
    %c0_106 = arith.constant 0 : index
    %c0_107 = arith.constant 0 : index
    %338 = vector.load %arg11[%c0_106, %c0_107] : memref<256x512xbf16, #tpu.memory_space<vmem>>, vector<256x512xbf16>
    %cst_108 = arith.constant dense<0.000000e+00> : vector<8x512xf32>
    %339 = tpu.matmul %337, %338, %cst_108 {dimension_numbers = #tpu.dot_dimension_numbers<[1], [0], [0], [1], [0, 0, 1, 1], [], []>} : vector<8x256xbf16>, vector<256x512xbf16>, vector<8x512xf32> -> vector<8x512xf32>
    %340 = arith.addf %336, %339 : vector<8x512xf32>
    %341 = arith.truncf %333 : vector<8x256xf32> to vector<8x256xbf16>
    %c0_109 = arith.constant 0 : index
    %c0_110 = arith.constant 0 : index
    %342 = vector.load %arg12[%c0_109, %c0_110] : memref<256x512xbf16, #tpu.memory_space<vmem>>, vector<256x512xbf16>
    %cst_111 = arith.constant dense<0.000000e+00> : vector<8x512xf32>
    %343 = tpu.matmul %341, %342, %cst_111 {dimension_numbers = #tpu.dot_dimension_numbers<[1], [0], [0], [1], [0, 0, 1, 1], [], []>} : vector<8x256xbf16>, vector<256x512xbf16>, vector<8x512xf32> -> vector<8x512xf32>
    %344 = arith.addf %340, %343 : vector<8x512xf32>
    %c0_112 = arith.constant 0 : index
    %c0_113 = arith.constant 0 : index
    %345 = vector.load %arg13[%c0_112, %c0_113] : memref<1x512xf32, #tpu.memory_space<vmem>>, vector<1x512xf32>
    %346 = vector.broadcast %345 : vector<1x512xf32> to vector<8x512xf32>
    %347 = arith.addf %344, %346 : vector<8x512xf32>
    %cst_114 = arith.constant 0.000000e+00 : f32
    %348 = vector.broadcast %cst_114 : f32 to vector<8x512xf32>
    %349 = arith.maximumf %347, %348 : vector<8x512xf32>
    %c0_115 = arith.constant 0 : index
    %c0_116 = arith.constant 0 : index
    %350 = vector.load %arg14[%c0_115, %c0_116] : memref<1x512xf32, #tpu.memory_space<vmem>>, vector<1x512xf32>
    %351 = vector.broadcast %350 : vector<1x512xf32> to vector<8x512xf32>
    %352 = arith.mulf %349, %351 : vector<8x512xf32>
    %cst_117 = arith.constant dense<0.000000e+00> : vector<8xf32>
    %353 = vector.multi_reduction <add>, %352, %cst_117 [1] : vector<8x512xf32> to vector<8xf32>
    %354 = vector.shape_cast %353 : vector<8xf32> to vector<8x1xf32>
    %c0_118 = arith.constant 0 : index
    %c0_119 = arith.constant 0 : index
    %355 = vector.load %arg15[%c0_118, %c0_119] : memref<1x1xf32, #tpu.memory_space<vmem>>, vector<1x1xf32>
    %356 = vector.broadcast %355 : vector<1x1xf32> to vector<8x1xf32>
    %357 = arith.addf %354, %356 : vector<8x1xf32>
    %c0_120 = arith.constant 0 : index
    %c0_121 = arith.constant 0 : index
    %358 = vector.load %arg16[%c0_120, %c0_121] : memref<8x1xf32, #tpu.memory_space<vmem>>, vector<8x1xf32>
    tpu.vector_store %arg16[%c0_120, %c0_121], %357 {strides = array<i32>} : memref<8x1xf32, #tpu.memory_space<vmem>>, vector<8x1xf32>,
    return
  }
  func.func @transform_0(%arg0: i32) -> (i32, i32, i32) {
    %c0_i32 = arith.constant 0 : i32
    %c0_i32_0 = arith.constant 0 : i32
    %c0_i32_1 = arith.constant 0 : i32
    return %arg0, %c0_i32, %c0_i32_0 : i32, i32, i32
  }
  func.func @transform_1(%arg0: i32) -> (i32, i32) {
    %c0_i32 = arith.constant 0 : i32
    %c0_i32_0 = arith.constant 0 : i32
    return %arg0, %c0_i32 : i32, i32
  }
  func.func @transform_2(%arg0: i32) -> (i32, i32) {
    %c0_i32 = arith.constant 0 : i32
    %c0_i32_0 = arith.constant 0 : i32
    %c0_i32_1 = arith.constant 0 : i32
    return %c0_i32, %c0_i32_0 : i32, i32
  }
  func.func @transform_3(%arg0: i32) -> (i32, i32) {
    %c0_i32 = arith.constant 0 : i32
    %c0_i32_0 = arith.constant 0 : i32
    %c0_i32_1 = arith.constant 0 : i32
    return %c0_i32, %c0_i32_0 : i32, i32
  }
  func.func @transform_4(%arg0: i32) -> (i32, i32) {
    %c0_i32 = arith.constant 0 : i32
    %c0_i32_0 = arith.constant 0 : i32
    %c0_i32_1 = arith.constant 0 : i32
    return %c0_i32, %c0_i32_0 : i32, i32
  }
  func.func @transform_5(%arg0: i32) -> (i32, i32) {
    %c0_i32 = arith.constant 0 : i32
    %c0_i32_0 = arith.constant 0 : i32
    %c0_i32_1 = arith.constant 0 : i32
    return %c0_i32, %c0_i32_0 : i32, i32
  }
  func.func @transform_6(%arg0: i32) -> (i32, i32) {
    %c0_i32 = arith.constant 0 : i32
    %c0_i32_0 = arith.constant 0 : i32
    %c0_i32_1 = arith.constant 0 : i32
    return %c0_i32, %c0_i32_0 : i32, i32
  }
  func.func @transform_7(%arg0: i32) -> (i32, i32) {
    %c0_i32 = arith.constant 0 : i32
    %c0_i32_0 = arith.constant 0 : i32
    %c0_i32_1 = arith.constant 0 : i32
    return %c0_i32, %c0_i32_0 : i32, i32
  }
  func.func @transform_8(%arg0: i32) -> (i32, i32) {
    %c0_i32 = arith.constant 0 : i32
    %c0_i32_0 = arith.constant 0 : i32
    %c0_i32_1 = arith.constant 0 : i32
    return %c0_i32, %c0_i32_0 : i32, i32
  }
  func.func @transform_9(%arg0: i32) -> (i32, i32) {
    %c0_i32 = arith.constant 0 : i32
    %c0_i32_0 = arith.constant 0 : i32
    %c0_i32_1 = arith.constant 0 : i32
    return %c0_i32, %c0_i32_0 : i32, i32
  }
  func.func @transform_10(%arg0: i32) -> (i32, i32) {
    %c0_i32 = arith.constant 0 : i32
    %c0_i32_0 = arith.constant 0 : i32
    %c0_i32_1 = arith.constant 0 : i32
    return %c0_i32, %c0_i32_0 : i32, i32
  }
  func.func @transform_11(%arg0: i32) -> (i32, i32) {
    %c0_i32 = arith.constant 0 : i32
    %c0_i32_0 = arith.constant 0 : i32
    %c0_i32_1 = arith.constant 0 : i32
    return %c0_i32, %c0_i32_0 : i32, i32
  }
  func.func @transform_12(%arg0: i32) -> (i32, i32) {
    %c0_i32 = arith.constant 0 : i32
    %c0_i32_0 = arith.constant 0 : i32
    %c0_i32_1 = arith.constant 0 : i32
    return %c0_i32, %c0_i32_0 : i32, i32
  }
  func.func @transform_13(%arg0: i32) -> (i32, i32) {
    %c0_i32 = arith.constant 0 : i32
    %c0_i32_0 = arith.constant 0 : i32
    %c0_i32_1 = arith.constant 0 : i32
    return %c0_i32, %c0_i32_0 : i32, i32
  }
  func.func @transform_14(%arg0: i32) -> (i32, i32) {
    %c0_i32 = arith.constant 0 : i32
    %c0_i32_0 = arith.constant 0 : i32
    %c0_i32_1 = arith.constant 0 : i32
    return %c0_i32, %c0_i32_0 : i32, i32
  }
  func.func @transform_15(%arg0: i32) -> (i32, i32) {
    %c0_i32 = arith.constant 0 : i32
    %c0_i32_0 = arith.constant 0 : i32
    return %arg0, %c0_i32 : i32, i32
  }
}

</mosaic_0001>

<bundles_post_ra>
// kernel: tpu_custom_call.1
= control target key start
LH: loop header
LB: loop body
LE: loop exit
PB: predicated region body
PF: predicated region fallthrough
CT: control target
= control target key end

     0   :  { %s12362_s0 = inlined_call_operand.hbm [shape: bf16[1,64,256], index: 0, kind: input, shape index: {}]   ;;  %s12363_s1 = inlined_call_operand.hbm [shape: f32[8,8], index: 1, kind: input, shape index: {}]   ;;  %s12364_s2 = inlined_call_operand.hbm [shape: bf16[256,1024], index: 2, kind: input, shape index: {}]   ;;  %s12365_s3 = inlined_call_operand.hbm [shape: bf16[256,1024], index: 3, kind: input, shape index: {}]   ;;  %s12366_s4 = inlined_call_operand.hbm [shape: f32[1,1024], index: 4, kind: input, shape index: {}]   ;;  %s12367_s5 = inlined_call_operand.hbm [shape: f32[4,256], index: 5, kind: input, shape index: {}]   ;;  %s12368_s6 = inlined_call_operand.hbm [shape: f32[1,256], index: 6, kind: input, shape index: {}]   ;;  %s12369_s7 = inlined_call_operand.hbm [shape: f32[1,256], index: 7, kind: input, shape index: {}]   ;;  %s12370_s8 = inlined_call_operand.hbm [shape: f32[1,256], index: 8, kind: input, shape index: {}]   ;;  %s12371_s9 = inlined_call_operand.hbm [shape: bf16[256,512], index: 9, kind: input, shape index: {}]   ;;  %s12372_s10 = inlined_call_operand.hbm [shape: bf16[256,512], index: 10, kind: input, shape index: {}]   ;;  %s12373_s11 = inlined_call_operand.hbm [shape: bf16[256,512], index: 11, kind: input, shape index: {}]   ;;  %s12374_s12 = inlined_call_operand.vmem [shape: f32[1,512], index: 12, kind: input, shape index: {}]   ;;  %s12375_s13 = inlined_call_operand.vmem [shape: f32[1,512], index: 13, kind: input, shape index: {}]   ;;  %s12376_s14 = inlined_call_operand.<no memory space> [shape: f32[1,1], index: 14, kind: input, shape index: {}]   ;;  %s12377_s15 = inlined_call_operand.vmem [shape: f32[8,1], index: 15, kind: output, shape index: {}]  }
   0x1   :  { %v20_v0 = vstv %s12376_s14 }
   0x2   :  { %21 = vst [vmem:[#allocation3] sm:$0x1] %v20_v0 }
   0x3   :  { %22 = vsyncpa [#allocation5], 0 }
   0x4   :  { %23 = vsyncpa [#allocation7], 0 }
   0x5   :  { %24 = vsyncpa [#allocation10], 0 }
   0x6   :  { %25 = vsyncpa [#allocation13], 0 }
   0x7   :  { %26 = vsyncpa [#allocation16], 0 }
   0x8   :  { %27 = vsyncpa [#allocation19], 0  ;;  %s47_s22 = sshll.u32 %s12363_s1, 4  ;;  %s48_s22 = int_to_ptr.hbm [resolvable:$true] %s47_s22 }
   0x9   :  { %28 = vsyncpa [#allocation22], 0  ;;  %s9803_s23 = smov [#allocation6]   ;;  %s70_s14 = sshll.u32 %s12365_s3, 4  ;;  %s71_s14 = int_to_ptr.hbm [resolvable:$true] %s70_s14 }
   0xa   :  { %s49_s24 = sshll.u32 %s9803_s23, 4  ;;  %s9804_s27 = smov [#allocation9]   ;;  %s50_s24 = int_to_ptr.vmem [resolvable:$true] %s49_s24 }
   0xb   :  { %52 = dma.hbm_to_vmem [thread:$0]  %s48_s22, 128, %s50_s24, [#allocation7]  }
   0xc   :  { %s72_s28 = sshll.u32 %s9804_s27, 4  ;;  %s95_s16 = sshll.u32 %s12367_s5, 4  ;;  %s73_s28 = int_to_ptr.vmem [resolvable:$true] %s72_s28  ;;  %s96_s16 = int_to_ptr.hbm [resolvable:$true] %s95_s16 }
   0xd   :  { %s9805_s1 = smov 512   ;;  %s9806_s17 = smov 32  }
   0xe   :  { %78 = dma.hbm_to_vmem [thread:$0]  %s71_s14, 16384, %s73_s28, [#allocation10], %s9805_s1, %s9805_s1, %s9806_s17  }
   0xf   :  { %s117_s20 = sshll.u32 %s12369_s7, 4  ;;  %s9807_s3 = smov [#allocation12]   ;;  %s118_s20 = int_to_ptr.hbm [resolvable:$true] %s117_s20 }
  0x10   :  { %s97_s21 = sshll.u32 %s9807_s3, 4  ;;  %s9808_s22 = smov [#allocation15]   ;;  %s98_s21 = int_to_ptr.vmem [resolvable:$true] %s97_s21 }
  0x11   :  { %100 = dma.hbm_to_vmem [thread:$0]  %s96_s16, 128, %s98_s21, [#allocation13]  }
  0x12   :  { %s119_s23 = sshll.u32 %s9808_s22, 4  ;;  %s138_s25 = sshll.u32 %s12371_s9, 4  ;;  %s120_s23 = int_to_ptr.vmem [resolvable:$true] %s119_s23  ;;  %s139_s25 = int_to_ptr.hbm [resolvable:$true] %s138_s25 }
  0x13   :  { %122 = dma.hbm_to_vmem [thread:$0]  %s118_s20, 32, %s120_s23, [#allocation16]  }
  0x14   :  { %s9809_s26 = smov [#allocation18]   ;;  %s33_s7 = sshll.u32 %s12362_s0, 4  ;;  %s34_s7 = int_to_ptr.hbm [resolvable:$true] %s33_s7 }
  0x15   :  { %s140_s14 = sshll.u32 %s9809_s26, 4  ;;  %s9810_s29 = smov 256   ;;  %s141_s14 = int_to_ptr.vmem [resolvable:$true] %s140_s14 }
  0x16   :  { %s9811_s30 = smov 16   ;;  %s9812_s16 = smov [#allocation4]  }
  0x17   :  { %146 = dma.hbm_to_vmem [thread:$0]  %s139_s25, 8192, %s141_s14, [#allocation19], %s9810_s29, %s9810_s29, %s9811_s30  }
  0x18   :  { %s35_s18 = sshll.u32 %s9812_s16, 4  ;;  %s9813_s9 = smov 128   ;;  %s36_s18 = int_to_ptr.vmem [resolvable:$true] %s35_s18 }
  0x19   :  { %s9814_s19 = smov 8   ;;  %s57_s21 = sshll.u32 %s12364_s2, 4  ;;  %s58_s21 = int_to_ptr.hbm [resolvable:$true] %s57_s21 }
  0x1a   :  { %41 = dma.hbm_to_vmem [thread:$0]  %s34_s7, 1024, %s36_s18, [#allocation5], %s9813_s9, %s9813_s9, %s9814_s19  }
  0x1b   :  { %s9815_s22 = smov [#allocation8]   ;;  %s84_s24 = sshll.u32 %s12366_s4, 4  ;;  %s85_s24 = int_to_ptr.hbm [resolvable:$true] %s84_s24 }
  0x1c   :  { %s59_s0 = sshll.u32 %s9815_s22, 4  ;;  %s9816_s25 = smov [#allocation11]   ;;  %s60_s0 = int_to_ptr.vmem [resolvable:$true] %s59_s0 }
  0x1d   :  { %65 = dma.hbm_to_vmem [thread:$0]  %s58_s21, 16384, %s60_s0, [#allocation7], %s9805_s1, %s9805_s1, %s9806_s17  }
  0x1e   :  { %s86_s26 = sshll.u32 %s9816_s25, 4  ;;  %s106_s28 = sshll.u32 %s12368_s6, 4  ;;  %s87_s26 = int_to_ptr.vmem [resolvable:$true] %s86_s26  ;;  %s107_s28 = int_to_ptr.hbm [resolvable:$true] %s106_s28 }
  0x1f   :  { %89 = dma.hbm_to_vmem [thread:$0]  %s85_s24, 128, %s87_s26, [#allocation10]  }
  0x20   :  { %s128_s16 = sshll.u32 %s12370_s8, 4  ;;  %s9817_s18 = smov [#allocation14]   ;;  %s129_s16 = int_to_ptr.hbm [resolvable:$true] %s128_s16 }
  0x21   :  { %s108_s4 = sshll.u32 %s9817_s18, 4  ;;  %s9818_s1 = smov [#allocation17]   ;;  %s109_s4 = int_to_ptr.vmem [resolvable:$true] %s108_s4 }
  0x22   :  { %111 = dma.hbm_to_vmem [thread:$0]  %s107_s28, 32, %s109_s4, [#allocation13]  }
  0x23   :  { %s130_s17 = sshll.u32 %s9818_s1, 4  ;;  %s151_s20 = sshll.u32 %s12372_s10, 4  ;;  %s131_s17 = int_to_ptr.vmem [resolvable:$true] %s130_s17  ;;  %s152_s20 = int_to_ptr.hbm [resolvable:$true] %s151_s20 }
  0x24   :  { %133 = dma.hbm_to_vmem [thread:$0]  %s129_s16, 32, %s131_s17, [#allocation16]  }
  0x25   :  { %s164_s21 = sshll.u32 %s12373_s11, 4  ;;  %s9819_s22 = smov [#allocation20]   ;;  %s165_s21 = int_to_ptr.hbm [resolvable:$true] %s164_s21 }
  0x26   :  { %s153_s8 = sshll.u32 %s9819_s22, 4  ;;  %s9820_s0 = smov [#allocation21]   ;;  %s154_s8 = int_to_ptr.vmem [resolvable:$true] %s153_s8 }
  0x27   :  { %159 = dma.hbm_to_vmem [thread:$0]  %s152_s20, 8192, %s154_s8, [#allocation19], %s9810_s29, %s9810_s29, %s9811_s30  }
  0x28   :  { %s166_s23 = sshll.u32 %s9820_s0, 4  ;;  %s167_s23 = int_to_ptr.vmem [resolvable:$true] %s166_s23 }
  0x29   :  { %172 = dma.hbm_to_vmem [thread:$0]  %s165_s21, 8192, %s167_s23, [#allocation22], %s9810_s29, %s9810_s29, %s9811_s30  }
  0x2a   :  { %9789 = dma.done.wait [#allocation5], 1024  }
  0x2b   :  { %9790 = vsyncadd [#allocation5], 4294966272 }
  0x2c   :  { %9791 = dma.done.wait [#allocation7], 16512  }
  0x2d   :  { %9792 = vsyncadd [#allocation7], 4294950784 }
  0x2e   :  { %9793 = dma.done.wait [#allocation10], 16512  }
  0x2f   :  { %9794 = vsyncadd [#allocation10], 4294950784 }
  0x30   :  { %9795 = dma.done.wait [#allocation13], 160  }
  0x31   :  { %9796 = vsyncadd [#allocation13], 4294967136 }
  0x32   :  { %9797 = dma.done.wait [#allocation16], 64  }
  0x33   :  { %9798 = vsyncadd [#allocation16], 4294967232 }
  0x34   :  { %9799 = dma.done.wait [#allocation19], 16384  }
  0x35   :  { %9800 = vsyncadd [#allocation19], 4294950912 }
  0x36   :  { %9801 = dma.done.wait [#allocation22], 8192  }
  0x37   :  { %9802 = vsyncadd [#allocation22], 4294959104  ;;  %v7145_v1 = vld [vmem:[#allocation8 + $0x1c0] sm:$0xf]  ;;  %v8823_v6 = vld [vmem:[#allocation8 + $0x1c4] sm:$0xf] }
  0x38   :  { %v8827_v2 = vld [vmem:[#allocation8 + $0x1dc] sm:$0xf0]  ;;  %v7147_v7 = vld [vmem:[#allocation8 + $0x1e0] sm:$0xf0] }
  0x39   :  { %v7401_v3 = vld [vmem:[#allocation8 + $0x3c0] sm:$0xf]  ;;  %v7146_v4 = vor.u32 %v8827_v2, %v7145_v1  ;;  %v7150_v9 = vor.u32 %v8823_v6, %v7147_v7  ;;  %v8887_v10 = vld [vmem:[#allocation8 + $0x3c4] sm:$0xf] }
  0x3a   :  { %v8891_v5 = vld [vmem:[#allocation8 + $0x3dc] sm:$0xf0]  ;;  %v7403_v11 = vld [vmem:[#allocation8 + $0x3e0] sm:$0xf0] }
  0x3b   :  { %v7402_v8 = vor.u32 %v8891_v5, %v7401_v3  ;;  %v7113_v12 = vld [vmem:[#allocation8 + $0x180] sm:$0xf]  ;;  %1044 = vmatpush.bf16.msra.mxu0 %v7146_v4  ;;  %v7406_v13 = vor.u32 %v8887_v10, %v7403_v11  ;;  %1102 = vmatpush.bf16.msra.mxu2 %v7150_v9  ;;  %v8815_v19 = vld [vmem:[#allocation8 + $0x184] sm:$0xf] }
  0x3c   :  { %v8819_v14 = vld [vmem:[#allocation8 + $0x19c] sm:$0xf0]  ;;  %v7115_v20 = vld [vmem:[#allocation8 + $0x1a0] sm:$0xf0] }
  0x3d   :  { %v7369_v15 = vld [vmem:[#allocation8 + $0x380] sm:$0xf]  ;;  %1073 = vmatpush.bf16.msra.mxu1 %v7402_v8  ;;  %v7114_v17 = vor.u32 %v8819_v14, %v7113_v12  ;;  %v8879_v21 = vld [vmem:[#allocation8 + $0x384] sm:$0xf]  ;;  %1131 = vmatpush.bf16.msra.mxu3 %v7406_v13  ;;  %v7118_v22 = vor.u32 %v8815_v19, %v7115_v20 }
  0x3e   :  { %v8883_v16 = vld [vmem:[#allocation8 + $0x39c] sm:$0xf0]  ;;  %v7371_v23 = vld [vmem:[#allocation8 + $0x3a0] sm:$0xf0] }
  0x3f   :  { %v7370_v18 = vor.u32 %v8883_v16, %v7369_v15  ;;  %v7081_v24 = vld [vmem:[#allocation8 + $0x140] sm:$0xf]  ;;  %v7374_v26 = vor.u32 %v8879_v21, %v7371_v23  ;;  %v8807_v29 = vld [vmem:[#allocation8 + $0x144] sm:$0xf]  ;;  %1045 = vmatpush.bf16.msra.mxu0 %v7114_v17  ;;  %1103 = vmatpush.bf16.msra.mxu2 %v7118_v22 }
  0x40   :  { %v8811_v25 = vld [vmem:[#allocation8 + $0x15c] sm:$0xf0]  ;;  %v7083_v31 = vld [vmem:[#allocation8 + $0x160] sm:$0xf0] }
  0x41   :  { %v7337_v27 = vld [vmem:[#allocation8 + $0x340] sm:$0xf]  ;;  %v7082_v30 = vor.u32 %v8811_v25, %v7081_v24  ;;  %v8871_v32 = vld [vmem:[#allocation8 + $0x344] sm:$0xf]  ;;  %1074 = vmatpush.bf16.msra.mxu1 %v7370_v18  ;;  %v7086_v35 = vor.u32 %v8807_v29, %v7083_v31  ;;  %1132 = vmatpush.bf16.msra.mxu3 %v7374_v26 }
  0x42   :  { %v8875_v28 = vld [vmem:[#allocation8 + $0x35c] sm:$0xf0]  ;;  %v7339_v33 = vld [vmem:[#allocation8 + $0x360] sm:$0xf0] }
  0x43   :  { %v7338_v34 = vor.u32 %v8875_v28, %v7337_v27  ;;  %v7049_v36 = vld [vmem:[#allocation8 + $0x100] sm:$0xf]  ;;  %v7342_v39 = vor.u32 %v8871_v32, %v7339_v33  ;;  %v8799_v41 = vld [vmem:[#allocation8 + $0x104] sm:$0xf]  ;;  %1046 = vmatpush.bf16.msra.mxu0 %v7082_v30  ;;  %1104 = vmatpush.bf16.msra.mxu2 %v7086_v35  ;;  %v6889_v30 = vld [vmem:[#allocation4] sm:$0xf] }
  0x44   :  { %v8803_v37 = vld [vmem:[#allocation8 + $0x11c] sm:$0xf0]  ;;  %v7051_v42 = vld [vmem:[#allocation8 + $0x120] sm:$0xf0] }
  0x45   :  { %v7305_v38 = vld [vmem:[#allocation8 + $0x300] sm:$0xf]  ;;  %v8863_v43 = vld [vmem:[#allocation8 + $0x304] sm:$0xf]  ;;  %v7050_v45 = vor.u32 %v8803_v37, %v7049_v36  ;;  %1075 = vmatpush.bf16.msra.mxu1 %v7338_v34  ;;  %v7054_v47 = vor.u32 %v8799_v41, %v7051_v42  ;;  %1133 = vmatpush.bf16.msra.mxu3 %v7342_v39  ;;  %v8759_v34 = vld [vmem:[#allocation4 + $0x4] sm:$0xf] }
  0x46   :  { %v8867_v40 = vld [vmem:[#allocation8 + $0x31c] sm:$0xf0]  ;;  %v7307_v44 = vld [vmem:[#allocation8 + $0x320] sm:$0xf0]  ;;  %v7153_v39 = vld [vmem:[#allocation8 + $0x1c8] sm:$0xf] }
  0x47   :  { %v7306_v46 = vor.u32 %v8867_v40, %v7305_v38  ;;  %v7017_v48 = vld [vmem:[#allocation8 + $0xc0] sm:$0xf]  ;;  %v7310_v51 = vor.u32 %v8863_v43, %v7307_v44  ;;  %v8791_v53 = vld [vmem:[#allocation8 + $0xc4] sm:$0xf]  ;;  %1047 = vmatpush.bf16.msra.mxu0 %v7050_v45  ;;  %1105 = vmatpush.bf16.msra.mxu2 %v7054_v47  ;;  %v8828_v40 = vld [vmem:[#allocation8 + $0x1e4] sm:$0xf0] }
  0x48   :  { %v8795_v49 = vld [vmem:[#allocation8 + $0xdc] sm:$0xf0]  ;;  %v7019_v54 = vld [vmem:[#allocation8 + $0xe0] sm:$0xf0]  ;;  %v7409_v41 = vld [vmem:[#allocation8 + $0x3c8] sm:$0xf]  ;;  %v7154_v42 = vor.u32 %v8828_v40, %v7153_v39 }
  0x49   :  { %v7273_v50 = vld [vmem:[#allocation8 + $0x2c0] sm:$0xf]  ;;  %v8855_v55 = vld [vmem:[#allocation8 + $0x2c4] sm:$0xf]  ;;  %v7018_v57 = vor.u32 %v8795_v49, %v7017_v48  ;;  %1076 = vmatpush.bf16.msra.mxu1 %v7306_v46  ;;  %v7022_v59 = vor.u32 %v8791_v53, %v7019_v54  ;;  %1134 = vmatpush.bf16.msra.mxu3 %v7310_v51  ;;  %v8892_v43 = vld [vmem:[#allocation8 + $0x3e4] sm:$0xf0] }
  0x4a   :  { %v8859_v52 = vld [vmem:[#allocation8 + $0x2dc] sm:$0xf0]  ;;  %v7275_v56 = vld [vmem:[#allocation8 + $0x2e0] sm:$0xf0]  ;;  %v8824_v44 = vld [vmem:[#allocation8 + $0x1cc] sm:$0xf]  ;;  %v7410_v46 = vor.u32 %v8892_v43, %v7409_v41 }
  0x4b   :  { %v7274_v58 = vor.u32 %v8859_v52, %v7273_v50  ;;  %v6985_v60 = vld [vmem:[#allocation8 + $0x80] sm:$0xf]  ;;  %v7278_v63 = vor.u32 %v8855_v55, %v7275_v56  ;;  %v8783_v1 = vld [vmem:[#allocation8 + $0x84] sm:$0xf]  ;;  %1048 = vmatpush.bf16.msra.mxu0 %v7018_v57  ;;  %1106 = vmatpush.bf16.msra.mxu2 %v7022_v59  ;;  %v7155_v45 = vld [vmem:[#allocation8 + $0x1e8] sm:$0xf0] }
  0x4c   :  { %v8787_v61 = vld [vmem:[#allocation8 + $0x9c] sm:$0xf0]  ;;  %v6987_v2 = vld [vmem:[#allocation8 + $0xa0] sm:$0xf0]  ;;  %v7158_v47 = vor.u32 %v8824_v44, %v7155_v45  ;;  %v8888_v48 = vld [vmem:[#allocation8 + $0x3cc] sm:$0xf] }
  0x4d   :  { %v7241_v62 = vld [vmem:[#allocation8 + $0x280] sm:$0xf]  ;;  %v8847_v3 = vld [vmem:[#allocation8 + $0x284] sm:$0xf]  ;;  %v6986_v5 = vor.u32 %v8787_v61, %v6985_v60  ;;  %1077 = vmatpush.bf16.msra.mxu1 %v7274_v58  ;;  %v6990_v7 = vor.u32 %v8783_v1, %v6987_v2  ;;  %1135 = vmatpush.bf16.msra.mxu3 %v7278_v63  ;;  %v7411_v49 = vld [vmem:[#allocation8 + $0x3e8] sm:$0xf0] }
  0x4e   :  { %v8851_v0 = vld [vmem:[#allocation8 + $0x29c] sm:$0xf0]  ;;  %v7243_v4 = vld [vmem:[#allocation8 + $0x2a0] sm:$0xf0]  ;;  %v7121_v50 = vld [vmem:[#allocation8 + $0x188] sm:$0xf]  ;;  %v7414_v51 = vor.u32 %v8888_v48, %v7411_v49 }
  0x4f   :  { %v7242_v6 = vor.u32 %v8851_v0, %v7241_v62  ;;  %v6953_v8 = vld [vmem:[#allocation8 + $0x40] sm:$0xf]  ;;  %v7246_v11 = vor.u32 %v8847_v3, %v7243_v4  ;;  %v8775_v13 = vld [vmem:[#allocation8 + $0x44] sm:$0xf]  ;;  %1049 = vmatpush.bf16.msra.mxu0 %v6986_v5  ;;  %1107 = vmatpush.bf16.msra.mxu2 %v6990_v7  ;;  %v8820_v52 = vld [vmem:[#allocation8 + $0x1a4] sm:$0xf0] }
  0x50   :  { %v8779_v9 = vld [vmem:[#allocation8 + $0x5c] sm:$0xf0]  ;;  %v6955_v14 = vld [vmem:[#allocation8 + $0x60] sm:$0xf0]  ;;  %v7377_v53 = vld [vmem:[#allocation8 + $0x388] sm:$0xf]  ;;  %v7122_v55 = vor.u32 %v8820_v52, %v7121_v50 }
  0x51   :  { %v7209_v10 = vld [vmem:[#allocation8 + $0x240] sm:$0xf]  ;;  %v8839_v15 = vld [vmem:[#allocation8 + $0x244] sm:$0xf]  ;;  %v6954_v17 = vor.u32 %v8779_v9, %v6953_v8  ;;  %1078 = vmatpush.bf16.msra.mxu1 %v7242_v6  ;;  %v6958_v20 = vor.u32 %v8775_v13, %v6955_v14  ;;  %1136 = vmatpush.bf16.msra.mxu3 %v7246_v11  ;;  %v8884_v54 = vld [vmem:[#allocation8 + $0x3a4] sm:$0xf0] }
  0x52   :  { %v8843_v12 = vld [vmem:[#allocation8 + $0x25c] sm:$0xf0]  ;;  %v7211_v16 = vld [vmem:[#allocation8 + $0x260] sm:$0xf0]  ;;  %v7378_v56 = vor.u32 %v8884_v54, %v7377_v53  ;;  %v8816_v57 = vld [vmem:[#allocation8 + $0x18c] sm:$0xf] }
  0x53   :  { %v6921_v18 = vld [vmem:[#allocation8] sm:$0xf]  ;;  %v7210_v19 = vor.u32 %v8843_v12, %v7209_v10  ;;  %v7214_v23 = vor.u32 %v8839_v15, %v7211_v16  ;;  %v8767_v25 = vld [vmem:[#allocation8 + $0x4] sm:$0xf]  ;;  %1050 = vmatpush.bf16.msra.mxu0 %v6954_v17  ;;  %1108 = vmatpush.bf16.msra.mxu2 %v6958_v20  ;;  %v7123_v58 = vld [vmem:[#allocation8 + $0x1a8] sm:$0xf0] }
  0x54   :  { %v8771_v21 = vld [vmem:[#allocation8 + $0x1c] sm:$0xf0]  ;;  %v6923_v26 = vld [vmem:[#allocation8 + $0x20] sm:$0xf0]  ;;  %v8880_v59 = vld [vmem:[#allocation8 + $0x38c] sm:$0xf]  ;;  %v7126_v60 = vor.u32 %v8816_v57, %v7123_v58 }
  0x55   :  { %v7177_v22 = vld [vmem:[#allocation8 + $0x200] sm:$0xf]  ;;  %v8831_v27 = vld [vmem:[#allocation8 + $0x204] sm:$0xf]  ;;  %v6922_v29 = vor.u32 %v8771_v21, %v6921_v18  ;;  %1079 = vmatpush.bf16.msra.mxu1 %v7210_v19  ;;  %v6926_v33 = vor.u32 %v8767_v25, %v6923_v26  ;;  %1137 = vmatpush.bf16.msra.mxu3 %v7214_v23  ;;  %v7379_v61 = vld [vmem:[#allocation8 + $0x3a8] sm:$0xf0] }
  0x56   :  { %v8835_v24 = vld [vmem:[#allocation8 + $0x21c] sm:$0xf0]  ;;  %v7179_v28 = vld [vmem:[#allocation8 + $0x220] sm:$0xf0]  ;;  %v7089_v62 = vld [vmem:[#allocation8 + $0x148] sm:$0xf]  ;;  %v7382_v0 = vor.u32 %v8880_v59, %v7379_v61 }
  0x57   :  { %v8760_v31 = vld [vmem:[#allocation4 + $0x4] sm:$0xf0]  ;;  %v7178_v32 = vor.u32 %v8835_v24, %v7177_v22  ;;  %v6891_v35 = vld [vmem:[#allocation4 + $0x8] sm:$0xf0]  ;;  %v7182_v36 = vor.u32 %v8831_v27, %v7179_v28  ;;  %1051 = vmatpush.bf16.msra.mxu0 %v6922_v29  ;;  %1109 = vmatpush.bf16.msra.mxu2 %v6926_v33  ;;  %v8812_v63 = vld [vmem:[#allocation8 + $0x164] sm:$0xf0] }
  0x58   :  { %v9960_v37 = vor.u32 %v8760_v31, %v6889_v30  ;;  %v9962_v38 = vor.u32 %v8759_v34, %v6891_v35  ;;  %v7345_v1 = vld [vmem:[#allocation8 + $0x348] sm:$0xf]  ;;  %v8808_v3 = vld [vmem:[#allocation8 + $0x14c] sm:$0xf]  ;;  %v7090_v4 = vor.u32 %v8812_v63, %v7089_v62  ;;  %v8762_v13 = vld [vmem:[#allocation4 + $0x14] sm:$0xf0] }
  0x59   :  { %1080 = vmatpush.bf16.msra.mxu1 %v7178_v32  ;;  %1138 = vmatpush.bf16.msra.mxu3 %v7182_v36  ;;  %v8876_v2 = vld [vmem:[#allocation8 + $0x364] sm:$0xf0]  ;;  %v7091_v5 = vld [vmem:[#allocation8 + $0x168] sm:$0xf0]  ;;  %v6899_v18 = vld [vmem:[#allocation4 + $0x18] sm:$0xf0] }
  0x5a   :  { %1052 = vmatmul.bf16.vlgmr.msra.gmra.mxu0 %v9960_v37  ;;  %1110 = vmatmul.bf16.vlgmr.msra.gmra.mxu2 %v9960_v37  ;;  %v8872_v6 = vld [vmem:[#allocation8 + $0x34c] sm:$0xf]  ;;  %v6897_v8 = vld [vmem:[#allocation4 + $0x10] sm:$0xf]  ;;  %v7346_v9 = vor.u32 %v8876_v2, %v7345_v1  ;;  %v7094_v10 = vor.u32 %v8808_v3, %v7091_v5  ;;  %v6905_v58 = vld [vmem:[#allocation4 + $0x20] sm:$0xf] }
  0x5b   :  { %1160 = vmatpush.bf16.msrb.mxu0 %v7154_v42  ;;  %1218 = vmatpush.bf16.msrb.mxu2 %v7158_v47  ;;  %v7347_v7 = vld [vmem:[#allocation8 + $0x368] sm:$0xf0]  ;;  %v7057_v11 = vld [vmem:[#allocation8 + $0x108] sm:$0xf]  ;;  %v9968_v22 = vor.u32 %v8762_v13, %v6897_v8  ;;  %v6907_v8 = vld [vmem:[#allocation4 + $0x28] sm:$0xf0] }
  0x5c   :  { %1081 = vmatmul.bf16.vlgmr.msra.gmra.mxu1 %v9962_v38  ;;  %1139 = vmatmul.bf16.vlgmr.msra.gmra.mxu3 %v9962_v38  ;;  %v8804_v12 = vld [vmem:[#allocation8 + $0x124] sm:$0xf0]  ;;  %v7350_v14 = vor.u32 %v8872_v6, %v7347_v7  ;;  %v8761_v17 = vld [vmem:[#allocation4 + $0x14] sm:$0xf]  ;;  %v8763_v7 = vld [vmem:[#allocation4 + $0x24] sm:$0xf] }
  0x5d   :  { %1189 = vmatpush.bf16.msrb.mxu1 %v7410_v46  ;;  %1247 = vmatpush.bf16.msrb.mxu3 %v7414_v51  ;;  %v7313_v15 = vld [vmem:[#allocation8 + $0x308] sm:$0xf]  ;;  %v7058_v19 = vor.u32 %v8804_v12, %v7057_v11  ;;  %v8800_v20 = vld [vmem:[#allocation8 + $0x10c] sm:$0xf]  ;;  %v9970_v26 = vor.u32 %v8761_v17, %v6899_v18  ;;  %v9978_v18 = vor.u32 %v8763_v7, %v6907_v8  ;;  %v8801_v8 = vld [vmem:[#allocation8 + $0x114] sm:$0xf] }
  0x5e   :  { %v8868_v16 = vld [vmem:[#allocation8 + $0x324] sm:$0xf0]  ;;  %v7059_v21 = vld [vmem:[#allocation8 + $0x128] sm:$0xf0] }
  0x5f   :  { %1161 = vmatpush.bf16.msrb.mxu0 %v7122_v55  ;;  %1219 = vmatpush.bf16.msrb.mxu2 %v7126_v60  ;;  %v7314_v23 = vor.u32 %v8868_v16, %v7313_v15  ;;  %v8864_v24 = vld [vmem:[#allocation8 + $0x30c] sm:$0xf]  ;;  %v7062_v27 = vor.u32 %v8800_v20, %v7059_v21  ;;  %v7025_v29 = vld [vmem:[#allocation8 + $0xc8] sm:$0xf] }
  0x60   :  { %v7315_v25 = vld [vmem:[#allocation8 + $0x328] sm:$0xf0]  ;;  %v8796_v30 = vld [vmem:[#allocation8 + $0xe4] sm:$0xf0] }
  0x61   :  { %1190 = vmatpush.bf16.msrb.mxu1 %v7378_v56  ;;  %1248 = vmatpush.bf16.msrb.mxu3 %v7382_v0  ;;  %v7318_v28 = vor.u32 %v8864_v24, %v7315_v25  ;;  %v7281_v31 = vld [vmem:[#allocation8 + $0x2c8] sm:$0xf]  ;;  %v7026_v32 = vor.u32 %v8796_v30, %v7025_v29  ;;  %v8792_v34 = vld [vmem:[#allocation8 + $0xcc] sm:$0xf]  ;;  %v6915_v25 = vld [vmem:[#allocation4 + $0x38] sm:$0xf0] }
  0x62   :  { %v8860_v33 = vld [vmem:[#allocation8 + $0x2e4] sm:$0xf0]  ;;  %v7027_v35 = vld [vmem:[#allocation8 + $0xe8] sm:$0xf0]  ;;  %v7161_v29 = vld [vmem:[#allocation8 + $0x1d0] sm:$0xf] }
  0x63   :  { %1162 = vmatpush.bf16.msrb.mxu0 %v7090_v4  ;;  %1220 = vmatpush.bf16.msrb.mxu2 %v7094_v10  ;;  %v7282_v36 = vor.u32 %v8860_v33, %v7281_v31  ;;  %v7030_v39 = vor.u32 %v8792_v34, %v7027_v35  ;;  %v8856_v40 = vld [vmem:[#allocation8 + $0x2cc] sm:$0xf]  ;;  %v6993_v42 = vld [vmem:[#allocation8 + $0x88] sm:$0xf]  ;;  %v8764_v4 = vld [vmem:[#allocation4 + $0x24] sm:$0xf0] }
  0x64   :  { %v7283_v41 = vld [vmem:[#allocation8 + $0x2e8] sm:$0xf0]  ;;  %v8788_v44 = vld [vmem:[#allocation8 + $0xa4] sm:$0xf0]  ;;  %v8829_v30 = vld [vmem:[#allocation8 + $0x1ec] sm:$0xf0] }
  0x65   :  { %1191 = vmatpush.bf16.msrb.mxu1 %v7346_v9  ;;  %1249 = vmatpush.bf16.msrb.mxu3 %v7350_v14  ;;  %v7286_v43 = vor.u32 %v8856_v40, %v7283_v41  ;;  %v7249_v45 = vld [vmem:[#allocation8 + $0x288] sm:$0xf]  ;;  %v6994_v47 = vor.u32 %v8788_v44, %v6993_v42  ;;  %v8784_v49 = vld [vmem:[#allocation8 + $0x8c] sm:$0xf]  ;;  %v9976_v14 = vor.u32 %v8764_v4, %v6905_v58  ;;  %v7417_v31 = vld [vmem:[#allocation8 + $0x3d0] sm:$0xf] }
  0x66   :  { %v8852_v46 = vld [vmem:[#allocation8 + $0x2a4] sm:$0xf0]  ;;  %v6995_v50 = vld [vmem:[#allocation8 + $0xa8] sm:$0xf0]  ;;  %v8893_v33 = vld [vmem:[#allocation8 + $0x3ec] sm:$0xf0] }
  0x67   :  { %1163 = vmatpush.bf16.msrb.mxu0 %v7058_v19  ;;  %1221 = vmatpush.bf16.msrb.mxu2 %v7062_v27  ;;  %v7250_v48 = vor.u32 %v8852_v46, %v7249_v45  ;;  %v8848_v51 = vld [vmem:[#allocation8 + $0x28c] sm:$0xf]  ;;  %v6961_v53 = vld [vmem:[#allocation8 + $0x48] sm:$0xf]  ;;  %v6998_v55 = vor.u32 %v8784_v49, %v6995_v50  ;;  %v8825_v34 = vld [vmem:[#allocation8 + $0x1d4] sm:$0xf] }
  0x68   :  { %v7251_v52 = vld [vmem:[#allocation8 + $0x2a8] sm:$0xf0]  ;;  %v8780_v54 = vld [vmem:[#allocation8 + $0x64] sm:$0xf0]  ;;  %v7163_v35 = vld [vmem:[#allocation8 + $0x1f0] sm:$0xf0] }
  0x69   :  { %1192 = vmatpush.bf16.msrb.mxu1 %v7314_v23  ;;  %1250 = vmatpush.bf16.msrb.mxu3 %v7318_v28  ;;  %v7217_v56 = vld [vmem:[#allocation8 + $0x248] sm:$0xf]  ;;  %v7254_v59 = vor.u32 %v8848_v51, %v7251_v52  ;;  %v6962_v60 = vor.u32 %v8780_v54, %v6961_v53  ;;  %v8776_v61 = vld [vmem:[#allocation8 + $0x4c] sm:$0xf]  ;;  %v8766_v23 = vld [vmem:[#allocation4 + $0x34] sm:$0xf0] }
  0x6a   :  { %1057 = vmatmul.bf16.gmra.mxu0 %v9968_v22  ;;  %1115 = vmatmul.bf16.gmra.mxu2 %v9968_v22  ;;  %v8844_v57 = vld [vmem:[#allocation8 + $0x264] sm:$0xf0]  ;;  %v6963_v62 = vld [vmem:[#allocation8 + $0x68] sm:$0xf0]  ;;  %v8889_v40 = vld [vmem:[#allocation8 + $0x3d4] sm:$0xf] }
  0x6b   :  { %1164 = vmatpush.bf16.msrb.mxu0 %v7026_v32  ;;  %1222 = vmatpush.bf16.msrb.mxu2 %v7030_v39  ;;  %v8840_v63 = vld [vmem:[#allocation8 + $0x24c] sm:$0xf]  ;;  %v7218_v0 = vor.u32 %v8844_v57, %v7217_v56  ;;  %v6929_v2 = vld [vmem:[#allocation8 + $0x8] sm:$0xf]  ;;  %v6966_v9 = vor.u32 %v8776_v61, %v6963_v62  ;;  %v7162_v32 = vor.u32 %v8829_v30, %v7161_v29  ;;  %v7419_v41 = vld [vmem:[#allocation8 + $0x3f0] sm:$0xf0] }
  0x6c   :  { %1086 = vmatmul.bf16.gmra.mxu1 %v9970_v26  ;;  %1144 = vmatmul.bf16.gmra.mxu3 %v9970_v26  ;;  %v7219_v1 = vld [vmem:[#allocation8 + $0x268] sm:$0xf0]  ;;  %v8772_v3 = vld [vmem:[#allocation8 + $0x24] sm:$0xf0]  ;;  %v7166_v39 = vor.u32 %v8825_v34, %v7163_v35  ;;  %v7129_v42 = vld [vmem:[#allocation8 + $0x190] sm:$0xf] }
  0x6d   :  { %1193 = vmatpush.bf16.msrb.mxu1 %v7282_v36  ;;  %1251 = vmatpush.bf16.msrb.mxu3 %v7286_v43  ;;  %v7185_v5 = vld [vmem:[#allocation8 + $0x208] sm:$0xf]  ;;  %v7222_v10 = vor.u32 %v8840_v63, %v7219_v1  ;;  %v6930_v11 = vor.u32 %v8772_v3, %v6929_v2  ;;  %v8768_v12 = vld [vmem:[#allocation8 + $0xc] sm:$0xf]  ;;  %v7418_v36 = vor.u32 %v8893_v33, %v7417_v31  ;;  %v8821_v44 = vld [vmem:[#allocation8 + $0x1ac] sm:$0xf0] }
  0x6e   :  { %v8836_v6 = vld [vmem:[#allocation8 + $0x224] sm:$0xf0]  ;;  %v6931_v13 = vld [vmem:[#allocation8 + $0x28] sm:$0xf0]  ;;  %v7422_v43 = vor.u32 %v8889_v40, %v7419_v41  ;;  %v7385_v45 = vld [vmem:[#allocation8 + $0x390] sm:$0xf] }
  0x6f   :  { %1165 = vmatpush.bf16.msrb.mxu0 %v6994_v47  ;;  %1223 = vmatpush.bf16.msrb.mxu2 %v6998_v55  ;;  %v7186_v15 = vor.u32 %v8836_v6, %v7185_v5  ;;  %v8832_v16 = vld [vmem:[#allocation8 + $0x20c] sm:$0xf]  ;;  %v6934_v19 = vor.u32 %v8768_v12, %v6931_v13  ;;  %v6913_v21 = vld [vmem:[#allocation4 + $0x30] sm:$0xf]  ;;  %v8885_v46 = vld [vmem:[#allocation8 + $0x3ac] sm:$0xf0]  ;;  %v7130_v47 = vor.u32 %v8821_v44, %v7129_v42 }
  0x70   :  { %v7187_v17 = vld [vmem:[#allocation8 + $0x228] sm:$0xf0]  ;;  %v9984_v27 = vor.u32 %v8766_v23, %v6913_v21  ;;  %v8817_v49 = vld [vmem:[#allocation8 + $0x194] sm:$0xf]  ;;  %v7097_v54 = vld [vmem:[#allocation8 + $0x150] sm:$0xf] }
  0x71   :  { %1194 = vmatpush.bf16.msrb.mxu1 %v7250_v48  ;;  %1252 = vmatpush.bf16.msrb.mxu3 %v7254_v59  ;;  %v7190_v20 = vor.u32 %v8832_v16, %v7187_v17  ;;  %v8765_v24 = vld [vmem:[#allocation4 + $0x34] sm:$0xf]  ;;  %v7386_v48 = vor.u32 %v8885_v46, %v7385_v45  ;;  %v7131_v50 = vld [vmem:[#allocation8 + $0x1b0] sm:$0xf0]  ;;  %v8813_v55 = vld [vmem:[#allocation8 + $0x16c] sm:$0xf0] }
  0x72   :  { %v9986_v28 = vor.u32 %v8765_v24, %v6915_v25  ;;  %v8881_v51 = vld [vmem:[#allocation8 + $0x394] sm:$0xf]  ;;  %v7134_v52 = vor.u32 %v8817_v49, %v7131_v50  ;;  %v7353_v57 = vld [vmem:[#allocation8 + $0x350] sm:$0xf] }
  0x73   :  { %1166 = vmatpush.bf16.msrb.mxu0 %v6962_v60  ;;  %1224 = vmatpush.bf16.msrb.mxu2 %v6966_v9  ;;  %v7387_v53 = vld [vmem:[#allocation8 + $0x3b0] sm:$0xf0]  ;;  %v8877_v58 = vld [vmem:[#allocation8 + $0x36c] sm:$0xf0]  ;;  %v7098_v60 = vor.u32 %v8813_v55, %v7097_v54 }
  0x74   :  { %v7390_v56 = vor.u32 %v8881_v51, %v7387_v53  ;;  %v8809_v59 = vld [vmem:[#allocation8 + $0x154] sm:$0xf]  ;;  %v7065_v2 = vld [vmem:[#allocation8 + $0x110] sm:$0xf] }
  0x75   :  { %1195 = vmatpush.bf16.msrb.mxu1 %v7218_v0  ;;  %1253 = vmatpush.bf16.msrb.mxu3 %v7222_v10  ;;  %v7099_v61 = vld [vmem:[#allocation8 + $0x170] sm:$0xf0]  ;;  %v7354_v0 = vor.u32 %v8877_v58, %v7353_v57  ;;  %v8805_v3 = vld [vmem:[#allocation8 + $0x12c] sm:$0xf0] }
  0x76   :  { %v8873_v62 = vld [vmem:[#allocation8 + $0x354] sm:$0xf]  ;;  %v7102_v1 = vor.u32 %v8809_v59, %v7099_v61  ;;  %v7321_v5 = vld [vmem:[#allocation8 + $0x310] sm:$0xf]  ;;  %v7066_v7 = vor.u32 %v8805_v3, %v7065_v2 }
  0x77   :  { %1167 = vmatpush.bf16.msrb.mxu0 %v6930_v11  ;;  %1225 = vmatpush.bf16.msrb.mxu2 %v6934_v19  ;;  %v7355_v63 = vld [vmem:[#allocation8 + $0x370] sm:$0xf0]  ;;  %v8869_v6 = vld [vmem:[#allocation8 + $0x32c] sm:$0xf0] }
  0x78   :  { %v7358_v4 = vor.u32 %v8873_v62, %v7355_v63  ;;  %v7067_v9 = vld [vmem:[#allocation8 + $0x130] sm:$0xf0]  ;;  %v7322_v10 = vor.u32 %v8869_v6, %v7321_v5  ;;  %v7033_v16 = vld [vmem:[#allocation8 + $0xd0] sm:$0xf] }
  0x79   :  { %1196 = vmatpush.bf16.msrb.mxu1 %v7186_v15  ;;  %1254 = vmatpush.bf16.msrb.mxu3 %v7190_v20  ;;  %v8865_v11 = vld [vmem:[#allocation8 + $0x314] sm:$0xf]  ;;  %v7070_v13 = vor.u32 %v8801_v8, %v7067_v9  ;;  %v8797_v17 = vld [vmem:[#allocation8 + $0xec] sm:$0xf0] }
  0x7a   :  { %1062 = vmatmul.bf16.gmra.mxu0 %v9976_v14  ;;  %1120 = vmatmul.bf16.gmra.mxu2 %v9976_v14  ;;  %v7323_v12 = vld [vmem:[#allocation8 + $0x330] sm:$0xf0]  ;;  %v7289_v19 = vld [vmem:[#allocation8 + $0x2d0] sm:$0xf]  ;;  %v7034_v20 = vor.u32 %v8797_v17, %v7033_v16  ;;  %v8826_v16 = vld [vmem:[#allocation8 + $0x1dc] sm:$0xf] }
  0x7b   :  { %1276 = vmatpush.bf16.msra.mxu0 %v7162_v32  ;;  %1334 = vmatpush.bf16.msra.mxu2 %v7166_v39  ;;  %v7326_v15 = vor.u32 %v8865_v11, %v7323_v12  ;;  %v8861_v21 = vld [vmem:[#allocation8 + $0x2ec] sm:$0xf0]  ;;  %v8793_v23 = vld [vmem:[#allocation8 + $0xd4] sm:$0xf]  ;;  %v8830_v11 = vld [vmem:[#allocation8 + $0x1f4] sm:$0xf0] }
  0x7c   :  { %1091 = vmatmul.bf16.gmra.mxu1 %v9978_v18  ;;  %1149 = vmatmul.bf16.gmra.mxu3 %v9978_v18  ;;  %v7035_v24 = vld [vmem:[#allocation8 + $0xf0] sm:$0xf0]  ;;  %v7290_v25 = vor.u32 %v8861_v21, %v7289_v19  ;;  %v7001_v32 = vld [vmem:[#allocation8 + $0x90] sm:$0xf]  ;;  %v7425_v12 = vld [vmem:[#allocation8 + $0x3d8] sm:$0xf] }
  0x7d   :  { %1305 = vmatpush.bf16.msra.mxu1 %v7418_v36  ;;  %1363 = vmatpush.bf16.msra.mxu3 %v7422_v43  ;;  %v7038_v29 = vor.u32 %v8793_v23, %v7035_v24  ;;  %v8857_v30 = vld [vmem:[#allocation8 + $0x2d4] sm:$0xf]  ;;  %v8789_v34 = vld [vmem:[#allocation8 + $0xac] sm:$0xf0]  ;;  %v7171_v17 = vld [vmem:[#allocation8 + $0x1f8] sm:$0xf0] }
  0x7e   :  { %v7291_v31 = vld [vmem:[#allocation8 + $0x2f0] sm:$0xf0]  ;;  %v7257_v35 = vld [vmem:[#allocation8 + $0x290] sm:$0xf]  ;;  %v7002_v39 = vor.u32 %v8789_v34, %v7001_v32  ;;  %v8890_v21 = vld [vmem:[#allocation8 + $0x3dc] sm:$0xf] }
  0x7f   :  { %1277 = vmatpush.bf16.msra.mxu0 %v7130_v47  ;;  %1335 = vmatpush.bf16.msra.mxu2 %v7134_v52  ;;  %v7294_v33 = vor.u32 %v8857_v30, %v7291_v31  ;;  %v8853_v36 = vld [vmem:[#allocation8 + $0x2ac] sm:$0xf0]  ;;  %v8785_v41 = vld [vmem:[#allocation8 + $0x94] sm:$0xf]  ;;  %v7427_v23 = vld [vmem:[#allocation8 + $0x3f8] sm:$0xf0] }
  0x80   :  { %v7258_v40 = vor.u32 %v8853_v36, %v7257_v35  ;;  %v7003_v42 = vld [vmem:[#allocation8 + $0xb0] sm:$0xf0]  ;;  %v6969_v45 = vld [vmem:[#allocation8 + $0x50] sm:$0xf]  ;;  %v7430_v24 = vor.u32 %v8890_v21, %v7427_v23  ;;  %v8822_v30 = vld [vmem:[#allocation8 + $0x1b4] sm:$0xf0] }
  0x81   :  { %1306 = vmatpush.bf16.msra.mxu1 %v7386_v48  ;;  %1364 = vmatpush.bf16.msra.mxu3 %v7390_v56  ;;  %v8849_v43 = vld [vmem:[#allocation8 + $0x294] sm:$0xf]  ;;  %v8781_v46 = vld [vmem:[#allocation8 + $0x6c] sm:$0xf0]  ;;  %v7006_v47 = vor.u32 %v8785_v41, %v7003_v42  ;;  %v7393_v31 = vld [vmem:[#allocation8 + $0x398] sm:$0xf] }
  0x82   :  { %v7259_v44 = vld [vmem:[#allocation8 + $0x2b0] sm:$0xf0]  ;;  %v7225_v48 = vld [vmem:[#allocation8 + $0x250] sm:$0xf]  ;;  %v6970_v51 = vor.u32 %v8781_v46, %v6969_v45  ;;  %v8886_v35 = vld [vmem:[#allocation8 + $0x3b4] sm:$0xf0] }
  0x83   :  { %1278 = vmatpush.bf16.msra.mxu0 %v7098_v60  ;;  %1336 = vmatpush.bf16.msra.mxu2 %v7102_v1  ;;  %v8845_v49 = vld [vmem:[#allocation8 + $0x26c] sm:$0xf0]  ;;  %v7262_v50 = vor.u32 %v8849_v43, %v7259_v44  ;;  %v8777_v52 = vld [vmem:[#allocation8 + $0x54] sm:$0xf]  ;;  %v8818_v36 = vld [vmem:[#allocation8 + $0x19c] sm:$0xf]  ;;  %v7394_v42 = vor.u32 %v8886_v35, %v7393_v31 }
  0x84   :  { %v6971_v53 = vld [vmem:[#allocation8 + $0x70] sm:$0xf0]  ;;  %v7226_v54 = vor.u32 %v8845_v49, %v7225_v48  ;;  %v6937_v59 = vld [vmem:[#allocation8 + $0x10] sm:$0xf]  ;;  %v8882_v44 = vld [vmem:[#allocation8 + $0x39c] sm:$0xf] }
  0x85   :  { %1307 = vmatpush.bf16.msra.mxu1 %v7354_v0  ;;  %1365 = vmatpush.bf16.msra.mxu3 %v7358_v4  ;;  %v8841_v55 = vld [vmem:[#allocation8 + $0x254] sm:$0xf]  ;;  %v6974_v57 = vor.u32 %v8777_v52, %v6971_v53  ;;  %v8773_v60 = vld [vmem:[#allocation8 + $0x2c] sm:$0xf0]  ;;  %v7395_v45 = vld [vmem:[#allocation8 + $0x3b8] sm:$0xf0] }
  0x86   :  { %v7227_v56 = vld [vmem:[#allocation8 + $0x270] sm:$0xf0]  ;;  %v7193_v61 = vld [vmem:[#allocation8 + $0x210] sm:$0xf]  ;;  %v6938_v62 = vor.u32 %v8773_v60, %v6937_v59  ;;  %v7105_v48 = vld [vmem:[#allocation8 + $0x158] sm:$0xf] }
  0x87   :  { %1279 = vmatpush.bf16.msra.mxu0 %v7066_v7  ;;  %1337 = vmatpush.bf16.msra.mxu2 %v7070_v13  ;;  %v7230_v58 = vor.u32 %v8841_v55, %v7227_v56  ;;  %v8837_v63 = vld [vmem:[#allocation8 + $0x22c] sm:$0xf0]  ;;  %v8769_v0 = vld [vmem:[#allocation8 + $0x14] sm:$0xf]  ;;  %v8814_v49 = vld [vmem:[#allocation8 + $0x174] sm:$0xf0] }
  0x88   :  { %v6939_v1 = vld [vmem:[#allocation8 + $0x30] sm:$0xf0]  ;;  %v7194_v2 = vor.u32 %v8837_v63, %v7193_v61  ;;  %v8878_v52 = vld [vmem:[#allocation8 + $0x374] sm:$0xf0]  ;;  %v8810_v53 = vld [vmem:[#allocation8 + $0x15c] sm:$0xf] }
  0x89   :  { %1308 = vmatpush.bf16.msra.mxu1 %v7322_v10  ;;  %1366 = vmatpush.bf16.msra.mxu3 %v7326_v15  ;;  %v6942_v3 = vor.u32 %v8769_v0, %v6939_v1  ;;  %v8833_v4 = vld [vmem:[#allocation8 + $0x214] sm:$0xf]  ;;  %v7169_v10 = vld [vmem:[#allocation8 + $0x1d8] sm:$0xf]  ;;  %v8794_v23 = vld [vmem:[#allocation8 + $0xdc] sm:$0xf] }
  0x8a   :  { %1067 = vmatmul.bf16.gmra.mxu0 %v9984_v27  ;;  %1125 = vmatmul.bf16.gmra.mxu2 %v9984_v27  ;;  %v7195_v5 = vld [vmem:[#allocation8 + $0x230] sm:$0xf0]  ;;  %v7170_v13 = vor.u32 %v8830_v11, %v7169_v10  ;;  %v8894_v15 = vld [vmem:[#allocation8 + $0x3f4] sm:$0xf0]  ;;  %v8866_v11 = vld [vmem:[#allocation8 + $0x31c] sm:$0xf] }
  0x8b   :  { %1280 = vmatpush.bf16.msra.mxu0 %v7034_v20  ;;  %1338 = vmatpush.bf16.msra.mxu2 %v7038_v29  ;;  %v7198_v6 = vor.u32 %v8833_v4, %v7195_v5  ;;  %v7426_v19 = vor.u32 %v8894_v15, %v7425_v12  ;;  %v7174_v20 = vor.u32 %v8826_v16, %v7171_v17  ;;  %v7137_v29 = vld [vmem:[#allocation8 + $0x198] sm:$0xf]  ;;  %v8802_v4 = vld [vmem:[#allocation8 + $0x11c] sm:$0xf] }
  0x8c   :  { %1096 = vmatmul.bf16.gmra.mxu1 %v9986_v28  ;;  %1154 = vmatmul.bf16.gmra.mxu3 %v9986_v28  ;;  %v7138_v34 = vor.u32 %v8822_v30, %v7137_v29  ;;  %v7073_v61 = vld [vmem:[#allocation8 + $0x118] sm:$0xf]  ;;  %v7075_v5 = vld [vmem:[#allocation8 + $0x138] sm:$0xf0] }
  0x8d   :  { %1309 = vmatpush.bf16.msra.mxu1 %v7290_v25  ;;  %1367 = vmatpush.bf16.msra.mxu3 %v7294_v33  ;;  %v7329_v63 = vld [vmem:[#allocation8 + $0x318] sm:$0xf]  ;;  %v7078_v10 = vor.u32 %v8802_v4, %v7075_v5  ;;  %v7331_v12 = vld [vmem:[#allocation8 + $0x338] sm:$0xf0] }
  0x8e   :  { %v7334_v15 = vor.u32 %v8866_v11, %v7331_v12  ;;  %v7041_v16 = vld [vmem:[#allocation8 + $0xd8] sm:$0xf]  ;;  %v8858_v30 = vld [vmem:[#allocation8 + $0x2dc] sm:$0xf] }
  0x8f   :  { %1281 = vmatpush.bf16.msra.mxu0 %v7002_v39  ;;  %1339 = vmatpush.bf16.msra.mxu2 %v7006_v47  ;;  %v7139_v39 = vld [vmem:[#allocation8 + $0x1b8] sm:$0xf0]  ;;  %v7398_v47 = vor.u32 %v8882_v44, %v7395_v45  ;;  %v8798_v17 = vld [vmem:[#allocation8 + $0xf4] sm:$0xf0] }
  0x90   :  { %v7142_v43 = vor.u32 %v8818_v36, %v7139_v39  ;;  %v8862_v21 = vld [vmem:[#allocation8 + $0x2f4] sm:$0xf0]  ;;  %v7299_v31 = vld [vmem:[#allocation8 + $0x2f8] sm:$0xf0] }
  0x91   :  { %1310 = vmatpush.bf16.msra.mxu1 %v7258_v40  ;;  %1368 = vmatpush.bf16.msra.mxu3 %v7262_v50  ;;  %v7361_v50 = vld [vmem:[#allocation8 + $0x358] sm:$0xf]  ;;  %v8786_v44 = vld [vmem:[#allocation8 + $0x9c] sm:$0xf] }
  0x92   :  { %v7362_v55 = vor.u32 %v8878_v52, %v7361_v50  ;;  %v8790_v35 = vld [vmem:[#allocation8 + $0xb4] sm:$0xf0]  ;;  %v7011_v45 = vld [vmem:[#allocation8 + $0xb8] sm:$0xf0] }
  0x93   :  { %1282 = vmatpush.bf16.msra.mxu0 %v6970_v51  ;;  %1340 = vmatpush.bf16.msra.mxu2 %v6974_v57  ;;  %v7106_v51 = vor.u32 %v8814_v49, %v7105_v48  ;;  %v8874_v57 = vld [vmem:[#allocation8 + $0x35c] sm:$0xf]  ;;  %v7265_v36 = vld [vmem:[#allocation8 + $0x298] sm:$0xf]  ;;  %v7014_v50 = vor.u32 %v8786_v44, %v7011_v45  ;;  %v7659_v44 = vld [vmem:[#allocation9 + $0x1e0] sm:$0xf0] }
  0x94   :  { %v7267_v52 = vld [vmem:[#allocation8 + $0x2b8] sm:$0xf0]  ;;  %v6945_v4 = vld [vmem:[#allocation8 + $0x18] sm:$0xf] }
  0x95   :  { %1311 = vmatpush.bf16.msra.mxu1 %v7226_v54  ;;  %1369 = vmatpush.bf16.msra.mxu3 %v7230_v58  ;;  %v7107_v54 = vld [vmem:[#allocation8 + $0x178] sm:$0xf0]  ;;  %v8774_v5 = vld [vmem:[#allocation8 + $0x34] sm:$0xf0] }
  0x96   :  { %v7110_v56 = vor.u32 %v8810_v53, %v7107_v54  ;;  %v7363_v58 = vld [vmem:[#allocation8 + $0x378] sm:$0xf0]  ;;  %v6946_v11 = vor.u32 %v8774_v5, %v6945_v4  ;;  %v8838_v12 = vld [vmem:[#allocation8 + $0x234] sm:$0xf0]  ;;  %v7593_v5 = vld [vmem:[#allocation9 + $0x140] sm:$0xf] }
  0x97   :  { %1283 = vmatpush.bf16.msra.mxu0 %v6938_v62  ;;  %1341 = vmatpush.bf16.msra.mxu2 %v6942_v3  ;;  %v7366_v59 = vor.u32 %v8874_v57, %v7363_v58  ;;  %v8806_v62 = vld [vmem:[#allocation8 + $0x134] sm:$0xf0] }
  0x98   :  { %v8870_v3 = vld [vmem:[#allocation8 + $0x334] sm:$0xf0] }
  0x99   :  { %1312 = vmatpush.bf16.msra.mxu1 %v7194_v2  ;;  %1370 = vmatpush.bf16.msra.mxu3 %v7198_v6  ;;  %v7074_v2 = vor.u32 %v8806_v62, %v7073_v61  ;;  %v7233_v57 = vld [vmem:[#allocation8 + $0x258] sm:$0xf]  ;;  %v6979_v61 = vld [vmem:[#allocation8 + $0x78] sm:$0xf0] }
  0x9a   :  { %1168 = vmatmul.bf16.vlgmr.msrb.gmra.mxu0 %v9960_v37  ;;  %1226 = vmatmul.bf16.vlgmr.msrb.gmra.mxu2 %v9960_v37 }
  0x9b   :  { %1392 = vmatpush.bf16.msrb.mxu0 %v7170_v13  ;;  %1450 = vmatpush.bf16.msrb.mxu2 %v7174_v20  ;;  %v7042_v20 = vor.u32 %v8798_v17, %v7041_v16  ;;  %v6947_v16 = vld [vmem:[#allocation8 + $0x38] sm:$0xf0] }
  0x9c   :  { %1197 = vmatmul.bf16.vlgmr.msrb.gmra.mxu1 %v9962_v38  ;;  %1255 = vmatmul.bf16.vlgmr.msrb.gmra.mxu3 %v9962_v38 }
  0x9d   :  { %1421 = vmatpush.bf16.msrb.mxu1 %v7426_v19  ;;  %1479 = vmatpush.bf16.msrb.mxu3 %v7430_v24  ;;  %v7297_v19 = vld [vmem:[#allocation8 + $0x2d8] sm:$0xf]  ;;  %v7043_v24 = vld [vmem:[#allocation8 + $0xf8] sm:$0xf0] }
  0x9e   :  { %v7046_v29 = vor.u32 %v8794_v23, %v7043_v24  ;;  %v8834_v23 = vld [vmem:[#allocation8 + $0x21c] sm:$0xf] }
  0x9f   :  { %1393 = vmatpush.bf16.msrb.mxu0 %v7138_v34  ;;  %1451 = vmatpush.bf16.msrb.mxu2 %v7142_v43  ;;  %v7009_v34 = vld [vmem:[#allocation8 + $0x98] sm:$0xf]  ;;  %v7203_v24 = vld [vmem:[#allocation8 + $0x238] sm:$0xf0] }
  0xa0   :  { %v8854_v43 = vld [vmem:[#allocation8 + $0x2b4] sm:$0xf0] }
  0xa1   :  { %1422 = vmatpush.bf16.msrb.mxu1 %v7394_v42  ;;  %1480 = vmatpush.bf16.msrb.mxu3 %v7398_v47  ;;  %v7010_v42 = vor.u32 %v8790_v35, %v7009_v34  ;;  %v7266_v49 = vor.u32 %v8854_v43, %v7265_v36  ;;  %v8955_v34 = vld [vmem:[#allocation9 + $0x1dc] sm:$0xf0]  ;;  %v8951_v43 = vld [vmem:[#allocation9 + $0x1c4] sm:$0xf] }
  0xa2   :  { %v7913_v35 = vld [vmem:[#allocation9 + $0x3c0] sm:$0xf] }
  0xa3   :  { %1394 = vmatpush.bf16.msrb.mxu0 %v7106_v51  ;;  %1452 = vmatpush.bf16.msrb.mxu2 %v7110_v56  ;;  %v8850_v51 = vld [vmem:[#allocation8 + $0x29c] sm:$0xf]  ;;  %v8782_v56 = vld [vmem:[#allocation8 + $0x74] sm:$0xf0] }
  0xa4   :  { %v7270_v54 = vor.u32 %v8850_v51, %v7267_v52  ;;  %v7915_v51 = vld [vmem:[#allocation9 + $0x3e0] sm:$0xf0]  ;;  %v7625_v52 = vld [vmem:[#allocation9 + $0x180] sm:$0xf] }
  0xa5   :  { %1423 = vmatpush.bf16.msrb.mxu1 %v7362_v55  ;;  %1481 = vmatpush.bf16.msrb.mxu3 %v7366_v59  ;;  %v6977_v55 = vld [vmem:[#allocation8 + $0x58] sm:$0xf] }
  0xa6   :  { %v6978_v58 = vor.u32 %v8782_v56, %v6977_v55  ;;  %v8846_v59 = vld [vmem:[#allocation8 + $0x274] sm:$0xf0]  ;;  %v8947_v55 = vld [vmem:[#allocation9 + $0x19c] sm:$0xf0] }
  0xa7   :  { %1395 = vmatpush.bf16.msrb.mxu0 %v7074_v2  ;;  %1453 = vmatpush.bf16.msrb.mxu2 %v7078_v10  ;;  %v7234_v62 = vor.u32 %v8846_v59, %v7233_v57  ;;  %v7881_v56 = vld [vmem:[#allocation9 + $0x380] sm:$0xf] }
  0xa8   :  { %v9011_v57 = vld [vmem:[#allocation9 + $0x39c] sm:$0xf0] }
  0xa9   :  { %1482 = vmatpush.bf16.msrb.mxu3 %v7334_v15  ;;  %v8770_v15 = vld [vmem:[#allocation8 + $0x1c] sm:$0xf]  ;;  %v10055_v59 = vor.u32 %v9011_v57, %v7881_v56 }
  0xaa   :  { %1173 = vmatmul.bf16.gmra.mxu0 %v9968_v22  ;;  %1231 = vmatmul.bf16.gmra.mxu2 %v9968_v22 }
  0xab   :  { %1396 = vmatpush.bf16.msrb.mxu0 %v7042_v20  ;;  %1454 = vmatpush.bf16.msrb.mxu2 %v7046_v29  ;;  %v7206_v29 = vor.u32 %v8834_v23, %v7203_v24  ;;  %12680 = vst [vmem:[#allocation46_spill] sm:$0xff] %v10055_v59  ;;  %v8999_v24 = vld [vmem:[#allocation9 + $0x344] sm:$0xf] }
  0xac   :  { %1202 = vmatmul.bf16.gmra.mxu1 %v9970_v26  ;;  %1260 = vmatmul.bf16.gmra.mxu3 %v9970_v26 }
  0xaf   :  { %1397 = vmatpush.bf16.msrb.mxu0 %v7010_v42  ;;  %1455 = vmatpush.bf16.msrb.mxu2 %v7014_v50  ;;  %v9019_v42 = vld [vmem:[#allocation9 + $0x3dc] sm:$0xf0]  ;;  %v9015_v50 = vld [vmem:[#allocation9 + $0x3c4] sm:$0xf] }
  0xb3   :  { %1398 = vmatpush.bf16.msrb.mxu0 %v6978_v58  ;;  %v10053_v58 = vor.u32 %v8947_v55, %v7625_v52 }
  0xb5   :  { %12679 = vst [vmem:[#allocation45_spill] sm:$0xff] %v10053_v58 }
  0xb7   :  { %1399 = vmatpush.bf16.msrb.mxu0 %v6946_v11 }
  0xba   :  { %1178 = vmatmul.bf16.gmra.mxu0 %v9976_v14  ;;  %1236 = vmatmul.bf16.gmra.mxu2 %v9976_v14 }
  0xbc   :  { %1207 = vmatmul.bf16.gmra.mxu1 %v9978_v18  ;;  %1265 = vmatmul.bf16.gmra.mxu3 %v9978_v18 }
  0xca   :  { %1183 = vmatmul.bf16.gmra.mxu0 %v9984_v27  ;;  %1241 = vmatmul.bf16.gmra.mxu2 %v9984_v27 }
  0xcc   :  { %1212 = vmatmul.bf16.gmra.mxu1 %v9986_v28  ;;  %1270 = vmatmul.bf16.gmra.mxu3 %v9986_v28 }
  0xd7   :  { %v1053_v7 = vpop.f32.mrf.mxu0 }
  0xd9   :  { %v1082_v8 = vpop.f32.mrf.mxu1 }
  0xda   :  { %v10008_v9 = vadd.f32 %v1082_v8, %v1053_v7  ;;  %1284 = vmatmul.bf16.vlgmr.msra.gmra.mxu0 %v9960_v37  ;;  %1342 = vmatmul.bf16.vlgmr.msra.gmra.mxu2 %v9960_v37  ;;  %v7330_v8 = vor.u32 %v8870_v3, %v7329_v63  ;;  %v8842_v63 = vld [vmem:[#allocation8 + $0x25c] sm:$0xf] }
  0xdc   :  { %12664 = vst [vmem:[#allocation30_spill] sm:$0xff] %v10008_v9  ;;  %1313 = vmatmul.bf16.vlgmr.msra.gmra.mxu1 %v9962_v38  ;;  %1371 = vmatmul.bf16.vlgmr.msra.gmra.mxu3 %v9962_v38  ;;  %v7569_v9 = vld [vmem:[#allocation9 + $0x108] sm:$0xf] }
  0xdd   :  { %v1111_v25 = vpop.f32.mrf.mxu2  ;;  %1424 = vmatpush.bf16.msrb.mxu1 %v7330_v8 }
  0xdf   :  { %v1140_v32 = vpop.f32.mrf.mxu3  ;;  %v1055_v33 = vpop.f32.mrf.mxu0 }
  0xe0   :  { %v10014_v40 = vadd.f32 %v1140_v32, %v1111_v25  ;;  %v7298_v25 = vor.u32 %v8862_v21, %v7297_v19  ;;  %v7302_v32 = vor.u32 %v8858_v30, %v7299_v31  ;;  %v6950_v21 = vor.u32 %v8770_v15, %v6947_v16  ;;  %v9003_v15 = vld [vmem:[#allocation9 + $0x35c] sm:$0xf0]  ;;  %v8935_v16 = vld [vmem:[#allocation9 + $0x144] sm:$0xf] }
  0xe1   :  { %v1084_v41 = vpop.f32.mrf.mxu1 }
  0xe2   :  { %12665 = vst [vmem:[#allocation31_spill] sm:$0xff] %v10014_v40  ;;  %v10016_v46 = vadd.f32 %v1084_v41, %v1055_v33  ;;  %1425 = vmatpush.bf16.msrb.mxu1 %v7298_v25  ;;  %1483 = vmatpush.bf16.msrb.mxu3 %v7302_v32 }
  0xe4   :  { %12666 = vst [vmem:[#allocation32_spill] sm:$0xff] %v10016_v46 }
  0xe5   :  { %v1113_v60 = vpop.f32.mrf.mxu2 }
  0xe6   :  { %1426 = vmatpush.bf16.msrb.mxu1 %v7266_v49  ;;  %1484 = vmatpush.bf16.msrb.mxu3 %v7270_v54  ;;  %v10046_v49 = vor.u32 %v8951_v43, %v7659_v44  ;;  %v10049_v54 = vor.u32 %v9015_v50, %v7915_v51  ;;  %v8991_v50 = vld [vmem:[#allocation9 + $0x304] sm:$0xf] }
  0xe7   :  { %v1142_v0 = vpop.f32.mrf.mxu3  ;;  %v1058_v1 = vpop.f32.mrf.mxu0  ;;  %v7819_v51 = vld [vmem:[#allocation9 + $0x320] sm:$0xf0] }
  0xe8   :  { %v10018_v6 = vadd.f32 %v1142_v0, %v1113_v60  ;;  %v8778_v60 = vld [vmem:[#allocation8 + $0x5c] sm:$0xf]  ;;  %12677 = vst [vmem:[#allocation43_spill] sm:$0xff] %v10046_v49  ;;  %v10092_v55 = vor.u32 %v8991_v50, %v7819_v51  ;;  %v7755_v51 = vld [vmem:[#allocation9 + $0x2a0] sm:$0xf0] }
  0xe9   :  { %v1087_v7 = vpop.f32.mrf.mxu1  ;;  %v7235_v0 = vld [vmem:[#allocation8 + $0x278] sm:$0xf0]  ;;  %12678 = vst [vmem:[#allocation44_spill] sm:$0xff] %v10049_v54 }
  0xea   :  { %12667 = vst [vmem:[#allocation33_spill] sm:$0xff] %v10018_v6  ;;  %v10020_v13 = vadd.f32 %v1087_v7, %v1058_v1  ;;  %1289 = vmatmul.bf16.gmra.mxu0 %v9968_v22  ;;  %1347 = vmatmul.bf16.gmra.mxu2 %v9968_v22  ;;  %v6982_v1 = vor.u32 %v8778_v60, %v6979_v61  ;;  %v7201_v7 = vld [vmem:[#allocation8 + $0x218] sm:$0xf]  ;;  %v8943_v60 = vld [vmem:[#allocation9 + $0x184] sm:$0xf] }
  0xeb   :  { %v7238_v2 = vor.u32 %v8842_v63, %v7235_v0  ;;  %1427 = vmatpush.bf16.msrb.mxu1 %v7234_v62  ;;  %v7202_v20 = vor.u32 %v8838_v12, %v7201_v7  ;;  %v7627_v61 = vld [vmem:[#allocation9 + $0x1a0] sm:$0xf0]  ;;  %v8939_v7 = vld [vmem:[#allocation9 + $0x15c] sm:$0xf0]  ;;  %12692 = vst [vmem:[#allocation58_spill] sm:$0xff] %v10092_v55 }
  0xec   :  { %12668 = vst [vmem:[#allocation34_spill] sm:$0xff] %v10020_v13  ;;  %1318 = vmatmul.bf16.gmra.mxu1 %v9970_v26  ;;  %1376 = vmatmul.bf16.gmra.mxu3 %v9970_v26  ;;  %v9007_v62 = vld [vmem:[#allocation9 + $0x384] sm:$0xf]  ;;  %v10058_v63 = vor.u32 %v8943_v60, %v7627_v61  ;;  %v10068_v12 = vor.u32 %v8939_v7, %v7593_v5  ;;  %v7529_v60 = vld [vmem:[#allocation9 + $0xc0] sm:$0xf] }
  0xed   :  { %v1116_v33 = vpop.f32.mrf.mxu2  ;;  %1456 = vmatpush.bf16.msrb.mxu2 %v6982_v1  ;;  %1485 = vmatpush.bf16.msrb.mxu3 %v7238_v2  ;;  %v7883_v0 = vld [vmem:[#allocation9 + $0x3a0] sm:$0xf0]  ;;  %v8923_v61 = vld [vmem:[#allocation9 + $0xdc] sm:$0xf0]  ;;  %v7857_v13 = vld [vmem:[#allocation9 + $0x348] sm:$0xf] }
  0xee   :  { %12681 = vst [vmem:[#allocation47_spill] sm:$0xff] %v10058_v63  ;;  %v10060_v1 = vor.u32 %v9007_v62, %v7883_v0  ;;  %v7785_v62 = vld [vmem:[#allocation9 + $0x2c0] sm:$0xf]  ;;  %v8919_v5 = vld [vmem:[#allocation9 + $0xc4] sm:$0xf] }
  0xef   :  { %v1145_v39 = vpop.f32.mrf.mxu3  ;;  %v1060_v41 = vpop.f32.mrf.mxu0  ;;  %1428 = vmatpush.bf16.msrb.mxu1 %v7202_v20  ;;  %12684 = vst [vmem:[#allocation50_spill] sm:$0xff] %v10068_v12  ;;  %v7531_v7 = vld [vmem:[#allocation9 + $0xe0] sm:$0xf0]  ;;  %v7603_v6 = vld [vmem:[#allocation9 + $0x168] sm:$0xf0] }
  0xf0   :  { %v10026_v47 = vadd.f32 %v1145_v39, %v1116_v33  ;;  %v7657_v33 = vld [vmem:[#allocation9 + $0x1c0] sm:$0xf]  ;;  %12682 = vst [vmem:[#allocation48_spill] sm:$0xff] %v10060_v1 }
  0xf1   :  { %v1089_v48 = vpop.f32.mrf.mxu1  ;;  %1457 = vmatpush.bf16.msrb.mxu2 %v6950_v21  ;;  %1486 = vmatpush.bf16.msrb.mxu3 %v7206_v29  ;;  %v7851_v29 = vld [vmem:[#allocation9 + $0x360] sm:$0xf0] }
  0xf2   :  { %12669 = vst [vmem:[#allocation35_spill] sm:$0xff] %v10026_v47  ;;  %v10028_v53 = vadd.f32 %v1089_v48, %v1060_v41  ;;  %v10040_v41 = vor.u32 %v8955_v34, %v7657_v33  ;;  %v10044_v48 = vor.u32 %v9019_v42, %v7913_v35  ;;  %v7817_v33 = vld [vmem:[#allocation9 + $0x300] sm:$0xf]  ;;  %v7563_v42 = vld [vmem:[#allocation9 + $0x120] sm:$0xf0] }
  0xf3   :  { %v8995_v35 = vld [vmem:[#allocation9 + $0x31c] sm:$0xf0]  ;;  %v8940_v47 = vld [vmem:[#allocation9 + $0x164] sm:$0xf0] }
  0xf4   :  { %12670 = vst [vmem:[#allocation36_spill] sm:$0xff] %v10028_v53  ;;  %2351 = vmatpush.bf16.msra.mxu0 %v10040_v41  ;;  %2364 = vmatpush.bf16.msra.mxu1 %v10044_v48  ;;  %v10087_v43 = vor.u32 %v8995_v35, %v7817_v33  ;;  %v8979_v33 = vld [vmem:[#allocation9 + $0x29c] sm:$0xf0]  ;;  %v8911_v35 = vld [vmem:[#allocation9 + $0x84] sm:$0xf] }
  0xf5   :  { %v1118_v3 = vpop.f32.mrf.mxu2  ;;  %12674 = vst [vmem:[#allocation40_spill] sm:$0xff] %v10040_v41  ;;  %2377 = vmatpush.bf16.msra.mxu2 %v10046_v49  ;;  %2390 = vmatpush.bf16.msra.mxu3 %v10049_v54 }
  0xf6   :  { %12676 = vst [vmem:[#allocation42_spill] sm:$0xff] %v10044_v48 }
  0xf7   :  { %v1147_v8 = vpop.f32.mrf.mxu3  ;;  %v1063_v10 = vpop.f32.mrf.mxu0  ;;  %12690 = vst [vmem:[#allocation56_spill] sm:$0xff] %v10087_v43 }
  0xf8   :  { %v10030_v17 = vadd.f32 %v1147_v8, %v1118_v3  ;;  %2352 = vmatpush.bf16.msra.mxu0 %v10053_v58  ;;  %2365 = vmatpush.bf16.msra.mxu1 %v10055_v59  ;;  %v7849_v8 = vld [vmem:[#allocation9 + $0x340] sm:$0xf] }
  0xf9   :  { %v1092_v19 = vpop.f32.mrf.mxu1  ;;  %2378 = vmatpush.bf16.msra.mxu2 %v10058_v63  ;;  %2391 = vmatpush.bf16.msra.mxu3 %v10060_v1  ;;  %v10072_v21 = vor.u32 %v9003_v15, %v7849_v8  ;;  %v10105_v15 = vor.u32 %v8919_v5, %v7531_v7  ;;  %v7721_v5 = vld [vmem:[#allocation9 + $0x240] sm:$0xf] }
  0xfa   :  { %12671 = vst [vmem:[#allocation37_spill] sm:$0xff] %v10030_v17  ;;  %v10032_v25 = vadd.f32 %v1092_v19, %v1063_v10  ;;  %1294 = vmatmul.bf16.gmra.mxu0 %v9976_v14  ;;  %1352 = vmatmul.bf16.gmra.mxu2 %v9976_v14  ;;  %v7595_v19 = vld [vmem:[#allocation9 + $0x160] sm:$0xf0]  ;;  %v8948_v17 = vld [vmem:[#allocation9 + $0x1a4] sm:$0xf0] }
  0xfb   :  { %12686 = vst [vmem:[#allocation52_spill] sm:$0xff] %v10072_v21  ;;  %v10074_v23 = vor.u32 %v8935_v16, %v7595_v19  ;;  %v8983_v16 = vld [vmem:[#allocation9 + $0x2c4] sm:$0xf] }
  0xfc   :  { %12672 = vst [vmem:[#allocation38_spill] sm:$0xff] %v10032_v25  ;;  %1323 = vmatmul.bf16.gmra.mxu1 %v9978_v18  ;;  %1381 = vmatmul.bf16.gmra.mxu3 %v9978_v18  ;;  %v7787_v19 = vld [vmem:[#allocation9 + $0x2e0] sm:$0xf0] }
  0xfd   :  { %v1121_v30 = vpop.f32.mrf.mxu2  ;;  %12687 = vst [vmem:[#allocation53_spill] sm:$0xff] %v10074_v23  ;;  %2353 = vmatpush.bf16.msra.mxu0 %v10068_v12  ;;  %2366 = vmatpush.bf16.msra.mxu1 %v10072_v21 }
  0xfe   :  { %2379 = vmatpush.bf16.msra.mxu2 %v10074_v23  ;;  %12697 = vst [vmem:[#allocation63_spill] sm:$0xff] %v10105_v15 }
  0xff   :  { %v1150_v31 = vpop.f32.mrf.mxu3  ;;  %v1065_v32 = vpop.f32.mrf.mxu0 }
 0x100   :  { %v10038_v36 = vadd.f32 %v1150_v31, %v1121_v30  ;;  %v10077_v30 = vor.u32 %v8999_v24, %v7851_v29  ;;  %v7561_v31 = vld [vmem:[#allocation9 + $0x100] sm:$0xf]  ;;  %v10108_v29 = vor.u32 %v8983_v16, %v7787_v19 }
 0x101   :  { %v1094_v39 = vpop.f32.mrf.mxu1  ;;  %2367 = vmatpush.bf16.msra.mxu1 %v10087_v43  ;;  %v7497_v24 = vld [vmem:[#allocation9 + $0x80] sm:$0xf] }
 0x102   :  { %12673 = vst [vmem:[#allocation39_spill] sm:$0xff] %v10038_v36  ;;  %v10042_v45 = vadd.f32 %v1094_v39, %v1065_v32  ;;  %v8931_v32 = vld [vmem:[#allocation9 + $0x11c] sm:$0xf0]  ;;  %v8927_v39 = vld [vmem:[#allocation9 + $0x104] sm:$0xf]  ;;  %2392 = vmatpush.bf16.msra.mxu3 %v10077_v30 }
 0x103   :  { %12688 = vst [vmem:[#allocation54_spill] sm:$0xff] %v10077_v30  ;;  %v10083_v34 = vor.u32 %v8931_v32, %v7561_v31  ;;  %v10089_v44 = vor.u32 %v8927_v39, %v7563_v42  ;;  %v8915_v31 = vld [vmem:[#allocation9 + $0x9c] sm:$0xf0]  ;;  %v7499_v39 = vld [vmem:[#allocation9 + $0xa0] sm:$0xf0] }
 0x104   :  { %12675 = vst [vmem:[#allocation41_spill] sm:$0xff] %v10042_v45  ;;  %v7753_v32 = vld [vmem:[#allocation9 + $0x280] sm:$0xf]  ;;  %v8975_v42 = vld [vmem:[#allocation9 + $0x284] sm:$0xf]  ;;  %v10111_v50 = vor.u32 %v8915_v31, %v7497_v24 }
 0x105   :  { %v1123_v2 = vpop.f32.mrf.mxu2  ;;  %12689 = vst [vmem:[#allocation55_spill] sm:$0xff] %v10083_v34  ;;  %2354 = vmatpush.bf16.msra.mxu0 %v10083_v34  ;;  %2380 = vmatpush.bf16.msra.mxu2 %v10089_v44  ;;  %v8971_v24 = vld [vmem:[#allocation9 + $0x25c] sm:$0xf0]  ;;  %v8903_v31 = vld [vmem:[#allocation9 + $0x44] sm:$0xf] }
 0x106   :  { %12691 = vst [vmem:[#allocation57_spill] sm:$0xff] %v10089_v44  ;;  %2393 = vmatpush.bf16.msra.mxu3 %v10092_v55 }
 0x107   :  { %v1152_v3 = vpop.f32.mrf.mxu3  ;;  %v1068_v4 = vpop.f32.mrf.mxu0  ;;  %12698 = vst [vmem:[#allocation64_spill] sm:$0xff] %v10108_v29 }
 0x108   :  { %v10065_v10 = vadd.f32 %v1152_v3, %v1123_v2  ;;  %v10097_v3 = vor.u32 %v8923_v61, %v7529_v60  ;;  %12699 = vst [vmem:[#allocation65_spill] sm:$0xff] %v10111_v50  ;;  %v10120_v60 = vor.u32 %v8975_v42, %v7755_v51  ;;  %v8967_v42 = vld [vmem:[#allocation9 + $0x244] sm:$0xf] }
 0x109   :  { %v1097_v11 = vpop.f32.mrf.mxu1  ;;  %2381 = vmatpush.bf16.msra.mxu2 %v10105_v15  ;;  %v7723_v51 = vld [vmem:[#allocation9 + $0x260] sm:$0xf0] }
 0x10a   :  { %12683 = vst [vmem:[#allocation49_spill] sm:$0xff] %v10065_v10  ;;  %v10070_v20 = vadd.f32 %v1097_v11, %v1068_v4  ;;  %1299 = vmatmul.bf16.gmra.mxu0 %v9984_v27  ;;  %1357 = vmatmul.bf16.gmra.mxu2 %v9984_v27  ;;  %v8987_v4 = vld [vmem:[#allocation9 + $0x2dc] sm:$0xf0] }
 0x10b   :  { %12694 = vst [vmem:[#allocation60_spill] sm:$0xff] %v10097_v3  ;;  %v10103_v11 = vor.u32 %v8987_v4, %v7785_v62  ;;  %2355 = vmatpush.bf16.msra.mxu0 %v10097_v3  ;;  %2394 = vmatpush.bf16.msra.mxu3 %v10108_v29  ;;  %v8907_v4 = vld [vmem:[#allocation9 + $0x5c] sm:$0xf0] }
 0x10c   :  { %12685 = vst [vmem:[#allocation51_spill] sm:$0xff] %v10070_v20  ;;  %1328 = vmatmul.bf16.gmra.mxu1 %v9986_v28  ;;  %1386 = vmatmul.bf16.gmra.mxu3 %v9986_v28 }
 0x10d   :  { %v1126_v52 = vpop.f32.mrf.mxu2  ;;  %12696 = vst [vmem:[#allocation62_spill] sm:$0xff] %v10103_v11  ;;  %2368 = vmatpush.bf16.msra.mxu1 %v10103_v11 }
 0x10e   :  { %12702 = vst [vmem:[#allocation68_spill] sm:$0xff] %v10120_v60 }
 0x10f   :  { %v1155_v56 = vpop.f32.mrf.mxu3  ;;  %v1070_v57 = vpop.f32.mrf.mxu0  ;;  %2356 = vmatpush.bf16.msra.mxu0 %v10111_v50  ;;  %2395 = vmatpush.bf16.msra.mxu3 %v10120_v60 }
 0x110   :  { %v10094_v0 = vadd.f32 %v1155_v56, %v1126_v52  ;;  %v10115_v52 = vor.u32 %v8979_v33, %v7753_v32  ;;  %v10117_v56 = vor.u32 %v8911_v35, %v7499_v39  ;;  %v7467_v32 = vld [vmem:[#allocation9 + $0x60] sm:$0xf0]  ;;  %v10131_v35 = vor.u32 %v8971_v24, %v7721_v5  ;;  %v8963_v5 = vld [vmem:[#allocation9 + $0x21c] sm:$0xf0] }
 0x111   :  { %v1099_v2 = vpop.f32.mrf.mxu1  ;;  %v10133_v39 = vor.u32 %v8903_v31, %v7467_v32  ;;  %v7435_v24 = vld [vmem:[#allocation9 + $0x20] sm:$0xf0] }
 0x112   :  { %12693 = vst [vmem:[#allocation59_spill] sm:$0xff] %v10094_v0  ;;  %v10099_v8 = vadd.f32 %v1099_v2, %v1070_v57  ;;  %v7465_v2 = vld [vmem:[#allocation9 + $0x40] sm:$0xf]  ;;  %2369 = vmatpush.bf16.msra.mxu1 %v10115_v52  ;;  %2382 = vmatpush.bf16.msra.mxu2 %v10117_v56 }
 0x113   :  { %12700 = vst [vmem:[#allocation66_spill] sm:$0xff] %v10115_v52  ;;  %v10125_v19 = vor.u32 %v8907_v4, %v7465_v2  ;;  %v7689_v2 = vld [vmem:[#allocation9 + $0x200] sm:$0xf] }
 0x114   :  { %12695 = vst [vmem:[#allocation61_spill] sm:$0xff] %v10099_v8  ;;  %v10147_v31 = vor.u32 %v8963_v5, %v7689_v2  ;;  %v9020_v8 = vld [vmem:[#allocation9 + $0x3e4] sm:$0xf0]  ;;  %v8952_v2 = vld [vmem:[#allocation9 + $0x1cc] sm:$0xf] }
 0x115   :  { %12701 = vst [vmem:[#allocation67_spill] sm:$0xff] %v10117_v56  ;;  %v1128_v57 = vpop.f32.mrf.mxu2  ;;  %2357 = vmatpush.bf16.msra.mxu0 %v10125_v19  ;;  %v7667_v5 = vld [vmem:[#allocation9 + $0x1e8] sm:$0xf0] }
 0x116   :  { %12704 = vst [vmem:[#allocation70_spill] sm:$0xff] %v10125_v19  ;;  %2370 = vmatpush.bf16.msra.mxu1 %v10131_v35  ;;  %2383 = vmatpush.bf16.msra.mxu2 %v10133_v39  ;;  %v10161_v25 = vor.u32 %v8952_v2, %v7667_v5  ;;  %v9008_v2 = vld [vmem:[#allocation9 + $0x38c] sm:$0xf] }
 0x117   :  { %v1157_v61 = vpop.f32.mrf.mxu3  ;;  %v1169_v62 = vpop.f32.mrf.mxu0  ;;  %12706 = vst [vmem:[#allocation72_spill] sm:$0xff] %v10131_v35  ;;  %v7891_v5 = vld [vmem:[#allocation9 + $0x3a8] sm:$0xf0] }
 0x118   :  { %v10122_v7 = vadd.f32 %v1157_v61, %v1128_v57  ;;  %12707 = vst [vmem:[#allocation73_spill] sm:$0xff] %v10133_v39  ;;  %v10137_v57 = vor.u32 %v8967_v42, %v7723_v51  ;;  %v7433_v61 = vld [vmem:[#allocation9] sm:$0xf]  ;;  %v7691_v42 = vld [vmem:[#allocation9 + $0x220] sm:$0xf0] }
 0x119   :  { %v1198_v16 = vpop.f32.mrf.mxu1  ;;  %12710 = vst [vmem:[#allocation76_spill] sm:$0xff] %v10147_v31  ;;  %v7665_v51 = vld [vmem:[#allocation9 + $0x1c8] sm:$0xf] }
 0x11a   :  { %12703 = vst [vmem:[#allocation69_spill] sm:$0xff] %v10122_v7  ;;  %v10127_v33 = vadd.f32 %v1198_v16, %v1169_v62  ;;  %1400 = vmatmul.bf16.vlgmr.msrb.gmra.mxu0 %v9960_v37  ;;  %1458 = vmatmul.bf16.vlgmr.msrb.gmra.mxu2 %v9960_v37  ;;  %v8899_v62 = vld [vmem:[#allocation9 + $0x1c] sm:$0xf0]  ;;  %v8895_v16 = vld [vmem:[#allocation9 + $0x4] sm:$0xf] }
 0x11b   :  { %12708 = vst [vmem:[#allocation74_spill] sm:$0xff] %v10137_v57  ;;  %v10143_v4 = vor.u32 %v8899_v62, %v7433_v61  ;;  %v10149_v32 = vor.u32 %v8895_v16, %v7435_v24  ;;  %v8959_v37 = vld [vmem:[#allocation9 + $0x204] sm:$0xf]  ;;  %2396 = vmatpush.bf16.msra.mxu3 %v10137_v57  ;;  %v8956_v61 = vld [vmem:[#allocation9 + $0x1e4] sm:$0xf0]  ;;  %2371 = vmatpush.bf16.msra.mxu1 %v10147_v31 }
 0x11c   :  { %12705 = vst [vmem:[#allocation71_spill] sm:$0xff] %v10127_v33  ;;  %1429 = vmatmul.bf16.vlgmr.msrb.gmra.mxu1 %v9962_v38  ;;  %1487 = vmatmul.bf16.vlgmr.msrb.gmra.mxu3 %v9962_v38  ;;  %v10152_v38 = vor.u32 %v8959_v37, %v7691_v42  ;;  %v7921_v62 = vld [vmem:[#allocation9 + $0x3c8] sm:$0xf]  ;;  %v10154_v10 = vor.u32 %v8956_v61, %v7665_v51  ;;  %v9016_v16 = vld [vmem:[#allocation9 + $0x3cc] sm:$0xf] }
 0x11d   :  { %12709 = vst [vmem:[#allocation75_spill] sm:$0xff] %v10143_v4  ;;  %v1227_v7 = vpop.f32.mrf.mxu2  ;;  %v10156_v45 = vor.u32 %v9020_v8, %v7921_v62  ;;  %2358 = vmatpush.bf16.msra.mxu0 %v10143_v4  ;;  %v7923_v37 = vld [vmem:[#allocation9 + $0x3e8] sm:$0xf0]  ;;  %v7633_v42 = vld [vmem:[#allocation9 + $0x188] sm:$0xf]  ;;  %2384 = vmatpush.bf16.msra.mxu2 %v10149_v32 }
 0x11e   :  { %12711 = vst [vmem:[#allocation77_spill] sm:$0xff] %v10149_v32  ;;  %v10167_v8 = vor.u32 %v9016_v16, %v7923_v37  ;;  %v7889_v51 = vld [vmem:[#allocation9 + $0x388] sm:$0xf]  ;;  %v7635_v62 = vld [vmem:[#allocation9 + $0x1a8] sm:$0xf0]  ;;  %v10180_v16 = vor.u32 %v9008_v2, %v7891_v5 }
 0x11f   :  { %12712 = vst [vmem:[#allocation78_spill] sm:$0xff] %v10152_v38  ;;  %v1256_v0 = vpop.f32.mrf.mxu3  ;;  %v1171_v20 = vpop.f32.mrf.mxu0  ;;  %v9012_v61 = vld [vmem:[#allocation9 + $0x3a4] sm:$0xf0]  ;;  %2397 = vmatpush.bf16.msra.mxu3 %v10152_v38  ;;  %2416 = vmatpush.bf16.msrb.mxu1 %v10156_v45 }
 0x120   :  { %12713 = vst [vmem:[#allocation79_spill] sm:$0xff] %v10154_v10  ;;  %v10158_v24 = vadd.f32 %v1256_v0, %v1227_v7  ;;  %v8944_v0 = vld [vmem:[#allocation9 + $0x18c] sm:$0xf]  ;;  %v10171_v7 = vor.u32 %v8948_v17, %v7633_v42  ;;  %v7601_v37 = vld [vmem:[#allocation9 + $0x148] sm:$0xf] }
 0x121   :  { %12714 = vst [vmem:[#allocation80_spill] sm:$0xff] %v10156_v45  ;;  %v1200_v36 = vpop.f32.mrf.mxu1  ;;  %2403 = vmatpush.bf16.msrb.mxu0 %v10154_v10  ;;  %2429 = vmatpush.bf16.msrb.mxu2 %v10161_v25  ;;  %v9004_v42 = vld [vmem:[#allocation9 + $0x364] sm:$0xf0]  ;;  %v10188_v2 = vor.u32 %v8940_v47, %v7601_v37  ;;  %v8992_v47 = vld [vmem:[#allocation9 + $0x30c] sm:$0xf] }
 0x122   :  { %12715 = vst [vmem:[#allocation81_spill] sm:$0xff] %v10158_v24  ;;  %v10163_v53 = vadd.f32 %v1200_v36, %v1171_v20  ;;  %v10175_v36 = vor.u32 %v9012_v61, %v7889_v51  ;;  %v10177_v20 = vor.u32 %v8944_v0, %v7635_v62  ;;  %v9000_v51 = vld [vmem:[#allocation9 + $0x34c] sm:$0xf]  ;;  %v10192_v33 = vor.u32 %v9004_v42, %v7857_v13  ;;  %v7537_v37 = vld [vmem:[#allocation9 + $0xc8] sm:$0xf] }
 0x123   :  { %12716 = vst [vmem:[#allocation82_spill] sm:$0xff] %v10161_v25  ;;  %2442 = vmatpush.bf16.msrb.mxu3 %v10167_v8  ;;  %v7859_v61 = vld [vmem:[#allocation9 + $0x368] sm:$0xf0]  ;;  %v8924_v42 = vld [vmem:[#allocation9 + $0xe4] sm:$0xf0] }
 0x124   :  { %12717 = vst [vmem:[#allocation83_spill] sm:$0xff] %v10163_v53  ;;  %v8936_v53 = vld [vmem:[#allocation9 + $0x14c] sm:$0xf]  ;;  %2417 = vmatpush.bf16.msrb.mxu1 %v10175_v36 }
 0x125   :  { %12718 = vst [vmem:[#allocation84_spill] sm:$0xff] %v10167_v8  ;;  %v1229_v17 = vpop.f32.mrf.mxu2  ;;  %2404 = vmatpush.bf16.msrb.mxu0 %v10171_v7  ;;  %2430 = vmatpush.bf16.msrb.mxu2 %v10177_v20  ;;  %v10194_v40 = vor.u32 %v8936_v53, %v7603_v6  ;;  %v8932_v8 = vld [vmem:[#allocation9 + $0x124] sm:$0xf0] }
 0x126   :  { %12719 = vst [vmem:[#allocation85_spill] sm:$0xff] %v10171_v7  ;;  %v10203_v6 = vor.u32 %v8932_v8, %v7569_v9  ;;  %v7539_v9 = vld [vmem:[#allocation9 + $0xe8] sm:$0xf0] }
 0x127   :  { %12720 = vst [vmem:[#allocation86_spill] sm:$0xff] %v10175_v36  ;;  %v1258_v46 = vpop.f32.mrf.mxu3  ;;  %v1174_v24 = vpop.f32.mrf.mxu0  ;;  %2443 = vmatpush.bf16.msrb.mxu3 %v10180_v16  ;;  %v7825_v36 = vld [vmem:[#allocation9 + $0x308] sm:$0xf] }
 0x128   :  { %12721 = vst [vmem:[#allocation87_spill] sm:$0xff] %v10177_v20  ;;  %v10185_v0 = vadd.f32 %v1258_v46, %v1229_v17  ;;  %v10197_v20 = vor.u32 %v9000_v51, %v7859_v61  ;;  %v8996_v46 = vld [vmem:[#allocation9 + $0x324] sm:$0xf0]  ;;  %v8928_v17 = vld [vmem:[#allocation9 + $0x10c] sm:$0xf]  ;;  %2418 = vmatpush.bf16.msrb.mxu1 %v10192_v33 }
 0x129   :  { %12722 = vst [vmem:[#allocation88_spill] sm:$0xff] %v10180_v16  ;;  %v1203_v62 = vpop.f32.mrf.mxu1  ;;  %2405 = vmatpush.bf16.msrb.mxu0 %v10188_v2  ;;  %2431 = vmatpush.bf16.msrb.mxu2 %v10194_v40  ;;  %v10207_v13 = vor.u32 %v8996_v46, %v7825_v36  ;;  %v7793_v51 = vld [vmem:[#allocation9 + $0x2c8] sm:$0xf]  ;;  %v7795_v16 = vld [vmem:[#allocation9 + $0x2e8] sm:$0xf0] }
 0x12a   :  { %12723 = vst [vmem:[#allocation89_spill] sm:$0xff] %v10185_v0  ;;  %v10190_v5 = vadd.f32 %v1203_v62, %v1174_v24  ;;  %1405 = vmatmul.bf16.gmra.mxu0 %v9968_v22  ;;  %v7571_v0 = vld [vmem:[#allocation9 + $0x128] sm:$0xf0]  ;;  %1463 = vmatmul.bf16.gmra.mxu2 %v9968_v22 }
 0x12b   :  { %12724 = vst [vmem:[#allocation90_spill] sm:$0xff] %v10188_v2  ;;  %v7827_v24 = vld [vmem:[#allocation9 + $0x328] sm:$0xf0]  ;;  %v10209_v53 = vor.u32 %v8928_v17, %v7571_v0  ;;  %2444 = vmatpush.bf16.msrb.mxu3 %v10197_v20  ;;  %v10217_v0 = vor.u32 %v8924_v42, %v7537_v37  ;;  %v7761_v2 = vld [vmem:[#allocation9 + $0x288] sm:$0xf] }
 0x12c   :  { %12725 = vst [vmem:[#allocation91_spill] sm:$0xff] %v10190_v5  ;;  %1434 = vmatmul.bf16.gmra.mxu1 %v9970_v26  ;;  %1492 = vmatmul.bf16.gmra.mxu3 %v9970_v26  ;;  %v10212_v61 = vor.u32 %v8992_v47, %v7827_v24  ;;  %v8988_v26 = vld [vmem:[#allocation9 + $0x2e4] sm:$0xf0]  ;;  %v8920_v62 = vld [vmem:[#allocation9 + $0xcc] sm:$0xf] }
 0x12d   :  { %12726 = vst [vmem:[#allocation92_spill] sm:$0xff] %v10192_v33  ;;  %v1232_v22 = vpop.f32.mrf.mxu2  ;;  %v8984_v33 = vld [vmem:[#allocation9 + $0x2cc] sm:$0xf]  ;;  %2406 = vmatpush.bf16.msrb.mxu0 %v10203_v6  ;;  %2419 = vmatpush.bf16.msrb.mxu1 %v10207_v13  ;;  %v10223_v17 = vor.u32 %v8988_v26, %v7793_v51  ;;  %v10225_v47 = vor.u32 %v8920_v62, %v7539_v9  ;;  %v7505_v24 = vld [vmem:[#allocation9 + $0x88] sm:$0xf] }
 0x12e   :  { %12727 = vst [vmem:[#allocation93_spill] sm:$0xff] %v10194_v40  ;;  %2432 = vmatpush.bf16.msrb.mxu2 %v10209_v53  ;;  %v8912_v37 = vld [vmem:[#allocation9 + $0x8c] sm:$0xf]  ;;  %v7473_v62 = vld [vmem:[#allocation9 + $0x48] sm:$0xf] }
 0x12f   :  { %12728 = vst [vmem:[#allocation94_spill] sm:$0xff] %v10197_v20  ;;  %v1261_v8 = vpop.f32.mrf.mxu3  ;;  %v1176_v5 = vpop.f32.mrf.mxu0  ;;  %v8916_v20 = vld [vmem:[#allocation9 + $0xa4] sm:$0xf0]  ;;  %2445 = vmatpush.bf16.msrb.mxu3 %v10212_v61  ;;  %v7507_v42 = vld [vmem:[#allocation9 + $0xa8] sm:$0xf0] }
 0x130   :  { %12729 = vst [vmem:[#allocation95_spill] sm:$0xff] %v10203_v6  ;;  %v10214_v40 = vadd.f32 %v1261_v8, %v1232_v22  ;;  %v10228_v22 = vor.u32 %v8984_v33, %v7795_v16  ;;  %v8980_v8 = vld [vmem:[#allocation9 + $0x2a4] sm:$0xf0]  ;;  %v10237_v26 = vor.u32 %v8912_v37, %v7507_v42 }
 0x131   :  { %12730 = vst [vmem:[#allocation96_spill] sm:$0xff] %v10207_v13  ;;  %v1205_v36 = vpop.f32.mrf.mxu1  ;;  %2407 = vmatpush.bf16.msrb.mxu0 %v10217_v0  ;;  %2420 = vmatpush.bf16.msrb.mxu1 %v10223_v17  ;;  %v10235_v51 = vor.u32 %v8980_v8, %v7761_v2  ;;  %v8908_v33 = vld [vmem:[#allocation9 + $0x64] sm:$0xf0] }
 0x132   :  { %12731 = vst [vmem:[#allocation97_spill] sm:$0xff] %v10209_v53  ;;  %v10219_v46 = vadd.f32 %v1205_v36, %v1176_v5  ;;  %v8976_v5 = vld [vmem:[#allocation9 + $0x28c] sm:$0xf]  ;;  %2433 = vmatpush.bf16.msrb.mxu2 %v10225_v47  ;;  %v7729_v16 = vld [vmem:[#allocation9 + $0x248] sm:$0xf]  ;;  %v10245_v8 = vor.u32 %v8908_v33, %v7473_v62 }
 0x133   :  { %12732 = vst [vmem:[#allocation98_spill] sm:$0xff] %v10212_v61  ;;  %v7763_v36 = vld [vmem:[#allocation9 + $0x2a8] sm:$0xf0]  ;;  %2446 = vmatpush.bf16.msrb.mxu3 %v10228_v22  ;;  %v8972_v61 = vld [vmem:[#allocation9 + $0x264] sm:$0xf0] }
 0x134   :  { %12733 = vst [vmem:[#allocation99_spill] sm:$0xff] %v10214_v40  ;;  %v10240_v40 = vor.u32 %v8976_v5, %v7763_v36  ;;  %v7731_v53 = vld [vmem:[#allocation9 + $0x268] sm:$0xf0]  ;;  %v10251_v42 = vor.u32 %v8972_v61, %v7729_v16  ;;  %v7441_v36 = vld [vmem:[#allocation9 + $0x8] sm:$0xf] }
 0x135   :  { %12734 = vst [vmem:[#allocation100_spill] sm:$0xff] %v10217_v0  ;;  %v1234_v9 = vpop.f32.mrf.mxu2  ;;  %v8904_v0 = vld [vmem:[#allocation9 + $0x4c] sm:$0xf]  ;;  %2421 = vmatpush.bf16.msrb.mxu1 %v10235_v51  ;;  %v7697_v6 = vld [vmem:[#allocation9 + $0x208] sm:$0xf] }
 0x136   :  { %12735 = vst [vmem:[#allocation101_spill] sm:$0xff] %v10219_v46  ;;  %v10231_v46 = vor.u32 %v8916_v20, %v7505_v24  ;;  %v7475_v20 = vld [vmem:[#allocation9 + $0x68] sm:$0xf0]  ;;  %2434 = vmatpush.bf16.msrb.mxu2 %v10237_v26  ;;  %v8964_v62 = vld [vmem:[#allocation9 + $0x224] sm:$0xf0] }
 0x137   :  { %12736 = vst [vmem:[#allocation102_spill] sm:$0xff] %v10223_v17  ;;  %v1263_v24 = vpop.f32.mrf.mxu3  ;;  %v1179_v13 = vpop.f32.mrf.mxu0  ;;  %v8968_v17 = vld [vmem:[#allocation9 + $0x24c] sm:$0xf]  ;;  %v10253_v5 = vor.u32 %v8904_v0, %v7475_v20  ;;  %2447 = vmatpush.bf16.msrb.mxu3 %v10240_v40 }
 0x138   :  { %12737 = vst [vmem:[#allocation103_spill] sm:$0xff] %v10225_v47  ;;  %v10242_v47 = vadd.f32 %v1263_v24, %v1234_v9  ;;  %2408 = vmatpush.bf16.msrb.mxu0 %v10231_v46  ;;  %v10257_v9 = vor.u32 %v8968_v17, %v7731_v53  ;;  %v7443_v33 = vld [vmem:[#allocation9 + $0x28] sm:$0xf0]  ;;  %v10267_v53 = vor.u32 %v8964_v62, %v7697_v6  ;;  %v12410_v24 = vmov 0  }
 0x139   :  { %12738 = vst [vmem:[#allocation104_spill] sm:$0xff] %v10228_v22  ;;  %v1208_v2 = vpop.f32.mrf.mxu1  ;;  %v8900_v22 = vld [vmem:[#allocation9 + $0x24] sm:$0xf0]  ;;  %v8960_v61 = vld [vmem:[#allocation9 + $0x20c] sm:$0xf]  ;;  %2422 = vmatpush.bf16.msrb.mxu1 %v10251_v42  ;;  %9238 = vset.pattern.permute.xlu0 %v12410_v24 }
 0x13a   :  { %12739 = vst [vmem:[#allocation105_spill] sm:$0xff] %v10231_v46  ;;  %v10247_v37 = vadd.f32 %v1208_v2, %v1179_v13  ;;  %1410 = vmatmul.bf16.gmra.mxu0 %v9976_v14  ;;  %v8896_v13 = vld [vmem:[#allocation9 + $0xc] sm:$0xf]  ;;  %1468 = vmatmul.bf16.gmra.mxu2 %v9976_v14  ;;  %v10263_v0 = vor.u32 %v8900_v22, %v7441_v36 }
 0x13b   :  { %12740 = vst [vmem:[#allocation106_spill] sm:$0xff] %v10235_v51  ;;  %v7699_v16 = vld [vmem:[#allocation9 + $0x228] sm:$0xf0]  ;;  %2435 = vmatpush.bf16.msrb.mxu2 %v10253_v5  ;;  %v10269_v17 = vor.u32 %v8896_v13, %v7443_v33  ;;  %2448 = vmatpush.bf16.msrb.mxu3 %v10257_v9 }
 0x13c   :  { %12741 = vst [vmem:[#allocation107_spill] sm:$0xff] %v10237_v26  ;;  %1439 = vmatmul.bf16.gmra.mxu1 %v9978_v18  ;;  %1497 = vmatmul.bf16.gmra.mxu3 %v9978_v18  ;;  %v10272_v14 = vor.u32 %v8960_v61, %v7699_v16 }
 0x13d   :  { %12742 = vst [vmem:[#allocation108_spill] sm:$0xff] %v10240_v40  ;;  %2409 = vmatpush.bf16.msrb.mxu0 %v10245_v8  ;;  %v1237_v20 = vpop.f32.mrf.mxu2  ;;  %2423 = vmatpush.bf16.msrb.mxu1 %v10267_v53  ;;  %v8965_v40 = vld [vmem:[#allocation9 + $0x22c] sm:$0xf0] }
 0x13e   :  { %12743 = vst [vmem:[#allocation109_spill] sm:$0xff] %v10242_v47  ;;  %v7931_v47 = vld [vmem:[#allocation9 + $0x3f0] sm:$0xf0] }
 0x13f   :  { %12744 = vst [vmem:[#allocation110_spill] sm:$0xff] %v10245_v8  ;;  %v1266_v18 = vpop.f32.mrf.mxu3  ;;  %v1181_v2 = vpop.f32.mrf.mxu0  ;;  %2436 = vmatpush.bf16.msrb.mxu2 %v10269_v17  ;;  %2449 = vmatpush.bf16.msrb.mxu3 %v10272_v14  ;;  %v7937_v8 = vld [vmem:[#allocation9 + $0x3d8] sm:$0xf] }
 0x140   :  { %12745 = vst [vmem:[#allocation111_spill] sm:$0xff] %v10247_v37  ;;  %v10275_v22 = vadd.f32 %v1266_v18, %v1237_v20 }
 0x141   :  { %12746 = vst [vmem:[#allocation112_spill] sm:$0xff] %v10251_v42  ;;  %v1210_v36 = vpop.f32.mrf.mxu1  ;;  %2410 = vmatpush.bf16.msrb.mxu0 %v10263_v0  ;;  %v7643_v42 = vld [vmem:[#allocation9 + $0x1b0] sm:$0xf0] }
 0x142   :  { %12747 = vst [vmem:[#allocation113_spill] sm:$0xff] %v10253_v5  ;;  %v10278_v37 = vadd.f32 %v1210_v36, %v1181_v2 }
 0x143   :  { %12748 = vst [vmem:[#allocation114_spill] sm:$0xff] %v10257_v9 }
 0x144   :  { %12749 = vst [vmem:[#allocation115_spill] sm:$0xff] %v10263_v0  ;;  %v8945_v0 = vld [vmem:[#allocation9 + $0x194] sm:$0xf] }
 0x145   :  { %12750 = vst [vmem:[#allocation116_spill] sm:$0xff] %v10267_v53  ;;  %v1239_v6 = vpop.f32.mrf.mxu2 }
 0x146   :  { %12751 = vst [vmem:[#allocation117_spill] sm:$0xff] %v10269_v17  ;;  %v12766_v17 = vmov 0  }
 0x147   :  { %12752 = vst [vmem:[#allocation118_spill] sm:$0xff] %v10272_v14  ;;  %v1268_v62 = vpop.f32.mrf.mxu3  ;;  %v1184_v13 = vpop.f32.mrf.mxu0 }
 0x148   :  { %12753 = vst [vmem:[#allocation119_spill] sm:$0xff] %v10275_v22  ;;  %v10283_v33 = vadd.f32 %v1268_v62, %v1239_v6  ;;  %v7673_v6 = vld [vmem:[#allocation9 + $0x1d0] sm:$0xf] }
 0x149   :  { %12754 = vst [vmem:[#allocation120_spill] sm:$0xff] %v10278_v37  ;;  %v1213_v61 = vpop.f32.mrf.mxu1  ;;  %v8957_v62 = vld [vmem:[#allocation9 + $0x1ec] sm:$0xf0]  ;;  %v7675_v37 = vld [vmem:[#allocation9 + $0x1f0] sm:$0xf0] }
 0x14a   :  { %12755 = vst [vmem:[#allocation121_spill] sm:$0xff] %v10283_v33  ;;  %v10285_v16 = vadd.f32 %v1213_v61, %v1184_v13  ;;  %1415 = vmatmul.bf16.gmra.mxu0 %v9984_v27  ;;  %1473 = vmatmul.bf16.gmra.mxu2 %v9984_v27  ;;  %v7929_v13 = vld [vmem:[#allocation9 + $0x3d0] sm:$0xf]  ;;  %v8953_v33 = vld [vmem:[#allocation9 + $0x1d4] sm:$0xf]  ;;  %v10301_v53 = vor.u32 %v8957_v62, %v7673_v6 }
 0x14b   :  { %v7899_v6 = vld [vmem:[#allocation9 + $0x3b0] sm:$0xf0]  ;;  %v8941_v62 = vld [vmem:[#allocation9 + $0x16c] sm:$0xf0] }
 0x14c   :  { %12756 = vst [vmem:[#allocation122_spill] sm:$0xff] %v10285_v16  ;;  %1444 = vmatmul.bf16.gmra.mxu1 %v9986_v28  ;;  %1502 = vmatmul.bf16.gmra.mxu3 %v9986_v28  ;;  %v9021_v16 = vld [vmem:[#allocation9 + $0x3ec] sm:$0xf0]  ;;  %v9017_v28 = vld [vmem:[#allocation9 + $0x3d4] sm:$0xf] }
 0x14d   :  { %v1242_v20 = vpop.f32.mrf.mxu2  ;;  %12762 = vst [vmem:[#allocation128_spill] sm:$0xff] %v10301_v53  ;;  %v10310_v9 = vor.u32 %v9017_v28, %v7931_v47 }
 0x14f   :  { %v1271_v18 = vpop.f32.mrf.mxu3  ;;  %v10291_v2 = vpop.f32.mrf.mxu0  ;;  %12767 = vst [vmem:[#allocation132_spill] sm:$0xff] %v10310_v9 }
 0x150   :  { %12757 = vst [vmem:[#allocation123_spill] sm:$0xff] %v10291_v2  ;;  %v10293_v36 = vadd.f32 %v1271_v18, %v1242_v20  ;;  %v10305_v18 = vor.u32 %v9021_v16, %v7929_v13  ;;  %v7641_v2 = vld [vmem:[#allocation9 + $0x190] sm:$0xf] }
 0x151   :  { %v10295_v24 = vpop.f32.mrf.mxu1  ;;  %v7609_v16 = vld [vmem:[#allocation9 + $0x150] sm:$0xf] }
 0x152   :  { %12758 = vst [vmem:[#allocation124_spill] sm:$0xff] %v10293_v36  ;;  %v8949_v36 = vld [vmem:[#allocation9 + $0x1ac] sm:$0xf0] }
 0x153   :  { %12759 = vst [vmem:[#allocation125_spill] sm:$0xff] %v10295_v24  ;;  %v10307_v24 = vor.u32 %v8953_v33, %v7675_v37  ;;  %v10316_v37 = vor.u32 %v8949_v36, %v7641_v2  ;;  %v10322_v33 = vor.u32 %v8945_v0, %v7643_v42  ;;  %v7865_v13 = vld [vmem:[#allocation9 + $0x350] sm:$0xf]  ;;  %v7611_v2 = vld [vmem:[#allocation9 + $0x170] sm:$0xf0]  ;;  %v10334_v0 = vor.u32 %v8941_v62, %v7609_v16 }
 0x154   :  { %12764 = vst [vmem:[#allocation130_spill] sm:$0xff] %v10305_v18  ;;  %v8993_v16 = vld [vmem:[#allocation9 + $0x314] sm:$0xf] }
 0x155   :  { %v10297_v61 = vpop.f32.mrf.mxu2  ;;  %12765 = vst [vmem:[#allocation131_spill] sm:$0xff] %v10307_v24  ;;  %v7835_v62 = vld [vmem:[#allocation9 + $0x330] sm:$0xf0] }
 0x156   :  { %12760 = vst [vmem:[#allocation126_spill] sm:$0xff] %v10297_v61  ;;  %v7897_v61 = vld [vmem:[#allocation9 + $0x390] sm:$0xf] }
 0x157   :  { %v10299_v22 = vpop.f32.mrf.mxu3  ;;  %v1285_v27 = vpop.f32.mrf.mxu0  ;;  %12768 = vst [vmem:[#allocation133_spill] sm:$0xff] %v10316_v37 }
 0x158   :  { %12761 = vst [vmem:[#allocation127_spill] sm:$0xff] %v10299_v22  ;;  %v9013_v22 = vld [vmem:[#allocation9 + $0x3ac] sm:$0xf0] }
 0x159   :  { %v1314_v14 = vpop.f32.mrf.mxu1  ;;  %v10320_v47 = vor.u32 %v9013_v22, %v7897_v61  ;;  %12770 = vst [vmem:[#allocation135_spill] sm:$0xff] %v10322_v33 }
 0x15a   :  { %v10303_v20 = vadd.f32 %v1314_v14, %v1285_v27  ;;  %2359 = vmatmul.bf16.vlgmr.msra.gmra.mxu0 %v12766_v17  ;;  %2385 = vmatmul.bf16.vlgmr.msra.gmra.mxu2 %v12766_v17  ;;  %v9009_v14 = vld [vmem:[#allocation9 + $0x394] sm:$0xf]  ;;  %12775 = vst [vmem:[#allocation140_spill] sm:$0xff] %v10334_v0 }
 0x15b   :  { %2455 = vmatpush.bf16.msra.mxu0 %v10301_v53  ;;  %2481 = vmatpush.bf16.msra.mxu2 %v10307_v24  ;;  %12769 = vst [vmem:[#allocation134_spill] sm:$0xff] %v10320_v47  ;;  %v10325_v28 = vor.u32 %v9009_v14, %v7899_v6  ;;  %v8937_v53 = vld [vmem:[#allocation9 + $0x154] sm:$0xf]  ;;  %v7577_v6 = vld [vmem:[#allocation9 + $0x110] sm:$0xf] }
 0x15c   :  { %12763 = vst [vmem:[#allocation129_spill] sm:$0xff] %v10303_v20  ;;  %2372 = vmatmul.bf16.vlgmr.msra.gmra.mxu1 %v12766_v17  ;;  %2398 = vmatmul.bf16.vlgmr.msra.gmra.mxu3 %v12766_v17  ;;  %v9005_v20 = vld [vmem:[#allocation9 + $0x36c] sm:$0xf0]  ;;  %v7867_v24 = vld [vmem:[#allocation9 + $0x370] sm:$0xf0]  ;;  %v10340_v14 = vor.u32 %v8937_v53, %v7611_v2 }
 0x15d   :  { %2468 = vmatpush.bf16.msra.mxu1 %v10305_v18  ;;  %2494 = vmatpush.bf16.msra.mxu3 %v10310_v9  ;;  %v1343_v27 = vpop.f32.mrf.mxu2  ;;  %12771 = vst [vmem:[#allocation136_spill] sm:$0xff] %v10325_v28  ;;  %v9001_v18 = vld [vmem:[#allocation9 + $0x354] sm:$0xf]  ;;  %v10338_v61 = vor.u32 %v9005_v20, %v7865_v13  ;;  %v7833_v9 = vld [vmem:[#allocation9 + $0x310] sm:$0xf] }
 0x15e   :  { %12777 = vst [vmem:[#allocation142_spill] sm:$0xff] %v10340_v14  ;;  %v7545_v13 = vld [vmem:[#allocation9 + $0xd0] sm:$0xf] }
 0x15f   :  { %v1372_v36 = vpop.f32.mrf.mxu3  ;;  %v10327_v5 = vpop.f32.mrf.mxu0  ;;  %2456 = vmatpush.bf16.msra.mxu0 %v10316_v37  ;;  %2482 = vmatpush.bf16.msra.mxu2 %v10322_v33  ;;  %12776 = vst [vmem:[#allocation141_spill] sm:$0xff] %v10338_v61  ;;  %v8929_v37 = vld [vmem:[#allocation9 + $0x114] sm:$0xf] }
 0x160   :  { %12772 = vst [vmem:[#allocation137_spill] sm:$0xff] %v10327_v5  ;;  %v10329_v22 = vadd.f32 %v1372_v36, %v1343_v27  ;;  %v8933_v5 = vld [vmem:[#allocation9 + $0x12c] sm:$0xf0]  ;;  %v10343_v27 = vor.u32 %v9001_v18, %v7867_v24 }
 0x161   :  { %v10332_v42 = vpop.f32.mrf.mxu1  ;;  %2469 = vmatpush.bf16.msra.mxu1 %v10320_v47  ;;  %2495 = vmatpush.bf16.msra.mxu3 %v10325_v28  ;;  %v8997_v36 = vld [vmem:[#allocation9 + $0x32c] sm:$0xf0]  ;;  %v10346_v47 = vor.u32 %v8933_v5, %v7577_v6  ;;  %v10357_v28 = vor.u32 %v8993_v16, %v7835_v62  ;;  %v8921_v5 = vld [vmem:[#allocation9 + $0xd4] sm:$0xf] }
 0x162   :  { %12773 = vst [vmem:[#allocation138_spill] sm:$0xff] %v10329_v22  ;;  %v10350_v53 = vor.u32 %v8997_v36, %v7833_v9  ;;  %v8925_v24 = vld [vmem:[#allocation9 + $0xec] sm:$0xf0]  ;;  %v7547_v6 = vld [vmem:[#allocation9 + $0xf0] sm:$0xf0] }
 0x163   :  { %12774 = vst [vmem:[#allocation139_spill] sm:$0xff] %v10332_v42  ;;  %v7579_v42 = vld [vmem:[#allocation9 + $0x130] sm:$0xf0]  ;;  %2457 = vmatpush.bf16.msra.mxu0 %v10334_v0  ;;  %2483 = vmatpush.bf16.msra.mxu2 %v10340_v14  ;;  %v7801_v18 = vld [vmem:[#allocation9 + $0x2d0] sm:$0xf]  ;;  %v10370_v62 = vor.u32 %v8921_v5, %v7547_v6 }
 0x164   :  { %12778 = vst [vmem:[#allocation143_spill] sm:$0xff] %v10343_v27  ;;  %v10352_v20 = vor.u32 %v8929_v37, %v7579_v42  ;;  %v8989_v0 = vld [vmem:[#allocation9 + $0x2ec] sm:$0xf0]  ;;  %v8985_v14 = vld [vmem:[#allocation9 + $0x2d4] sm:$0xf]  ;;  %v10362_v42 = vor.u32 %v8925_v24, %v7545_v13 }
 0x165   :  { %12779 = vst [vmem:[#allocation144_spill] sm:$0xff] %v10346_v47  ;;  %2470 = vmatpush.bf16.msra.mxu1 %v10338_v61  ;;  %2496 = vmatpush.bf16.msra.mxu3 %v10343_v27  ;;  %v10355_v2 = vpop.f32.mrf.mxu2  ;;  %v7803_v9 = vld [vmem:[#allocation9 + $0x2f0] sm:$0xf0]  ;;  %v10368_v16 = vor.u32 %v8989_v0, %v7801_v18  ;;  %v7769_v27 = vld [vmem:[#allocation9 + $0x290] sm:$0xf] }
 0x166   :  { %12780 = vst [vmem:[#allocation145_spill] sm:$0xff] %v10350_v53  ;;  %v8981_v13 = vld [vmem:[#allocation9 + $0x2ac] sm:$0xf0]  ;;  %v8913_v24 = vld [vmem:[#allocation9 + $0x94] sm:$0xf] }
 0x167   :  { %12781 = vst [vmem:[#allocation146_spill] sm:$0xff] %v10352_v20  ;;  %v10359_v33 = vpop.f32.mrf.mxu3  ;;  %v1290_v61 = vpop.f32.mrf.mxu0  ;;  %2458 = vmatpush.bf16.msra.mxu0 %v10346_v47  ;;  %2484 = vmatpush.bf16.msra.mxu2 %v10352_v20  ;;  %v10374_v47 = vor.u32 %v8985_v14, %v7803_v9  ;;  %v8977_v0 = vld [vmem:[#allocation9 + $0x294] sm:$0xf]  ;;  %v10384_v14 = vor.u32 %v8981_v13, %v7769_v27  ;;  %v7481_v6 = vld [vmem:[#allocation9 + $0x50] sm:$0xf] }
 0x168   :  { %12782 = vst [vmem:[#allocation147_spill] sm:$0xff] %v10355_v2  ;;  %v7513_v2 = vld [vmem:[#allocation9 + $0x90] sm:$0xf] }
 0x169   :  { %12783 = vst [vmem:[#allocation148_spill] sm:$0xff] %v10357_v28  ;;  %v1319_v37 = vpop.f32.mrf.mxu1  ;;  %2471 = vmatpush.bf16.msra.mxu1 %v10350_v53  ;;  %2497 = vmatpush.bf16.msra.mxu3 %v10357_v28  ;;  %v7515_v53 = vld [vmem:[#allocation9 + $0xb0] sm:$0xf0]  ;;  %v8909_v9 = vld [vmem:[#allocation9 + $0x6c] sm:$0xf0] }
 0x16a   :  { %12784 = vst [vmem:[#allocation149_spill] sm:$0xff] %v10359_v33  ;;  %v10366_v36 = vadd.f32 %v1319_v37, %v1290_v61  ;;  %v8917_v33 = vld [vmem:[#allocation9 + $0xac] sm:$0xf0]  ;;  %2411 = vmatmul.bf16.vlgmr.msrb.gmra.mxu0 %v12766_v17  ;;  %2437 = vmatmul.bf16.vlgmr.msrb.gmra.mxu2 %v12766_v17  ;;  %v7771_v61 = vld [vmem:[#allocation9 + $0x2b0] sm:$0xf0]  ;;  %v10386_v5 = vor.u32 %v8913_v24, %v7515_v53 }
 0x16b   :  { %12785 = vst [vmem:[#allocation150_spill] sm:$0xff] %v10362_v42  ;;  %2459 = vmatpush.bf16.msra.mxu0 %v10362_v42  ;;  %v10380_v18 = vor.u32 %v8917_v33, %v7513_v2  ;;  %2485 = vmatpush.bf16.msra.mxu2 %v10370_v62  ;;  %v7737_v37 = vld [vmem:[#allocation9 + $0x250] sm:$0xf]  ;;  %v10389_v28 = vor.u32 %v8977_v0, %v7771_v61  ;;  %v8905_v42 = vld [vmem:[#allocation9 + $0x54] sm:$0xf] }
 0x16c   :  { %12786 = vst [vmem:[#allocation151_spill] sm:$0xff] %v10366_v36  ;;  %2424 = vmatmul.bf16.vlgmr.msrb.gmra.mxu1 %v12766_v17  ;;  %2450 = vmatmul.bf16.vlgmr.msrb.gmra.mxu3 %v12766_v17  ;;  %v8973_v20 = vld [vmem:[#allocation9 + $0x26c] sm:$0xf0]  ;;  %v7483_v33 = vld [vmem:[#allocation9 + $0x70] sm:$0xf0]  ;;  %v10398_v13 = vor.u32 %v8909_v9, %v7481_v6 }
 0x16d   :  { %12787 = vst [vmem:[#allocation152_spill] sm:$0xff] %v10368_v16  ;;  %2472 = vmatpush.bf16.msra.mxu1 %v10368_v16  ;;  %2498 = vmatpush.bf16.msra.mxu3 %v10374_v47  ;;  %v1348_v36 = vpop.f32.mrf.mxu2  ;;  %v8969_v16 = vld [vmem:[#allocation9 + $0x254] sm:$0xf]  ;;  %v7449_v24 = vld [vmem:[#allocation9 + $0x10] sm:$0xf]  ;;  %v10402_v0 = vor.u32 %v8973_v20, %v7737_v37  ;;  %v10404_v61 = vor.u32 %v8905_v42, %v7483_v33 }
 0x16e   :  { %12788 = vst [vmem:[#allocation153_spill] sm:$0xff] %v10370_v62  ;;  %v7739_v62 = vld [vmem:[#allocation9 + $0x270] sm:$0xf0]  ;;  %v9022_v20 = vld [vmem:[#allocation9 + $0x3f4] sm:$0xf0] }
 0x16f   :  { %12789 = vst [vmem:[#allocation154_spill] sm:$0xff] %v10374_v47  ;;  %v1377_v2 = vpop.f32.mrf.mxu3  ;;  %v10391_v22 = vpop.f32.mrf.mxu0  ;;  %2460 = vmatpush.bf16.msra.mxu0 %v10380_v18  ;;  %v8901_v47 = vld [vmem:[#allocation9 + $0x2c] sm:$0xf0]  ;;  %2486 = vmatpush.bf16.msra.mxu2 %v10386_v5  ;;  %v8961_v6 = vld [vmem:[#allocation9 + $0x214] sm:$0xf] }
 0x170   :  { %12790 = vst [vmem:[#allocation155_spill] sm:$0xff] %v10380_v18  ;;  %v10393_v27 = vadd.f32 %v1377_v2, %v1348_v36  ;;  %v8897_v36 = vld [vmem:[#allocation9 + $0x14] sm:$0xf]  ;;  %v10407_v2 = vor.u32 %v8969_v16, %v7739_v62  ;;  %v8958_v18 = vld [vmem:[#allocation9 + $0x1f4] sm:$0xf0] }
 0x171   :  { %12791 = vst [vmem:[#allocation156_spill] sm:$0xff] %v10384_v14  ;;  %v10396_v53 = vpop.f32.mrf.mxu1  ;;  %2473 = vmatpush.bf16.msra.mxu1 %v10384_v14  ;;  %2499 = vmatpush.bf16.msra.mxu3 %v10389_v28  ;;  %v7707_v9 = vld [vmem:[#allocation9 + $0x230] sm:$0xf0]  ;;  %v10410_v14 = vor.u32 %v8901_v47, %v7449_v24  ;;  %v8954_v42 = vld [vmem:[#allocation9 + $0x1dc] sm:$0xf] }
 0x172   :  { %12792 = vst [vmem:[#allocation157_spill] sm:$0xff] %v10386_v5  ;;  %v7683_v37 = vld [vmem:[#allocation9 + $0x1f8] sm:$0xf0] }
 0x173   :  { %12793 = vst [vmem:[#allocation158_spill] sm:$0xff] %v10389_v28  ;;  %2461 = vmatpush.bf16.msra.mxu0 %v10398_v13  ;;  %2487 = vmatpush.bf16.msra.mxu2 %v10404_v61  ;;  %v9018_v62 = vld [vmem:[#allocation9 + $0x3dc] sm:$0xf] }
 0x174   :  { %12794 = vst [vmem:[#allocation159_spill] sm:$0xff] %v10391_v22  ;;  %v7705_v22 = vld [vmem:[#allocation9 + $0x210] sm:$0xf]  ;;  %v7939_v28 = vld [vmem:[#allocation9 + $0x3f8] sm:$0xf0] }
 0x175   :  { %12795 = vst [vmem:[#allocation160_spill] sm:$0xff] %v10393_v27  ;;  %v7681_v27 = vld [vmem:[#allocation9 + $0x1d8] sm:$0xf]  ;;  %2474 = vmatpush.bf16.msra.mxu1 %v10402_v0  ;;  %v10414_v33 = vor.u32 %v8965_v40, %v7705_v22  ;;  %2500 = vmatpush.bf16.msra.mxu3 %v10407_v2  ;;  %v10419_v5 = vpop.f32.mrf.mxu2 }
 0x176   :  { %12796 = vst [vmem:[#allocation161_spill] sm:$0xff] %v10396_v53  ;;  %v7451_v53 = vld [vmem:[#allocation9 + $0x30] sm:$0xf0]  ;;  %v10423_v47 = vor.u32 %v8958_v18, %v7681_v27  ;;  %v7649_v40 = vld [vmem:[#allocation9 + $0x198] sm:$0xf] }
 0x177   :  { %12797 = vst [vmem:[#allocation162_spill] sm:$0xff] %v10398_v13  ;;  %v10416_v16 = vor.u32 %v8897_v36, %v7451_v53  ;;  %v10421_v13 = vor.u32 %v8961_v6, %v7707_v9  ;;  %v10425_v24 = vpop.f32.mrf.mxu3  ;;  %v1295_v51 = vpop.f32.mrf.mxu0  ;;  %v8950_v22 = vld [vmem:[#allocation9 + $0x1b4] sm:$0xf0]  ;;  %2462 = vmatpush.bf16.msra.mxu0 %v10410_v14  ;;  %v8946_v6 = vld [vmem:[#allocation9 + $0x19c] sm:$0xf] }
 0x178   :  { %12798 = vst [vmem:[#allocation163_spill] sm:$0xff] %v10402_v0  ;;  %v10427_v0 = vor.u32 %v9022_v20, %v7937_v8  ;;  %v7905_v53 = vld [vmem:[#allocation9 + $0x398] sm:$0xf]  ;;  %v7651_v9 = vld [vmem:[#allocation9 + $0x1b8] sm:$0xf0]  ;;  %v10440_v20 = vor.u32 %v8950_v22, %v7649_v40 }
 0x179   :  { %12799 = vst [vmem:[#allocation164_spill] sm:$0xff] %v10404_v61  ;;  %v10429_v61 = vor.u32 %v8954_v42, %v7683_v37  ;;  %v1324_v36 = vpop.f32.mrf.mxu1  ;;  %2475 = vmatpush.bf16.msra.mxu1 %v10414_v33  ;;  %2488 = vmatpush.bf16.msra.mxu2 %v10416_v16  ;;  %v9010_v8 = vld [vmem:[#allocation9 + $0x39c] sm:$0xf]  ;;  %v10446_v42 = vor.u32 %v8946_v6, %v7651_v9  ;;  %v7617_v37 = vld [vmem:[#allocation9 + $0x158] sm:$0xf] }
 0x17a   :  { %12800 = vst [vmem:[#allocation165_spill] sm:$0xff] %v10407_v2  ;;  %v10432_v2 = vor.u32 %v9018_v62, %v7939_v28  ;;  %v10436_v18 = vadd.f32 %v1324_v36, %v1295_v51  ;;  %v7907_v27 = vld [vmem:[#allocation9 + $0x3b8] sm:$0xf0]  ;;  %2501 = vmatpush.bf16.msra.mxu3 %v10421_v13  ;;  %v8942_v62 = vld [vmem:[#allocation9 + $0x174] sm:$0xf0]  ;;  %2463 = vmatmul.bf16.vlgmr.msra.gmra.mxu0 %v12766_v17 }
 0x17b   :  { %12801 = vst [vmem:[#allocation166_spill] sm:$0xff] %v10410_v14  ;;  %2507 = vmatpush.bf16.msrb.mxu0 %v10423_v47  ;;  %v7873_v51 = vld [vmem:[#allocation9 + $0x358] sm:$0xf]  ;;  %v10450_v36 = vor.u32 %v9010_v8, %v7907_v27  ;;  %v8938_v40 = vld [vmem:[#allocation9 + $0x15c] sm:$0xf]  ;;  %v10456_v9 = vor.u32 %v8942_v62, %v7617_v37 }
 0x17c   :  { %12802 = vst [vmem:[#allocation167_spill] sm:$0xff] %v10414_v33  ;;  %v7619_v22 = vld [vmem:[#allocation9 + $0x178] sm:$0xf0]  ;;  %2476 = vmatmul.bf16.vlgmr.msra.gmra.mxu1 %v12766_v17  ;;  %2489 = vmatmul.bf16.vlgmr.msra.gmra.mxu2 %v12766_v17  ;;  %v7841_v33 = vld [vmem:[#allocation9 + $0x318] sm:$0xf] }
 0x17d   :  { %12803 = vst [vmem:[#allocation168_spill] sm:$0xff] %v10416_v16  ;;  %2520 = vmatpush.bf16.msrb.mxu1 %v10427_v0  ;;  %2533 = vmatpush.bf16.msrb.mxu2 %v10429_v61  ;;  %v1353_v6 = vpop.f32.mrf.mxu2 }
 0x17e   :  { %12804 = vst [vmem:[#allocation169_spill] sm:$0xff] %v10419_v5  ;;  %v9014_v5 = vld [vmem:[#allocation9 + $0x3b4] sm:$0xf0]  ;;  %2546 = vmatpush.bf16.msrb.mxu3 %v10432_v2 }
 0x17f   :  { %12805 = vst [vmem:[#allocation170_spill] sm:$0xff] %v10421_v13  ;;  %v10444_v28 = vor.u32 %v9014_v5, %v7905_v53  ;;  %v9002_v5 = vld [vmem:[#allocation9 + $0x35c] sm:$0xf]  ;;  %2502 = vmatmul.bf16.vlgmr.msra.gmra.mxu3 %v12766_v17  ;;  %2508 = vmatpush.bf16.msrb.mxu0 %v10440_v20  ;;  %v1382_v8 = vpop.f32.mrf.mxu3  ;;  %v10460_v27 = vpop.f32.mrf.mxu0  ;;  %v8934_v13 = vld [vmem:[#allocation9 + $0x134] sm:$0xf0] }
 0x180   :  { %12806 = vst [vmem:[#allocation171_spill] sm:$0xff] %v10423_v47  ;;  %v7875_v53 = vld [vmem:[#allocation9 + $0x378] sm:$0xf0] }
 0x181   :  { %12807 = vst [vmem:[#allocation172_spill] sm:$0xff] %v10425_v24  ;;  %2521 = vmatpush.bf16.msrb.mxu1 %v10444_v28  ;;  %2534 = vmatpush.bf16.msrb.mxu2 %v10446_v42  ;;  %v10469_v37 = vpop.f32.mrf.mxu1  ;;  %v10471_v62 = vor.u32 %v9002_v5, %v7875_v53  ;;  %v8994_v47 = vld [vmem:[#allocation9 + $0x31c] sm:$0xf]  ;;  %v8926_v5 = vld [vmem:[#allocation9 + $0xf4] sm:$0xf0] }
 0x182   :  { %12808 = vst [vmem:[#allocation173_spill] sm:$0xff] %v10427_v0  ;;  %v7585_v0 = vld [vmem:[#allocation9 + $0x118] sm:$0xf]  ;;  %2547 = vmatpush.bf16.msrb.mxu3 %v10450_v36 }
 0x183   :  { %12809 = vst [vmem:[#allocation174_spill] sm:$0xff] %v10429_v61  ;;  %v7587_v61 = vld [vmem:[#allocation9 + $0x138] sm:$0xf0]  ;;  %2509 = vmatpush.bf16.msrb.mxu0 %v10456_v9  ;;  %v7809_v53 = vld [vmem:[#allocation9 + $0x2d8] sm:$0xf] }
 0x184   :  { %12810 = vst [vmem:[#allocation175_spill] sm:$0xff] %v10432_v2  ;;  %v10464_v2 = vor.u32 %v8938_v40, %v7619_v22  ;;  %v7553_v22 = vld [vmem:[#allocation9 + $0xd8] sm:$0xf] }
 0x185   :  { %12811 = vst [vmem:[#allocation176_spill] sm:$0xff] %v10436_v18  ;;  %v9006_v18 = vld [vmem:[#allocation9 + $0x374] sm:$0xf0] }
 0x186   :  { %12812 = vst [vmem:[#allocation177_spill] sm:$0xff] %v10440_v20  ;;  %v10462_v24 = vor.u32 %v9006_v18, %v7873_v51  ;;  %v10467_v20 = vadd.f32 %v1382_v8, %v1353_v6  ;;  %v10474_v18 = vor.u32 %v8934_v13, %v7585_v0  ;;  %2535 = vmatpush.bf16.msrb.mxu2 %v10464_v2  ;;  %v8990_v8 = vld [vmem:[#allocation9 + $0x2f4] sm:$0xf0]  ;;  %v8986_v13 = vld [vmem:[#allocation9 + $0x2dc] sm:$0xf] }
 0x187   :  { %12813 = vst [vmem:[#allocation178_spill] sm:$0xff] %v10444_v28  ;;  %v8998_v28 = vld [vmem:[#allocation9 + $0x334] sm:$0xf0]  ;;  %2548 = vmatpush.bf16.msrb.mxu3 %v10471_v62  ;;  %v7811_v0 = vld [vmem:[#allocation9 + $0x2f8] sm:$0xf0] }
 0x188   :  { %12814 = vst [vmem:[#allocation179_spill] sm:$0xff] %v10446_v42  ;;  %v8930_v42 = vld [vmem:[#allocation9 + $0x11c] sm:$0xf]  ;;  %2522 = vmatpush.bf16.msrb.mxu1 %v10462_v24  ;;  %v10478_v51 = vor.u32 %v8998_v28, %v7841_v33  ;;  %2510 = vmatpush.bf16.msrb.mxu0 %v10474_v18  ;;  %v10488_v33 = vor.u32 %v8926_v5, %v7553_v22  ;;  %v1300_v28 = vpop.f32.mrf.mxu0  ;;  %v8982_v22 = vld [vmem:[#allocation9 + $0x2b4] sm:$0xf0] }
 0x189   :  { %12815 = vst [vmem:[#allocation180_spill] sm:$0xff] %v10450_v36  ;;  %v10480_v40 = vor.u32 %v8930_v42, %v7587_v61  ;;  %v10492_v61 = vpop.f32.mrf.mxu3  ;;  %v7777_v36 = vld [vmem:[#allocation9 + $0x298] sm:$0xf]  ;;  %v8914_v5 = vld [vmem:[#allocation9 + $0x9c] sm:$0xf] }
 0x18a   :  { %12816 = vst [vmem:[#allocation181_spill] sm:$0xff] %v10456_v9  ;;  %v8962_v9 = vld [vmem:[#allocation9 + $0x21c] sm:$0xf] }
 0x18b   :  { %12817 = vst [vmem:[#allocation182_spill] sm:$0xff] %v10460_v27  ;;  %v7843_v27 = vld [vmem:[#allocation9 + $0x338] sm:$0xf0]  ;;  %2536 = vmatpush.bf16.msrb.mxu2 %v10480_v40 }
 0x18c   :  { %12818 = vst [vmem:[#allocation183_spill] sm:$0xff] %v10462_v24  ;;  %v10483_v6 = vor.u32 %v8994_v47, %v7843_v27  ;;  %v10486_v24 = vpop.f32.mrf.mxu2  ;;  %2523 = vmatpush.bf16.msrb.mxu1 %v10478_v51  ;;  %v10494_v47 = vor.u32 %v8990_v8, %v7809_v53  ;;  %v7521_v27 = vld [vmem:[#allocation9 + $0x98] sm:$0xf]  ;;  %2511 = vmatpush.bf16.msrb.mxu0 %v10488_v33 }
 0x18d   :  { %12819 = vst [vmem:[#allocation184_spill] sm:$0xff] %v10464_v2  ;;  %v7489_v8 = vld [vmem:[#allocation9 + $0x58] sm:$0xf] }
 0x18e   :  { %12820 = vst [vmem:[#allocation185_spill] sm:$0xff] %v10467_v20  ;;  %v7555_v20 = vld [vmem:[#allocation9 + $0xf8] sm:$0xf0]  ;;  %2549 = vmatpush.bf16.msrb.mxu3 %v10483_v6 }
 0x18f   :  { %12821 = vst [vmem:[#allocation186_spill] sm:$0xff] %v10469_v37  ;;  %v8922_v37 = vld [vmem:[#allocation9 + $0xdc] sm:$0xf] }
 0x190   :  { %12822 = vst [vmem:[#allocation187_spill] sm:$0xff] %v10471_v62  ;;  %v10496_v42 = vor.u32 %v8922_v37, %v7555_v20  ;;  %v8918_v62 = vld [vmem:[#allocation9 + $0xb4] sm:$0xf0]  ;;  %2524 = vmatpush.bf16.msrb.mxu1 %v10494_v47  ;;  %v10508_v20 = vor.u32 %v8982_v22, %v7777_v36 }
 0x191   :  { %12823 = vst [vmem:[#allocation188_spill] sm:$0xff] %v10474_v18  ;;  %v1329_v18 = vpop.f32.mrf.mxu1  ;;  %v10504_v53 = vor.u32 %v8918_v62, %v7521_v27  ;;  %v8970_v62 = vld [vmem:[#allocation9 + $0x25c] sm:$0xf]  ;;  %v1387_v36 = vpop.f32.mrf.mxu3 }
 0x192   :  { %12824 = vst [vmem:[#allocation189_spill] sm:$0xff] %v10478_v51  ;;  %v7523_v51 = vld [vmem:[#allocation9 + $0xb8] sm:$0xf0]  ;;  %v10501_v2 = vadd.f32 %v1329_v18, %v1300_v28  ;;  %2537 = vmatpush.bf16.msrb.mxu2 %v10496_v42  ;;  %v8974_v28 = vld [vmem:[#allocation9 + $0x274] sm:$0xf0] }
 0x193   :  { %12825 = vst [vmem:[#allocation190_spill] sm:$0xff] %v10480_v40  ;;  %v8978_v40 = vld [vmem:[#allocation9 + $0x29c] sm:$0xf]  ;;  %v10510_v37 = vor.u32 %v8914_v5, %v7523_v51  ;;  %2512 = vmatpush.bf16.msrb.mxu0 %v10504_v53  ;;  %v10520_v51 = vpop.f32.mrf.mxu0  ;;  %v8902_v5 = vld [vmem:[#allocation9 + $0x34] sm:$0xf0] }
 0x194   :  { %12826 = vst [vmem:[#allocation191_spill] sm:$0xff] %v10483_v6  ;;  %v7491_v6 = vld [vmem:[#allocation9 + $0x78] sm:$0xf0]  ;;  %2525 = vmatpush.bf16.msrb.mxu1 %v10508_v20 }
 0x195   :  { %12827 = vst [vmem:[#allocation192_spill] sm:$0xff] %v10486_v24  ;;  %v10499_v24 = vor.u32 %v8986_v13, %v7811_v0  ;;  %v8910_v13 = vld [vmem:[#allocation9 + $0x74] sm:$0xf0]  ;;  %v7747_v27 = vld [vmem:[#allocation9 + $0x278] sm:$0xf0] }
 0x196   :  { %12828 = vst [vmem:[#allocation193_spill] sm:$0xff] %v10488_v33  ;;  %v7745_v0 = vld [vmem:[#allocation9 + $0x258] sm:$0xf]  ;;  %2538 = vmatpush.bf16.msrb.mxu2 %v10510_v37  ;;  %v7459_v33 = vld [vmem:[#allocation9 + $0x38] sm:$0xf0] }
 0x197   :  { %12829 = vst [vmem:[#allocation194_spill] sm:$0xff] %v10492_v61  ;;  %v7779_v61 = vld [vmem:[#allocation9 + $0x2b8] sm:$0xf0]  ;;  %2550 = vmatpush.bf16.msrb.mxu3 %v10499_v24  ;;  %v10522_v22 = vor.u32 %v8974_v28, %v7745_v0 }
 0x198   :  { %12830 = vst [vmem:[#allocation195_spill] sm:$0xff] %v10494_v47  ;;  %v10513_v18 = vor.u32 %v8978_v40, %v7779_v61  ;;  %v1358_v47 = vpop.f32.mrf.mxu2  ;;  %v7457_v61 = vld [vmem:[#allocation9 + $0x18] sm:$0xf] }
 0x199   :  { %12831 = vst [vmem:[#allocation196_spill] sm:$0xff] %v10496_v42  ;;  %v10516_v42 = vor.u32 %v8910_v13, %v7489_v8  ;;  %v10529_v8 = vpop.f32.mrf.mxu1  ;;  %v10531_v13 = vor.u32 %v8970_v62, %v7747_v27  ;;  %2526 = vmatpush.bf16.msrb.mxu1 %v10522_v22  ;;  %v10550_v62 = vpop.f32.mrf.mxu3 }
 0x19a   :  { %12832 = vst [vmem:[#allocation197_spill] sm:$0xff] %v10499_v24  ;;  %v7713_v24 = vld [vmem:[#allocation9 + $0x218] sm:$0xf] }
 0x19b   :  { %12833 = vst [vmem:[#allocation198_spill] sm:$0xff] %v10501_v2  ;;  %v8906_v2 = vld [vmem:[#allocation9 + $0x5c] sm:$0xf]  ;;  %2551 = vmatpush.bf16.msrb.mxu3 %v10513_v18  ;;  %2513 = vmatpush.bf16.msrb.mxu0 %v10516_v42  ;;  %v1401_v27 = vpop.f32.mrf.mxu0 }
 0x19c   :  { %12834 = vst [vmem:[#allocation199_spill] sm:$0xff] %v10504_v53  ;;  %v10524_v40 = vor.u32 %v8906_v2, %v7491_v6  ;;  %v10527_v53 = vadd.f32 %v1387_v36, %v1358_v47  ;;  %v10534_v2 = vor.u32 %v8902_v5, %v7457_v61 }
 0x19d   :  { %12835 = vst [vmem:[#allocation200_spill] sm:$0xff] %v10508_v20  ;;  %v8966_v20 = vld [vmem:[#allocation9 + $0x234] sm:$0xf0] }
 0x19e   :  { %12836 = vst [vmem:[#allocation201_spill] sm:$0xff] %v10510_v37  ;;  %v8898_v37 = vld [vmem:[#allocation9 + $0x1c] sm:$0xf]  ;;  %2539 = vmatpush.bf16.msrb.mxu2 %v10524_v40  ;;  %v10538_v6 = vor.u32 %v8966_v20, %v7713_v24 }
 0x19f   :  { %12837 = vst [vmem:[#allocation202_spill] sm:$0xff] %v10513_v18  ;;  %v10540_v47 = vor.u32 %v8898_v37, %v7459_v33  ;;  %2552 = vmatpush.bf16.msrb.mxu3 %v10531_v13  ;;  %2514 = vmatpush.bf16.msrb.mxu0 %v10534_v2 }
 0x1a0   :  { %12838 = vst [vmem:[#allocation203_spill] sm:$0xff] %v10516_v42  ;;  %v10546_v28 = vpop.f32.mrf.mxu2  ;;  %2527 = vmatpush.bf16.msrb.mxu1 %v10538_v6 }
 0x1a1   :  { %12839 = vst [vmem:[#allocation204_spill] sm:$0xff] %v10520_v51  ;;  %v7715_v51 = vld [vmem:[#allocation9 + $0x238] sm:$0xf0]  ;;  %v1430_v24 = vpop.f32.mrf.mxu1  ;;  %v1488_v20 = vpop.f32.mrf.mxu3 }
 0x1a2   :  { %12840 = vst [vmem:[#allocation205_spill] sm:$0xff] %v10522_v22  ;;  %v10543_v0 = vor.u32 %v8962_v9, %v7715_v51  ;;  %2540 = vmatpush.bf16.msrb.mxu2 %v10540_v47  ;;  %2515 = vmatmul.bf16.vlgmr.msrb.gmra.mxu0 %v12766_v17  ;;  %v10555_v9 = vadd.f32 %v1430_v24, %v1401_v27 }
 0x1a3   :  { %12841 = vst [vmem:[#allocation206_spill] sm:$0xff] %v10524_v40  ;;  %2732 = vmatpush.bf16.msra.mxu0 %v10040_v41  ;;  %2528 = vmatmul.bf16.vlgmr.msrb.gmra.mxu1 %v12766_v17  ;;  %v10565_v37 = vpop.f32.mrf.mxu0 }
 0x1a4   :  { %12842 = vst [vmem:[#allocation207_spill] sm:$0xff] %v10527_v53  ;;  %2553 = vmatpush.bf16.msrb.mxu3 %v10543_v0  ;;  %2745 = vmatpush.bf16.msra.mxu1 %v10044_v48 }
 0x1a5   :  { %12843 = vst [vmem:[#allocation208_spill] sm:$0xff] %v10529_v8  ;;  %2541 = vmatmul.bf16.vlgmr.msrb.gmra.mxu2 %v12766_v17 }
 0x1a6   :  { %12844 = vst [vmem:[#allocation209_spill] sm:$0xff] %v10531_v13  ;;  %2758 = vmatpush.bf16.msra.mxu2 %v10046_v49 }
 0x1a7   :  { %12845 = vst [vmem:[#allocation210_spill] sm:$0xff] %v10534_v2  ;;  %2554 = vmatmul.bf16.vlgmr.msrb.gmra.mxu3 %v12766_v17  ;;  %2733 = vmatpush.bf16.msra.mxu0 %v10053_v58 }
 0x1a8   :  { %12846 = vst [vmem:[#allocation211_spill] sm:$0xff] %v10538_v6  ;;  %2771 = vmatpush.bf16.msra.mxu3 %v10049_v54  ;;  %v1459_v33 = vpop.f32.mrf.mxu2  ;;  %2746 = vmatpush.bf16.msra.mxu1 %v10055_v59 }
 0x1a9   :  { %12847 = vst [vmem:[#allocation212_spill] sm:$0xff] %v10540_v47  ;;  %v10568_v36 = vadd.f32 %v1488_v20, %v1459_v33  ;;  %v10570_v51 = vpop.f32.mrf.mxu1  ;;  %v10581_v61 = vpop.f32.mrf.mxu3 }
 0x1aa   :  { %12848 = vst [vmem:[#allocation213_spill] sm:$0xff] %v10543_v0  ;;  %2759 = vmatpush.bf16.msra.mxu2 %v10058_v63 }
 0x1ab   :  { %12849 = vst [vmem:[#allocation214_spill] sm:$0xff] %v10546_v28  ;;  %2734 = vmatpush.bf16.msra.mxu0 %v10068_v12  ;;  %v1406_v5 = vpop.f32.mrf.mxu0 }
 0x1ac   :  { %12850 = vst [vmem:[#allocation215_spill] sm:$0xff] %v10550_v62  ;;  %2772 = vmatpush.bf16.msra.mxu3 %v10060_v1  ;;  %2747 = vmatpush.bf16.msra.mxu1 %v10072_v21 }
 0x1ad   :  { %12851 = vst [vmem:[#allocation216_spill] sm:$0xff] %v10565_v37  ;;  %v12872_v37 = vld [vmem:[#allocation95_spill] sm:$0xff] }
 0x1ae   :  { %12852 = vst [vmem:[#allocation217_spill] sm:$0xff] %v10570_v51  ;;  %2760 = vmatpush.bf16.msra.mxu2 %v10074_v23 }
 0x1af   :  { %2735 = vmatpush.bf16.msra.mxu0 %v10083_v34  ;;  %12854 = vst [vmem:[#allocation219_spill] sm:$0xff] %v10581_v61  ;;  %v12867_v61 = vld [vmem:[#allocation93_spill] sm:$0xff] }
 0x1b0   :  { %2773 = vmatpush.bf16.msra.mxu3 %v10077_v30  ;;  %v10579_v17 = vpop.f32.mrf.mxu2  ;;  %2748 = vmatpush.bf16.msra.mxu1 %v10087_v43 }
 0x1b1   :  { %12853 = vst [vmem:[#allocation218_spill] sm:$0xff] %v10579_v17  ;;  %v1435_v27 = vpop.f32.mrf.mxu1  ;;  %v1493_v20 = vpop.f32.mrf.mxu3 }
 0x1b2   :  { %2761 = vmatpush.bf16.msra.mxu2 %v10089_v44  ;;  %v10586_v24 = vadd.f32 %v1435_v27, %v1406_v5 }
 0x1b3   :  { %2736 = vmatpush.bf16.msra.mxu0 %v10097_v3  ;;  %v10593_v62 = vpop.f32.mrf.mxu0 }
 0x1b4   :  { %2774 = vmatpush.bf16.msra.mxu3 %v10092_v55  ;;  %12855 = vst [vmem:[#allocation220_spill] sm:$0xff] %v10586_v24  ;;  %2749 = vmatpush.bf16.msra.mxu1 %v10103_v11 }
 0x1b5   :  { %12856 = vst [vmem:[#allocation221_spill] sm:$0xff] %v10593_v62  ;;  %v12863_v62 = vld [vmem:[#allocation87_spill] sm:$0xff] }
 0x1b6   :  { %2762 = vmatpush.bf16.msra.mxu2 %v10105_v15 }
 0x1b7   :  { %2737 = vmatpush.bf16.msra.mxu0 %v10111_v50 }
 0x1b8   :  { %2775 = vmatpush.bf16.msra.mxu3 %v10108_v29  ;;  %v1464_v33 = vpop.f32.mrf.mxu2  ;;  %2750 = vmatpush.bf16.msra.mxu1 %v10115_v52 }
 0x1b9   :  { %v10596_v28 = vadd.f32 %v1493_v20, %v1464_v33  ;;  %v10598_v5 = vpop.f32.mrf.mxu1  ;;  %v10611_v33 = vpop.f32.mrf.mxu3 }
 0x1ba   :  { %2763 = vmatpush.bf16.msra.mxu2 %v10117_v56  ;;  %12858 = vst [vmem:[#allocation223_spill] sm:$0xff] %v10598_v5  ;;  %v12862_v5 = vld [vmem:[#allocation84_spill] sm:$0xff] }
 0x1bb   :  { %12857 = vst [vmem:[#allocation222_spill] sm:$0xff] %v10596_v28  ;;  %2738 = vmatpush.bf16.msra.mxu0 %v10125_v19  ;;  %v1411_v20 = vpop.f32.mrf.mxu0  ;;  %v12865_v28 = vld [vmem:[#allocation90_spill] sm:$0xff] }
 0x1bc   :  { %2776 = vmatpush.bf16.msra.mxu3 %v10120_v60  ;;  %2751 = vmatpush.bf16.msra.mxu1 %v10131_v35  ;;  %12860 = vst [vmem:[#allocation225_spill] sm:$0xff] %v10611_v33  ;;  %v12866_v33 = vld [vmem:[#allocation88_spill] sm:$0xff] }
 0x1be   :  { %2764 = vmatpush.bf16.msra.mxu2 %v10133_v39 }
 0x1bf   :  { %2739 = vmatpush.bf16.msra.mxu0 %v10143_v4 }
 0x1c0   :  { %2777 = vmatpush.bf16.msra.mxu3 %v10137_v57  ;;  %v10608_v27 = vpop.f32.mrf.mxu2  ;;  %2752 = vmatpush.bf16.msra.mxu1 %v10147_v31 }
 0x1c1   :  { %12859 = vst [vmem:[#allocation224_spill] sm:$0xff] %v10608_v27  ;;  %v1440_v8 = vpop.f32.mrf.mxu1  ;;  %v12864_v27 = vld [vmem:[#allocation86_spill] sm:$0xff]  ;;  %v1498_v17 = vpop.f32.mrf.mxu3 }
 0x1c2   :  { %2765 = vmatpush.bf16.msra.mxu2 %v10149_v32  ;;  %v10616_v53 = vadd.f32 %v1440_v8, %v1411_v20  ;;  %v12910_v32 = vld [vmem:[#allocation138_spill] sm:$0xff] }
 0x1c3   :  { %2784 = vmatpush.bf16.msrb.mxu0 %v10154_v10  ;;  %v10625_v51 = vpop.f32.mrf.mxu0 }
 0x1c4   :  { %2778 = vmatpush.bf16.msra.mxu3 %v10152_v38  ;;  %2797 = vmatpush.bf16.msrb.mxu1 %v10156_v45  ;;  %12861 = vst [vmem:[#allocation226_spill] sm:$0xff] %v10616_v53  ;;  %v12871_v53 = vld [vmem:[#allocation92_spill] sm:$0xff] }
 0x1c5   :  { %12868 = vst [vmem:[#allocation227_spill] sm:$0xff] %v10625_v51 }
 0x1c6   :  { %2810 = vmatpush.bf16.msrb.mxu2 %v10161_v25 }
 0x1c7   :  { %2785 = vmatpush.bf16.msrb.mxu0 %v10171_v7 }
 0x1c8   :  { %2823 = vmatpush.bf16.msrb.mxu3 %v12862_v5  ;;  %2798 = vmatpush.bf16.msrb.mxu1 %v12864_v27  ;;  %v1469_v24 = vpop.f32.mrf.mxu2  ;;  %v12873_v5 = vld [vmem:[#allocation94_spill] sm:$0xff]  ;;  %v12874_v27 = vld [vmem:[#allocation97_spill] sm:$0xff] }
 0x1c9   :  { %v10627_v8 = vadd.f32 %v1498_v17, %v1469_v24  ;;  %v10629_v20 = vpop.f32.mrf.mxu1  ;;  %v12879_v17 = vld [vmem:[#allocation103_spill] sm:$0xff]  ;;  %v10641_v24 = vpop.f32.mrf.mxu3 }
 0x1ca   :  { %2811 = vmatpush.bf16.msrb.mxu2 %v12863_v62  ;;  %12870 = vst [vmem:[#allocation229_spill] sm:$0xff] %v10629_v20 }
 0x1cb   :  { %2786 = vmatpush.bf16.msrb.mxu0 %v12865_v28  ;;  %12869 = vst [vmem:[#allocation228_spill] sm:$0xff] %v10627_v8  ;;  %v12875_v28 = vld [vmem:[#allocation96_spill] sm:$0xff]  ;;  %v1416_v20 = vpop.f32.mrf.mxu0  ;;  %v12881_v8 = vld [vmem:[#allocation102_spill] sm:$0xff] }
 0x1cc   :  { %2824 = vmatpush.bf16.msrb.mxu3 %v12866_v33  ;;  %2799 = vmatpush.bf16.msrb.mxu1 %v12871_v53  ;;  %v12876_v33 = vld [vmem:[#allocation100_spill] sm:$0xff]  ;;  %12880 = vst [vmem:[#allocation231_spill] sm:$0xff] %v10641_v24  ;;  %v12887_v24 = vld [vmem:[#allocation113_spill] sm:$0xff] }
 0x1ce   :  { %2812 = vmatpush.bf16.msrb.mxu2 %v12867_v61  ;;  %v12877_v61 = vld [vmem:[#allocation98_spill] sm:$0xff] }
 0x1cf   :  { %2787 = vmatpush.bf16.msrb.mxu0 %v12872_v37 }
 0x1d0   :  { %2825 = vmatpush.bf16.msrb.mxu3 %v12873_v5  ;;  %2800 = vmatpush.bf16.msrb.mxu1 %v12875_v28  ;;  %v10638_v45 = vpop.f32.mrf.mxu2  ;;  %v12883_v5 = vld [vmem:[#allocation104_spill] sm:$0xff]  ;;  %v12884_v28 = vld [vmem:[#allocation106_spill] sm:$0xff] }
 0x1d1   :  { %12878 = vst [vmem:[#allocation230_spill] sm:$0xff] %v10638_v45  ;;  %v1445_v51 = vpop.f32.mrf.mxu1  ;;  %v12886_v45 = vld [vmem:[#allocation108_spill] sm:$0xff] }
 0x1d2   :  { %2813 = vmatpush.bf16.msrb.mxu2 %v12874_v27  ;;  %v10644_v53 = vadd.f32 %v1445_v51, %v1416_v20 }
 0x1d3   :  { %2788 = vmatpush.bf16.msrb.mxu0 %v12876_v33  ;;  %v1503_v33 = vpop.f32.mrf.mxu3  ;;  %v10653_v27 = vpop.f32.mrf.mxu0 }
 0x1d4   :  { %2826 = vmatpush.bf16.msrb.mxu3 %v12877_v61  ;;  %2801 = vmatpush.bf16.msrb.mxu1 %v12881_v8  ;;  %12882 = vst [vmem:[#allocation232_spill] sm:$0xff] %v10644_v53  ;;  %v12885_v61 = vld [vmem:[#allocation110_spill] sm:$0xff]  ;;  %v12891_v53 = vld [vmem:[#allocation112_spill] sm:$0xff] }
 0x1d5   :  { %12888 = vst [vmem:[#allocation233_spill] sm:$0xff] %v10653_v27  ;;  %v12893_v8 = vld [vmem:[#allocation114_spill] sm:$0xff] }
 0x1d6   :  { %2814 = vmatpush.bf16.msrb.mxu2 %v12879_v17 }
 0x1d7   :  { %2789 = vmatpush.bf16.msrb.mxu0 %v10231_v46 }
 0x1d8   :  { %2827 = vmatpush.bf16.msrb.mxu3 %v12883_v5  ;;  %2802 = vmatpush.bf16.msrb.mxu1 %v12884_v28  ;;  %v1474_v17 = vpop.f32.mrf.mxu2  ;;  %v12892_v5 = vld [vmem:[#allocation115_spill] sm:$0xff]  ;;  %v12894_v28 = vld [vmem:[#allocation117_spill] sm:$0xff] }
 0x1d9   :  { %v10655_v51 = vadd.f32 %v1503_v33, %v1474_v17  ;;  %v10657_v20 = vpop.f32.mrf.mxu1 }
 0x1da   :  { %2815 = vmatpush.bf16.msrb.mxu2 %v10237_v26  ;;  %12890 = vst [vmem:[#allocation235_spill] sm:$0xff] %v10657_v20  ;;  %v10667_v26 = vld [vmem:[#allocation11] sm:$0xff] }
 0x1db   :  { %2790 = vmatpush.bf16.msrb.mxu0 %v12885_v61  ;;  %12889 = vst [vmem:[#allocation234_spill] sm:$0xff] %v10655_v51  ;;  %v12895_v61 = vld [vmem:[#allocation116_spill] sm:$0xff]  ;;  %v10669_v33 = vpop.f32.mrf.mxu3  ;;  %v2360_v17 = vpop.f32.mrf.mxu0  ;;  %v10672_v51 = vperm.slane %v10667_v26, 0 }
 0x1dc   :  { %2828 = vmatpush.bf16.msrb.mxu3 %v12886_v45  ;;  %2803 = vmatpush.bf16.msrb.mxu1 %v12891_v53  ;;  %v12896_v45 = vld [vmem:[#allocation118_spill] sm:$0xff]  ;;  %12898 = vst [vmem:[#allocation237_spill] sm:$0xff] %v10669_v33  ;;  %v12902_v33 = vld [vmem:[#allocation31_spill] sm:$0xff] }
 0x1dd   :  { %12899 = vst [vmem:[#allocation238_spill] sm:$0xff] %v10672_v51  ;;  %v12900_v53 = vld [vmem:[#allocation30_spill] sm:$0xff] }
 0x1de   :  { %2816 = vmatpush.bf16.msrb.mxu2 %v12887_v24 }
 0x1df   :  { %2791 = vmatpush.bf16.msrb.mxu0 %v12892_v5 }
 0x1e0   :  { %2829 = vmatpush.bf16.msrb.mxu3 %v12893_v8  ;;  %2804 = vmatpush.bf16.msrb.mxu1 %v12895_v61  ;;  %v10665_v24 = vpop.f32.mrf.mxu2 }
 0x1e1   :  { %12897 = vst [vmem:[#allocation236_spill] sm:$0xff] %v10665_v24  ;;  %v2373_v20 = vpop.f32.mrf.mxu1  ;;  %v10677_v24 = vperm.slane %v10667_v26, 1 }
 0x1e2   :  { %2817 = vmatpush.bf16.msrb.mxu2 %v12894_v28  ;;  %v2374_v27 = vadd.f32 %v2373_v20, %v2360_v17 }
 0x1e3   :  { %v2399_v46 = vpop.f32.mrf.mxu3  ;;  %12901 = vst [vmem:[#allocation30_spill] sm:$0xff] %v10677_v24 }
 0x1e4   :  { %2830 = vmatpush.bf16.msrb.mxu3 %v12896_v45  ;;  %v2559_v8 = vadd.f32 %v2374_v27, %v12900_v53  ;;  %v2362_v45 = vpop.f32.mrf.mxu0 }
 0x1e6   :  { %v2585_v28 = vadd.f32 %v10672_v51, %v2559_v8 }
 0x1e8   :  { %v2386_v5 = vpop.f32.mrf.mxu2  ;;  %v7943_v61 = vmul.f32 -1.442695, %v2585_v28 }
 0x1e9   :  { %v2400_v37 = vadd.f32 %v2399_v46, %v2386_v5  ;;  %v2375_v38 = vpop.f32.mrf.mxu1  ;;  %v10684_v46 = vperm.slane %v10667_v26, 2 }
 0x1ea   :  { %9245 = vpow2.f32 %v7943_v61  ;;  %v12904_v38 = vld [vmem:[#allocation71_spill] sm:$0xff] }
 0x1eb   :  { %v2560_v31 = vadd.f32 %v2400_v37, %v12902_v33  ;;  %v2401_v53 = vpop.f32.mrf.mxu3  ;;  %12903 = vst [vmem:[#allocation31_spill] sm:$0xff] %v10684_v46 }
 0x1ec   :  { %v2412_v27 = vpop.f32.mrf.mxu0 }
 0x1ed   :  { %v2586_v20 = vadd.f32 %v10677_v24, %v2560_v31  ;;  %v12906_v24 = vld [vmem:[#allocation81_spill] sm:$0xff] }
 0x1ef   :  { %v7944_v17 = vmul.f32 -1.442695, %v2586_v20 }
 0x1f0   :  { %v2388_v62 = vpop.f32.mrf.mxu2  ;;  %v9246_v7 = vpop.eup %9245 }
 0x1f1   :  { %v10681_v8 = vadd.f32 1.0, %v9246_v7  ;;  %9247 = vpow2.f32 %v7944_v17  ;;  %v2425_v28 = vpop.f32.mrf.mxu1  ;;  %v10692_v17 = vperm.slane %v10667_v26, 3 }
 0x1f2   :  { %v2426_v45 = vadd.f32 %v2425_v28, %v2412_v27 }
 0x1f3   :  { %9249 = vrcp.f32 %v10681_v8  ;;  %v2451_v20 = vpop.f32.mrf.mxu3  ;;  %12905 = vst [vmem:[#allocation71_spill] sm:$0xff] %v10692_v17  ;;  %vm2606_vm1 = vweird.f32 %v10681_v8 }
 0x1f4   :  { %v2561_v61 = vadd.f32 %v2426_v45, %v12904_v38  ;;  %v2414_v7 = vpop.f32.mrf.mxu0 }
 0x1f6   :  { %v2587_v37 = vadd.f32 %v10684_v46, %v2561_v61 }
 0x1f7   :  { %v9248_v31 = vpop.eup %9247 }
 0x1f8   :  { %v2438_v5 = vpop.f32.mrf.mxu2  ;;  %v10689_v62 = vadd.f32 1.0, %v9248_v31  ;;  %v7945_v33 = vmul.f32 -1.442695, %v2587_v37 }
 0x1f9   :  { %v2452_v53 = vadd.f32 %v2451_v20, %v2438_v5  ;;  %v2427_v27 = vpop.f32.mrf.mxu1  ;;  %v9250_v28 = vpop.eup %9249 }
 0x1fa   :  { %9251 = vrcp.f32 %v10689_v62  ;;  %v2602_v38 = vmul.f32 %v9250_v28, %v10681_v8  ;;  %vm2607_vm0 = vweird.f32 %v9250_v28  ;;  %vm2621_vm8 = vweird.f32 %v10689_v62 }
 0x1fb   :  { %9253 = vpow2.f32 %v7945_v33  ;;  %v2562_v45 = vadd.f32 %v2452_v53, %v12906_v24  ;;  %v2453_v7 = vpop.f32.mrf.mxu3  ;;  %v10703_v53 = vperm.slane %v10667_v26, 4  ;;  %vm2608_vm2 = vmor %vm2606_vm1, %vm2607_vm0 }
 0x1fc   :  { %v2603_v20 = vsub.f32 1.0, %v2602_v38  ;;  %v2464_v27 = vpop.f32.mrf.mxu0 }
 0x1fd   :  { %v2588_v61 = vadd.f32 %v10692_v17, %v2562_v45  ;;  %12907 = vst [vmem:[#allocation81_spill] sm:$0xff] %v10703_v53 }
 0x1fe   :  { %v2604_v45 = vmul.f32 %v9250_v28, %v2603_v20  ;;  %v10713_v20 = vperm.slane %v10667_v26, 5 }
 0x1ff   :  { %v7946_v31 = vmul.f32 -1.442695, %v2588_v61  ;;  %v12908_v61 = vld [vmem:[#allocation129_spill] sm:$0xff] }
 0x200   :  { %v2440_v46 = vpop.f32.mrf.mxu2  ;;  %v10698_v37 = vpop.eup %9251  ;;  %12909 = vst [vmem:[#allocation129_spill] sm:$0xff] %v10713_v20 }
 0x201   :  { %v9254_v5 = vpop.eup %9253  ;;  %9255 = vpow2.f32 %v7946_v31  ;;  %v2477_v57 = vpop.f32.mrf.mxu1  ;;  %v2617_v33 = vmul.f32 %v10698_v37, %v10689_v62  ;;  %v2605_v31 = vadd.f32 %v9250_v28, %v2604_v45  ;;  %vm2622_vm5 = vweird.f32 %v10698_v37 }
 0x202   :  { %v2637_v51 = vadd.f32 1.0, %v9254_v5  ;;  %v2478_v24 = vadd.f32 %v2477_v57, %v2464_v27  ;;  %v2610_v57 = vand.u32 2147483647, %v10681_v8  ;;  %v2612_v27 = vand.u32 2147483648, %v10681_v8  ;;  %vm2623_vm10 = vmor %vm2621_vm8, %vm2622_vm5 }
 0x203   :  { %v2618_v35 = vsub.f32 1.0, %v2617_v33  ;;  %v2503_v10 = vpop.f32.mrf.mxu3 }
 0x204   :  { %9257 = vrcp.f32 %v2637_v51  ;;  %v2563_v46 = vadd.f32 %v2478_v24, %v12908_v61  ;;  %v2466_v24 = vpop.f32.mrf.mxu0  ;;  %v2650_v60 = vand.u32 2147483648, %v2637_v51  ;;  %vm2611_vm3 = vcmp.eq.f32.partialorder %v2610_v57, 8.507059e+37 }
 0x205   :  { %v2619_v61 = vmul.f32 %v10698_v37, %v2618_v35  ;;  %v2613_v52 = vor.u32 1.1754944e-38, %v2612_v27  ;;  %v2648_v19 = vand.u32 2147483647, %v2637_v51  ;;  %v2627_v35 = vand.u32 2147483648, %v10689_v62 }
 0x206   :  { %v2589_v38 = vadd.f32 %v10703_v53, %v2563_v46  ;;  %v2609_v53 = vsel %vm2608_vm2, %v9250_v28, %v2605_v31  ;;  %vm2644_vm6 = vweird.f32 %v2637_v51 }
 0x207   :  { %v9256_v17 = vpop.eup %9255  ;;  %v2614_v8 = vsel %vm2611_vm3, %v2613_v52, %v2609_v53  ;;  %v2625_v52 = vand.u32 2147483647, %v10689_v62  ;;  %vm2649_vm9 = vcmp.eq.f32.partialorder %v2648_v19, 8.507059e+37 }
 0x208   :  { %v10706_v7 = vadd.f32 1.0, %v9256_v17  ;;  %v2490_v5 = vpop.f32.mrf.mxu2 }
 0x209   :  { %v2504_v17 = vadd.f32 %v2503_v10, %v2490_v5  ;;  %v2479_v45 = vpop.f32.mrf.mxu1  ;;  %v2620_v10 = vadd.f32 %v10698_v37, %v2619_v61  ;;  %v2651_v5 = vor.u32 1.1754944e-38, %v2650_v60  ;;  %v2628_v60 = vor.u32 1.1754944e-38, %v2627_v35 }
 0x20a   :  { %v9258_v25 = vpop.eup %9257  ;;  %9259 = vrcp.f32 %v10706_v7  ;;  %v2663_v61 = vand.u32 2147483647, %v10706_v7  ;;  %vm2626_vm12 = vcmp.eq.f32.partialorder %v2625_v52, 8.507059e+37  ;;  %vm2659_vm13 = vweird.f32 %v10706_v7 }
 0x20b   :  { %v2640_v33 = vmul.f32 %v9258_v25, %v2637_v51  ;;  %9261 = vtanh.f32 %v2589_v38  ;;  %v2564_v4 = vadd.f32 %v2504_v17, %v12910_v32  ;;  %vm2645_vm4 = vweird.f32 %v9258_v25 }
 0x20c   :  { %vm2646_vm7 = vmor %vm2644_vm6, %vm2645_vm4  ;;  %v2665_v51 = vand.u32 2147483648, %v10706_v7  ;;  %vm2664_vm15 = vcmp.eq.f32.partialorder %v2663_v61, 8.507059e+37 }
 0x20d   :  { %v2641_v46 = vsub.f32 1.0, %v2640_v33  ;;  %v2590_v24 = vadd.f32 %v10713_v20, %v2564_v4  ;;  %v2505_v4 = vpop.f32.mrf.mxu3  ;;  %v2624_v33 = vsel %vm2623_vm10, %v10698_v37, %v2620_v10 }
 0x20e   :  { %v2629_v19 = vsel %vm2626_vm12, %v2628_v60, %v2624_v33 }
 0x20f   :  { %v2642_v39 = vmul.f32 %v9258_v25, %v2641_v46  ;;  %9263 = vtanh.f32 %v2590_v24  ;;  %v2666_v24 = vor.u32 1.1754944e-38, %v2665_v51  ;;  %v10742_v51 = vperm.slane %v10667_v26, 7 }
 0x210   :  { %v9260_v29 = vpop.eup %9259  ;;  %v2492_v31 = vpop.f32.mrf.mxu2 }
 0x211   :  { %v9262_v38 = vpop.eup %9261  ;;  %v2655_v32 = vmul.f32 %v9260_v29, %v10706_v7  ;;  %v2643_v28 = vadd.f32 %v9258_v25, %v2642_v39  ;;  %vm2660_vm11 = vweird.f32 %v9260_v29 }
 0x212   :  { %v2711_v57 = vmul.f32 %v9262_v38, %v2614_v8  ;;  %vm2661_vm14 = vmor %vm2659_vm13, %vm2660_vm11 }
 0x213   :  { %v2656_v53 = vsub.f32 1.0, %v2655_v32  ;;  %v2647_v27 = vsel %vm2646_vm7, %v9258_v25, %v2643_v28 }
 0x214   :  { %v2652_v39 = vsel %vm2649_vm9, %v2651_v5, %v2647_v27  ;;  %v10737_v5 = vperm.slane %v10667_v26, 6 }
 0x215   :  { %v2657_v17 = vmul.f32 %v9260_v29, %v2656_v53  ;;  %v2709_v45 = vmul.f32 0.0, %v2652_v39  ;;  %v9264_v62 = vpop.eup %9263 }
 0x216   :  { %v2712_v8 = vmul.f32 %v9264_v62, %v2629_v19 }
 0x217   :  { %v10732_v25 = vadd.f32 %v2711_v57, %v2709_v45  ;;  %v2658_v46 = vadd.f32 %v9260_v29, %v2657_v17 }
 0x219   :  { %v2662_v38 = vsel %vm2661_vm14, %v9260_v29, %v2658_v46 }
 0x21a   :  { %v2667_v37 = vsel %vm2664_vm15, %v2666_v24, %v2662_v38 }
 0x21b   :  { %v2710_v10 = vmul.f32 0.0, %v2667_v37 }
 0x21d   :  { %v10734_v35 = vadd.f32 %v2712_v8, %v2710_v10 }
 0x21f   :  { %v2516_v32 = vpop.f32.mrf.mxu0 }
 0x220   :  { %v2529_v28 = vpop.f32.mrf.mxu1 }
 0x221   :  { %v2530_v31 = vadd.f32 %v2529_v28, %v2516_v32 }
 0x223   :  { %v2565_v7 = vadd.f32 %v2530_v31, %v10555_v9 }
 0x225   :  { %v2591_v57 = vadd.f32 %v10737_v5, %v2565_v7 }
 0x227   :  { %v7947_v4 = vmul.f32 -1.442695, %v2591_v57  ;;  %v2518_v27 = vpop.f32.mrf.mxu0 }
 0x228   :  { %v2542_v52 = vpop.f32.mrf.mxu2  ;;  %v2531_v39 = vpop.f32.mrf.mxu1 }
 0x229   :  { %9265 = vpow2.f32 %v7947_v4 }
 0x22a   :  { %v2555_v53 = vpop.f32.mrf.mxu3 }
 0x22b   :  { %v2556_v29 = vadd.f32 %v2555_v53, %v2542_v52 }
 0x22d   :  { %v2566_v33 = vadd.f32 %v2556_v29, %v10568_v36 }
 0x22f   :  { %v2592_v60 = vadd.f32 %v10742_v51, %v2566_v33  ;;  %v9266_v61 = vpop.eup %9265 }
 0x230   :  { %v2544_v45 = vpop.f32.mrf.mxu2  ;;  %v2677_v62 = vadd.f32 1.0, %v9266_v61  ;;  %v12911_v61 = vld [vmem:[#allocation128_spill] sm:$0xff] }
 0x231   :  { %v7948_v17 = vmul.f32 -1.442695, %v2592_v60 }
 0x232   :  { %v2557_v9 = vpop.f32.mrf.mxu3  ;;  %v2690_v38 = vand.u32 2147483648, %v2677_v62  ;;  %v2688_v36 = vand.u32 2147483647, %v2677_v62  ;;  %vm2684_vm1 = vweird.f32 %v2677_v62 }
 0x233   :  { %9267 = vpow2.f32 %v7948_v17  ;;  %v12912_v9 = vld [vmem:[#allocation131_spill] sm:$0xff] }
 0x234   :  { %9269 = vrcp.f32 %v2677_v62  ;;  %v2691_v28 = vor.u32 1.1754944e-38, %v2690_v38  ;;  %vm2689_vm3 = vcmp.eq.f32.partialorder %v2688_v36, 8.507059e+37  ;;  %v12915_v38 = vld [vmem:[#allocation130_spill] sm:$0xff]  ;;  %v12917_v36 = vld [vmem:[#allocation140_spill] sm:$0xff] }
 0x239   :  { %v9268_v19 = vpop.eup %9267 }
 0x23a   :  { %v2678_v46 = vadd.f32 1.0, %v9268_v19  ;;  %v9270_v24 = vpop.eup %9269 }
 0x23b   :  { %v2680_v8 = vmul.f32 %v9270_v24, %v2677_v62  ;;  %vm2685_vm0 = vweird.f32 %v9270_v24 }
 0x23c   :  { %9271 = vrcp.f32 %v2678_v46  ;;  %vm2686_vm2 = vmor %vm2684_vm1, %vm2685_vm0  ;;  %v2705_v27 = vand.u32 2147483648, %v2678_v46  ;;  %v2703_v39 = vand.u32 2147483647, %v2678_v46  ;;  %vm2699_vm5 = vweird.f32 %v2678_v46 }
 0x23d   :  { %v2681_v26 = vsub.f32 1.0, %v2680_v8  ;;  %9273 = vtanh.f32 %v10732_v25 }
 0x23e   :  { %9275 = vtanh.f32 %v10734_v35  ;;  %v2706_v17 = vor.u32 1.1754944e-38, %v2705_v27  ;;  %vm2704_vm7 = vcmp.eq.f32.partialorder %v2703_v39, 8.507059e+37  ;;  %v12927_v27 = vld [vmem:[#allocation145_spill] sm:$0xff]  ;;  %v12929_v39 = vld [vmem:[#allocation155_spill] sm:$0xff] }
 0x23f   :  { %v2682_v37 = vmul.f32 %v9270_v24, %v2681_v26  ;;  %v12913_v26 = vld [vmem:[#allocation133_spill] sm:$0xff] }
 0x241   :  { %v2683_v32 = vadd.f32 %v9270_v24, %v2682_v37  ;;  %v12916_v37 = vld [vmem:[#allocation132_spill] sm:$0xff] }
 0x242   :  { %v9272_v10 = vpop.eup %9271 }
 0x243   :  { %v2695_v31 = vmul.f32 %v9272_v10, %v2678_v46  ;;  %v2687_v7 = vsel %vm2686_vm2, %v9270_v24, %v2683_v32  ;;  %v9274_v57 = vpop.eup %9273  ;;  %vm2700_vm4 = vweird.f32 %v9272_v10  ;;  %v12914_v46 = vld [vmem:[#allocation135_spill] sm:$0xff]  ;;  %v12919_v32 = vld [vmem:[#allocation134_spill] sm:$0xff] }
 0x244   :  { %v2692_v52 = vsel %vm2689_vm3, %v2691_v28, %v2687_v7  ;;  %vm2701_vm6 = vmor %vm2699_vm5, %vm2700_vm4  ;;  %v9276_v62 = vpop.eup %9275  ;;  %v12920_v28 = vld [vmem:[#allocation136_spill] sm:$0xff]  ;;  %v12922_v7 = vld [vmem:[#allocation146_spill] sm:$0xff] }
 0x245   :  { %v2696_v4 = vsub.f32 1.0, %v2695_v31  ;;  %v2717_v53 = vmul.f32 %v9274_v57, %v2692_v52  ;;  %v12921_v31 = vld [vmem:[#allocation144_spill] sm:$0xff]  ;;  %v12923_v57 = vld [vmem:[#allocation141_spill] sm:$0xff]  ;;  %v12924_v52 = vld [vmem:[#allocation143_spill] sm:$0xff] }
 0x247   :  { %v2697_v29 = vmul.f32 %v9272_v10, %v2696_v4  ;;  %v10748_v33 = vpack.c.bf16 %v2717_v53, %v2717_v53  ;;  %v12925_v4 = vld [vmem:[#allocation150_spill] sm:$0xff]  ;;  %v12926_v53 = vld [vmem:[#allocation153_spill] sm:$0xff] }
 0x249   :  { %v2698_v60 = vadd.f32 %v9272_v10, %v2697_v29  ;;  %2740 = vmatmul.bf16.vlgmr.msra.gmra.mxu0 %v10748_v33  ;;  %2766 = vmatmul.bf16.vlgmr.msra.gmra.mxu2 %v10748_v33  ;;  %v12928_v29 = vld [vmem:[#allocation148_spill] sm:$0xff] }
 0x24a   :  { %2836 = vmatpush.bf16.msra.mxu0 %v12911_v61  ;;  %2862 = vmatpush.bf16.msra.mxu2 %v12912_v9 }
 0x24b   :  { %v2702_v45 = vsel %vm2701_vm6, %v9272_v10, %v2698_v60  ;;  %v12918_v10 = vld [vmem:[#allocation142_spill] sm:$0xff]  ;;  %v12930_v60 = vld [vmem:[#allocation157_spill] sm:$0xff] }
 0x24c   :  { %v2707_v19 = vsel %vm2704_vm7, %v2706_v17, %v2702_v45  ;;  %v12931_v17 = vld [vmem:[#allocation152_spill] sm:$0xff]  ;;  %v12932_v45 = vld [vmem:[#allocation154_spill] sm:$0xff] }
 0x24d   :  { %v2718_v24 = vmul.f32 %v9276_v62, %v2707_v19  ;;  %v12933_v62 = vld [vmem:[#allocation162_spill] sm:$0xff]  ;;  %v12934_v19 = vld [vmem:[#allocation164_spill] sm:$0xff] }
 0x24e   :  { %2837 = vmatpush.bf16.msra.mxu0 %v12913_v26  ;;  %2863 = vmatpush.bf16.msra.mxu2 %v12914_v46 }
 0x24f   :  { %v10754_v8 = vpack.c.bf16 %v2718_v24, %v2718_v24  ;;  %v12935_v24 = vld [vmem:[#allocation156_spill] sm:$0xff] }
 0x251   :  { %2753 = vmatmul.bf16.vlgmr.msra.gmra.mxu1 %v10754_v8  ;;  %2779 = vmatmul.bf16.vlgmr.msra.gmra.mxu3 %v10754_v8 }
 0x252   :  { %2849 = vmatpush.bf16.msra.mxu1 %v12915_v38  ;;  %2875 = vmatpush.bf16.msra.mxu3 %v12916_v37 }
 0x253   :  { %2838 = vmatpush.bf16.msra.mxu0 %v12917_v36  ;;  %2864 = vmatpush.bf16.msra.mxu2 %v12918_v10 }
 0x256   :  { %2850 = vmatpush.bf16.msra.mxu1 %v12919_v32  ;;  %2876 = vmatpush.bf16.msra.mxu3 %v12920_v28 }
 0x257   :  { %2839 = vmatpush.bf16.msra.mxu0 %v12921_v31  ;;  %2865 = vmatpush.bf16.msra.mxu2 %v12922_v7 }
 0x259   :  { %2792 = vmatmul.bf16.vlgmr.msrb.gmra.mxu0 %v10748_v33  ;;  %2818 = vmatmul.bf16.vlgmr.msrb.gmra.mxu2 %v10748_v33 }
 0x25a   :  { %2851 = vmatpush.bf16.msra.mxu1 %v12923_v57  ;;  %2877 = vmatpush.bf16.msra.mxu3 %v12924_v52 }
 0x25b   :  { %2840 = vmatpush.bf16.msra.mxu0 %v12925_v4  ;;  %2866 = vmatpush.bf16.msra.mxu2 %v12926_v53 }
 0x25e   :  { %2852 = vmatpush.bf16.msra.mxu1 %v12927_v27  ;;  %2878 = vmatpush.bf16.msra.mxu3 %v12928_v29  ;;  %v12936_v27 = vld [vmem:[#allocation158_spill] sm:$0xff]  ;;  %v12939_v29 = vld [vmem:[#allocation163_spill] sm:$0xff] }
 0x25f   :  { %2841 = vmatpush.bf16.msra.mxu0 %v12929_v39  ;;  %2867 = vmatpush.bf16.msra.mxu2 %v12930_v60  ;;  %v12937_v60 = vld [vmem:[#allocation171_spill] sm:$0xff]  ;;  %v12938_v39 = vld [vmem:[#allocation174_spill] sm:$0xff] }
 0x261   :  { %2805 = vmatmul.bf16.vlgmr.msrb.gmra.mxu1 %v10754_v8  ;;  %2831 = vmatmul.bf16.vlgmr.msrb.gmra.mxu3 %v10754_v8 }
 0x262   :  { %2853 = vmatpush.bf16.msra.mxu1 %v12931_v17  ;;  %2879 = vmatpush.bf16.msra.mxu3 %v12932_v45  ;;  %v12940_v17 = vld [vmem:[#allocation165_spill] sm:$0xff]  ;;  %v12959_v45 = vld [vmem:[#allocation199_spill] sm:$0xff] }
 0x263   :  { %2842 = vmatpush.bf16.msra.mxu0 %v12933_v62  ;;  %2868 = vmatpush.bf16.msra.mxu2 %v12934_v19  ;;  %v12941_v19 = vld [vmem:[#allocation177_spill] sm:$0xff]  ;;  %v12958_v62 = vld [vmem:[#allocation191_spill] sm:$0xff] }
 0x266   :  { %2854 = vmatpush.bf16.msra.mxu1 %v12935_v24  ;;  %2880 = vmatpush.bf16.msra.mxu3 %v12936_v27  ;;  %v12942_v24 = vld [vmem:[#allocation179_spill] sm:$0xff] }
 0x267   :  { %2843 = vmatpush.bf16.msra.mxu0 %v10410_v14  ;;  %2869 = vmatpush.bf16.msra.mxu2 %v10416_v16  ;;  %v12943_v27 = vld [vmem:[#allocation167_spill] sm:$0xff]  ;;  %v12944_v14 = vld [vmem:[#allocation170_spill] sm:$0xff]  ;;  %v12945_v16 = vld [vmem:[#allocation173_spill] sm:$0xff] }
 0x26a   :  { %2855 = vmatpush.bf16.msra.mxu1 %v12939_v29  ;;  %2881 = vmatpush.bf16.msra.mxu3 %v12940_v17  ;;  %v12948_v29 = vld [vmem:[#allocation184_spill] sm:$0xff]  ;;  %v12949_v17 = vld [vmem:[#allocation178_spill] sm:$0xff] }
 0x26b   :  { %2888 = vmatpush.bf16.msrb.mxu0 %v12937_v60  ;;  %2914 = vmatpush.bf16.msrb.mxu2 %v12938_v39  ;;  %v12946_v60 = vld [vmem:[#allocation175_spill] sm:$0xff]  ;;  %v12947_v39 = vld [vmem:[#allocation181_spill] sm:$0xff] }
 0x26c   :  { %2844 = vmatmul.bf16.vlgmr.msra.gmra.mxu0 %v10748_v33  ;;  %2870 = vmatmul.bf16.vlgmr.msra.gmra.mxu2 %v10748_v33 }
 0x26e   :  { %2856 = vmatpush.bf16.msra.mxu1 %v12943_v27  ;;  %2882 = vmatpush.bf16.msra.mxu3 %v12944_v14  ;;  %v12952_v27 = vld [vmem:[#allocation190_spill] sm:$0xff]  ;;  %v12953_v14 = vld [vmem:[#allocation183_spill] sm:$0xff] }
 0x26f   :  { %2889 = vmatpush.bf16.msrb.mxu0 %v12941_v19  ;;  %2915 = vmatpush.bf16.msrb.mxu2 %v12942_v24  ;;  %v12950_v19 = vld [vmem:[#allocation180_spill] sm:$0xff] }
 0x270   :  { %v12951_v24 = vld [vmem:[#allocation188_spill] sm:$0xff] }
 0x271   :  { %2857 = vmatmul.bf16.vlgmr.msra.gmra.mxu1 %v10754_v8  ;;  %2883 = vmatmul.bf16.vlgmr.msra.gmra.mxu3 %v10754_v8 }
 0x272   :  { %2901 = vmatpush.bf16.msrb.mxu1 %v12945_v16  ;;  %2927 = vmatpush.bf16.msrb.mxu3 %v12946_v60  ;;  %v12954_v16 = vld [vmem:[#allocation187_spill] sm:$0xff]  ;;  %v12955_v60 = vld [vmem:[#allocation193_spill] sm:$0xff] }
 0x273   :  { %2890 = vmatpush.bf16.msrb.mxu0 %v12947_v39  ;;  %2916 = vmatpush.bf16.msrb.mxu2 %v12948_v29  ;;  %v12956_v39 = vld [vmem:[#allocation196_spill] sm:$0xff]  ;;  %v12957_v29 = vld [vmem:[#allocation189_spill] sm:$0xff] }
 0x276   :  { %2902 = vmatpush.bf16.msrb.mxu1 %v12949_v17  ;;  %2928 = vmatpush.bf16.msrb.mxu3 %v12950_v19  ;;  %v12960_v17 = vld [vmem:[#allocation201_spill] sm:$0xff]  ;;  %v12961_v19 = vld [vmem:[#allocation195_spill] sm:$0xff] }
 0x277   :  { %2891 = vmatpush.bf16.msrb.mxu0 %v12951_v24  ;;  %2917 = vmatpush.bf16.msrb.mxu2 %v12952_v27  ;;  %v12962_v24 = vld [vmem:[#allocation197_spill] sm:$0xff] }
 0x27a   :  { %2903 = vmatpush.bf16.msrb.mxu1 %v12953_v14  ;;  %2929 = vmatpush.bf16.msrb.mxu3 %v12954_v16  ;;  %v12963_v16 = vld [vmem:[#allocation200_spill] sm:$0xff] }
 0x27b   :  { %2892 = vmatpush.bf16.msrb.mxu0 %v12955_v60  ;;  %2918 = vmatpush.bf16.msrb.mxu2 %v12956_v39 }
 0x27e   :  { %2904 = vmatpush.bf16.msrb.mxu1 %v12957_v29  ;;  %2930 = vmatpush.bf16.msrb.mxu3 %v12958_v62 }
 0x27f   :  { %2893 = vmatpush.bf16.msrb.mxu0 %v12959_v45  ;;  %2919 = vmatpush.bf16.msrb.mxu2 %v12960_v17 }
 0x282   :  { %2905 = vmatpush.bf16.msrb.mxu1 %v12961_v19  ;;  %2931 = vmatpush.bf16.msrb.mxu3 %v12962_v24 }
 0x283   :  { %2894 = vmatpush.bf16.msrb.mxu0 %v10516_v42  ;;  %2920 = vmatpush.bf16.msrb.mxu2 %v10524_v40 }
 0x286   :  { %2906 = vmatpush.bf16.msrb.mxu1 %v12963_v16  ;;  %2932 = vmatpush.bf16.msrb.mxu3 %v10513_v18 }
 0x287   :  { %2895 = vmatpush.bf16.msrb.mxu0 %v10534_v2  ;;  %2921 = vmatpush.bf16.msrb.mxu2 %v10540_v47 }
 0x28a   :  { %2907 = vmatpush.bf16.msrb.mxu1 %v10522_v22  ;;  %2933 = vmatpush.bf16.msrb.mxu3 %v10531_v13  ;;  %v13018_v22 = vld [vmem:[#allocation147_spill] sm:$0xff] }
 0x28b   :  { %3095 = vmatpush.bf16.msra.mxu0 %v10040_v41  ;;  %3121 = vmatpush.bf16.msra.mxu2 %v10046_v49  ;;  %v13019_v49 = vld [vmem:[#allocation149_spill] sm:$0xff] }
 0x28c   :  { %2896 = vmatmul.bf16.vlgmr.msrb.gmra.mxu0 %v10748_v33  ;;  %2922 = vmatmul.bf16.vlgmr.msrb.gmra.mxu2 %v10748_v33  ;;  %v12964_v33 = vld [vmem:[#allocation64_spill] sm:$0xff] }
 0x28e   :  { %2908 = vmatpush.bf16.msrb.mxu1 %v10538_v6  ;;  %2934 = vmatpush.bf16.msrb.mxu3 %v10543_v0 }
 0x28f   :  { %3096 = vmatpush.bf16.msra.mxu0 %v10053_v58  ;;  %3122 = vmatpush.bf16.msra.mxu2 %v10058_v63 }
 0x291   :  { %2909 = vmatmul.bf16.vlgmr.msrb.gmra.mxu1 %v10754_v8  ;;  %2935 = vmatmul.bf16.vlgmr.msrb.gmra.mxu3 %v10754_v8  ;;  %v12965_v8 = vld [vmem:[#allocation70_spill] sm:$0xff] }
 0x292   :  { %3108 = vmatpush.bf16.msra.mxu1 %v10044_v48  ;;  %3134 = vmatpush.bf16.msra.mxu3 %v10049_v54  ;;  %v13010_v48 = vld [vmem:[#allocation30_spill] sm:$0xff] }
 0x293   :  { %3097 = vmatpush.bf16.msra.mxu0 %v10068_v12  ;;  %3123 = vmatpush.bf16.msra.mxu2 %v10074_v23 }
 0x296   :  { %3109 = vmatpush.bf16.msra.mxu1 %v10055_v59  ;;  %3135 = vmatpush.bf16.msra.mxu3 %v10060_v1 }
 0x297   :  { %3098 = vmatpush.bf16.msra.mxu0 %v10083_v34  ;;  %3124 = vmatpush.bf16.msra.mxu2 %v10089_v44 }
 0x29a   :  { %3110 = vmatpush.bf16.msra.mxu1 %v10072_v21  ;;  %3136 = vmatpush.bf16.msra.mxu3 %v10077_v30  ;;  %v12966_v21 = vld [vmem:[#allocation73_spill] sm:$0xff]  ;;  %v12967_v30 = vld [vmem:[#allocation66_spill] sm:$0xff] }
 0x29b   :  { %3099 = vmatpush.bf16.msra.mxu0 %v10097_v3  ;;  %3125 = vmatpush.bf16.msra.mxu2 %v10105_v15  ;;  %v12968_v3 = vld [vmem:[#allocation68_spill] sm:$0xff]  ;;  %v12969_v15 = vld [vmem:[#allocation75_spill] sm:$0xff] }
 0x29e   :  { %3111 = vmatpush.bf16.msra.mxu1 %v10087_v43  ;;  %3137 = vmatpush.bf16.msra.mxu3 %v10092_v55  ;;  %v12970_v43 = vld [vmem:[#allocation77_spill] sm:$0xff]  ;;  %v12971_v55 = vld [vmem:[#allocation79_spill] sm:$0xff] }
 0x29f   :  { %3100 = vmatpush.bf16.msra.mxu0 %v10111_v50  ;;  %3126 = vmatpush.bf16.msra.mxu2 %v10117_v56  ;;  %v12972_v50 = vld [vmem:[#allocation82_spill] sm:$0xff]  ;;  %v12973_v56 = vld [vmem:[#allocation72_spill] sm:$0xff] }
 0x2a2   :  { %3112 = vmatpush.bf16.msra.mxu1 %v10103_v11  ;;  %3138 = vmatpush.bf16.msra.mxu3 %v12964_v33  ;;  %v12974_v11 = vld [vmem:[#allocation74_spill] sm:$0xff]  ;;  %v12975_v33 = vld [vmem:[#allocation85_spill] sm:$0xff] }
 0x2a3   :  { %3101 = vmatpush.bf16.msra.mxu0 %v12965_v8  ;;  %3127 = vmatpush.bf16.msra.mxu2 %v12966_v21  ;;  %v12976_v8 = vld [vmem:[#allocation87_spill] sm:$0xff]  ;;  %v12977_v21 = vld [vmem:[#allocation76_spill] sm:$0xff] }
 0x2a6   :  { %3113 = vmatpush.bf16.msra.mxu1 %v12967_v30  ;;  %3139 = vmatpush.bf16.msra.mxu3 %v12968_v3  ;;  %v12978_v30 = vld [vmem:[#allocation78_spill] sm:$0xff]  ;;  %v12979_v3 = vld [vmem:[#allocation80_spill] sm:$0xff] }
 0x2a7   :  { %3102 = vmatpush.bf16.msra.mxu0 %v12969_v15  ;;  %3128 = vmatpush.bf16.msra.mxu2 %v12970_v43  ;;  %v12980_v15 = vld [vmem:[#allocation84_spill] sm:$0xff]  ;;  %v12981_v43 = vld [vmem:[#allocation90_spill] sm:$0xff] }
 0x2aa   :  { %3114 = vmatpush.bf16.msra.mxu1 %v12973_v56  ;;  %3140 = vmatpush.bf16.msra.mxu3 %v12974_v11  ;;  %v12984_v56 = vld [vmem:[#allocation88_spill] sm:$0xff]  ;;  %v12985_v11 = vld [vmem:[#allocation95_spill] sm:$0xff] }
 0x2ab   :  { %3147 = vmatpush.bf16.msrb.mxu0 %v12971_v55  ;;  %3173 = vmatpush.bf16.msrb.mxu2 %v12972_v50  ;;  %v12982_v55 = vld [vmem:[#allocation93_spill] sm:$0xff]  ;;  %v12983_v50 = vld [vmem:[#allocation86_spill] sm:$0xff] }
 0x2ae   :  { %3115 = vmatpush.bf16.msra.mxu1 %v12977_v21  ;;  %3141 = vmatpush.bf16.msra.mxu3 %v12978_v30  ;;  %v12988_v21 = vld [vmem:[#allocation94_spill] sm:$0xff]  ;;  %v12989_v30 = vld [vmem:[#allocation100_spill] sm:$0xff] }
 0x2af   :  { %3148 = vmatpush.bf16.msrb.mxu0 %v12975_v33  ;;  %3174 = vmatpush.bf16.msrb.mxu2 %v12976_v8  ;;  %v12986_v33 = vld [vmem:[#allocation97_spill] sm:$0xff]  ;;  %v12987_v8 = vld [vmem:[#allocation92_spill] sm:$0xff] }
 0x2b2   :  { %3160 = vmatpush.bf16.msrb.mxu1 %v12979_v3  ;;  %3186 = vmatpush.bf16.msrb.mxu3 %v12980_v15  ;;  %v12990_v3 = vld [vmem:[#allocation103_spill] sm:$0xff]  ;;  %v12991_v15 = vld [vmem:[#allocation96_spill] sm:$0xff] }
 0x2b3   :  { %3149 = vmatpush.bf16.msrb.mxu0 %v12981_v43  ;;  %3175 = vmatpush.bf16.msrb.mxu2 %v12982_v55  ;;  %v12992_v43 = vld [vmem:[#allocation98_spill] sm:$0xff]  ;;  %v12993_v55 = vld [vmem:[#allocation105_spill] sm:$0xff] }
 0x2b6   :  { %3161 = vmatpush.bf16.msrb.mxu1 %v12983_v50  ;;  %3187 = vmatpush.bf16.msrb.mxu3 %v12984_v56  ;;  %v12994_v50 = vld [vmem:[#allocation107_spill] sm:$0xff]  ;;  %v12995_v56 = vld [vmem:[#allocation102_spill] sm:$0xff] }
 0x2b7   :  { %3150 = vmatpush.bf16.msrb.mxu0 %v12985_v11  ;;  %3176 = vmatpush.bf16.msrb.mxu2 %v12986_v33  ;;  %v12996_v11 = vld [vmem:[#allocation104_spill] sm:$0xff]  ;;  %v12997_v33 = vld [vmem:[#allocation110_spill] sm:$0xff] }
 0x2ba   :  { %3162 = vmatpush.bf16.msrb.mxu1 %v12987_v8  ;;  %3188 = vmatpush.bf16.msrb.mxu3 %v12988_v21  ;;  %v12998_v8 = vld [vmem:[#allocation113_spill] sm:$0xff]  ;;  %v12999_v21 = vld [vmem:[#allocation106_spill] sm:$0xff] }
 0x2bb   :  { %3151 = vmatpush.bf16.msrb.mxu0 %v12989_v30  ;;  %3177 = vmatpush.bf16.msrb.mxu2 %v12990_v3  ;;  %v13000_v30 = vld [vmem:[#allocation108_spill] sm:$0xff]  ;;  %v13001_v3 = vld [vmem:[#allocation115_spill] sm:$0xff] }
 0x2be   :  { %3163 = vmatpush.bf16.msrb.mxu1 %v12991_v15  ;;  %3189 = vmatpush.bf16.msrb.mxu3 %v12992_v43  ;;  %v13002_v15 = vld [vmem:[#allocation117_spill] sm:$0xff]  ;;  %v13003_v43 = vld [vmem:[#allocation112_spill] sm:$0xff] }
 0x2bf   :  { %3152 = vmatpush.bf16.msrb.mxu0 %v12993_v55  ;;  %3178 = vmatpush.bf16.msrb.mxu2 %v12994_v50  ;;  %v13004_v55 = vld [vmem:[#allocation114_spill] sm:$0xff]  ;;  %v13005_v50 = vld [vmem:[#allocation116_spill] sm:$0xff] }
 0x2c2   :  { %3164 = vmatpush.bf16.msrb.mxu1 %v12995_v56  ;;  %3190 = vmatpush.bf16.msrb.mxu3 %v12996_v11  ;;  %v13006_v56 = vld [vmem:[#allocation118_spill] sm:$0xff] }
 0x2c3   :  { %3153 = vmatpush.bf16.msrb.mxu0 %v12997_v33  ;;  %3179 = vmatpush.bf16.msrb.mxu2 %v12998_v8 }
 0x2c6   :  { %3165 = vmatpush.bf16.msrb.mxu1 %v12999_v21  ;;  %3191 = vmatpush.bf16.msrb.mxu3 %v13000_v30  ;;  %v2741_v11 = vpop.f32.mrf.mxu0  ;;  %v13007_v21 = vld [vmem:[#allocation32_spill] sm:$0xff]  ;;  %v13008_v30 = vld [vmem:[#allocation238_spill] sm:$0xff] }
 0x2c7   :  { %3154 = vmatpush.bf16.msrb.mxu0 %v13001_v3  ;;  %3180 = vmatpush.bf16.msrb.mxu2 %v13002_v15 }
 0x2ca   :  { %3166 = vmatpush.bf16.msrb.mxu1 %v13003_v43  ;;  %3192 = vmatpush.bf16.msrb.mxu3 %v13004_v55  ;;  %v13009_v55 = vld [vmem:[#allocation33_spill] sm:$0xff] }
 0x2cc   :  { %v2767_v33 = vpop.f32.mrf.mxu2 }
 0x2ce   :  { %3167 = vmatpush.bf16.msrb.mxu1 %v13005_v50  ;;  %3193 = vmatpush.bf16.msrb.mxu3 %v13006_v56  ;;  %v2754_v44 = vpop.f32.mrf.mxu1  ;;  %v2743_v34 = vpop.f32.mrf.mxu0 }
 0x2cf   :  { %v2755_v8 = vadd.f32 %v2754_v44, %v2741_v11 }
 0x2d1   :  { %v2940_v1 = vadd.f32 %v2755_v8, %v13007_v21  ;;  %v13014_v8 = vld [vmem:[#allocation71_spill] sm:$0xff] }
 0x2d3   :  { %v2948_v59 = vadd.f32 %v2940_v1, %v13008_v30 }
 0x2d4   :  { %v2780_v3 = vpop.f32.mrf.mxu3  ;;  %v2769_v12 = vpop.f32.mrf.mxu2 }
 0x2d5   :  { %v7949_v23 = vmul.f32 -1.442695, %v2948_v59  ;;  %v2781_v15 = vadd.f32 %v2780_v3, %v2767_v33  ;;  %v13011_v59 = vld [vmem:[#allocation83_spill] sm:$0xff]  ;;  %v13013_v33 = vld [vmem:[#allocation89_spill] sm:$0xff] }
 0x2d6   :  { %v2756_v43 = vpop.f32.mrf.mxu1  ;;  %v2793_v50 = vpop.f32.mrf.mxu0 }
 0x2d7   :  { %9277 = vpow2.f32 %v7949_v23  ;;  %v2941_v54 = vadd.f32 %v2781_v15, %v13009_v55  ;;  %v13012_v43 = vld [vmem:[#allocation31_spill] sm:$0xff] }
 0x2d9   :  { %v2949_v56 = vadd.f32 %v2941_v54, %v13010_v48 }
 0x2db   :  { %v7950_v0 = vmul.f32 -1.442695, %v2949_v56 }
 0x2dc   :  { %v2782_v6 = vpop.f32.mrf.mxu3  ;;  %v2819_v44 = vpop.f32.mrf.mxu2 }
 0x2dd   :  { %v9278_v63 = vpop.eup %9277  ;;  %9279 = vpow2.f32 %v7950_v0 }
 0x2de   :  { %v2806_v34 = vpop.f32.mrf.mxu1  ;;  %v10900_v11 = vadd.f32 1.0, %v9278_v63  ;;  %v2795_v1 = vpop.f32.mrf.mxu0 }
 0x2df   :  { %v2807_v21 = vadd.f32 %v2806_v34, %v2793_v50 }
 0x2e0   :  { %9281 = vrcp.f32 %v10900_v11  ;;  %vm2969_vm9 = vweird.f32 %v10900_v11 }
 0x2e1   :  { %v2942_v3 = vadd.f32 %v2807_v21, %v13011_v59 }
 0x2e3   :  { %v9280_v12 = vpop.eup %9279  ;;  %v2950_v23 = vadd.f32 %v2942_v3, %v13012_v43 }
 0x2e4   :  { %v2832_v55 = vpop.f32.mrf.mxu3  ;;  %v10905_v56 = vadd.f32 1.0, %v9280_v12  ;;  %v2821_v0 = vpop.f32.mrf.mxu2 }
 0x2e5   :  { %v7951_v15 = vmul.f32 -1.442695, %v2950_v23  ;;  %v2833_v54 = vadd.f32 %v2832_v55, %v2819_v44 }
 0x2e6   :  { %v2808_v6 = vpop.f32.mrf.mxu1  ;;  %v10909_v1 = vpop.eup %9281  ;;  %vm2984_vm13 = vweird.f32 %v10905_v56 }
 0x2e7   :  { %9283 = vpow2.f32 %v7951_v15  ;;  %v2943_v50 = vadd.f32 %v2833_v54, %v13013_v33  ;;  %v2965_v44 = vmul.f32 %v10909_v1, %v10900_v11  ;;  %v13015_v54 = vld [vmem:[#allocation137_spill] sm:$0xff]  ;;  %v13016_v6 = vld [vmem:[#allocation139_spill] sm:$0xff]  ;;  %vm2970_vm8 = vweird.f32 %v10909_v1 }
 0x2e8   :  { %9285 = vrcp.f32 %v10905_v56  ;;  %v1317_v0 = vadd.f32 %v13016_v6, %v13015_v54  ;;  %v1375_v54 = vadd.f32 %v13019_v49, %v13018_v22  ;;  %vm10934_vm11 = vmor %vm2969_vm9, %vm2970_vm8 }
 0x2e9   :  { %v2845_v63 = vpop.f32.mrf.mxu0  ;;  %v2951_v34 = vadd.f32 %v2943_v50, %v13014_v8  ;;  %v2966_v8 = vsub.f32 1.0, %v2965_v44 }
 0x2eb   :  { %v7952_v21 = vmul.f32 -1.442695, %v2951_v34  ;;  %v2967_v30 = vmul.f32 %v10909_v1, %v2966_v8 }
 0x2ec   :  { %v2834_v59 = vpop.f32.mrf.mxu3 }
 0x2ed   :  { %v9284_v3 = vpop.eup %9283  ;;  %9287 = vpow2.f32 %v7952_v21  ;;  %v13017_v21 = vld [vmem:[#allocation81_spill] sm:$0xff]  ;;  %v2968_v8 = vadd.f32 %v10909_v1, %v2967_v30 }
 0x2ee   :  { %v3000_v12 = vadd.f32 1.0, %v9284_v3  ;;  %v2858_v55 = vpop.f32.mrf.mxu1  ;;  %v10914_v15 = vpop.eup %9285 }
 0x2ef   :  { %v2871_v23 = vpop.f32.mrf.mxu2  ;;  %v2859_v33 = vadd.f32 %v2858_v55, %v2845_v63  ;;  %v2980_v59 = vmul.f32 %v10914_v15, %v10905_v56  ;;  %vm2985_vm0 = vweird.f32 %v10914_v15 }
 0x2f0   :  { %9289 = vrcp.f32 %v3000_v12  ;;  %v3011_v22 = vand.u32 2147483647, %v3000_v12  ;;  %vm3007_vm14 = vweird.f32 %v3000_v12  ;;  %vm2986_vm3 = vmor %vm2984_vm13, %vm2985_vm0 }
 0x2f1   :  { %v2847_v50 = vpop.f32.mrf.mxu0  ;;  %v2944_v43 = vadd.f32 %v2859_v33, %v1317_v0  ;;  %v2981_v55 = vsub.f32 1.0, %v2980_v59  ;;  %v2973_v33 = vand.u32 2147483647, %v10900_v11 }
 0x2f2   :  { %v2975_v50 = vand.u32 2147483648, %v10900_v11  ;;  %v2988_v11 = vand.u32 2147483647, %v10905_v56  ;;  %vm3012_vm1 = vcmp.eq.f32.partialorder %v3011_v22, 8.507059e+37 }
 0x2f3   :  { %v9288_v34 = vpop.eup %9287  ;;  %v2952_v3 = vadd.f32 %v2944_v43, %v13017_v21  ;;  %v3013_v21 = vand.u32 2147483648, %v3000_v12  ;;  %vm10938_vm12 = vcmp.eq.f32.partialorder %v2973_v33, 8.507059e+37 }
 0x2f4   :  { %v10920_v48 = vadd.f32 1.0, %v9288_v34  ;;  %v2884_v58 = vpop.f32.mrf.mxu3  ;;  %v2976_v30 = vor.u32 1.1754944e-38, %v2975_v50  ;;  %v2990_v50 = vand.u32 2147483648, %v10905_v56  ;;  %vm2989_vm6 = vcmp.eq.f32.partialorder %v2988_v11, 8.507059e+37 }
 0x2f5   :  { %v2885_v63 = vadd.f32 %v2884_v58, %v2871_v23  ;;  %v2982_v23 = vmul.f32 %v10914_v15, %v2981_v55  ;;  %v3014_v33 = vor.u32 1.1754944e-38, %v3013_v21 }
 0x2f6   :  { %v9290_v13 = vpop.eup %9289  ;;  %9291 = vrcp.f32 %v10920_v48  ;;  %v2860_v0 = vpop.f32.mrf.mxu1  ;;  %vm3022_vm4 = vweird.f32 %v10920_v48 }
 0x2f7   :  { %v2873_v44 = vpop.f32.mrf.mxu2  ;;  %v3003_v6 = vmul.f32 %v9290_v13, %v3000_v12  ;;  %9293 = vtanh.f32 %v2952_v3  ;;  %v2945_v43 = vadd.f32 %v2885_v63, %v1375_v54  ;;  %vm3008_vm10 = vweird.f32 %v9290_v13 }
 0x2f8   :  { %v2972_v63 = vsel %vm10934_vm11, %v10909_v1, %v2968_v8  ;;  %vm3009_vm15 = vmor %vm3007_vm14, %vm3008_vm10  ;;  %v2983_v12 = vadd.f32 %v10914_v15, %v2982_v23 }
 0x2f9   :  { %v3004_v34 = vsub.f32 1.0, %v3003_v6  ;;  %v2953_v49 = vadd.f32 %v2945_v43, %v10713_v20  ;;  %v3028_v20 = vand.u32 2147483648, %v10920_v48  ;;  %v2977_v1 = vsel %vm10938_vm12, %v2976_v30, %v2972_v63 }
 0x2fa   :  { %v2991_v30 = vor.u32 1.1754944e-38, %v2990_v50  ;;  %v13026_v50 = vld [vmem:[#allocation218_spill] sm:$0xff] }
 0x2fb   :  { %v3005_v58 = vmul.f32 %v9290_v13, %v3004_v34  ;;  %9295 = vtanh.f32 %v2953_v49  ;;  %v2987_v49 = vsel %vm2986_vm3, %v10914_v15, %v2983_v12  ;;  %v3029_v3 = vor.u32 1.1754944e-38, %v3028_v20  ;;  %v13025_v15 = vld [vmem:[#allocation217_spill] sm:$0xff] }
 0x2fc   :  { %v9292_v59 = vpop.eup %9291  ;;  %v2886_v6 = vpop.f32.mrf.mxu3  ;;  %v2992_v63 = vsel %vm2989_vm6, %v2991_v30, %v2987_v49 }
 0x2fd   :  { %v3018_v54 = vmul.f32 %v9292_v59, %v10920_v48  ;;  %v3006_v55 = vadd.f32 %v9290_v13, %v3005_v58  ;;  %v9294_v0 = vpop.eup %9293  ;;  %v3026_v58 = vand.u32 2147483647, %v10920_v48  ;;  %vm3023_vm2 = vweird.f32 %v9292_v59 }
 0x2fe   :  { %v3074_v6 = vmul.f32 %v9294_v0, %v2977_v1  ;;  %vm3024_vm5 = vmor %vm3022_vm4, %vm3023_vm2 }
 0x2ff   :  { %v3019_v43 = vsub.f32 1.0, %v3018_v54  ;;  %v3010_v34 = vsel %vm3009_vm15, %v9290_v13, %v3006_v55  ;;  %vm3027_vm7 = vcmp.eq.f32.partialorder %v3026_v58, 8.507059e+37  ;;  %v13027_v58 = vld [vmem:[#allocation219_spill] sm:$0xff] }
 0x300   :  { %v3015_v8 = vsel %vm3012_vm1, %v3014_v33, %v3010_v34  ;;  %v13024_v34 = vld [vmem:[#allocation216_spill] sm:$0xff] }
 0x301   :  { %v3020_v44 = vmul.f32 %v9292_v59, %v3019_v43  ;;  %v3072_v21 = vmul.f32 %v3015_v8, %v10732_v25  ;;  %v9296_v23 = vpop.eup %9295  ;;  %v1433_v12 = vadd.f32 %v13025_v15, %v13024_v34 }
 0x302   :  { %v3075_v0 = vmul.f32 %v9296_v23, %v2992_v63 }
 0x303   :  { %v10962_v13 = vadd.f32 %v3074_v6, %v3072_v21  ;;  %v3021_v22 = vadd.f32 %v9292_v59, %v3020_v44  ;;  %v1491_v44 = vadd.f32 %v13027_v58, %v13026_v50 }
 0x305   :  { %v3025_v54 = vsel %vm3024_vm5, %v9292_v59, %v3021_v22 }
 0x306   :  { %v3030_v55 = vsel %vm3027_vm7, %v3029_v3, %v3025_v54 }
 0x307   :  { %v3073_v56 = vmul.f32 %v3030_v55, %v10734_v35 }
 0x309   :  { %v2897_v25 = vpop.f32.mrf.mxu0  ;;  %v10966_v33 = vadd.f32 %v3075_v0, %v3073_v56 }
 0x30e   :  { %v2910_v48 = vpop.f32.mrf.mxu1 }
 0x30f   :  { %v2923_v43 = vpop.f32.mrf.mxu2  ;;  %v2911_v1 = vadd.f32 %v2910_v48, %v2897_v25 }
 0x311   :  { %v2899_v8 = vpop.f32.mrf.mxu0  ;;  %v2946_v20 = vadd.f32 %v2911_v1, %v1433_v12 }
 0x313   :  { %v2954_v11 = vadd.f32 %v2946_v20, %v10737_v5 }
 0x314   :  { %v2936_v59 = vpop.f32.mrf.mxu3 }
 0x315   :  { %v7953_v21 = vmul.f32 -1.442695, %v2954_v11  ;;  %v2937_v6 = vadd.f32 %v2936_v59, %v2923_v43 }
 0x316   :  { %v2912_v35 = vpop.f32.mrf.mxu1 }
 0x317   :  { %v2925_v49 = vpop.f32.mrf.mxu2  ;;  %9297 = vpow2.f32 %v7953_v21  ;;  %v2947_v22 = vadd.f32 %v2937_v6, %v1491_v44 }
 0x319   :  { %v2955_v23 = vadd.f32 %v2947_v22, %v10742_v51 }
 0x31b   :  { %v7954_v3 = vmul.f32 -1.442695, %v2955_v23 }
 0x31c   :  { %v2938_v30 = vpop.f32.mrf.mxu3 }
 0x31d   :  { %v9298_v54 = vpop.eup %9297  ;;  %9299 = vpow2.f32 %v7954_v3 }
 0x31e   :  { %v3040_v25 = vadd.f32 1.0, %v9298_v54 }
 0x320   :  { %9301 = vrcp.f32 %v3040_v25  ;;  %v3053_v43 = vand.u32 2147483648, %v3040_v25  ;;  %v3051_v15 = vand.u32 2147483647, %v3040_v25  ;;  %vm3047_vm9 = vweird.f32 %v3040_v25 }
 0x322   :  { %v3054_v20 = vor.u32 1.1754944e-38, %v3053_v43  ;;  %vm3052_vm11 = vcmp.eq.f32.partialorder %v3051_v15, 8.507059e+37  ;;  %v13032_v43 = vld [vmem:[#allocation152_spill] sm:$0xff]  ;;  %v13034_v15 = vld [vmem:[#allocation162_spill] sm:$0xff] }
 0x323   :  { %v9300_v63 = vpop.eup %9299 }
 0x324   :  { %v3041_v55 = vadd.f32 1.0, %v9300_v63 }
 0x326   :  { %v9302_v56 = vpop.eup %9301  ;;  %9303 = vrcp.f32 %v3041_v55  ;;  %v3068_v44 = vand.u32 2147483648, %v3041_v55  ;;  %v3066_v35 = vand.u32 2147483647, %v3041_v55  ;;  %vm3062_vm13 = vweird.f32 %v3041_v55 }
 0x327   :  { %v3043_v0 = vmul.f32 %v9302_v56, %v3040_v25  ;;  %9305 = vtanh.f32 %v10962_v13  ;;  %vm3048_vm8 = vweird.f32 %v9302_v56 }
 0x328   :  { %vm3049_vm10 = vmor %vm3047_vm9, %vm3048_vm8  ;;  %9307 = vtanh.f32 %v10966_v33  ;;  %v3069_v23 = vor.u32 1.1754944e-38, %v3068_v44  ;;  %vm3067_vm15 = vcmp.eq.f32.partialorder %v3066_v35, 8.507059e+37  ;;  %v13043_v44 = vld [vmem:[#allocation165_spill] sm:$0xff]  ;;  %v13046_v35 = vld [vmem:[#allocation167_spill] sm:$0xff] }
 0x329   :  { %v3044_v48 = vsub.f32 1.0, %v3043_v0  ;;  %v13030_v0 = vld [vmem:[#allocation155_spill] sm:$0xff] }
 0x32b   :  { %v3045_v34 = vmul.f32 %v9302_v56, %v3044_v48  ;;  %v13031_v48 = vld [vmem:[#allocation157_spill] sm:$0xff] }
 0x32c   :  { %v9304_v12 = vpop.eup %9303 }
 0x32d   :  { %v3046_v1 = vadd.f32 %v9302_v56, %v3045_v34  ;;  %v3058_v8 = vmul.f32 %v9304_v12, %v3041_v55  ;;  %v9306_v50 = vpop.eup %9305  ;;  %vm3063_vm12 = vweird.f32 %v9304_v12  ;;  %v13028_v55 = vld [vmem:[#allocation145_spill] sm:$0xff]  ;;  %v13033_v34 = vld [vmem:[#allocation154_spill] sm:$0xff] }
 0x32e   :  { %vm3064_vm14 = vmor %vm3062_vm13, %vm3063_vm12  ;;  %v9308_v30 = vpop.eup %9307 }
 0x32f   :  { %v3050_v11 = vsel %vm3049_vm10, %v9302_v56, %v3046_v1  ;;  %v3059_v59 = vsub.f32 1.0, %v3058_v8  ;;  %v13029_v56 = vld [vmem:[#allocation148_spill] sm:$0xff]  ;;  %v13037_v8 = vld [vmem:[#allocation158_spill] sm:$0xff] }
 0x330   :  { %v3055_v58 = vsel %vm3052_vm11, %v3054_v20, %v3050_v11  ;;  %v13036_v1 = vld [vmem:[#allocation156_spill] sm:$0xff]  ;;  %v13038_v20 = vld [vmem:[#allocation166_spill] sm:$0xff] }
 0x331   :  { %v3080_v21 = vmul.f32 %v9306_v50, %v3055_v58  ;;  %v3060_v6 = vmul.f32 %v9304_v12, %v3059_v59  ;;  %v13039_v11 = vld [vmem:[#allocation168_spill] sm:$0xff]  ;;  %v13040_v59 = vld [vmem:[#allocation171_spill] sm:$0xff]  ;;  %v13041_v50 = vld [vmem:[#allocation174_spill] sm:$0xff] }
 0x332   :  { %v13042_v58 = vld [vmem:[#allocation163_spill] sm:$0xff] }
 0x333   :  { %v10976_v49 = vpack.c.bf16 %v3080_v21, %v3080_v21  ;;  %v3061_v22 = vadd.f32 %v9304_v12, %v3060_v6  ;;  %v13044_v21 = vld [vmem:[#allocation177_spill] sm:$0xff]  ;;  %v13045_v6 = vld [vmem:[#allocation179_spill] sm:$0xff] }
 0x335   :  { %v3065_v3 = vsel %vm3064_vm14, %v9304_v12, %v3061_v22  ;;  %3103 = vmatmul.bf16.vlgmr.msra.gmra.mxu0 %v10976_v49  ;;  %3129 = vmatmul.bf16.vlgmr.msra.gmra.mxu2 %v10976_v49  ;;  %v13035_v12 = vld [vmem:[#allocation164_spill] sm:$0xff]  ;;  %v13047_v22 = vld [vmem:[#allocation170_spill] sm:$0xff] }
 0x336   :  { %v3070_v54 = vsel %vm3067_vm15, %v3069_v23, %v3065_v3  ;;  %3199 = vmatpush.bf16.msra.mxu0 %v12911_v61  ;;  %3225 = vmatpush.bf16.msra.mxu2 %v12912_v9  ;;  %v13048_v23 = vld [vmem:[#allocation173_spill] sm:$0xff]  ;;  %v13049_v3 = vld [vmem:[#allocation175_spill] sm:$0xff] }
 0x337   :  { %v3081_v25 = vmul.f32 %v9308_v30, %v3070_v54  ;;  %v13050_v30 = vld [vmem:[#allocation181_spill] sm:$0xff]  ;;  %v13051_v54 = vld [vmem:[#allocation184_spill] sm:$0xff] }
 0x339   :  { %v10982_v63 = vpack.c.bf16 %v3081_v25, %v3081_v25  ;;  %v13052_v25 = vld [vmem:[#allocation178_spill] sm:$0xff] }
 0x33a   :  { %3200 = vmatpush.bf16.msra.mxu0 %v12913_v26  ;;  %3226 = vmatpush.bf16.msra.mxu2 %v12914_v46 }
 0x33b   :  { %3116 = vmatmul.bf16.vlgmr.msra.gmra.mxu1 %v10982_v63  ;;  %3142 = vmatmul.bf16.vlgmr.msra.gmra.mxu3 %v10982_v63 }
 0x33c   :  { %3212 = vmatpush.bf16.msra.mxu1 %v12915_v38  ;;  %3238 = vmatpush.bf16.msra.mxu3 %v12916_v37 }
 0x33e   :  { %3201 = vmatpush.bf16.msra.mxu0 %v12917_v36  ;;  %3227 = vmatpush.bf16.msra.mxu2 %v12918_v10 }
 0x340   :  { %3213 = vmatpush.bf16.msra.mxu1 %v12919_v32  ;;  %3239 = vmatpush.bf16.msra.mxu3 %v12920_v28 }
 0x342   :  { %3202 = vmatpush.bf16.msra.mxu0 %v12921_v31  ;;  %3228 = vmatpush.bf16.msra.mxu2 %v12922_v7 }
 0x344   :  { %3214 = vmatpush.bf16.msra.mxu1 %v12923_v57  ;;  %3240 = vmatpush.bf16.msra.mxu3 %v12924_v52 }
 0x345   :  { %3155 = vmatmul.bf16.vlgmr.msrb.gmra.mxu0 %v10976_v49  ;;  %3181 = vmatmul.bf16.vlgmr.msrb.gmra.mxu2 %v10976_v49 }
 0x346   :  { %3203 = vmatpush.bf16.msra.mxu0 %v12925_v4  ;;  %3229 = vmatpush.bf16.msra.mxu2 %v12926_v53 }
 0x348   :  { %3215 = vmatpush.bf16.msra.mxu1 %v13028_v55  ;;  %3241 = vmatpush.bf16.msra.mxu3 %v13029_v56 }
 0x34a   :  { %3204 = vmatpush.bf16.msra.mxu0 %v13030_v0  ;;  %3230 = vmatpush.bf16.msra.mxu2 %v13031_v48 }
 0x34b   :  { %3168 = vmatmul.bf16.vlgmr.msrb.gmra.mxu1 %v10982_v63  ;;  %3194 = vmatmul.bf16.vlgmr.msrb.gmra.mxu3 %v10982_v63 }
 0x34c   :  { %3216 = vmatpush.bf16.msra.mxu1 %v13032_v43  ;;  %3242 = vmatpush.bf16.msra.mxu3 %v13033_v34 }
 0x34e   :  { %3205 = vmatpush.bf16.msra.mxu0 %v13034_v15  ;;  %3231 = vmatpush.bf16.msra.mxu2 %v13035_v12 }
 0x350   :  { %3217 = vmatpush.bf16.msra.mxu1 %v13036_v1  ;;  %3243 = vmatpush.bf16.msra.mxu3 %v13037_v8 }
 0x352   :  { %3206 = vmatpush.bf16.msra.mxu0 %v13038_v20  ;;  %3232 = vmatpush.bf16.msra.mxu2 %v13039_v11 }
 0x354   :  { %3218 = vmatpush.bf16.msra.mxu1 %v13042_v58  ;;  %3244 = vmatpush.bf16.msra.mxu3 %v13043_v44 }
 0x355   :  { %3207 = vmatmul.bf16.vlgmr.msra.gmra.mxu0 %v10976_v49  ;;  %3233 = vmatmul.bf16.vlgmr.msra.gmra.mxu2 %v10976_v49 }
 0x356   :  { %3251 = vmatpush.bf16.msrb.mxu0 %v13040_v59  ;;  %3277 = vmatpush.bf16.msrb.mxu2 %v13041_v50 }
 0x358   :  { %3219 = vmatpush.bf16.msra.mxu1 %v13046_v35  ;;  %3245 = vmatpush.bf16.msra.mxu3 %v13047_v22 }
 0x35a   :  { %3252 = vmatpush.bf16.msrb.mxu0 %v13044_v21  ;;  %3278 = vmatpush.bf16.msrb.mxu2 %v13045_v6  ;;  %v13053_v21 = vld [vmem:[#allocation180_spill] sm:$0xff] }
 0x35b   :  { %3220 = vmatmul.bf16.vlgmr.msra.gmra.mxu1 %v10982_v63  ;;  %3246 = vmatmul.bf16.vlgmr.msra.gmra.mxu3 %v10982_v63  ;;  %v13054_v6 = vld [vmem:[#allocation188_spill] sm:$0xff] }
 0x35c   :  { %3264 = vmatpush.bf16.msrb.mxu1 %v13048_v23  ;;  %3290 = vmatpush.bf16.msrb.mxu3 %v13049_v3  ;;  %v13055_v23 = vld [vmem:[#allocation187_spill] sm:$0xff] }
 0x35e   :  { %3253 = vmatpush.bf16.msrb.mxu0 %v13050_v30  ;;  %3279 = vmatpush.bf16.msrb.mxu2 %v13051_v54 }
 0x360   :  { %3265 = vmatpush.bf16.msrb.mxu1 %v13052_v25  ;;  %3291 = vmatpush.bf16.msrb.mxu3 %v13053_v21 }
 0x362   :  { %3254 = vmatpush.bf16.msrb.mxu0 %v13054_v6  ;;  %3280 = vmatpush.bf16.msrb.mxu2 %v12952_v27 }
 0x364   :  { %3266 = vmatpush.bf16.msrb.mxu1 %v12953_v14  ;;  %3292 = vmatpush.bf16.msrb.mxu3 %v13055_v23  ;;  %v13126_v14 = vld [vmem:[#allocation30_spill] sm:$0xff] }
 0x366   :  { %3255 = vmatpush.bf16.msrb.mxu0 %v12955_v60  ;;  %3281 = vmatpush.bf16.msrb.mxu2 %v12956_v39 }
 0x368   :  { %3267 = vmatpush.bf16.msrb.mxu1 %v12957_v29  ;;  %3293 = vmatpush.bf16.msrb.mxu3 %v12958_v62 }
 0x36a   :  { %3256 = vmatpush.bf16.msrb.mxu0 %v12959_v45  ;;  %3282 = vmatpush.bf16.msrb.mxu2 %v12960_v17  ;;  %v13056_v45 = vld [vmem:[#allocation43_spill] sm:$0xff]  ;;  %v13057_v17 = vld [vmem:[#allocation205_spill] sm:$0xff] }
 0x36c   :  { %3268 = vmatpush.bf16.msrb.mxu1 %v12961_v19  ;;  %3294 = vmatpush.bf16.msrb.mxu3 %v12962_v24  ;;  %v13058_v19 = vld [vmem:[#allocation209_spill] sm:$0xff] }
 0x36e   :  { %3257 = vmatpush.bf16.msrb.mxu0 %v10516_v42  ;;  %3283 = vmatpush.bf16.msrb.mxu2 %v10524_v40  ;;  %v13059_v40 = vld [vmem:[#allocation45_spill] sm:$0xff] }
 0x370   :  { %3269 = vmatpush.bf16.msrb.mxu1 %v12963_v16  ;;  %3295 = vmatpush.bf16.msrb.mxu3 %v10513_v18  ;;  %v13060_v16 = vld [vmem:[#allocation47_spill] sm:$0xff] }
 0x371   :  { %v13061_v18 = vld [vmem:[#allocation211_spill] sm:$0xff] }
 0x372   :  { %3258 = vmatpush.bf16.msrb.mxu0 %v10534_v2  ;;  %3284 = vmatpush.bf16.msrb.mxu2 %v10540_v47  ;;  %v13062_v2 = vld [vmem:[#allocation213_spill] sm:$0xff]  ;;  %v13063_v47 = vld [vmem:[#allocation42_spill] sm:$0xff] }
 0x374   :  { %3270 = vmatpush.bf16.msrb.mxu1 %v13057_v17  ;;  %3296 = vmatpush.bf16.msrb.mxu3 %v13058_v19  ;;  %v13065_v19 = vld [vmem:[#allocation50_spill] sm:$0xff]  ;;  %v13066_v17 = vld [vmem:[#allocation53_spill] sm:$0xff] }
 0x375   :  { %3259 = vmatmul.bf16.vlgmr.msrb.gmra.mxu0 %v10976_v49  ;;  %3285 = vmatmul.bf16.vlgmr.msrb.gmra.mxu2 %v10976_v49  ;;  %v13067_v49 = vld [vmem:[#allocation46_spill] sm:$0xff] }
 0x376   :  { %3458 = vmatpush.bf16.msra.mxu0 %v10040_v41  ;;  %3484 = vmatpush.bf16.msra.mxu2 %v13056_v45  ;;  %v13064_v41 = vld [vmem:[#allocation44_spill] sm:$0xff]  ;;  %v13074_v45 = vld [vmem:[#allocation63_spill] sm:$0xff] }
 0x378   :  { %3271 = vmatpush.bf16.msrb.mxu1 %v13061_v18  ;;  %3297 = vmatpush.bf16.msrb.mxu3 %v13062_v2  ;;  %v13070_v18 = vld [vmem:[#allocation57_spill] sm:$0xff]  ;;  %v13071_v2 = vld [vmem:[#allocation52_spill] sm:$0xff] }
 0x37a   :  { %3459 = vmatpush.bf16.msra.mxu0 %v13059_v40  ;;  %3485 = vmatpush.bf16.msra.mxu2 %v13060_v16  ;;  %v13068_v40 = vld [vmem:[#allocation48_spill] sm:$0xff]  ;;  %v13069_v16 = vld [vmem:[#allocation55_spill] sm:$0xff] }
 0x37b   :  { %3272 = vmatmul.bf16.vlgmr.msrb.gmra.mxu1 %v10982_v63  ;;  %3298 = vmatmul.bf16.vlgmr.msrb.gmra.mxu3 %v10982_v63  ;;  %v13075_v63 = vld [vmem:[#allocation56_spill] sm:$0xff] }
 0x37c   :  { %3471 = vmatpush.bf16.msra.mxu1 %v13063_v47  ;;  %3497 = vmatpush.bf16.msra.mxu3 %v13064_v41  ;;  %v13072_v47 = vld [vmem:[#allocation54_spill] sm:$0xff]  ;;  %v13073_v41 = vld [vmem:[#allocation60_spill] sm:$0xff] }
 0x37e   :  { %3460 = vmatpush.bf16.msra.mxu0 %v13065_v19  ;;  %3486 = vmatpush.bf16.msra.mxu2 %v13066_v17  ;;  %v13076_v19 = vld [vmem:[#allocation58_spill] sm:$0xff]  ;;  %v13077_v17 = vld [vmem:[#allocation65_spill] sm:$0xff] }
 0x380   :  { %3472 = vmatpush.bf16.msra.mxu1 %v13067_v49  ;;  %3498 = vmatpush.bf16.msra.mxu3 %v13068_v40  ;;  %v13078_v49 = vld [vmem:[#allocation67_spill] sm:$0xff]  ;;  %v13079_v40 = vld [vmem:[#allocation62_spill] sm:$0xff] }
 0x382   :  { %3461 = vmatpush.bf16.msra.mxu0 %v13069_v16  ;;  %3487 = vmatpush.bf16.msra.mxu2 %v13070_v18  ;;  %v13080_v16 = vld [vmem:[#allocation64_spill] sm:$0xff]  ;;  %v13081_v18 = vld [vmem:[#allocation70_spill] sm:$0xff] }
 0x384   :  { %3473 = vmatpush.bf16.msra.mxu1 %v13071_v2  ;;  %3499 = vmatpush.bf16.msra.mxu3 %v13072_v47  ;;  %v13082_v2 = vld [vmem:[#allocation73_spill] sm:$0xff]  ;;  %v13083_v47 = vld [vmem:[#allocation66_spill] sm:$0xff] }
 0x386   :  { %3462 = vmatpush.bf16.msra.mxu0 %v13073_v41  ;;  %3488 = vmatpush.bf16.msra.mxu2 %v13074_v45  ;;  %v13084_v41 = vld [vmem:[#allocation68_spill] sm:$0xff]  ;;  %v13085_v45 = vld [vmem:[#allocation75_spill] sm:$0xff] }
 0x388   :  { %3474 = vmatpush.bf16.msra.mxu1 %v13075_v63  ;;  %3500 = vmatpush.bf16.msra.mxu3 %v13076_v19  ;;  %v13086_v63 = vld [vmem:[#allocation77_spill] sm:$0xff]  ;;  %v13087_v19 = vld [vmem:[#allocation79_spill] sm:$0xff] }
 0x38a   :  { %3463 = vmatpush.bf16.msra.mxu0 %v13077_v17  ;;  %3489 = vmatpush.bf16.msra.mxu2 %v13078_v49  ;;  %v13088_v17 = vld [vmem:[#allocation82_spill] sm:$0xff]  ;;  %v13089_v49 = vld [vmem:[#allocation72_spill] sm:$0xff] }
 0x38c   :  { %3475 = vmatpush.bf16.msra.mxu1 %v13079_v40  ;;  %3501 = vmatpush.bf16.msra.mxu3 %v13080_v16  ;;  %v13090_v40 = vld [vmem:[#allocation74_spill] sm:$0xff]  ;;  %v13091_v16 = vld [vmem:[#allocation85_spill] sm:$0xff] }
 0x38e   :  { %3464 = vmatpush.bf16.msra.mxu0 %v13081_v18  ;;  %3490 = vmatpush.bf16.msra.mxu2 %v13082_v2  ;;  %v13092_v18 = vld [vmem:[#allocation87_spill] sm:$0xff]  ;;  %v13093_v2 = vld [vmem:[#allocation76_spill] sm:$0xff] }
 0x390   :  { %3476 = vmatpush.bf16.msra.mxu1 %v13083_v47  ;;  %3502 = vmatpush.bf16.msra.mxu3 %v13084_v41  ;;  %v13094_v47 = vld [vmem:[#allocation78_spill] sm:$0xff]  ;;  %v13095_v41 = vld [vmem:[#allocation80_spill] sm:$0xff] }
 0x392   :  { %3465 = vmatpush.bf16.msra.mxu0 %v13085_v45  ;;  %3491 = vmatpush.bf16.msra.mxu2 %v13086_v63  ;;  %v13096_v45 = vld [vmem:[#allocation84_spill] sm:$0xff]  ;;  %v13097_v63 = vld [vmem:[#allocation90_spill] sm:$0xff] }
 0x394   :  { %3477 = vmatpush.bf16.msra.mxu1 %v13089_v49  ;;  %3503 = vmatpush.bf16.msra.mxu3 %v13090_v40  ;;  %v13100_v49 = vld [vmem:[#allocation88_spill] sm:$0xff]  ;;  %v13101_v40 = vld [vmem:[#allocation95_spill] sm:$0xff] }
 0x396   :  { %3510 = vmatpush.bf16.msrb.mxu0 %v13087_v19  ;;  %3536 = vmatpush.bf16.msrb.mxu2 %v13088_v17  ;;  %v13098_v19 = vld [vmem:[#allocation93_spill] sm:$0xff]  ;;  %v13099_v17 = vld [vmem:[#allocation86_spill] sm:$0xff] }
 0x398   :  { %3478 = vmatpush.bf16.msra.mxu1 %v13093_v2  ;;  %3504 = vmatpush.bf16.msra.mxu3 %v13094_v47  ;;  %v13104_v2 = vld [vmem:[#allocation94_spill] sm:$0xff]  ;;  %v13105_v47 = vld [vmem:[#allocation100_spill] sm:$0xff] }
 0x39a   :  { %3511 = vmatpush.bf16.msrb.mxu0 %v13091_v16  ;;  %3537 = vmatpush.bf16.msrb.mxu2 %v13092_v18  ;;  %v13102_v16 = vld [vmem:[#allocation97_spill] sm:$0xff]  ;;  %v13103_v18 = vld [vmem:[#allocation92_spill] sm:$0xff] }
 0x39c   :  { %3523 = vmatpush.bf16.msrb.mxu1 %v13095_v41  ;;  %3549 = vmatpush.bf16.msrb.mxu3 %v13096_v45  ;;  %v13106_v41 = vld [vmem:[#allocation103_spill] sm:$0xff]  ;;  %v13107_v45 = vld [vmem:[#allocation96_spill] sm:$0xff] }
 0x39e   :  { %3512 = vmatpush.bf16.msrb.mxu0 %v13097_v63  ;;  %3538 = vmatpush.bf16.msrb.mxu2 %v13098_v19  ;;  %v13108_v63 = vld [vmem:[#allocation98_spill] sm:$0xff]  ;;  %v13109_v19 = vld [vmem:[#allocation105_spill] sm:$0xff] }
 0x3a0   :  { %3524 = vmatpush.bf16.msrb.mxu1 %v13099_v17  ;;  %3550 = vmatpush.bf16.msrb.mxu3 %v13100_v49  ;;  %v13110_v17 = vld [vmem:[#allocation107_spill] sm:$0xff]  ;;  %v13111_v49 = vld [vmem:[#allocation102_spill] sm:$0xff] }
 0x3a2   :  { %3513 = vmatpush.bf16.msrb.mxu0 %v13101_v40  ;;  %3539 = vmatpush.bf16.msrb.mxu2 %v13102_v16  ;;  %v13112_v40 = vld [vmem:[#allocation104_spill] sm:$0xff]  ;;  %v13113_v16 = vld [vmem:[#allocation110_spill] sm:$0xff] }
 0x3a4   :  { %3525 = vmatpush.bf16.msrb.mxu1 %v13103_v18  ;;  %3551 = vmatpush.bf16.msrb.mxu3 %v13104_v2  ;;  %v13114_v18 = vld [vmem:[#allocation113_spill] sm:$0xff]  ;;  %v13115_v2 = vld [vmem:[#allocation106_spill] sm:$0xff] }
 0x3a6   :  { %3514 = vmatpush.bf16.msrb.mxu0 %v13105_v47  ;;  %3540 = vmatpush.bf16.msrb.mxu2 %v13106_v41  ;;  %v13116_v47 = vld [vmem:[#allocation108_spill] sm:$0xff]  ;;  %v13117_v41 = vld [vmem:[#allocation115_spill] sm:$0xff] }
 0x3a8   :  { %3526 = vmatpush.bf16.msrb.mxu1 %v13107_v45  ;;  %3552 = vmatpush.bf16.msrb.mxu3 %v13108_v63  ;;  %v13118_v45 = vld [vmem:[#allocation117_spill] sm:$0xff]  ;;  %v13119_v63 = vld [vmem:[#allocation112_spill] sm:$0xff] }
 0x3aa   :  { %3515 = vmatpush.bf16.msrb.mxu0 %v13109_v19  ;;  %3541 = vmatpush.bf16.msrb.mxu2 %v13110_v17  ;;  %v13120_v19 = vld [vmem:[#allocation114_spill] sm:$0xff]  ;;  %v13121_v17 = vld [vmem:[#allocation116_spill] sm:$0xff] }
 0x3ac   :  { %3527 = vmatpush.bf16.msrb.mxu1 %v13111_v49  ;;  %3553 = vmatpush.bf16.msrb.mxu3 %v13112_v40  ;;  %v13122_v49 = vld [vmem:[#allocation118_spill] sm:$0xff] }
 0x3ae   :  { %3516 = vmatpush.bf16.msrb.mxu0 %v13113_v16  ;;  %3542 = vmatpush.bf16.msrb.mxu2 %v13114_v18 }
 0x3b0   :  { %3528 = vmatpush.bf16.msrb.mxu1 %v13115_v2  ;;  %3554 = vmatpush.bf16.msrb.mxu3 %v13116_v47  ;;  %v13123_v2 = vld [vmem:[#allocation34_spill] sm:$0xff] }
 0x3b1   :  { %v13124_v47 = vld [vmem:[#allocation238_spill] sm:$0xff] }
 0x3b2   :  { %3517 = vmatpush.bf16.msrb.mxu0 %v13117_v41  ;;  %3543 = vmatpush.bf16.msrb.mxu2 %v13118_v45  ;;  %v3104_v40 = vpop.f32.mrf.mxu0 }
 0x3b4   :  { %3529 = vmatpush.bf16.msrb.mxu1 %v13119_v63  ;;  %3555 = vmatpush.bf16.msrb.mxu3 %v13120_v19  ;;  %v13125_v19 = vld [vmem:[#allocation35_spill] sm:$0xff] }
 0x3b8   :  { %3530 = vmatpush.bf16.msrb.mxu1 %v13121_v17  ;;  %3556 = vmatpush.bf16.msrb.mxu3 %v13122_v49  ;;  %v3117_v16 = vpop.f32.mrf.mxu1  ;;  %v3130_v42 = vpop.f32.mrf.mxu2 }
 0x3b9   :  { %v3118_v18 = vadd.f32 %v3117_v16, %v3104_v40 }
 0x3ba   :  { %v3106_v24 = vpop.f32.mrf.mxu0 }
 0x3bb   :  { %v3303_v62 = vadd.f32 %v3118_v18, %v13123_v2 }
 0x3bd   :  { %v3311_v29 = vadd.f32 %v3303_v62, %v13124_v47 }
 0x3be   :  { %v3143_v41 = vpop.f32.mrf.mxu3 }
 0x3bf   :  { %v7955_v39 = vmul.f32 -1.442695, %v3311_v29  ;;  %v3144_v45 = vadd.f32 %v3143_v41, %v3130_v42  ;;  %v13127_v29 = vld [vmem:[#allocation91_spill] sm:$0xff] }
 0x3c0   :  { %v3119_v60 = vpop.f32.mrf.mxu1  ;;  %v3132_v63 = vpop.f32.mrf.mxu2 }
 0x3c1   :  { %9309 = vpow2.f32 %v7955_v39  ;;  %v3304_v23 = vadd.f32 %v3144_v45, %v13125_v19  ;;  %v13128_v60 = vld [vmem:[#allocation31_spill] sm:$0xff] }
 0x3c2   :  { %v3156_v17 = vpop.f32.mrf.mxu0 }
 0x3c3   :  { %v3312_v49 = vadd.f32 %v3304_v23, %v13126_v14 }
 0x3c5   :  { %v7956_v27 = vmul.f32 -1.442695, %v3312_v49  ;;  %v13129_v49 = vld [vmem:[#allocation99_spill] sm:$0xff] }
 0x3c6   :  { %v3145_v6 = vpop.f32.mrf.mxu3 }
 0x3c7   :  { %v9310_v21 = vpop.eup %9309  ;;  %9311 = vpow2.f32 %v7956_v27 }
 0x3c8   :  { %v3325_v16 = vadd.f32 1.0, %v9310_v21  ;;  %v3169_v40 = vpop.f32.mrf.mxu1  ;;  %v3182_v18 = vpop.f32.mrf.mxu2 }
 0x3c9   :  { %v3170_v2 = vadd.f32 %v3169_v40, %v3156_v17  ;;  %v13130_v40 = vld [vmem:[#allocation71_spill] sm:$0xff] }
 0x3ca   :  { %v3158_v62 = vpop.f32.mrf.mxu0  ;;  %9313 = vrcp.f32 %v3325_v16  ;;  %vm3332_vm1 = vweird.f32 %v3325_v16 }
 0x3cb   :  { %v3305_v41 = vadd.f32 %v3170_v2, %v13127_v29 }
 0x3cd   :  { %v9312_v42 = vpop.eup %9311  ;;  %v3313_v39 = vadd.f32 %v3305_v41, %v13128_v60 }
 0x3ce   :  { %v11130_v24 = vadd.f32 1.0, %v9312_v42  ;;  %v3195_v45 = vpop.f32.mrf.mxu3 }
 0x3cf   :  { %v7957_v19 = vmul.f32 -1.442695, %v3313_v39  ;;  %v3196_v23 = vadd.f32 %v3195_v45, %v3182_v18 }
 0x3d0   :  { %9315 = vrcp.f32 %v11130_v24  ;;  %v3171_v6 = vpop.f32.mrf.mxu1  ;;  %v3184_v27 = vpop.f32.mrf.mxu2  ;;  %vm3347_vm6 = vweird.f32 %v11130_v24 }
 0x3d1   :  { %v9314_v21 = vpop.eup %9313  ;;  %9317 = vpow2.f32 %v7957_v19  ;;  %v3306_v17 = vadd.f32 %v3196_v23, %v13129_v49  ;;  %v13131_v49 = vld [vmem:[#allocation151_spill] sm:$0xff] }
 0x3d2   :  { %v3208_v63 = vpop.f32.mrf.mxu0  ;;  %v3328_v2 = vmul.f32 %v9314_v21, %v3325_v16  ;;  %vm3333_vm0 = vweird.f32 %v9314_v21 }
 0x3d3   :  { %v3314_v62 = vadd.f32 %v3306_v17, %v13130_v40  ;;  %vm11146_vm2 = vmor %vm3332_vm1, %vm3333_vm0 }
 0x3d4   :  { %v3329_v39 = vsub.f32 1.0, %v3328_v2  ;;  %v3338_v2 = vand.u32 2147483648, %v3325_v16 }
 0x3d5   :  { %v7958_v29 = vmul.f32 -1.442695, %v3314_v62 }
 0x3d6   :  { %v11135_v14 = vpop.eup %9315  ;;  %v3197_v41 = vpop.f32.mrf.mxu3  ;;  %v3330_v17 = vmul.f32 %v9314_v21, %v3329_v39 }
 0x3d7   :  { %v9318_v42 = vpop.eup %9317  ;;  %9319 = vpow2.f32 %v7958_v29  ;;  %v3343_v6 = vmul.f32 %v11135_v14, %v11130_v24  ;;  %v13132_v41 = vld [vmem:[#allocation81_spill] sm:$0xff]  ;;  %v3336_v29 = vand.u32 2147483647, %v3325_v16  ;;  %vm3348_vm4 = vweird.f32 %v11135_v14 }
 0x3d8   :  { %v3363_v18 = vadd.f32 1.0, %v9318_v42  ;;  %v3234_v45 = vpop.f32.mrf.mxu2  ;;  %v3221_v27 = vpop.f32.mrf.mxu1  ;;  %v3331_v30 = vadd.f32 %v9314_v21, %v3330_v17  ;;  %v3339_v17 = vor.u32 1.1754944e-38, %v3338_v2  ;;  %v3353_v2 = vand.u32 2147483648, %v11130_v24  ;;  %vm11167_vm8 = vmor %vm3347_vm6, %vm3348_vm4 }
 0x3d9   :  { %v3222_v19 = vadd.f32 %v3221_v27, %v3208_v63  ;;  %v3344_v62 = vsub.f32 1.0, %v3343_v6  ;;  %vm11150_vm3 = vcmp.eq.f32.partialorder %v3336_v29, 8.507059e+37  ;;  %v3351_v29 = vand.u32 2147483647, %v11130_v24 }
 0x3da   :  { %9321 = vrcp.f32 %v3363_v18  ;;  %v3210_v23 = vpop.f32.mrf.mxu0  ;;  %vm3370_vm7 = vweird.f32 %v3363_v18 }
 0x3db   :  { %v3307_v60 = vadd.f32 %v3222_v19, %v13131_v49  ;;  %v3345_v39 = vmul.f32 %v11135_v14, %v3344_v62  ;;  %vm3352_vm11 = vcmp.eq.f32.partialorder %v3351_v29, 8.507059e+37 }
 0x3dd   :  { %v9320_v40 = vpop.eup %9319  ;;  %v3315_v25 = vadd.f32 %v3307_v60, %v13132_v41 }
 0x3de   :  { %v11140_v47 = vadd.f32 1.0, %v9320_v40  ;;  %v3247_v42 = vpop.f32.mrf.mxu3  ;;  %v13133_v40 = vld [vmem:[#allocation160_spill] sm:$0xff] }
 0x3df   :  { %v3248_v3 = vadd.f32 %v3247_v42, %v3234_v45  ;;  %v3376_v45 = vand.u32 2147483648, %v3363_v18  ;;  %v13138_v42 = vld [vmem:[#allocation129_spill] sm:$0xff] }
 0x3e0   :  { %v9322_v54 = vpop.eup %9321  ;;  %9323 = vrcp.f32 %v11140_v47  ;;  %v3236_v63 = vpop.f32.mrf.mxu2  ;;  %v3391_v49 = vand.u32 2147483648, %v11140_v47  ;;  %vm3385_vm13 = vweird.f32 %v11140_v47 }
 0x3e1   :  { %v3366_v27 = vmul.f32 %v9322_v54, %v3363_v18  ;;  %9325 = vtanh.f32 %v3315_v25  ;;  %v3223_v19 = vpop.f32.mrf.mxu1  ;;  %v3308_v6 = vadd.f32 %v3248_v3, %v13133_v40  ;;  %v3335_v25 = vsel %vm11146_vm2, %v9314_v21, %v3331_v30 }
 0x3e2   :  { %vm3371_vm5 = vweird.f32 %v9322_v54  ;;  %v3374_v3 = vand.u32 2147483647, %v3363_v18  ;;  %v3346_v63 = vadd.f32 %v11135_v14, %v3345_v39  ;;  %v3340_v21 = vsel %vm11150_vm3, %v3339_v17, %v3335_v25 }
 0x3e3   :  { %v3367_v23 = vsub.f32 1.0, %v3366_v27  ;;  %v3316_v62 = vadd.f32 %v3308_v6, %v13138_v42  ;;  %vm3372_vm9 = vmor %vm3370_vm7, %vm3371_vm5  ;;  %v3354_v25 = vor.u32 1.1754944e-38, %v3353_v2  ;;  %v3389_v42 = vand.u32 2147483647, %v11140_v47 }
 0x3e4   :  { %vm3375_vm10 = vcmp.eq.f32.partialorder %v3374_v3, 8.507059e+37  ;;  %v3350_v18 = vsel %vm11167_vm8, %v11135_v14, %v3346_v63  ;;  %v3392_v14 = vor.u32 1.1754944e-38, %v3391_v49 }
 0x3e5   :  { %v3368_v16 = vmul.f32 %v9322_v54, %v3367_v23  ;;  %9327 = vtanh.f32 %v3316_v62  ;;  %v3377_v23 = vor.u32 1.1754944e-38, %v3376_v45  ;;  %vm3390_vm15 = vcmp.eq.f32.partialorder %v3389_v42, 8.507059e+37  ;;  %v13142_v42 = vld [vmem:[#allocation222_spill] sm:$0xff] }
 0x3e6   :  { %v9324_v27 = vpop.eup %9323  ;;  %v3249_v6 = vpop.f32.mrf.mxu3 }
 0x3e7   :  { %v9326_v19 = vpop.eup %9325  ;;  %v3381_v30 = vmul.f32 %v9324_v27, %v11140_v47  ;;  %v3369_v40 = vadd.f32 %v9322_v54, %v3368_v16  ;;  %vm3386_vm12 = vweird.f32 %v9324_v27 }
 0x3e8   :  { %v3437_v24 = vmul.f32 %v9326_v19, %v3340_v21  ;;  %v3355_v19 = vsel %vm3352_vm11, %v3354_v25, %v3350_v18  ;;  %vm3387_vm14 = vmor %vm3385_vm13, %vm3386_vm12 }
 0x3e9   :  { %v3382_v60 = vsub.f32 1.0, %v3381_v30  ;;  %v3373_v62 = vsel %vm3372_vm9, %v9322_v54, %v3369_v40 }
 0x3ea   :  { %v3378_v17 = vsel %vm3375_vm10, %v3377_v23, %v3373_v62  ;;  %v13141_v62 = vld [vmem:[#allocation220_spill] sm:$0xff] }
 0x3eb   :  { %v3383_v16 = vmul.f32 %v9324_v27, %v3382_v60  ;;  %v3435_v6 = vmul.f32 %v3378_v17, %v10962_v13  ;;  %v9328_v45 = vpop.eup %9327 }
 0x3ec   :  { %v3438_v30 = vmul.f32 %v9328_v45, %v3355_v19 }
 0x3ed   :  { %v11179_v54 = vadd.f32 %v3437_v24, %v3435_v6  ;;  %v3384_v3 = vadd.f32 %v9324_v27, %v3383_v16 }
 0x3ef   :  { %v3388_v63 = vsel %vm3387_vm14, %v9324_v27, %v3384_v3 }
 0x3f0   :  { %v3393_v2 = vsel %vm3390_vm15, %v3392_v14, %v3388_v63 }
 0x3f1   :  { %v3436_v21 = vmul.f32 %v3393_v2, %v10966_v33 }
 0x3f2   :  { %v3260_v29 = vpop.f32.mrf.mxu0 }
 0x3f3   :  { %v11182_v40 = vadd.f32 %v3438_v30, %v3436_v21 }
 0x3f8   :  { %v3273_v13 = vpop.f32.mrf.mxu1  ;;  %v3286_v39 = vpop.f32.mrf.mxu2 }
 0x3f9   :  { %v3274_v23 = vadd.f32 %v3273_v13, %v3260_v29 }
 0x3fa   :  { %v3262_v60 = vpop.f32.mrf.mxu0 }
 0x3fb   :  { %v3309_v47 = vadd.f32 %v3274_v23, %v13141_v62 }
 0x3fd   :  { %v3317_v24 = vadd.f32 %v3309_v47, %v10737_v5 }
 0x3fe   :  { %v3299_v18 = vpop.f32.mrf.mxu3 }
 0x3ff   :  { %v7959_v17 = vmul.f32 -1.442695, %v3317_v24  ;;  %v3300_v25 = vadd.f32 %v3299_v18, %v3286_v39 }
 0x400   :  { %v3275_v49 = vpop.f32.mrf.mxu1  ;;  %v3288_v27 = vpop.f32.mrf.mxu2 }
 0x401   :  { %9329 = vpow2.f32 %v7959_v17  ;;  %v3310_v16 = vadd.f32 %v3300_v25, %v13142_v42 }
 0x403   :  { %v3318_v33 = vadd.f32 %v3310_v16, %v10742_v51 }
 0x405   :  { %v7960_v6 = vmul.f32 -1.442695, %v3318_v33 }
 0x406   :  { %v3301_v45 = vpop.f32.mrf.mxu3 }
 0x407   :  { %v9330_v19 = vpop.eup %9329  ;;  %9331 = vpow2.f32 %v7960_v6 }
 0x408   :  { %v3403_v3 = vadd.f32 1.0, %v9330_v19 }
 0x40a   :  { %9333 = vrcp.f32 %v3403_v3  ;;  %v3416_v21 = vand.u32 2147483648, %v3403_v3  ;;  %v3414_v39 = vand.u32 2147483647, %v3403_v3  ;;  %vm3410_vm1 = vweird.f32 %v3403_v3 }
 0x40c   :  { %v3417_v47 = vor.u32 1.1754944e-38, %v3416_v21  ;;  %vm3415_vm3 = vcmp.eq.f32.partialorder %v3414_v39, 8.507059e+37  ;;  %v13145_v21 = vld [vmem:[#allocation173_spill] sm:$0xff] }
 0x40d   :  { %v9332_v30 = vpop.eup %9331  ;;  %v13147_v39 = vld [vmem:[#allocation181_spill] sm:$0xff] }
 0x40e   :  { %v3404_v14 = vadd.f32 1.0, %v9332_v30 }
 0x410   :  { %v9334_v63 = vpop.eup %9333  ;;  %9335 = vrcp.f32 %v3404_v14  ;;  %v3431_v49 = vand.u32 2147483648, %v3404_v14  ;;  %v3429_v16 = vand.u32 2147483647, %v3404_v14  ;;  %vm3425_vm5 = vweird.f32 %v3404_v14 }
 0x411   :  { %v3406_v29 = vmul.f32 %v9334_v63, %v3403_v3  ;;  %9337 = vtanh.f32 %v11179_v54  ;;  %vm3411_vm0 = vweird.f32 %v9334_v63 }
 0x412   :  { %vm3412_vm2 = vmor %vm3410_vm1, %vm3411_vm0  ;;  %9339 = vtanh.f32 %v11182_v40  ;;  %v3432_v45 = vor.u32 1.1754944e-38, %v3431_v49  ;;  %vm3430_vm7 = vcmp.eq.f32.partialorder %v3429_v16, 8.507059e+37  ;;  %v13156_v49 = vld [vmem:[#allocation196_spill] sm:$0xff]  ;;  %v13159_v16 = vld [vmem:[#allocation199_spill] sm:$0xff] }
 0x413   :  { %v3407_v2 = vsub.f32 1.0, %v3406_v29 }
 0x415   :  { %v3408_v13 = vmul.f32 %v9334_v63, %v3407_v2  ;;  %v13144_v2 = vld [vmem:[#allocation179_spill] sm:$0xff] }
 0x416   :  { %v9336_v23 = vpop.eup %9335 }
 0x417   :  { %v3409_v60 = vadd.f32 %v9334_v63, %v3408_v13  ;;  %v3421_v62 = vmul.f32 %v9336_v23, %v3404_v14  ;;  %v9338_v17 = vpop.eup %9337  ;;  %vm3426_vm4 = vweird.f32 %v9336_v23  ;;  %v13143_v14 = vld [vmem:[#allocation177_spill] sm:$0xff]  ;;  %v13146_v13 = vld [vmem:[#allocation175_spill] sm:$0xff] }
 0x418   :  { %vm3427_vm6 = vmor %vm3425_vm5, %vm3426_vm4  ;;  %v9340_v3 = vpop.eup %9339 }
 0x419   :  { %v3413_v24 = vsel %vm3412_vm2, %v9334_v63, %v3409_v60  ;;  %v3422_v18 = vsub.f32 1.0, %v3421_v62  ;;  %v13149_v60 = vld [vmem:[#allocation178_spill] sm:$0xff]  ;;  %v13150_v62 = vld [vmem:[#allocation180_spill] sm:$0xff] }
 0x41a   :  { %v3418_v25 = vsel %vm3415_vm3, %v3417_v47, %v3413_v24  ;;  %v13151_v47 = vld [vmem:[#allocation188_spill] sm:$0xff]  ;;  %v13152_v24 = vld [vmem:[#allocation190_spill] sm:$0xff] }
 0x41b   :  { %v3443_v27 = vmul.f32 %v9338_v17, %v3418_v25  ;;  %v3423_v42 = vmul.f32 %v9336_v23, %v3422_v18  ;;  %v13153_v18 = vld [vmem:[#allocation183_spill] sm:$0xff]  ;;  %v13155_v25 = vld [vmem:[#allocation193_spill] sm:$0xff] }
 0x41c   :  { %v13154_v17 = vld [vmem:[#allocation187_spill] sm:$0xff] }
 0x41d   :  { %v11190_v33 = vpack.c.bf16 %v3443_v27, %v3443_v27  ;;  %v3424_v6 = vadd.f32 %v9336_v23, %v3423_v42  ;;  %v13157_v27 = vld [vmem:[#allocation189_spill] sm:$0xff]  ;;  %v13158_v42 = vld [vmem:[#allocation191_spill] sm:$0xff] }
 0x41f   :  { %v3428_v19 = vsel %vm3427_vm6, %v9336_v23, %v3424_v6  ;;  %3466 = vmatmul.bf16.vlgmr.msra.gmra.mxu0 %v11190_v33  ;;  %3492 = vmatmul.bf16.vlgmr.msra.gmra.mxu2 %v11190_v33  ;;  %v13148_v23 = vld [vmem:[#allocation184_spill] sm:$0xff]  ;;  %v13160_v6 = vld [vmem:[#allocation201_spill] sm:$0xff] }
 0x420   :  { %v3433_v30 = vsel %vm3430_vm7, %v3432_v45, %v3428_v19  ;;  %3562 = vmatpush.bf16.msra.mxu0 %v12911_v61  ;;  %3588 = vmatpush.bf16.msra.mxu2 %v12912_v9  ;;  %v13161_v45 = vld [vmem:[#allocation195_spill] sm:$0xff]  ;;  %v13162_v19 = vld [vmem:[#allocation197_spill] sm:$0xff] }
 0x421   :  { %v3444_v63 = vmul.f32 %v9340_v3, %v3433_v30  ;;  %v13163_v3 = vld [vmem:[#allocation203_spill] sm:$0xff]  ;;  %v13164_v30 = vld [vmem:[#allocation206_spill] sm:$0xff] }
 0x423   :  { %v11196_v29 = vpack.c.bf16 %v3444_v63, %v3444_v63  ;;  %v13165_v63 = vld [vmem:[#allocation200_spill] sm:$0xff] }
 0x424   :  { %3563 = vmatpush.bf16.msra.mxu0 %v12913_v26  ;;  %3589 = vmatpush.bf16.msra.mxu2 %v12914_v46 }
 0x425   :  { %3479 = vmatmul.bf16.vlgmr.msra.gmra.mxu1 %v11196_v29  ;;  %3505 = vmatmul.bf16.vlgmr.msra.gmra.mxu3 %v11196_v29 }
 0x426   :  { %3575 = vmatpush.bf16.msra.mxu1 %v12915_v38  ;;  %3601 = vmatpush.bf16.msra.mxu3 %v12916_v37 }
 0x428   :  { %3564 = vmatpush.bf16.msra.mxu0 %v12917_v36  ;;  %3590 = vmatpush.bf16.msra.mxu2 %v12918_v10 }
 0x42a   :  { %3576 = vmatpush.bf16.msra.mxu1 %v12919_v32  ;;  %3602 = vmatpush.bf16.msra.mxu3 %v12920_v28 }
 0x42c   :  { %3565 = vmatpush.bf16.msra.mxu0 %v12921_v31  ;;  %3591 = vmatpush.bf16.msra.mxu2 %v12922_v7 }
 0x42e   :  { %3577 = vmatpush.bf16.msra.mxu1 %v12923_v57  ;;  %3603 = vmatpush.bf16.msra.mxu3 %v12924_v52 }
 0x42f   :  { %3518 = vmatmul.bf16.vlgmr.msrb.gmra.mxu0 %v11190_v33  ;;  %3544 = vmatmul.bf16.vlgmr.msrb.gmra.mxu2 %v11190_v33 }
 0x430   :  { %3566 = vmatpush.bf16.msra.mxu0 %v12925_v4  ;;  %3592 = vmatpush.bf16.msra.mxu2 %v12926_v53 }
 0x432   :  { %3578 = vmatpush.bf16.msra.mxu1 %v13028_v55  ;;  %3604 = vmatpush.bf16.msra.mxu3 %v13029_v56 }
 0x434   :  { %3567 = vmatpush.bf16.msra.mxu0 %v13030_v0  ;;  %3593 = vmatpush.bf16.msra.mxu2 %v13031_v48 }
 0x435   :  { %3531 = vmatmul.bf16.vlgmr.msrb.gmra.mxu1 %v11196_v29  ;;  %3557 = vmatmul.bf16.vlgmr.msrb.gmra.mxu3 %v11196_v29 }
 0x436   :  { %3579 = vmatpush.bf16.msra.mxu1 %v13032_v43  ;;  %3605 = vmatpush.bf16.msra.mxu3 %v13033_v34 }
 0x438   :  { %3568 = vmatpush.bf16.msra.mxu0 %v13034_v15  ;;  %3594 = vmatpush.bf16.msra.mxu2 %v13035_v12 }
 0x43a   :  { %3580 = vmatpush.bf16.msra.mxu1 %v13036_v1  ;;  %3606 = vmatpush.bf16.msra.mxu3 %v13037_v8 }
 0x43c   :  { %3569 = vmatpush.bf16.msra.mxu0 %v13038_v20  ;;  %3595 = vmatpush.bf16.msra.mxu2 %v13039_v11 }
 0x43e   :  { %3581 = vmatpush.bf16.msra.mxu1 %v13042_v58  ;;  %3607 = vmatpush.bf16.msra.mxu3 %v13043_v44 }
 0x43f   :  { %3570 = vmatmul.bf16.vlgmr.msra.gmra.mxu0 %v11190_v33  ;;  %3596 = vmatmul.bf16.vlgmr.msra.gmra.mxu2 %v11190_v33 }
 0x440   :  { %3614 = vmatpush.bf16.msrb.mxu0 %v13040_v59  ;;  %3640 = vmatpush.bf16.msrb.mxu2 %v13041_v50 }
 0x442   :  { %3582 = vmatpush.bf16.msra.mxu1 %v13046_v35  ;;  %3608 = vmatpush.bf16.msra.mxu3 %v13047_v22  ;;  %v13247_v22 = vld [vmem:[#allocation169_spill] sm:$0xff]  ;;  %v13248_v35 = vld [vmem:[#allocation172_spill] sm:$0xff] }
 0x444   :  { %3615 = vmatpush.bf16.msrb.mxu0 %v13143_v14  ;;  %3641 = vmatpush.bf16.msrb.mxu2 %v13144_v2 }
 0x445   :  { %3583 = vmatmul.bf16.vlgmr.msra.gmra.mxu1 %v11196_v29  ;;  %3609 = vmatmul.bf16.vlgmr.msra.gmra.mxu3 %v11196_v29 }
 0x446   :  { %3627 = vmatpush.bf16.msrb.mxu1 %v13145_v21  ;;  %3653 = vmatpush.bf16.msrb.mxu3 %v13146_v13 }
 0x448   :  { %3616 = vmatpush.bf16.msrb.mxu0 %v13147_v39  ;;  %3642 = vmatpush.bf16.msrb.mxu2 %v13148_v23 }
 0x44a   :  { %3628 = vmatpush.bf16.msrb.mxu1 %v13149_v60  ;;  %3654 = vmatpush.bf16.msrb.mxu3 %v13150_v62  ;;  %v13240_v60 = vld [vmem:[#allocation30_spill] sm:$0xff] }
 0x44c   :  { %3617 = vmatpush.bf16.msrb.mxu0 %v13151_v47  ;;  %3643 = vmatpush.bf16.msrb.mxu2 %v13152_v24 }
 0x44e   :  { %3629 = vmatpush.bf16.msrb.mxu1 %v13153_v18  ;;  %3655 = vmatpush.bf16.msrb.mxu3 %v13154_v17 }
 0x450   :  { %3618 = vmatpush.bf16.msrb.mxu0 %v13155_v25  ;;  %3644 = vmatpush.bf16.msrb.mxu2 %v13156_v49  ;;  %v13166_v25 = vld [vmem:[#allocation202_spill] sm:$0xff] }
 0x451   :  { %v13167_v49 = vld [vmem:[#allocation210_spill] sm:$0xff] }
 0x452   :  { %3630 = vmatpush.bf16.msrb.mxu1 %v13157_v27  ;;  %3656 = vmatpush.bf16.msrb.mxu3 %v13158_v42  ;;  %v13168_v27 = vld [vmem:[#allocation212_spill] sm:$0xff] }
 0x453   :  { %v13169_v42 = vld [vmem:[#allocation40_spill] sm:$0xff] }
 0x454   :  { %3619 = vmatpush.bf16.msrb.mxu0 %v13159_v16  ;;  %3645 = vmatpush.bf16.msrb.mxu2 %v13160_v6  ;;  %v13170_v16 = vld [vmem:[#allocation43_spill] sm:$0xff]  ;;  %v13171_v6 = vld [vmem:[#allocation205_spill] sm:$0xff] }
 0x456   :  { %3631 = vmatpush.bf16.msrb.mxu1 %v13161_v45  ;;  %3657 = vmatpush.bf16.msrb.mxu3 %v13162_v19  ;;  %v13172_v45 = vld [vmem:[#allocation209_spill] sm:$0xff] }
 0x458   :  { %3620 = vmatpush.bf16.msrb.mxu0 %v13163_v3  ;;  %3646 = vmatpush.bf16.msrb.mxu2 %v13164_v30  ;;  %v13173_v30 = vld [vmem:[#allocation45_spill] sm:$0xff] }
 0x45a   :  { %3632 = vmatpush.bf16.msrb.mxu1 %v13165_v63  ;;  %3658 = vmatpush.bf16.msrb.mxu3 %v13166_v25  ;;  %v13174_v63 = vld [vmem:[#allocation47_spill] sm:$0xff] }
 0x45b   :  { %v13175_v25 = vld [vmem:[#allocation211_spill] sm:$0xff] }
 0x45c   :  { %3621 = vmatpush.bf16.msrb.mxu0 %v13167_v49  ;;  %3647 = vmatpush.bf16.msrb.mxu2 %v13168_v27  ;;  %v13176_v49 = vld [vmem:[#allocation213_spill] sm:$0xff]  ;;  %v13177_v27 = vld [vmem:[#allocation42_spill] sm:$0xff] }
 0x45e   :  { %3633 = vmatpush.bf16.msrb.mxu1 %v13171_v6  ;;  %3659 = vmatpush.bf16.msrb.mxu3 %v13172_v45  ;;  %v13179_v45 = vld [vmem:[#allocation50_spill] sm:$0xff]  ;;  %v13180_v6 = vld [vmem:[#allocation53_spill] sm:$0xff] }
 0x45f   :  { %3622 = vmatmul.bf16.vlgmr.msrb.gmra.mxu0 %v11190_v33  ;;  %3648 = vmatmul.bf16.vlgmr.msrb.gmra.mxu2 %v11190_v33  ;;  %v13181_v33 = vld [vmem:[#allocation46_spill] sm:$0xff] }
 0x460   :  { %3821 = vmatpush.bf16.msra.mxu0 %v13169_v42  ;;  %3847 = vmatpush.bf16.msra.mxu2 %v13170_v16  ;;  %v13178_v42 = vld [vmem:[#allocation44_spill] sm:$0xff]  ;;  %v13188_v16 = vld [vmem:[#allocation63_spill] sm:$0xff] }
 0x462   :  { %3634 = vmatpush.bf16.msrb.mxu1 %v13175_v25  ;;  %3660 = vmatpush.bf16.msrb.mxu3 %v13176_v49  ;;  %v13184_v25 = vld [vmem:[#allocation57_spill] sm:$0xff]  ;;  %v13185_v49 = vld [vmem:[#allocation52_spill] sm:$0xff] }
 0x464   :  { %3822 = vmatpush.bf16.msra.mxu0 %v13173_v30  ;;  %3848 = vmatpush.bf16.msra.mxu2 %v13174_v63  ;;  %v13182_v30 = vld [vmem:[#allocation48_spill] sm:$0xff]  ;;  %v13183_v63 = vld [vmem:[#allocation55_spill] sm:$0xff] }
 0x465   :  { %3635 = vmatmul.bf16.vlgmr.msrb.gmra.mxu1 %v11196_v29  ;;  %3661 = vmatmul.bf16.vlgmr.msrb.gmra.mxu3 %v11196_v29  ;;  %v13189_v29 = vld [vmem:[#allocation56_spill] sm:$0xff] }
 0x466   :  { %3834 = vmatpush.bf16.msra.mxu1 %v13177_v27  ;;  %3860 = vmatpush.bf16.msra.mxu3 %v13178_v42  ;;  %v13186_v27 = vld [vmem:[#allocation54_spill] sm:$0xff]  ;;  %v13187_v42 = vld [vmem:[#allocation60_spill] sm:$0xff] }
 0x468   :  { %3823 = vmatpush.bf16.msra.mxu0 %v13179_v45  ;;  %3849 = vmatpush.bf16.msra.mxu2 %v13180_v6  ;;  %v13190_v45 = vld [vmem:[#allocation58_spill] sm:$0xff]  ;;  %v13191_v6 = vld [vmem:[#allocation65_spill] sm:$0xff] }
 0x46a   :  { %3835 = vmatpush.bf16.msra.mxu1 %v13181_v33  ;;  %3861 = vmatpush.bf16.msra.mxu3 %v13182_v30  ;;  %v13192_v33 = vld [vmem:[#allocation67_spill] sm:$0xff]  ;;  %v13193_v30 = vld [vmem:[#allocation62_spill] sm:$0xff] }
 0x46c   :  { %3824 = vmatpush.bf16.msra.mxu0 %v13183_v63  ;;  %3850 = vmatpush.bf16.msra.mxu2 %v13184_v25  ;;  %v13194_v63 = vld [vmem:[#allocation64_spill] sm:$0xff]  ;;  %v13195_v25 = vld [vmem:[#allocation70_spill] sm:$0xff] }
 0x46e   :  { %3836 = vmatpush.bf16.msra.mxu1 %v13185_v49  ;;  %3862 = vmatpush.bf16.msra.mxu3 %v13186_v27  ;;  %v13196_v49 = vld [vmem:[#allocation73_spill] sm:$0xff]  ;;  %v13197_v27 = vld [vmem:[#allocation66_spill] sm:$0xff] }
 0x470   :  { %3825 = vmatpush.bf16.msra.mxu0 %v13187_v42  ;;  %3851 = vmatpush.bf16.msra.mxu2 %v13188_v16  ;;  %v13198_v42 = vld [vmem:[#allocation68_spill] sm:$0xff]  ;;  %v13199_v16 = vld [vmem:[#allocation75_spill] sm:$0xff] }
 0x472   :  { %3837 = vmatpush.bf16.msra.mxu1 %v13189_v29  ;;  %3863 = vmatpush.bf16.msra.mxu3 %v13190_v45  ;;  %v13200_v29 = vld [vmem:[#allocation77_spill] sm:$0xff]  ;;  %v13201_v45 = vld [vmem:[#allocation79_spill] sm:$0xff] }
 0x474   :  { %3826 = vmatpush.bf16.msra.mxu0 %v13191_v6  ;;  %3852 = vmatpush.bf16.msra.mxu2 %v13192_v33  ;;  %v13202_v6 = vld [vmem:[#allocation82_spill] sm:$0xff]  ;;  %v13203_v33 = vld [vmem:[#allocation72_spill] sm:$0xff] }
 0x476   :  { %3838 = vmatpush.bf16.msra.mxu1 %v13193_v30  ;;  %3864 = vmatpush.bf16.msra.mxu3 %v13194_v63  ;;  %v13204_v30 = vld [vmem:[#allocation74_spill] sm:$0xff]  ;;  %v13205_v63 = vld [vmem:[#allocation85_spill] sm:$0xff] }
 0x478   :  { %3827 = vmatpush.bf16.msra.mxu0 %v13195_v25  ;;  %3853 = vmatpush.bf16.msra.mxu2 %v13196_v49  ;;  %v13206_v25 = vld [vmem:[#allocation87_spill] sm:$0xff]  ;;  %v13207_v49 = vld [vmem:[#allocation76_spill] sm:$0xff] }
 0x47a   :  { %3839 = vmatpush.bf16.msra.mxu1 %v13197_v27  ;;  %3865 = vmatpush.bf16.msra.mxu3 %v13198_v42  ;;  %v13208_v27 = vld [vmem:[#allocation78_spill] sm:$0xff]  ;;  %v13209_v42 = vld [vmem:[#allocation80_spill] sm:$0xff] }
 0x47c   :  { %3828 = vmatpush.bf16.msra.mxu0 %v13199_v16  ;;  %3854 = vmatpush.bf16.msra.mxu2 %v13200_v29  ;;  %v13210_v16 = vld [vmem:[#allocation84_spill] sm:$0xff]  ;;  %v13211_v29 = vld [vmem:[#allocation90_spill] sm:$0xff] }
 0x47e   :  { %3840 = vmatpush.bf16.msra.mxu1 %v13203_v33  ;;  %3866 = vmatpush.bf16.msra.mxu3 %v13204_v30  ;;  %v13214_v33 = vld [vmem:[#allocation88_spill] sm:$0xff]  ;;  %v13215_v30 = vld [vmem:[#allocation95_spill] sm:$0xff] }
 0x480   :  { %3873 = vmatpush.bf16.msrb.mxu0 %v13201_v45  ;;  %3899 = vmatpush.bf16.msrb.mxu2 %v13202_v6  ;;  %v13212_v45 = vld [vmem:[#allocation93_spill] sm:$0xff]  ;;  %v13213_v6 = vld [vmem:[#allocation86_spill] sm:$0xff] }
 0x482   :  { %3841 = vmatpush.bf16.msra.mxu1 %v13207_v49  ;;  %3867 = vmatpush.bf16.msra.mxu3 %v13208_v27  ;;  %v13218_v49 = vld [vmem:[#allocation94_spill] sm:$0xff]  ;;  %v13219_v27 = vld [vmem:[#allocation100_spill] sm:$0xff] }
 0x484   :  { %3874 = vmatpush.bf16.msrb.mxu0 %v13205_v63  ;;  %3900 = vmatpush.bf16.msrb.mxu2 %v13206_v25  ;;  %v13216_v63 = vld [vmem:[#allocation97_spill] sm:$0xff]  ;;  %v13217_v25 = vld [vmem:[#allocation92_spill] sm:$0xff] }
 0x486   :  { %3886 = vmatpush.bf16.msrb.mxu1 %v13209_v42  ;;  %3912 = vmatpush.bf16.msrb.mxu3 %v13210_v16  ;;  %v13220_v42 = vld [vmem:[#allocation103_spill] sm:$0xff]  ;;  %v13221_v16 = vld [vmem:[#allocation96_spill] sm:$0xff] }
 0x488   :  { %3875 = vmatpush.bf16.msrb.mxu0 %v13211_v29  ;;  %3901 = vmatpush.bf16.msrb.mxu2 %v13212_v45  ;;  %v13222_v29 = vld [vmem:[#allocation98_spill] sm:$0xff]  ;;  %v13223_v45 = vld [vmem:[#allocation105_spill] sm:$0xff] }
 0x48a   :  { %3887 = vmatpush.bf16.msrb.mxu1 %v13213_v6  ;;  %3913 = vmatpush.bf16.msrb.mxu3 %v13214_v33  ;;  %v13224_v6 = vld [vmem:[#allocation107_spill] sm:$0xff]  ;;  %v13225_v33 = vld [vmem:[#allocation102_spill] sm:$0xff] }
 0x48c   :  { %3876 = vmatpush.bf16.msrb.mxu0 %v13215_v30  ;;  %3902 = vmatpush.bf16.msrb.mxu2 %v13216_v63  ;;  %v13226_v30 = vld [vmem:[#allocation104_spill] sm:$0xff]  ;;  %v13227_v63 = vld [vmem:[#allocation110_spill] sm:$0xff] }
 0x48e   :  { %3888 = vmatpush.bf16.msrb.mxu1 %v13217_v25  ;;  %3914 = vmatpush.bf16.msrb.mxu3 %v13218_v49  ;;  %v13228_v25 = vld [vmem:[#allocation113_spill] sm:$0xff]  ;;  %v13229_v49 = vld [vmem:[#allocation106_spill] sm:$0xff] }
 0x490   :  { %3877 = vmatpush.bf16.msrb.mxu0 %v13219_v27  ;;  %3903 = vmatpush.bf16.msrb.mxu2 %v13220_v42  ;;  %v13230_v27 = vld [vmem:[#allocation108_spill] sm:$0xff]  ;;  %v13231_v42 = vld [vmem:[#allocation115_spill] sm:$0xff] }
 0x492   :  { %3889 = vmatpush.bf16.msrb.mxu1 %v13221_v16  ;;  %3915 = vmatpush.bf16.msrb.mxu3 %v13222_v29  ;;  %v13232_v16 = vld [vmem:[#allocation117_spill] sm:$0xff]  ;;  %v13233_v29 = vld [vmem:[#allocation112_spill] sm:$0xff] }
 0x494   :  { %3878 = vmatpush.bf16.msrb.mxu0 %v13223_v45  ;;  %3904 = vmatpush.bf16.msrb.mxu2 %v13224_v6  ;;  %v13234_v45 = vld [vmem:[#allocation114_spill] sm:$0xff]  ;;  %v13235_v6 = vld [vmem:[#allocation116_spill] sm:$0xff] }
 0x496   :  { %3890 = vmatpush.bf16.msrb.mxu1 %v13225_v33  ;;  %3916 = vmatpush.bf16.msrb.mxu3 %v13226_v30  ;;  %v13236_v33 = vld [vmem:[#allocation118_spill] sm:$0xff] }
 0x498   :  { %3879 = vmatpush.bf16.msrb.mxu0 %v13227_v63  ;;  %3905 = vmatpush.bf16.msrb.mxu2 %v13228_v25 }
 0x49a   :  { %3891 = vmatpush.bf16.msrb.mxu1 %v13229_v49  ;;  %3917 = vmatpush.bf16.msrb.mxu3 %v13230_v27  ;;  %v13237_v49 = vld [vmem:[#allocation36_spill] sm:$0xff]  ;;  %v13238_v27 = vld [vmem:[#allocation238_spill] sm:$0xff] }
 0x49c   :  { %3880 = vmatpush.bf16.msrb.mxu0 %v13231_v42  ;;  %3906 = vmatpush.bf16.msrb.mxu2 %v13232_v16  ;;  %v3467_v30 = vpop.f32.mrf.mxu0 }
 0x49e   :  { %3892 = vmatpush.bf16.msrb.mxu1 %v13233_v29  ;;  %3918 = vmatpush.bf16.msrb.mxu3 %v13234_v45  ;;  %v13239_v45 = vld [vmem:[#allocation37_spill] sm:$0xff] }
 0x4a2   :  { %3893 = vmatpush.bf16.msrb.mxu1 %v13235_v6  ;;  %3919 = vmatpush.bf16.msrb.mxu3 %v13236_v33  ;;  %v3480_v63 = vpop.f32.mrf.mxu1  ;;  %v3493_v3 = vpop.f32.mrf.mxu2 }
 0x4a3   :  { %v3481_v25 = vadd.f32 %v3480_v63, %v3467_v30 }
 0x4a4   :  { %v3469_v19 = vpop.f32.mrf.mxu0 }
 0x4a5   :  { %v3666_v17 = vadd.f32 %v3481_v25, %v13237_v49 }
 0x4a7   :  { %v3674_v18 = vadd.f32 %v3666_v17, %v13238_v27 }
 0x4a8   :  { %v3506_v42 = vpop.f32.mrf.mxu3 }
 0x4a9   :  { %v7961_v24 = vmul.f32 -1.442695, %v3674_v18  ;;  %v3507_v16 = vadd.f32 %v3506_v42, %v3493_v3  ;;  %v13241_v18 = vld [vmem:[#allocation101_spill] sm:$0xff]  ;;  %v13242_v3 = vld [vmem:[#allocation31_spill] sm:$0xff] }
 0x4aa   :  { %v3482_v47 = vpop.f32.mrf.mxu1  ;;  %v3495_v29 = vpop.f32.mrf.mxu2 }
 0x4ab   :  { %9341 = vpow2.f32 %v7961_v24  ;;  %v3667_v62 = vadd.f32 %v3507_v16, %v13239_v45  ;;  %v13244_v29 = vld [vmem:[#allocation71_spill] sm:$0xff] }
 0x4ac   :  { %v3519_v6 = vpop.f32.mrf.mxu0 }
 0x4ad   :  { %v3675_v33 = vadd.f32 %v3667_v62, %v13240_v60 }
 0x4af   :  { %v7962_v23 = vmul.f32 -1.442695, %v3675_v33  ;;  %v13243_v33 = vld [vmem:[#allocation109_spill] sm:$0xff] }
 0x4b0   :  { %v3508_v39 = vpop.f32.mrf.mxu3 }
 0x4b1   :  { %v9342_v13 = vpop.eup %9341  ;;  %9343 = vpow2.f32 %v7962_v23 }
 0x4b2   :  { %v3532_v19 = vpop.f32.mrf.mxu1  ;;  %v3545_v30 = vpop.f32.mrf.mxu2  ;;  %v11342_v49 = vadd.f32 1.0, %v9342_v13 }
 0x4b3   :  { %v3533_v25 = vadd.f32 %v3532_v19, %v3519_v6 }
 0x4b4   :  { %v3521_v17 = vpop.f32.mrf.mxu0  ;;  %9345 = vrcp.f32 %v11342_v49  ;;  %vm3695_vm9 = vweird.f32 %v11342_v49 }
 0x4b5   :  { %v3668_v42 = vadd.f32 %v3533_v25, %v13241_v18 }
 0x4b7   :  { %v9344_v47 = vpop.eup %9343  ;;  %v3676_v24 = vadd.f32 %v3668_v42, %v13242_v3 }
 0x4b8   :  { %v3558_v16 = vpop.f32.mrf.mxu3  ;;  %v11347_v63 = vadd.f32 1.0, %v9344_v47 }
 0x4b9   :  { %v7963_v45 = vmul.f32 -1.442695, %v3676_v24  ;;  %v3559_v62 = vadd.f32 %v3558_v16, %v3545_v30 }
 0x4ba   :  { %v3534_v39 = vpop.f32.mrf.mxu1  ;;  %v3547_v23 = vpop.f32.mrf.mxu2  ;;  %vm3710_vm13 = vweird.f32 %v11347_v63 }
 0x4bb   :  { %9347 = vpow2.f32 %v7963_v45  ;;  %v3669_v6 = vadd.f32 %v3559_v62, %v13243_v33  ;;  %v11351_v17 = vpop.eup %9345  ;;  %v13245_v62 = vld [vmem:[#allocation159_spill] sm:$0xff]  ;;  %v13246_v39 = vld [vmem:[#allocation161_spill] sm:$0xff] }
 0x4bc   :  { %v3571_v13 = vpop.f32.mrf.mxu0  ;;  %9349 = vrcp.f32 %v11347_v63  ;;  %v3691_v30 = vmul.f32 %v11351_v17, %v11342_v49  ;;  %v1322_v23 = vadd.f32 %v13246_v39, %v13245_v62  ;;  %v1380_v62 = vadd.f32 %v13248_v35, %v13247_v22  ;;  %v13249_v35 = vld [vmem:[#allocation129_spill] sm:$0xff] }
 0x4bd   :  { %v3677_v19 = vadd.f32 %v3669_v6, %v13244_v29  ;;  %vm3696_vm8 = vweird.f32 %v11351_v17 }
 0x4be   :  { %v3692_v29 = vsub.f32 1.0, %v3691_v30  ;;  %vm11376_vm11 = vmor %vm3695_vm9, %vm3696_vm8 }
 0x4bf   :  { %v7964_v25 = vmul.f32 -1.442695, %v3677_v19 }
 0x4c0   :  { %v3560_v18 = vpop.f32.mrf.mxu3 }
 0x4c1   :  { %v9348_v42 = vpop.eup %9347  ;;  %9351 = vpow2.f32 %v7964_v25 }
 0x4c2   :  { %v3726_v47 = vadd.f32 1.0, %v9348_v42  ;;  %v3597_v24 = vpop.f32.mrf.mxu2  ;;  %v3584_v16 = vpop.f32.mrf.mxu1  ;;  %v3693_v42 = vmul.f32 %v11351_v17, %v3692_v29 }
 0x4c3   :  { %v11356_v45 = vpop.eup %9349  ;;  %v3585_v33 = vadd.f32 %v3584_v16, %v3571_v13 }
 0x4c4   :  { %9353 = vrcp.f32 %v3726_v47  ;;  %v3573_v6 = vpop.f32.mrf.mxu0  ;;  %v3706_v18 = vmul.f32 %v11356_v45, %v11347_v63  ;;  %v3694_v29 = vadd.f32 %v11351_v17, %v3693_v42  ;;  %vm3733_vm14 = vweird.f32 %v3726_v47 }
 0x4c5   :  { %v3670_v3 = vadd.f32 %v3585_v33, %v1322_v23  ;;  %v3699_v33 = vand.u32 2147483647, %v11342_v49  ;;  %v3701_v6 = vand.u32 2147483648, %v11342_v49  ;;  %v3714_v49 = vand.u32 2147483647, %v11347_v63 }
 0x4c6   :  { %v3707_v16 = vsub.f32 1.0, %v3706_v18  ;;  %vm3711_vm0 = vweird.f32 %v11356_v45 }
 0x4c7   :  { %v9352_v19 = vpop.eup %9351  ;;  %v3678_v25 = vadd.f32 %v3670_v3, %v13132_v41  ;;  %v3739_v41 = vand.u32 2147483648, %v3726_v47  ;;  %vm11380_vm12 = vcmp.eq.f32.partialorder %v3699_v33, 8.507059e+37  ;;  %v3702_v42 = vor.u32 1.1754944e-38, %v3701_v6  ;;  %vm3712_vm3 = vmor %vm3710_vm13, %vm3711_vm0 }
 0x4c8   :  { %v11362_v60 = vadd.f32 1.0, %v9352_v19  ;;  %v3610_v27 = vpop.f32.mrf.mxu3  ;;  %v3708_v18 = vmul.f32 %v11356_v45, %v3707_v16  ;;  %v3716_v6 = vand.u32 2147483648, %v11347_v63  ;;  %vm3715_vm6 = vcmp.eq.f32.partialorder %v3714_v49, 8.507059e+37 }
 0x4c9   :  { %v3611_v13 = vadd.f32 %v3610_v27, %v3597_v24  ;;  %v3737_v24 = vand.u32 2147483647, %v3726_v47  ;;  %v3740_v33 = vor.u32 1.1754944e-38, %v3739_v41 }
 0x4ca   :  { %v9354_v21 = vpop.eup %9353  ;;  %9355 = vrcp.f32 %v11362_v60  ;;  %v3599_v30 = vpop.f32.mrf.mxu2  ;;  %v3754_v2 = vand.u32 2147483648, %v11362_v60  ;;  %vm3748_vm4 = vweird.f32 %v11362_v60 }
 0x4cb   :  { %v3729_v39 = vmul.f32 %v9354_v21, %v3726_v47  ;;  %v3586_v23 = vpop.f32.mrf.mxu1  ;;  %9357 = vtanh.f32 %v3678_v25  ;;  %v3671_v3 = vadd.f32 %v3611_v13, %v1380_v62  ;;  %vm3734_vm10 = vweird.f32 %v9354_v21 }
 0x4cc   :  { %v3698_v13 = vsel %vm11376_vm11, %v11351_v17, %v3694_v29  ;;  %vm3735_vm15 = vmor %vm3733_vm14, %vm3734_vm10  ;;  %vm3738_vm1 = vcmp.eq.f32.partialorder %v3737_v24, 8.507059e+37  ;;  %v3709_v47 = vadd.f32 %v11356_v45, %v3708_v18  ;;  %v3755_v18 = vor.u32 1.1754944e-38, %v3754_v2 }
 0x4cd   :  { %v3730_v19 = vsub.f32 1.0, %v3729_v39  ;;  %v3679_v22 = vadd.f32 %v3671_v3, %v13249_v35  ;;  %v3703_v17 = vsel %vm11380_vm12, %v3702_v42, %v3698_v13  ;;  %v3717_v25 = vor.u32 1.1754944e-38, %v3716_v6  ;;  %v13256_v6 = vld [vmem:[#allocation224_spill] sm:$0xff] }
 0x4cf   :  { %v3731_v27 = vmul.f32 %v9354_v21, %v3730_v19  ;;  %9359 = vtanh.f32 %v3679_v22  ;;  %v3713_v22 = vsel %vm3712_vm3, %v11356_v45, %v3709_v47  ;;  %v13255_v45 = vld [vmem:[#allocation223_spill] sm:$0xff] }
 0x4d0   :  { %v9356_v30 = vpop.eup %9355  ;;  %v3612_v39 = vpop.f32.mrf.mxu3 }
 0x4d1   :  { %v3744_v62 = vmul.f32 %v9356_v30, %v11362_v60  ;;  %v3732_v16 = vadd.f32 %v9354_v21, %v3731_v27  ;;  %v9358_v3 = vpop.eup %9357  ;;  %v3752_v27 = vand.u32 2147483647, %v11362_v60  ;;  %vm3749_vm2 = vweird.f32 %v9356_v30 }
 0x4d2   :  { %v3800_v39 = vmul.f32 %v9358_v3, %v3703_v17  ;;  %vm3750_vm5 = vmor %vm3748_vm4, %vm3749_vm2 }
 0x4d3   :  { %v3745_v19 = vsub.f32 1.0, %v3744_v62  ;;  %v3736_v35 = vsel %vm3735_vm15, %v9354_v21, %v3732_v16  ;;  %vm3753_vm7 = vcmp.eq.f32.partialorder %v3752_v27, 8.507059e+37  ;;  %v3718_v62 = vsel %vm3715_vm6, %v3717_v25, %v3713_v22  ;;  %v13257_v27 = vld [vmem:[#allocation225_spill] sm:$0xff] }
 0x4d4   :  { %v3741_v29 = vsel %vm3738_vm1, %v3740_v33, %v3736_v35 }
 0x4d5   :  { %v3746_v23 = vmul.f32 %v9356_v30, %v3745_v19  ;;  %v3798_v41 = vmul.f32 %v3741_v29, %v11179_v54  ;;  %v9360_v35 = vpop.eup %9359  ;;  %v13254_v19 = vld [vmem:[#allocation221_spill] sm:$0xff] }
 0x4d6   :  { %v3801_v16 = vmul.f32 %v9360_v35, %v3718_v62  ;;  %v1438_v47 = vadd.f32 %v13255_v45, %v13254_v19 }
 0x4d7   :  { %v11404_v21 = vadd.f32 %v3800_v39, %v3798_v41  ;;  %v3747_v24 = vadd.f32 %v9356_v30, %v3746_v23  ;;  %v1496_v23 = vadd.f32 %v13257_v27, %v13256_v6 }
 0x4d9   :  { %v3751_v42 = vsel %vm3750_vm5, %v9356_v30, %v3747_v24 }
 0x4da   :  { %v3756_v13 = vsel %vm3753_vm7, %v3755_v18, %v3751_v42 }
 0x4db   :  { %v3799_v63 = vmul.f32 %v3756_v13, %v11182_v40 }
 0x4dc   :  { %v3623_v54 = vpop.f32.mrf.mxu0 }
 0x4dd   :  { %v11408_v3 = vadd.f32 %v3801_v16, %v3799_v63 }
 0x4e2   :  { %v3636_v60 = vpop.f32.mrf.mxu1  ;;  %v3649_v33 = vpop.f32.mrf.mxu2 }
 0x4e3   :  { %v3637_v17 = vadd.f32 %v3636_v60, %v3623_v54 }
 0x4e4   :  { %v3625_v29 = vpop.f32.mrf.mxu0 }
 0x4e5   :  { %v3672_v2 = vadd.f32 %v3637_v17, %v1438_v47 }
 0x4e7   :  { %v3680_v49 = vadd.f32 %v3672_v2, %v10737_v5 }
 0x4e8   :  { %v3662_v30 = vpop.f32.mrf.mxu3 }
 0x4e9   :  { %v7965_v41 = vmul.f32 -1.442695, %v3680_v49  ;;  %v3663_v39 = vadd.f32 %v3662_v30, %v3649_v33 }
 0x4ea   :  { %v3638_v40 = vpop.f32.mrf.mxu1  ;;  %v3651_v22 = vpop.f32.mrf.mxu2 }
 0x4eb   :  { %9361 = vpow2.f32 %v7965_v41  ;;  %v3673_v24 = vadd.f32 %v3663_v39, %v1496_v23 }
 0x4ed   :  { %v3681_v35 = vadd.f32 %v3673_v24, %v10742_v51 }
 0x4ef   :  { %v7966_v18 = vmul.f32 -1.442695, %v3681_v35 }
 0x4f0   :  { %v3664_v25 = vpop.f32.mrf.mxu3 }
 0x4f1   :  { %v9362_v42 = vpop.eup %9361  ;;  %9363 = vpow2.f32 %v7966_v18 }
 0x4f2   :  { %v3766_v54 = vadd.f32 1.0, %v9362_v42 }
 0x4f4   :  { %9365 = vrcp.f32 %v3766_v54  ;;  %v3779_v33 = vand.u32 2147483648, %v3766_v54  ;;  %v3777_v45 = vand.u32 2147483647, %v3766_v54  ;;  %vm3773_vm9 = vweird.f32 %v3766_v54 }
 0x4f6   :  { %v3780_v2 = vor.u32 1.1754944e-38, %v3779_v33  ;;  %vm3778_vm11 = vcmp.eq.f32.partialorder %v3777_v45, 8.507059e+37  ;;  %v13262_v33 = vld [vmem:[#allocation175_spill] sm:$0xff]  ;;  %v13264_v45 = vld [vmem:[#allocation184_spill] sm:$0xff] }
 0x4f7   :  { %v9364_v62 = vpop.eup %9363 }
 0x4f8   :  { %v3767_v13 = vadd.f32 1.0, %v9364_v62 }
 0x4fa   :  { %v9366_v63 = vpop.eup %9365  ;;  %9367 = vrcp.f32 %v3767_v13  ;;  %v3794_v23 = vand.u32 2147483648, %v3767_v13  ;;  %v3792_v40 = vand.u32 2147483647, %v3767_v13  ;;  %vm3788_vm13 = vweird.f32 %v3767_v13 }
 0x4fb   :  { %v3769_v16 = vmul.f32 %v9366_v63, %v3766_v54  ;;  %9369 = vtanh.f32 %v11404_v21  ;;  %vm3774_vm8 = vweird.f32 %v9366_v63 }
 0x4fc   :  { %vm3775_vm10 = vmor %vm3773_vm9, %vm3774_vm8  ;;  %9371 = vtanh.f32 %v11408_v3  ;;  %v3795_v35 = vor.u32 1.1754944e-38, %v3794_v23  ;;  %vm3793_vm15 = vcmp.eq.f32.partialorder %v3792_v40, 8.507059e+37  ;;  %v13273_v23 = vld [vmem:[#allocation189_spill] sm:$0xff] }
 0x4fd   :  { %v3770_v60 = vsub.f32 1.0, %v3769_v16  ;;  %v13260_v16 = vld [vmem:[#allocation170_spill] sm:$0xff]  ;;  %v13276_v40 = vld [vmem:[#allocation201_spill] sm:$0xff] }
 0x4ff   :  { %v3771_v19 = vmul.f32 %v9366_v63, %v3770_v60  ;;  %v13261_v60 = vld [vmem:[#allocation173_spill] sm:$0xff] }
 0x500   :  { %v9368_v47 = vpop.eup %9367 }
 0x501   :  { %v3772_v17 = vadd.f32 %v9366_v63, %v3771_v19  ;;  %v3784_v29 = vmul.f32 %v9368_v47, %v3767_v13  ;;  %v9370_v6 = vpop.eup %9369  ;;  %vm3789_vm12 = vweird.f32 %v9368_v47  ;;  %v13258_v13 = vld [vmem:[#allocation179_spill] sm:$0xff]  ;;  %v13263_v19 = vld [vmem:[#allocation181_spill] sm:$0xff] }
 0x502   :  { %vm3790_vm14 = vmor %vm3788_vm13, %vm3789_vm12  ;;  %v9372_v25 = vpop.eup %9371 }
 0x503   :  { %v3776_v49 = vsel %vm3775_vm10, %v9366_v63, %v3772_v17  ;;  %v3785_v30 = vsub.f32 1.0, %v3784_v29  ;;  %v13259_v63 = vld [vmem:[#allocation167_spill] sm:$0xff]  ;;  %v13266_v17 = vld [vmem:[#allocation180_spill] sm:$0xff] }
 0x504   :  { %v3781_v27 = vsel %vm3778_vm11, %v3780_v2, %v3776_v49  ;;  %v13267_v29 = vld [vmem:[#allocation188_spill] sm:$0xff]  ;;  %v13268_v2 = vld [vmem:[#allocation190_spill] sm:$0xff]  ;;  %v13269_v49 = vld [vmem:[#allocation183_spill] sm:$0xff] }
 0x505   :  { %v3806_v41 = vmul.f32 %v9370_v6, %v3781_v27  ;;  %v3786_v39 = vmul.f32 %v9368_v47, %v3785_v30  ;;  %v13270_v30 = vld [vmem:[#allocation187_spill] sm:$0xff]  ;;  %v13271_v6 = vld [vmem:[#allocation193_spill] sm:$0xff]  ;;  %v13272_v27 = vld [vmem:[#allocation196_spill] sm:$0xff] }
 0x507   :  { %v11418_v22 = vpack.c.bf16 %v3806_v41, %v3806_v41  ;;  %v3787_v24 = vadd.f32 %v9368_v47, %v3786_v39  ;;  %v13274_v41 = vld [vmem:[#allocation191_spill] sm:$0xff] }
 0x508   :  { %v13275_v39 = vld [vmem:[#allocation199_spill] sm:$0xff] }
 0x509   :  { %v3791_v18 = vsel %vm3790_vm14, %v9368_v47, %v3787_v24  ;;  %3829 = vmatmul.bf16.vlgmr.msra.gmra.mxu0 %v11418_v22  ;;  %3855 = vmatmul.bf16.vlgmr.msra.gmra.mxu2 %v11418_v22  ;;  %v13265_v47 = vld [vmem:[#allocation178_spill] sm:$0xff]  ;;  %v13277_v24 = vld [vmem:[#allocation195_spill] sm:$0xff] }
 0x50a   :  { %v3796_v42 = vsel %vm3793_vm15, %v3795_v35, %v3791_v18  ;;  %3925 = vmatpush.bf16.msra.mxu0 %v12911_v61  ;;  %3951 = vmatpush.bf16.msra.mxu2 %v12912_v9  ;;  %v13278_v35 = vld [vmem:[#allocation197_spill] sm:$0xff]  ;;  %v13279_v18 = vld [vmem:[#allocation203_spill] sm:$0xff] }
 0x50b   :  { %v3807_v54 = vmul.f32 %v9372_v25, %v3796_v42  ;;  %v13280_v25 = vld [vmem:[#allocation206_spill] sm:$0xff]  ;;  %v13281_v42 = vld [vmem:[#allocation200_spill] sm:$0xff] }
 0x50d   :  { %v11424_v62 = vpack.c.bf16 %v3807_v54, %v3807_v54  ;;  %v13282_v54 = vld [vmem:[#allocation202_spill] sm:$0xff] }
 0x50e   :  { %3926 = vmatpush.bf16.msra.mxu0 %v12913_v26  ;;  %3952 = vmatpush.bf16.msra.mxu2 %v12914_v46 }
 0x50f   :  { %3842 = vmatmul.bf16.vlgmr.msra.gmra.mxu1 %v11424_v62  ;;  %3868 = vmatmul.bf16.vlgmr.msra.gmra.mxu3 %v11424_v62 }
 0x510   :  { %3938 = vmatpush.bf16.msra.mxu1 %v12915_v38  ;;  %3964 = vmatpush.bf16.msra.mxu3 %v12916_v37 }
 0x512   :  { %3927 = vmatpush.bf16.msra.mxu0 %v12917_v36  ;;  %3953 = vmatpush.bf16.msra.mxu2 %v12918_v10 }
 0x514   :  { %3939 = vmatpush.bf16.msra.mxu1 %v12919_v32  ;;  %3965 = vmatpush.bf16.msra.mxu3 %v12920_v28 }
 0x516   :  { %3928 = vmatpush.bf16.msra.mxu0 %v12921_v31  ;;  %3954 = vmatpush.bf16.msra.mxu2 %v12922_v7 }
 0x518   :  { %3940 = vmatpush.bf16.msra.mxu1 %v12923_v57  ;;  %3966 = vmatpush.bf16.msra.mxu3 %v12924_v52 }
 0x519   :  { %3881 = vmatmul.bf16.vlgmr.msrb.gmra.mxu0 %v11418_v22  ;;  %3907 = vmatmul.bf16.vlgmr.msrb.gmra.mxu2 %v11418_v22 }
 0x51a   :  { %3929 = vmatpush.bf16.msra.mxu0 %v12925_v4  ;;  %3955 = vmatpush.bf16.msra.mxu2 %v12926_v53 }
 0x51c   :  { %3941 = vmatpush.bf16.msra.mxu1 %v13028_v55  ;;  %3967 = vmatpush.bf16.msra.mxu3 %v13029_v56 }
 0x51e   :  { %3930 = vmatpush.bf16.msra.mxu0 %v13030_v0  ;;  %3956 = vmatpush.bf16.msra.mxu2 %v13031_v48 }
 0x51f   :  { %3894 = vmatmul.bf16.vlgmr.msrb.gmra.mxu1 %v11424_v62  ;;  %3920 = vmatmul.bf16.vlgmr.msrb.gmra.mxu3 %v11424_v62 }
 0x520   :  { %3942 = vmatpush.bf16.msra.mxu1 %v13032_v43  ;;  %3968 = vmatpush.bf16.msra.mxu3 %v13033_v34 }
 0x522   :  { %3931 = vmatpush.bf16.msra.mxu0 %v13034_v15  ;;  %3957 = vmatpush.bf16.msra.mxu2 %v13035_v12 }
 0x524   :  { %3943 = vmatpush.bf16.msra.mxu1 %v13036_v1  ;;  %3969 = vmatpush.bf16.msra.mxu3 %v13037_v8 }
 0x526   :  { %3932 = vmatpush.bf16.msra.mxu0 %v13038_v20  ;;  %3958 = vmatpush.bf16.msra.mxu2 %v13039_v11 }
 0x528   :  { %3944 = vmatpush.bf16.msra.mxu1 %v13042_v58  ;;  %3970 = vmatpush.bf16.msra.mxu3 %v13043_v44 }
 0x529   :  { %3933 = vmatmul.bf16.vlgmr.msra.gmra.mxu0 %v11418_v22  ;;  %3959 = vmatmul.bf16.vlgmr.msra.gmra.mxu2 %v11418_v22 }
 0x52a   :  { %3977 = vmatpush.bf16.msrb.mxu0 %v13040_v59  ;;  %4003 = vmatpush.bf16.msrb.mxu2 %v13041_v50 }
 0x52c   :  { %3945 = vmatpush.bf16.msra.mxu1 %v13259_v63  ;;  %3971 = vmatpush.bf16.msra.mxu3 %v13260_v16 }
 0x52e   :  { %3978 = vmatpush.bf16.msrb.mxu0 %v13143_v14  ;;  %4004 = vmatpush.bf16.msrb.mxu2 %v13258_v13 }
 0x52f   :  { %3946 = vmatmul.bf16.vlgmr.msra.gmra.mxu1 %v11424_v62  ;;  %3972 = vmatmul.bf16.vlgmr.msra.gmra.mxu3 %v11424_v62 }
 0x530   :  { %3990 = vmatpush.bf16.msrb.mxu1 %v13261_v60  ;;  %4016 = vmatpush.bf16.msrb.mxu3 %v13262_v33 }
 0x532   :  { %3979 = vmatpush.bf16.msrb.mxu0 %v13263_v19  ;;  %4005 = vmatpush.bf16.msrb.mxu2 %v13264_v45 }
 0x534   :  { %3991 = vmatpush.bf16.msrb.mxu1 %v13265_v47  ;;  %4017 = vmatpush.bf16.msrb.mxu3 %v13266_v17  ;;  %v13356_v17 = vld [vmem:[#allocation30_spill] sm:$0xff] }
 0x536   :  { %3980 = vmatpush.bf16.msrb.mxu0 %v13267_v29  ;;  %4006 = vmatpush.bf16.msrb.mxu2 %v13268_v2 }
 0x538   :  { %3992 = vmatpush.bf16.msrb.mxu1 %v13269_v49  ;;  %4018 = vmatpush.bf16.msrb.mxu3 %v13270_v30 }
 0x53a   :  { %3981 = vmatpush.bf16.msrb.mxu0 %v13271_v6  ;;  %4007 = vmatpush.bf16.msrb.mxu2 %v13272_v27  ;;  %v13283_v27 = vld [vmem:[#allocation210_spill] sm:$0xff] }
 0x53c   :  { %3993 = vmatpush.bf16.msrb.mxu1 %v13273_v23  ;;  %4019 = vmatpush.bf16.msrb.mxu3 %v13274_v41  ;;  %v13284_v23 = vld [vmem:[#allocation212_spill] sm:$0xff] }
 0x53d   :  { %v13285_v41 = vld [vmem:[#allocation40_spill] sm:$0xff] }
 0x53e   :  { %3982 = vmatpush.bf16.msrb.mxu0 %v13275_v39  ;;  %4008 = vmatpush.bf16.msrb.mxu2 %v13276_v40  ;;  %v13286_v39 = vld [vmem:[#allocation43_spill] sm:$0xff]  ;;  %v13287_v40 = vld [vmem:[#allocation205_spill] sm:$0xff] }
 0x540   :  { %3994 = vmatpush.bf16.msrb.mxu1 %v13277_v24  ;;  %4020 = vmatpush.bf16.msrb.mxu3 %v13278_v35  ;;  %v13288_v24 = vld [vmem:[#allocation209_spill] sm:$0xff] }
 0x542   :  { %3983 = vmatpush.bf16.msrb.mxu0 %v13279_v18  ;;  %4009 = vmatpush.bf16.msrb.mxu2 %v13280_v25  ;;  %v13289_v25 = vld [vmem:[#allocation45_spill] sm:$0xff] }
 0x544   :  { %3995 = vmatpush.bf16.msrb.mxu1 %v13281_v42  ;;  %4021 = vmatpush.bf16.msrb.mxu3 %v13282_v54  ;;  %v13290_v42 = vld [vmem:[#allocation47_spill] sm:$0xff] }
 0x545   :  { %v13291_v54 = vld [vmem:[#allocation211_spill] sm:$0xff] }
 0x546   :  { %3984 = vmatpush.bf16.msrb.mxu0 %v13283_v27  ;;  %4010 = vmatpush.bf16.msrb.mxu2 %v13284_v23  ;;  %v13292_v27 = vld [vmem:[#allocation213_spill] sm:$0xff]  ;;  %v13293_v23 = vld [vmem:[#allocation42_spill] sm:$0xff] }
 0x548   :  { %3996 = vmatpush.bf16.msrb.mxu1 %v13287_v40  ;;  %4022 = vmatpush.bf16.msrb.mxu3 %v13288_v24  ;;  %v13295_v24 = vld [vmem:[#allocation50_spill] sm:$0xff]  ;;  %v13296_v40 = vld [vmem:[#allocation53_spill] sm:$0xff] }
 0x549   :  { %3985 = vmatmul.bf16.vlgmr.msrb.gmra.mxu0 %v11418_v22  ;;  %4011 = vmatmul.bf16.vlgmr.msrb.gmra.mxu2 %v11418_v22  ;;  %v13297_v22 = vld [vmem:[#allocation46_spill] sm:$0xff] }
 0x54a   :  { %4184 = vmatpush.bf16.msra.mxu0 %v13285_v41  ;;  %4210 = vmatpush.bf16.msra.mxu2 %v13286_v39  ;;  %v13294_v41 = vld [vmem:[#allocation44_spill] sm:$0xff]  ;;  %v13304_v39 = vld [vmem:[#allocation63_spill] sm:$0xff] }
 0x54c   :  { %3997 = vmatpush.bf16.msrb.mxu1 %v13291_v54  ;;  %4023 = vmatpush.bf16.msrb.mxu3 %v13292_v27  ;;  %v13300_v54 = vld [vmem:[#allocation57_spill] sm:$0xff]  ;;  %v13301_v27 = vld [vmem:[#allocation52_spill] sm:$0xff] }
 0x54e   :  { %4185 = vmatpush.bf16.msra.mxu0 %v13289_v25  ;;  %4211 = vmatpush.bf16.msra.mxu2 %v13290_v42  ;;  %v13298_v25 = vld [vmem:[#allocation48_spill] sm:$0xff]  ;;  %v13299_v42 = vld [vmem:[#allocation55_spill] sm:$0xff] }
 0x54f   :  { %3998 = vmatmul.bf16.vlgmr.msrb.gmra.mxu1 %v11424_v62  ;;  %4024 = vmatmul.bf16.vlgmr.msrb.gmra.mxu3 %v11424_v62  ;;  %v13305_v62 = vld [vmem:[#allocation56_spill] sm:$0xff] }
 0x550   :  { %4197 = vmatpush.bf16.msra.mxu1 %v13293_v23  ;;  %4223 = vmatpush.bf16.msra.mxu3 %v13294_v41  ;;  %v13302_v23 = vld [vmem:[#allocation54_spill] sm:$0xff]  ;;  %v13303_v41 = vld [vmem:[#allocation60_spill] sm:$0xff] }
 0x552   :  { %4186 = vmatpush.bf16.msra.mxu0 %v13295_v24  ;;  %4212 = vmatpush.bf16.msra.mxu2 %v13296_v40  ;;  %v13306_v24 = vld [vmem:[#allocation58_spill] sm:$0xff]  ;;  %v13307_v40 = vld [vmem:[#allocation65_spill] sm:$0xff] }
 0x554   :  { %4198 = vmatpush.bf16.msra.mxu1 %v13297_v22  ;;  %4224 = vmatpush.bf16.msra.mxu3 %v13298_v25  ;;  %v13308_v22 = vld [vmem:[#allocation67_spill] sm:$0xff]  ;;  %v13309_v25 = vld [vmem:[#allocation62_spill] sm:$0xff] }
 0x556   :  { %4187 = vmatpush.bf16.msra.mxu0 %v13299_v42  ;;  %4213 = vmatpush.bf16.msra.mxu2 %v13300_v54  ;;  %v13310_v42 = vld [vmem:[#allocation64_spill] sm:$0xff]  ;;  %v13311_v54 = vld [vmem:[#allocation70_spill] sm:$0xff] }
 0x558   :  { %4199 = vmatpush.bf16.msra.mxu1 %v13301_v27  ;;  %4225 = vmatpush.bf16.msra.mxu3 %v13302_v23  ;;  %v13312_v27 = vld [vmem:[#allocation73_spill] sm:$0xff]  ;;  %v13313_v23 = vld [vmem:[#allocation66_spill] sm:$0xff] }
 0x55a   :  { %4188 = vmatpush.bf16.msra.mxu0 %v13303_v41  ;;  %4214 = vmatpush.bf16.msra.mxu2 %v13304_v39  ;;  %v13314_v41 = vld [vmem:[#allocation68_spill] sm:$0xff]  ;;  %v13315_v39 = vld [vmem:[#allocation75_spill] sm:$0xff] }
 0x55c   :  { %4200 = vmatpush.bf16.msra.mxu1 %v13305_v62  ;;  %4226 = vmatpush.bf16.msra.mxu3 %v13306_v24  ;;  %v13316_v62 = vld [vmem:[#allocation77_spill] sm:$0xff]  ;;  %v13317_v24 = vld [vmem:[#allocation79_spill] sm:$0xff] }
 0x55e   :  { %4189 = vmatpush.bf16.msra.mxu0 %v13307_v40  ;;  %4215 = vmatpush.bf16.msra.mxu2 %v13308_v22  ;;  %v13318_v40 = vld [vmem:[#allocation82_spill] sm:$0xff]  ;;  %v13319_v22 = vld [vmem:[#allocation72_spill] sm:$0xff] }
 0x560   :  { %4201 = vmatpush.bf16.msra.mxu1 %v13309_v25  ;;  %4227 = vmatpush.bf16.msra.mxu3 %v13310_v42  ;;  %v13320_v25 = vld [vmem:[#allocation74_spill] sm:$0xff]  ;;  %v13321_v42 = vld [vmem:[#allocation85_spill] sm:$0xff] }
 0x562   :  { %4190 = vmatpush.bf16.msra.mxu0 %v13311_v54  ;;  %4216 = vmatpush.bf16.msra.mxu2 %v13312_v27  ;;  %v13322_v54 = vld [vmem:[#allocation87_spill] sm:$0xff]  ;;  %v13323_v27 = vld [vmem:[#allocation76_spill] sm:$0xff] }
 0x564   :  { %4202 = vmatpush.bf16.msra.mxu1 %v13313_v23  ;;  %4228 = vmatpush.bf16.msra.mxu3 %v13314_v41  ;;  %v13324_v23 = vld [vmem:[#allocation78_spill] sm:$0xff]  ;;  %v13325_v41 = vld [vmem:[#allocation80_spill] sm:$0xff] }
 0x566   :  { %4191 = vmatpush.bf16.msra.mxu0 %v13315_v39  ;;  %4217 = vmatpush.bf16.msra.mxu2 %v13316_v62  ;;  %v13326_v39 = vld [vmem:[#allocation84_spill] sm:$0xff]  ;;  %v13327_v62 = vld [vmem:[#allocation90_spill] sm:$0xff] }
 0x568   :  { %4203 = vmatpush.bf16.msra.mxu1 %v13319_v22  ;;  %4229 = vmatpush.bf16.msra.mxu3 %v13320_v25  ;;  %v13330_v22 = vld [vmem:[#allocation88_spill] sm:$0xff]  ;;  %v13331_v25 = vld [vmem:[#allocation95_spill] sm:$0xff] }
 0x56a   :  { %4236 = vmatpush.bf16.msrb.mxu0 %v13317_v24  ;;  %4262 = vmatpush.bf16.msrb.mxu2 %v13318_v40  ;;  %v13328_v24 = vld [vmem:[#allocation93_spill] sm:$0xff]  ;;  %v13329_v40 = vld [vmem:[#allocation86_spill] sm:$0xff] }
 0x56c   :  { %4204 = vmatpush.bf16.msra.mxu1 %v13323_v27  ;;  %4230 = vmatpush.bf16.msra.mxu3 %v13324_v23  ;;  %v13334_v27 = vld [vmem:[#allocation94_spill] sm:$0xff]  ;;  %v13335_v23 = vld [vmem:[#allocation100_spill] sm:$0xff] }
 0x56e   :  { %4237 = vmatpush.bf16.msrb.mxu0 %v13321_v42  ;;  %4263 = vmatpush.bf16.msrb.mxu2 %v13322_v54  ;;  %v13332_v42 = vld [vmem:[#allocation97_spill] sm:$0xff]  ;;  %v13333_v54 = vld [vmem:[#allocation92_spill] sm:$0xff] }
 0x570   :  { %4249 = vmatpush.bf16.msrb.mxu1 %v13325_v41  ;;  %4275 = vmatpush.bf16.msrb.mxu3 %v13326_v39  ;;  %v13336_v41 = vld [vmem:[#allocation103_spill] sm:$0xff]  ;;  %v13337_v39 = vld [vmem:[#allocation96_spill] sm:$0xff] }
 0x572   :  { %4238 = vmatpush.bf16.msrb.mxu0 %v13327_v62  ;;  %4264 = vmatpush.bf16.msrb.mxu2 %v13328_v24  ;;  %v13338_v62 = vld [vmem:[#allocation98_spill] sm:$0xff]  ;;  %v13339_v24 = vld [vmem:[#allocation105_spill] sm:$0xff] }
 0x574   :  { %4250 = vmatpush.bf16.msrb.mxu1 %v13329_v40  ;;  %4276 = vmatpush.bf16.msrb.mxu3 %v13330_v22  ;;  %v13340_v40 = vld [vmem:[#allocation107_spill] sm:$0xff]  ;;  %v13341_v22 = vld [vmem:[#allocation102_spill] sm:$0xff] }
 0x576   :  { %4239 = vmatpush.bf16.msrb.mxu0 %v13331_v25  ;;  %4265 = vmatpush.bf16.msrb.mxu2 %v13332_v42  ;;  %v13342_v25 = vld [vmem:[#allocation104_spill] sm:$0xff]  ;;  %v13343_v42 = vld [vmem:[#allocation110_spill] sm:$0xff] }
 0x578   :  { %4251 = vmatpush.bf16.msrb.mxu1 %v13333_v54  ;;  %4277 = vmatpush.bf16.msrb.mxu3 %v13334_v27  ;;  %v13344_v54 = vld [vmem:[#allocation113_spill] sm:$0xff]  ;;  %v13345_v27 = vld [vmem:[#allocation106_spill] sm:$0xff] }
 0x57a   :  { %4240 = vmatpush.bf16.msrb.mxu0 %v13335_v23  ;;  %4266 = vmatpush.bf16.msrb.mxu2 %v13336_v41  ;;  %v13346_v23 = vld [vmem:[#allocation108_spill] sm:$0xff]  ;;  %v13347_v41 = vld [vmem:[#allocation115_spill] sm:$0xff] }
 0x57c   :  { %4252 = vmatpush.bf16.msrb.mxu1 %v13337_v39  ;;  %4278 = vmatpush.bf16.msrb.mxu3 %v13338_v62  ;;  %v13348_v39 = vld [vmem:[#allocation117_spill] sm:$0xff]  ;;  %v13349_v62 = vld [vmem:[#allocation112_spill] sm:$0xff] }
 0x57e   :  { %4241 = vmatpush.bf16.msrb.mxu0 %v13339_v24  ;;  %4267 = vmatpush.bf16.msrb.mxu2 %v13340_v40  ;;  %v13350_v24 = vld [vmem:[#allocation114_spill] sm:$0xff]  ;;  %v13351_v40 = vld [vmem:[#allocation116_spill] sm:$0xff] }
 0x580   :  { %4253 = vmatpush.bf16.msrb.mxu1 %v13341_v22  ;;  %4279 = vmatpush.bf16.msrb.mxu3 %v13342_v25  ;;  %v13352_v22 = vld [vmem:[#allocation118_spill] sm:$0xff] }
 0x582   :  { %4242 = vmatpush.bf16.msrb.mxu0 %v13343_v42  ;;  %4268 = vmatpush.bf16.msrb.mxu2 %v13344_v54 }
 0x584   :  { %4254 = vmatpush.bf16.msrb.mxu1 %v13345_v27  ;;  %4280 = vmatpush.bf16.msrb.mxu3 %v13346_v23  ;;  %v13353_v27 = vld [vmem:[#allocation38_spill] sm:$0xff] }
 0x585   :  { %v13354_v23 = vld [vmem:[#allocation238_spill] sm:$0xff] }
 0x586   :  { %4243 = vmatpush.bf16.msrb.mxu0 %v13347_v41  ;;  %4269 = vmatpush.bf16.msrb.mxu2 %v13348_v39  ;;  %v3830_v25 = vpop.f32.mrf.mxu0 }
 0x588   :  { %4255 = vmatpush.bf16.msrb.mxu1 %v13349_v62  ;;  %4281 = vmatpush.bf16.msrb.mxu3 %v13350_v24  ;;  %v13355_v24 = vld [vmem:[#allocation39_spill] sm:$0xff] }
 0x58c   :  { %4256 = vmatpush.bf16.msrb.mxu1 %v13351_v40  ;;  %4282 = vmatpush.bf16.msrb.mxu3 %v13352_v22  ;;  %v3843_v42 = vpop.f32.mrf.mxu1  ;;  %v3856_v18 = vpop.f32.mrf.mxu2 }
 0x58d   :  { %v3844_v54 = vadd.f32 %v3843_v42, %v3830_v25 }
 0x58e   :  { %v3832_v35 = vpop.f32.mrf.mxu0 }
 0x58f   :  { %v4029_v6 = vadd.f32 %v3844_v54, %v13353_v27 }
 0x591   :  { %v4037_v30 = vadd.f32 %v4029_v6, %v13354_v23 }
 0x592   :  { %v3869_v41 = vpop.f32.mrf.mxu3 }
 0x593   :  { %v7967_v49 = vmul.f32 -1.442695, %v4037_v30  ;;  %v3870_v39 = vadd.f32 %v3869_v41, %v3856_v18  ;;  %v13357_v30 = vld [vmem:[#allocation111_spill] sm:$0xff] }
 0x594   :  { %v3845_v2 = vpop.f32.mrf.mxu1  ;;  %v3858_v62 = vpop.f32.mrf.mxu2  ;;  %v13358_v18 = vld [vmem:[#allocation31_spill] sm:$0xff] }
 0x595   :  { %9373 = vpow2.f32 %v7967_v49  ;;  %v4030_v29 = vadd.f32 %v3870_v39, %v13355_v24 }
 0x596   :  { %v3882_v40 = vpop.f32.mrf.mxu0 }
 0x597   :  { %v4038_v22 = vadd.f32 %v4030_v29, %v13356_v17 }
 0x599   :  { %v7968_v47 = vmul.f32 -1.442695, %v4038_v22  ;;  %v13359_v22 = vld [vmem:[#allocation119_spill] sm:$0xff] }
 0x59a   :  { %v3871_v45 = vpop.f32.mrf.mxu3 }
 0x59b   :  { %v9374_v19 = vpop.eup %9373  ;;  %9375 = vpow2.f32 %v7968_v47 }
 0x59c   :  { %v4051_v35 = vadd.f32 1.0, %v9374_v19  ;;  %v3895_v25 = vpop.f32.mrf.mxu1  ;;  %v3908_v27 = vpop.f32.mrf.mxu2 }
 0x59d   :  { %v3896_v42 = vadd.f32 %v3895_v25, %v3882_v40  ;;  %v13360_v25 = vld [vmem:[#allocation71_spill] sm:$0xff] }
 0x59e   :  { %v3884_v6 = vpop.f32.mrf.mxu0  ;;  %9377 = vrcp.f32 %v4051_v35  ;;  %vm4058_vm1 = vweird.f32 %v4051_v35 }
 0x59f   :  { %v4031_v41 = vadd.f32 %v3896_v42, %v13357_v30 }
 0x5a1   :  { %v9376_v2 = vpop.eup %9375  ;;  %v4039_v49 = vadd.f32 %v4031_v41, %v13358_v18 }
 0x5a2   :  { %v11572_v54 = vadd.f32 1.0, %v9376_v2  ;;  %v3921_v39 = vpop.f32.mrf.mxu3 }
 0x5a3   :  { %v7969_v24 = vmul.f32 -1.442695, %v4039_v49  ;;  %v3922_v29 = vadd.f32 %v3921_v39, %v3908_v27 }
 0x5a4   :  { %9379 = vrcp.f32 %v11572_v54  ;;  %v3897_v45 = vpop.f32.mrf.mxu1  ;;  %v3910_v47 = vpop.f32.mrf.mxu2  ;;  %vm4073_vm6 = vweird.f32 %v11572_v54 }
 0x5a5   :  { %v9378_v19 = vpop.eup %9377  ;;  %9381 = vpow2.f32 %v7969_v24  ;;  %v4032_v40 = vadd.f32 %v3922_v29, %v13359_v22  ;;  %v13361_v22 = vld [vmem:[#allocation176_spill] sm:$0xff] }
 0x5a6   :  { %v3934_v62 = vpop.f32.mrf.mxu0  ;;  %v4054_v42 = vmul.f32 %v9378_v19, %v4051_v35  ;;  %vm4059_vm0 = vweird.f32 %v9378_v19 }
 0x5a7   :  { %v4040_v6 = vadd.f32 %v4032_v40, %v13360_v25  ;;  %vm11588_vm2 = vmor %vm4058_vm1, %vm4059_vm0 }
 0x5a8   :  { %v4055_v49 = vsub.f32 1.0, %v4054_v42  ;;  %v4064_v42 = vand.u32 2147483648, %v4051_v35 }
 0x5a9   :  { %v7970_v30 = vmul.f32 -1.442695, %v4040_v6 }
 0x5aa   :  { %v11577_v17 = vpop.eup %9379  ;;  %v3923_v41 = vpop.f32.mrf.mxu3  ;;  %v4056_v40 = vmul.f32 %v9378_v19, %v4055_v49 }
 0x5ab   :  { %v9382_v2 = vpop.eup %9381  ;;  %9383 = vpow2.f32 %v7970_v30  ;;  %v4069_v45 = vmul.f32 %v11577_v17, %v11572_v54  ;;  %v13362_v41 = vld [vmem:[#allocation81_spill] sm:$0xff]  ;;  %v4062_v30 = vand.u32 2147483647, %v4051_v35  ;;  %vm4074_vm4 = vweird.f32 %v11577_v17 }
 0x5ac   :  { %v4089_v27 = vadd.f32 1.0, %v9382_v2  ;;  %v3960_v39 = vpop.f32.mrf.mxu2  ;;  %v3947_v47 = vpop.f32.mrf.mxu1  ;;  %v4057_v16 = vadd.f32 %v9378_v19, %v4056_v40  ;;  %v4065_v40 = vor.u32 1.1754944e-38, %v4064_v42  ;;  %v4079_v42 = vand.u32 2147483648, %v11572_v54  ;;  %vm11609_vm8 = vmor %vm4073_vm6, %vm4074_vm4 }
 0x5ad   :  { %v3948_v24 = vadd.f32 %v3947_v47, %v3934_v62  ;;  %v4070_v6 = vsub.f32 1.0, %v4069_v45  ;;  %vm11592_vm3 = vcmp.eq.f32.partialorder %v4062_v30, 8.507059e+37  ;;  %v4077_v30 = vand.u32 2147483647, %v11572_v54 }
 0x5ae   :  { %9385 = vrcp.f32 %v4089_v27  ;;  %v3936_v29 = vpop.f32.mrf.mxu0  ;;  %vm4096_vm7 = vweird.f32 %v4089_v27 }
 0x5af   :  { %v4033_v18 = vadd.f32 %v3948_v24, %v13361_v22  ;;  %v4071_v49 = vmul.f32 %v11577_v17, %v4070_v6  ;;  %vm4078_vm11 = vcmp.eq.f32.partialorder %v4077_v30, 8.507059e+37 }
 0x5b1   :  { %v9384_v25 = vpop.eup %9383  ;;  %v4041_v33 = vadd.f32 %v4033_v18, %v13362_v41 }
 0x5b2   :  { %v11582_v23 = vadd.f32 1.0, %v9384_v25  ;;  %v3973_v2 = vpop.f32.mrf.mxu3  ;;  %v13363_v25 = vld [vmem:[#allocation185_spill] sm:$0xff] }
 0x5b3   :  { %v3974_v63 = vadd.f32 %v3973_v2, %v3960_v39  ;;  %v4102_v39 = vand.u32 2147483648, %v4089_v27  ;;  %v13368_v2 = vld [vmem:[#allocation129_spill] sm:$0xff] }
 0x5b4   :  { %v9386_v60 = vpop.eup %9385  ;;  %9387 = vrcp.f32 %v11582_v23  ;;  %v3962_v62 = vpop.f32.mrf.mxu2  ;;  %v4117_v22 = vand.u32 2147483648, %v11582_v23  ;;  %vm4111_vm13 = vweird.f32 %v11582_v23 }
 0x5b5   :  { %v4092_v47 = vmul.f32 %v9386_v60, %v4089_v27  ;;  %9389 = vtanh.f32 %v4041_v33  ;;  %v3949_v24 = vpop.f32.mrf.mxu1  ;;  %v4034_v45 = vadd.f32 %v3974_v63, %v13363_v25  ;;  %v4061_v33 = vsel %vm11588_vm2, %v9378_v19, %v4057_v16 }
 0x5b6   :  { %vm4097_vm5 = vweird.f32 %v9386_v60  ;;  %v4100_v63 = vand.u32 2147483647, %v4089_v27  ;;  %v4072_v62 = vadd.f32 %v11577_v17, %v4071_v49  ;;  %v4066_v19 = vsel %vm11592_vm3, %v4065_v40, %v4061_v33 }
 0x5b7   :  { %v4093_v29 = vsub.f32 1.0, %v4092_v47  ;;  %v4042_v6 = vadd.f32 %v4034_v45, %v13368_v2  ;;  %vm4098_vm9 = vmor %vm4096_vm7, %vm4097_vm5  ;;  %v4080_v33 = vor.u32 1.1754944e-38, %v4079_v42  ;;  %v4115_v2 = vand.u32 2147483647, %v11582_v23 }
 0x5b8   :  { %vm4101_vm10 = vcmp.eq.f32.partialorder %v4100_v63, 8.507059e+37  ;;  %v4076_v27 = vsel %vm11609_vm8, %v11577_v17, %v4072_v62  ;;  %v4118_v17 = vor.u32 1.1754944e-38, %v4117_v22 }
 0x5b9   :  { %v4094_v35 = vmul.f32 %v9386_v60, %v4093_v29  ;;  %9391 = vtanh.f32 %v4042_v6  ;;  %v4103_v29 = vor.u32 1.1754944e-38, %v4102_v39  ;;  %vm4116_vm15 = vcmp.eq.f32.partialorder %v4115_v2, 8.507059e+37  ;;  %v13372_v2 = vld [vmem:[#allocation228_spill] sm:$0xff] }
 0x5ba   :  { %v9388_v47 = vpop.eup %9387  ;;  %v3975_v45 = vpop.f32.mrf.mxu3 }
 0x5bb   :  { %v9390_v24 = vpop.eup %9389  ;;  %v4107_v16 = vmul.f32 %v9388_v47, %v11582_v23  ;;  %v4095_v25 = vadd.f32 %v9386_v60, %v4094_v35  ;;  %vm4112_vm12 = vweird.f32 %v9388_v47 }
 0x5bc   :  { %v4163_v54 = vmul.f32 %v9390_v24, %v4066_v19  ;;  %v4081_v24 = vsel %vm4078_vm11, %v4080_v33, %v4076_v27  ;;  %vm4113_vm14 = vmor %vm4111_vm13, %vm4112_vm12 }
 0x5bd   :  { %v4108_v18 = vsub.f32 1.0, %v4107_v16  ;;  %v4099_v6 = vsel %vm4098_vm9, %v9386_v60, %v4095_v25 }
 0x5be   :  { %v4104_v40 = vsel %vm4101_vm10, %v4103_v29, %v4099_v6  ;;  %v13371_v6 = vld [vmem:[#allocation226_spill] sm:$0xff] }
 0x5bf   :  { %v4109_v35 = vmul.f32 %v9388_v47, %v4108_v18  ;;  %v4161_v45 = vmul.f32 %v4104_v40, %v11404_v21  ;;  %v9392_v39 = vpop.eup %9391 }
 0x5c0   :  { %v4164_v16 = vmul.f32 %v9392_v39, %v4081_v24 }
 0x5c1   :  { %v11621_v60 = vadd.f32 %v4163_v54, %v4161_v45  ;;  %v4110_v63 = vadd.f32 %v9388_v47, %v4109_v35 }
 0x5c3   :  { %v4114_v62 = vsel %vm4113_vm14, %v9388_v47, %v4110_v63 }
 0x5c4   :  { %v4119_v42 = vsel %vm4116_vm15, %v4118_v17, %v4114_v62 }
 0x5c5   :  { %v4162_v19 = vmul.f32 %v4119_v42, %v11408_v3 }
 0x5c6   :  { %v3986_v30 = vpop.f32.mrf.mxu0 }
 0x5c7   :  { %v11624_v25 = vadd.f32 %v4164_v16, %v4162_v19 }
 0x5cc   :  { %v3999_v21 = vpop.f32.mrf.mxu1  ;;  %v4012_v49 = vpop.f32.mrf.mxu2 }
 0x5cd   :  { %v4000_v29 = vadd.f32 %v3999_v21, %v3986_v30 }
 0x5ce   :  { %v3988_v18 = vpop.f32.mrf.mxu0 }
 0x5cf   :  { %v4035_v23 = vadd.f32 %v4000_v29, %v13371_v6 }
 0x5d1   :  { %v4043_v54 = vadd.f32 %v4035_v23, %v10737_v5 }
 0x5d2   :  { %v4025_v27 = vpop.f32.mrf.mxu3 }
 0x5d3   :  { %v7971_v40 = vmul.f32 -1.442695, %v4043_v54  ;;  %v4026_v33 = vadd.f32 %v4025_v27, %v4012_v49 }
 0x5d4   :  { %v4001_v22 = vpop.f32.mrf.mxu1  ;;  %v4014_v47 = vpop.f32.mrf.mxu2 }
 0x5d5   :  { %9393 = vpow2.f32 %v7971_v40  ;;  %v4036_v35 = vadd.f32 %v4026_v33, %v13372_v2 }
 0x5d7   :  { %v4044_v3 = vadd.f32 %v4036_v35, %v10742_v51 }
 0x5d9   :  { %v7972_v45 = vmul.f32 -1.442695, %v4044_v3 }
 0x5da   :  { %v4027_v39 = vpop.f32.mrf.mxu3 }
 0x5db   :  { %v9394_v24 = vpop.eup %9393  ;;  %9395 = vpow2.f32 %v7972_v45 }
 0x5dc   :  { %v4129_v63 = vadd.f32 1.0, %v9394_v24 }
 0x5de   :  { %9397 = vrcp.f32 %v4129_v63  ;;  %v4142_v19 = vand.u32 2147483648, %v4129_v63  ;;  %v4140_v49 = vand.u32 2147483647, %v4129_v63  ;;  %vm4136_vm1 = vweird.f32 %v4129_v63 }
 0x5e0   :  { %v4143_v23 = vor.u32 1.1754944e-38, %v4142_v19  ;;  %vm4141_vm3 = vcmp.eq.f32.partialorder %v4140_v49, 8.507059e+37  ;;  %v13375_v19 = vld [vmem:[#allocation173_spill] sm:$0xff] }
 0x5e1   :  { %v9396_v16 = vpop.eup %9395  ;;  %v13377_v49 = vld [vmem:[#allocation181_spill] sm:$0xff] }
 0x5e2   :  { %v4130_v17 = vadd.f32 1.0, %v9396_v16 }
 0x5e4   :  { %v9398_v62 = vpop.eup %9397  ;;  %9399 = vrcp.f32 %v4130_v17  ;;  %v4157_v22 = vand.u32 2147483648, %v4130_v17  ;;  %v4155_v35 = vand.u32 2147483647, %v4130_v17  ;;  %vm4151_vm5 = vweird.f32 %v4130_v17 }
 0x5e5   :  { %v4132_v30 = vmul.f32 %v9398_v62, %v4129_v63  ;;  %9401 = vtanh.f32 %v11621_v60  ;;  %vm4137_vm0 = vweird.f32 %v9398_v62 }
 0x5e6   :  { %vm4138_vm2 = vmor %vm4136_vm1, %vm4137_vm0  ;;  %9403 = vtanh.f32 %v11624_v25  ;;  %v4158_v39 = vor.u32 1.1754944e-38, %v4157_v22  ;;  %vm4156_vm7 = vcmp.eq.f32.partialorder %v4155_v35, 8.507059e+37  ;;  %v13386_v22 = vld [vmem:[#allocation196_spill] sm:$0xff]  ;;  %v13389_v35 = vld [vmem:[#allocation199_spill] sm:$0xff] }
 0x5e7   :  { %v4133_v42 = vsub.f32 1.0, %v4132_v30 }
 0x5e9   :  { %v4134_v21 = vmul.f32 %v9398_v62, %v4133_v42  ;;  %v13374_v42 = vld [vmem:[#allocation170_spill] sm:$0xff] }
 0x5ea   :  { %v9400_v29 = vpop.eup %9399 }
 0x5eb   :  { %v4135_v18 = vadd.f32 %v9398_v62, %v4134_v21  ;;  %v4147_v6 = vmul.f32 %v9400_v29, %v4130_v17  ;;  %v9402_v40 = vpop.eup %9401  ;;  %vm4152_vm4 = vweird.f32 %v9400_v29  ;;  %v13373_v17 = vld [vmem:[#allocation167_spill] sm:$0xff] }
 0x5ec   :  { %vm4153_vm6 = vmor %vm4151_vm5, %vm4152_vm4  ;;  %v9404_v63 = vpop.eup %9403  ;;  %v13376_v21 = vld [vmem:[#allocation175_spill] sm:$0xff] }
 0x5ed   :  { %v4139_v54 = vsel %vm4138_vm2, %v9398_v62, %v4135_v18  ;;  %v4148_v27 = vsub.f32 1.0, %v4147_v6  ;;  %v13379_v18 = vld [vmem:[#allocation178_spill] sm:$0xff]  ;;  %v13380_v6 = vld [vmem:[#allocation180_spill] sm:$0xff] }
 0x5ee   :  { %v4144_v33 = vsel %vm4141_vm3, %v4143_v23, %v4139_v54  ;;  %v13381_v23 = vld [vmem:[#allocation188_spill] sm:$0xff]  ;;  %v13382_v54 = vld [vmem:[#allocation190_spill] sm:$0xff] }
 0x5ef   :  { %v4169_v47 = vmul.f32 %v9402_v40, %v4144_v33  ;;  %v4149_v2 = vmul.f32 %v9400_v29, %v4148_v27  ;;  %v13383_v27 = vld [vmem:[#allocation183_spill] sm:$0xff]  ;;  %v13385_v33 = vld [vmem:[#allocation193_spill] sm:$0xff] }
 0x5f0   :  { %v13384_v40 = vld [vmem:[#allocation187_spill] sm:$0xff] }
 0x5f1   :  { %v11632_v3 = vpack.c.bf16 %v4169_v47, %v4169_v47  ;;  %v4150_v45 = vadd.f32 %v9400_v29, %v4149_v2  ;;  %v13387_v47 = vld [vmem:[#allocation189_spill] sm:$0xff]  ;;  %v13388_v2 = vld [vmem:[#allocation191_spill] sm:$0xff] }
 0x5f3   :  { %v4154_v24 = vsel %vm4153_vm6, %v9400_v29, %v4150_v45  ;;  %4192 = vmatmul.bf16.vlgmr.msra.gmra.mxu0 %v11632_v3  ;;  %4218 = vmatmul.bf16.vlgmr.msra.gmra.mxu2 %v11632_v3  ;;  %v13378_v29 = vld [vmem:[#allocation184_spill] sm:$0xff]  ;;  %v13390_v45 = vld [vmem:[#allocation201_spill] sm:$0xff] }
 0x5f4   :  { %v4159_v16 = vsel %vm4156_vm7, %v4158_v39, %v4154_v24  ;;  %4288 = vmatpush.bf16.msra.mxu0 %v12911_v61  ;;  %4314 = vmatpush.bf16.msra.mxu2 %v12912_v9  ;;  %v13391_v39 = vld [vmem:[#allocation195_spill] sm:$0xff]  ;;  %v13392_v24 = vld [vmem:[#allocation197_spill] sm:$0xff] }
 0x5f5   :  { %v4170_v62 = vmul.f32 %v9404_v63, %v4159_v16  ;;  %v13393_v63 = vld [vmem:[#allocation203_spill] sm:$0xff]  ;;  %v13394_v16 = vld [vmem:[#allocation206_spill] sm:$0xff] }
 0x5f7   :  { %v11638_v30 = vpack.c.bf16 %v4170_v62, %v4170_v62  ;;  %v13395_v62 = vld [vmem:[#allocation200_spill] sm:$0xff] }
 0x5f8   :  { %4289 = vmatpush.bf16.msra.mxu0 %v12913_v26  ;;  %4315 = vmatpush.bf16.msra.mxu2 %v12914_v46 }
 0x5f9   :  { %4205 = vmatmul.bf16.vlgmr.msra.gmra.mxu1 %v11638_v30  ;;  %4231 = vmatmul.bf16.vlgmr.msra.gmra.mxu3 %v11638_v30 }
 0x5fa   :  { %4301 = vmatpush.bf16.msra.mxu1 %v12915_v38  ;;  %4327 = vmatpush.bf16.msra.mxu3 %v12916_v37 }
 0x5fc   :  { %4290 = vmatpush.bf16.msra.mxu0 %v12917_v36  ;;  %4316 = vmatpush.bf16.msra.mxu2 %v12918_v10 }
 0x5fe   :  { %4302 = vmatpush.bf16.msra.mxu1 %v12919_v32  ;;  %4328 = vmatpush.bf16.msra.mxu3 %v12920_v28 }
 0x600   :  { %4291 = vmatpush.bf16.msra.mxu0 %v12921_v31  ;;  %4317 = vmatpush.bf16.msra.mxu2 %v12922_v7 }
 0x602   :  { %4303 = vmatpush.bf16.msra.mxu1 %v12923_v57  ;;  %4329 = vmatpush.bf16.msra.mxu3 %v12924_v52 }
 0x603   :  { %4244 = vmatmul.bf16.vlgmr.msrb.gmra.mxu0 %v11632_v3  ;;  %4270 = vmatmul.bf16.vlgmr.msrb.gmra.mxu2 %v11632_v3 }
 0x604   :  { %4292 = vmatpush.bf16.msra.mxu0 %v12925_v4  ;;  %4318 = vmatpush.bf16.msra.mxu2 %v12926_v53 }
 0x606   :  { %4304 = vmatpush.bf16.msra.mxu1 %v13028_v55  ;;  %4330 = vmatpush.bf16.msra.mxu3 %v13029_v56 }
 0x608   :  { %4293 = vmatpush.bf16.msra.mxu0 %v13030_v0  ;;  %4319 = vmatpush.bf16.msra.mxu2 %v13031_v48 }
 0x609   :  { %4257 = vmatmul.bf16.vlgmr.msrb.gmra.mxu1 %v11638_v30  ;;  %4283 = vmatmul.bf16.vlgmr.msrb.gmra.mxu3 %v11638_v30 }
 0x60a   :  { %4305 = vmatpush.bf16.msra.mxu1 %v13032_v43  ;;  %4331 = vmatpush.bf16.msra.mxu3 %v13033_v34 }
 0x60c   :  { %4294 = vmatpush.bf16.msra.mxu0 %v13034_v15  ;;  %4320 = vmatpush.bf16.msra.mxu2 %v13035_v12 }
 0x60e   :  { %4306 = vmatpush.bf16.msra.mxu1 %v13036_v1  ;;  %4332 = vmatpush.bf16.msra.mxu3 %v13037_v8 }
 0x610   :  { %4295 = vmatpush.bf16.msra.mxu0 %v13038_v20  ;;  %4321 = vmatpush.bf16.msra.mxu2 %v13039_v11 }
 0x612   :  { %4307 = vmatpush.bf16.msra.mxu1 %v13042_v58  ;;  %4333 = vmatpush.bf16.msra.mxu3 %v13043_v44 }
 0x613   :  { %4296 = vmatmul.bf16.vlgmr.msra.gmra.mxu0 %v11632_v3  ;;  %4322 = vmatmul.bf16.vlgmr.msra.gmra.mxu2 %v11632_v3 }
 0x614   :  { %4340 = vmatpush.bf16.msrb.mxu0 %v13040_v59  ;;  %4366 = vmatpush.bf16.msrb.mxu2 %v13041_v50 }
 0x616   :  { %4308 = vmatpush.bf16.msra.mxu1 %v13373_v17  ;;  %4334 = vmatpush.bf16.msra.mxu3 %v13374_v42  ;;  %v13477_v42 = vld [vmem:[#allocation192_spill] sm:$0xff]  ;;  %v13478_v17 = vld [vmem:[#allocation194_spill] sm:$0xff] }
 0x618   :  { %4341 = vmatpush.bf16.msrb.mxu0 %v13143_v14  ;;  %4367 = vmatpush.bf16.msrb.mxu2 %v13258_v13 }
 0x619   :  { %4309 = vmatmul.bf16.vlgmr.msra.gmra.mxu1 %v11638_v30  ;;  %4335 = vmatmul.bf16.vlgmr.msra.gmra.mxu3 %v11638_v30 }
 0x61a   :  { %4353 = vmatpush.bf16.msrb.mxu1 %v13375_v19  ;;  %4379 = vmatpush.bf16.msrb.mxu3 %v13376_v21 }
 0x61c   :  { %4342 = vmatpush.bf16.msrb.mxu0 %v13377_v49  ;;  %4368 = vmatpush.bf16.msrb.mxu2 %v13378_v29 }
 0x61e   :  { %4354 = vmatpush.bf16.msrb.mxu1 %v13379_v18  ;;  %4380 = vmatpush.bf16.msrb.mxu3 %v13380_v6  ;;  %v13470_v18 = vld [vmem:[#allocation30_spill] sm:$0xff] }
 0x620   :  { %4343 = vmatpush.bf16.msrb.mxu0 %v13381_v23  ;;  %4369 = vmatpush.bf16.msrb.mxu2 %v13382_v54 }
 0x622   :  { %4355 = vmatpush.bf16.msrb.mxu1 %v13383_v27  ;;  %4381 = vmatpush.bf16.msrb.mxu3 %v13384_v40 }
 0x624   :  { %4344 = vmatpush.bf16.msrb.mxu0 %v13385_v33  ;;  %4370 = vmatpush.bf16.msrb.mxu2 %v13386_v22  ;;  %v13396_v33 = vld [vmem:[#allocation202_spill] sm:$0xff] }
 0x625   :  { %v13397_v22 = vld [vmem:[#allocation210_spill] sm:$0xff] }
 0x626   :  { %4356 = vmatpush.bf16.msrb.mxu1 %v13387_v47  ;;  %4382 = vmatpush.bf16.msrb.mxu3 %v13388_v2  ;;  %v13398_v47 = vld [vmem:[#allocation212_spill] sm:$0xff] }
 0x627   :  { %v13399_v2 = vld [vmem:[#allocation40_spill] sm:$0xff] }
 0x628   :  { %4345 = vmatpush.bf16.msrb.mxu0 %v13389_v35  ;;  %4371 = vmatpush.bf16.msrb.mxu2 %v13390_v45  ;;  %v13400_v35 = vld [vmem:[#allocation43_spill] sm:$0xff]  ;;  %v13401_v45 = vld [vmem:[#allocation205_spill] sm:$0xff] }
 0x62a   :  { %4357 = vmatpush.bf16.msrb.mxu1 %v13391_v39  ;;  %4383 = vmatpush.bf16.msrb.mxu3 %v13392_v24  ;;  %v13402_v39 = vld [vmem:[#allocation209_spill] sm:$0xff] }
 0x62c   :  { %4346 = vmatpush.bf16.msrb.mxu0 %v13393_v63  ;;  %4372 = vmatpush.bf16.msrb.mxu2 %v13394_v16  ;;  %v13403_v16 = vld [vmem:[#allocation45_spill] sm:$0xff] }
 0x62e   :  { %4358 = vmatpush.bf16.msrb.mxu1 %v13395_v62  ;;  %4384 = vmatpush.bf16.msrb.mxu3 %v13396_v33  ;;  %v13404_v62 = vld [vmem:[#allocation47_spill] sm:$0xff] }
 0x62f   :  { %v13405_v33 = vld [vmem:[#allocation211_spill] sm:$0xff] }
 0x630   :  { %4347 = vmatpush.bf16.msrb.mxu0 %v13397_v22  ;;  %4373 = vmatpush.bf16.msrb.mxu2 %v13398_v47  ;;  %v13406_v22 = vld [vmem:[#allocation213_spill] sm:$0xff]  ;;  %v13407_v47 = vld [vmem:[#allocation42_spill] sm:$0xff] }
 0x632   :  { %4359 = vmatpush.bf16.msrb.mxu1 %v13401_v45  ;;  %4385 = vmatpush.bf16.msrb.mxu3 %v13402_v39  ;;  %v13409_v39 = vld [vmem:[#allocation50_spill] sm:$0xff]  ;;  %v13410_v45 = vld [vmem:[#allocation53_spill] sm:$0xff] }
 0x633   :  { %4348 = vmatmul.bf16.vlgmr.msrb.gmra.mxu0 %v11632_v3  ;;  %4374 = vmatmul.bf16.vlgmr.msrb.gmra.mxu2 %v11632_v3  ;;  %v13411_v3 = vld [vmem:[#allocation46_spill] sm:$0xff] }
 0x634   :  { %4547 = vmatpush.bf16.msra.mxu0 %v13399_v2  ;;  %4573 = vmatpush.bf16.msra.mxu2 %v13400_v35  ;;  %v13408_v2 = vld [vmem:[#allocation44_spill] sm:$0xff]  ;;  %v13418_v35 = vld [vmem:[#allocation63_spill] sm:$0xff] }
 0x636   :  { %4360 = vmatpush.bf16.msrb.mxu1 %v13405_v33  ;;  %4386 = vmatpush.bf16.msrb.mxu3 %v13406_v22  ;;  %v13414_v33 = vld [vmem:[#allocation57_spill] sm:$0xff]  ;;  %v13415_v22 = vld [vmem:[#allocation52_spill] sm:$0xff] }
 0x638   :  { %4548 = vmatpush.bf16.msra.mxu0 %v13403_v16  ;;  %4574 = vmatpush.bf16.msra.mxu2 %v13404_v62  ;;  %v13412_v16 = vld [vmem:[#allocation48_spill] sm:$0xff]  ;;  %v13413_v62 = vld [vmem:[#allocation55_spill] sm:$0xff] }
 0x639   :  { %4361 = vmatmul.bf16.vlgmr.msrb.gmra.mxu1 %v11638_v30  ;;  %4387 = vmatmul.bf16.vlgmr.msrb.gmra.mxu3 %v11638_v30  ;;  %v13419_v30 = vld [vmem:[#allocation56_spill] sm:$0xff] }
 0x63a   :  { %4560 = vmatpush.bf16.msra.mxu1 %v13407_v47  ;;  %4586 = vmatpush.bf16.msra.mxu3 %v13408_v2  ;;  %v13416_v47 = vld [vmem:[#allocation54_spill] sm:$0xff]  ;;  %v13417_v2 = vld [vmem:[#allocation60_spill] sm:$0xff] }
 0x63c   :  { %4549 = vmatpush.bf16.msra.mxu0 %v13409_v39  ;;  %4575 = vmatpush.bf16.msra.mxu2 %v13410_v45  ;;  %v13420_v39 = vld [vmem:[#allocation58_spill] sm:$0xff]  ;;  %v13421_v45 = vld [vmem:[#allocation65_spill] sm:$0xff] }
 0x63e   :  { %4561 = vmatpush.bf16.msra.mxu1 %v13411_v3  ;;  %4587 = vmatpush.bf16.msra.mxu3 %v13412_v16  ;;  %v13422_v3 = vld [vmem:[#allocation67_spill] sm:$0xff]  ;;  %v13423_v16 = vld [vmem:[#allocation62_spill] sm:$0xff] }
 0x640   :  { %4550 = vmatpush.bf16.msra.mxu0 %v13413_v62  ;;  %4576 = vmatpush.bf16.msra.mxu2 %v13414_v33  ;;  %v13424_v62 = vld [vmem:[#allocation64_spill] sm:$0xff]  ;;  %v13425_v33 = vld [vmem:[#allocation70_spill] sm:$0xff] }
 0x642   :  { %4562 = vmatpush.bf16.msra.mxu1 %v13415_v22  ;;  %4588 = vmatpush.bf16.msra.mxu3 %v13416_v47  ;;  %v13426_v22 = vld [vmem:[#allocation73_spill] sm:$0xff]  ;;  %v13427_v47 = vld [vmem:[#allocation66_spill] sm:$0xff] }
 0x644   :  { %4551 = vmatpush.bf16.msra.mxu0 %v13417_v2  ;;  %4577 = vmatpush.bf16.msra.mxu2 %v13418_v35  ;;  %v13428_v2 = vld [vmem:[#allocation68_spill] sm:$0xff]  ;;  %v13429_v35 = vld [vmem:[#allocation75_spill] sm:$0xff] }
 0x646   :  { %4563 = vmatpush.bf16.msra.mxu1 %v13419_v30  ;;  %4589 = vmatpush.bf16.msra.mxu3 %v13420_v39  ;;  %v13430_v30 = vld [vmem:[#allocation77_spill] sm:$0xff]  ;;  %v13431_v39 = vld [vmem:[#allocation79_spill] sm:$0xff] }
 0x648   :  { %4552 = vmatpush.bf16.msra.mxu0 %v13421_v45  ;;  %4578 = vmatpush.bf16.msra.mxu2 %v13422_v3  ;;  %v13432_v45 = vld [vmem:[#allocation82_spill] sm:$0xff]  ;;  %v13433_v3 = vld [vmem:[#allocation72_spill] sm:$0xff] }
 0x64a   :  { %4564 = vmatpush.bf16.msra.mxu1 %v13423_v16  ;;  %4590 = vmatpush.bf16.msra.mxu3 %v13424_v62  ;;  %v13434_v16 = vld [vmem:[#allocation74_spill] sm:$0xff]  ;;  %v13435_v62 = vld [vmem:[#allocation85_spill] sm:$0xff] }
 0x64c   :  { %4553 = vmatpush.bf16.msra.mxu0 %v13425_v33  ;;  %4579 = vmatpush.bf16.msra.mxu2 %v13426_v22  ;;  %v13436_v33 = vld [vmem:[#allocation87_spill] sm:$0xff]  ;;  %v13437_v22 = vld [vmem:[#allocation76_spill] sm:$0xff] }
 0x64e   :  { %4565 = vmatpush.bf16.msra.mxu1 %v13427_v47  ;;  %4591 = vmatpush.bf16.msra.mxu3 %v13428_v2  ;;  %v13438_v47 = vld [vmem:[#allocation78_spill] sm:$0xff]  ;;  %v13439_v2 = vld [vmem:[#allocation80_spill] sm:$0xff] }
 0x650   :  { %4554 = vmatpush.bf16.msra.mxu0 %v13429_v35  ;;  %4580 = vmatpush.bf16.msra.mxu2 %v13430_v30  ;;  %v13440_v35 = vld [vmem:[#allocation84_spill] sm:$0xff]  ;;  %v13441_v30 = vld [vmem:[#allocation90_spill] sm:$0xff] }
 0x652   :  { %4566 = vmatpush.bf16.msra.mxu1 %v13433_v3  ;;  %4592 = vmatpush.bf16.msra.mxu3 %v13434_v16  ;;  %v13444_v3 = vld [vmem:[#allocation88_spill] sm:$0xff]  ;;  %v13445_v16 = vld [vmem:[#allocation95_spill] sm:$0xff] }
 0x654   :  { %4599 = vmatpush.bf16.msrb.mxu0 %v13431_v39  ;;  %4625 = vmatpush.bf16.msrb.mxu2 %v13432_v45  ;;  %v13442_v39 = vld [vmem:[#allocation93_spill] sm:$0xff]  ;;  %v13443_v45 = vld [vmem:[#allocation86_spill] sm:$0xff] }
 0x656   :  { %4567 = vmatpush.bf16.msra.mxu1 %v13437_v22  ;;  %4593 = vmatpush.bf16.msra.mxu3 %v13438_v47  ;;  %v13448_v22 = vld [vmem:[#allocation94_spill] sm:$0xff]  ;;  %v13449_v47 = vld [vmem:[#allocation100_spill] sm:$0xff] }
 0x658   :  { %4600 = vmatpush.bf16.msrb.mxu0 %v13435_v62  ;;  %4626 = vmatpush.bf16.msrb.mxu2 %v13436_v33  ;;  %v13446_v62 = vld [vmem:[#allocation97_spill] sm:$0xff]  ;;  %v13447_v33 = vld [vmem:[#allocation92_spill] sm:$0xff] }
 0x65a   :  { %4612 = vmatpush.bf16.msrb.mxu1 %v13439_v2  ;;  %4638 = vmatpush.bf16.msrb.mxu3 %v13440_v35  ;;  %v13450_v2 = vld [vmem:[#allocation103_spill] sm:$0xff]  ;;  %v13451_v35 = vld [vmem:[#allocation96_spill] sm:$0xff] }
 0x65c   :  { %4601 = vmatpush.bf16.msrb.mxu0 %v13441_v30  ;;  %4627 = vmatpush.bf16.msrb.mxu2 %v13442_v39  ;;  %v13452_v30 = vld [vmem:[#allocation98_spill] sm:$0xff]  ;;  %v13453_v39 = vld [vmem:[#allocation105_spill] sm:$0xff] }
 0x65e   :  { %4613 = vmatpush.bf16.msrb.mxu1 %v13443_v45  ;;  %4639 = vmatpush.bf16.msrb.mxu3 %v13444_v3  ;;  %v13454_v45 = vld [vmem:[#allocation107_spill] sm:$0xff]  ;;  %v13455_v3 = vld [vmem:[#allocation102_spill] sm:$0xff] }
 0x660   :  { %4602 = vmatpush.bf16.msrb.mxu0 %v13445_v16  ;;  %4628 = vmatpush.bf16.msrb.mxu2 %v13446_v62  ;;  %v13456_v16 = vld [vmem:[#allocation104_spill] sm:$0xff]  ;;  %v13457_v62 = vld [vmem:[#allocation110_spill] sm:$0xff] }
 0x662   :  { %4614 = vmatpush.bf16.msrb.mxu1 %v13447_v33  ;;  %4640 = vmatpush.bf16.msrb.mxu3 %v13448_v22  ;;  %v13458_v33 = vld [vmem:[#allocation113_spill] sm:$0xff]  ;;  %v13459_v22 = vld [vmem:[#allocation106_spill] sm:$0xff] }
 0x664   :  { %4603 = vmatpush.bf16.msrb.mxu0 %v13449_v47  ;;  %4629 = vmatpush.bf16.msrb.mxu2 %v13450_v2  ;;  %v13460_v47 = vld [vmem:[#allocation108_spill] sm:$0xff]  ;;  %v13461_v2 = vld [vmem:[#allocation115_spill] sm:$0xff] }
 0x666   :  { %4615 = vmatpush.bf16.msrb.mxu1 %v13451_v35  ;;  %4641 = vmatpush.bf16.msrb.mxu3 %v13452_v30  ;;  %v13462_v35 = vld [vmem:[#allocation117_spill] sm:$0xff]  ;;  %v13463_v30 = vld [vmem:[#allocation112_spill] sm:$0xff] }
 0x668   :  { %4604 = vmatpush.bf16.msrb.mxu0 %v13453_v39  ;;  %4630 = vmatpush.bf16.msrb.mxu2 %v13454_v45  ;;  %v13464_v39 = vld [vmem:[#allocation114_spill] sm:$0xff]  ;;  %v13465_v45 = vld [vmem:[#allocation116_spill] sm:$0xff] }
 0x66a   :  { %4616 = vmatpush.bf16.msrb.mxu1 %v13455_v3  ;;  %4642 = vmatpush.bf16.msrb.mxu3 %v13456_v16  ;;  %v13466_v3 = vld [vmem:[#allocation118_spill] sm:$0xff] }
 0x66c   :  { %4605 = vmatpush.bf16.msrb.mxu0 %v13457_v62  ;;  %4631 = vmatpush.bf16.msrb.mxu2 %v13458_v33 }
 0x66e   :  { %4617 = vmatpush.bf16.msrb.mxu1 %v13459_v22  ;;  %4643 = vmatpush.bf16.msrb.mxu3 %v13460_v47  ;;  %v13467_v22 = vld [vmem:[#allocation41_spill] sm:$0xff]  ;;  %v13468_v47 = vld [vmem:[#allocation238_spill] sm:$0xff] }
 0x670   :  { %4606 = vmatpush.bf16.msrb.mxu0 %v13461_v2  ;;  %4632 = vmatpush.bf16.msrb.mxu2 %v13462_v35  ;;  %v4193_v16 = vpop.f32.mrf.mxu0 }
 0x672   :  { %4618 = vmatpush.bf16.msrb.mxu1 %v13463_v30  ;;  %4644 = vmatpush.bf16.msrb.mxu3 %v13464_v39  ;;  %v13469_v39 = vld [vmem:[#allocation49_spill] sm:$0xff] }
 0x676   :  { %4619 = vmatpush.bf16.msrb.mxu1 %v13465_v45  ;;  %4645 = vmatpush.bf16.msrb.mxu3 %v13466_v3  ;;  %v4206_v62 = vpop.f32.mrf.mxu1  ;;  %v4219_v63 = vpop.f32.mrf.mxu2 }
 0x677   :  { %v4207_v33 = vadd.f32 %v4206_v62, %v4193_v16 }
 0x678   :  { %v4195_v24 = vpop.f32.mrf.mxu0 }
 0x679   :  { %v4392_v40 = vadd.f32 %v4207_v33, %v13467_v22 }
 0x67b   :  { %v4400_v27 = vadd.f32 %v4392_v40, %v13468_v47 }
 0x67c   :  { %v4232_v2 = vpop.f32.mrf.mxu3 }
 0x67d   :  { %v7973_v54 = vmul.f32 -1.442695, %v4400_v27  ;;  %v4233_v35 = vadd.f32 %v4232_v2, %v4219_v63  ;;  %v13471_v27 = vld [vmem:[#allocation120_spill] sm:$0xff]  ;;  %v13472_v63 = vld [vmem:[#allocation31_spill] sm:$0xff] }
 0x67e   :  { %v4208_v23 = vpop.f32.mrf.mxu1  ;;  %v4221_v30 = vpop.f32.mrf.mxu2 }
 0x67f   :  { %9405 = vpow2.f32 %v7973_v54  ;;  %v4393_v6 = vadd.f32 %v4233_v35, %v13469_v39  ;;  %v13474_v30 = vld [vmem:[#allocation71_spill] sm:$0xff] }
 0x680   :  { %v4245_v45 = vpop.f32.mrf.mxu0 }
 0x681   :  { %v4401_v3 = vadd.f32 %v4393_v6, %v13470_v18 }
 0x683   :  { %v7974_v29 = vmul.f32 -1.442695, %v4401_v3  ;;  %v13473_v3 = vld [vmem:[#allocation121_spill] sm:$0xff] }
 0x684   :  { %v4234_v49 = vpop.f32.mrf.mxu3 }
 0x685   :  { %v9406_v21 = vpop.eup %9405  ;;  %9407 = vpow2.f32 %v7974_v29 }
 0x686   :  { %v4258_v24 = vpop.f32.mrf.mxu1  ;;  %v4271_v16 = vpop.f32.mrf.mxu2  ;;  %v11784_v22 = vadd.f32 1.0, %v9406_v21 }
 0x687   :  { %v4259_v33 = vadd.f32 %v4258_v24, %v4245_v45 }
 0x688   :  { %v4247_v40 = vpop.f32.mrf.mxu0  ;;  %9409 = vrcp.f32 %v11784_v22  ;;  %vm4421_vm9 = vweird.f32 %v11784_v22 }
 0x689   :  { %v4394_v2 = vadd.f32 %v4259_v33, %v13471_v27 }
 0x68b   :  { %v9408_v23 = vpop.eup %9407  ;;  %v4402_v54 = vadd.f32 %v4394_v2, %v13472_v63 }
 0x68c   :  { %v4284_v35 = vpop.f32.mrf.mxu3  ;;  %v11789_v62 = vadd.f32 1.0, %v9408_v23 }
 0x68d   :  { %v7975_v39 = vmul.f32 -1.442695, %v4402_v54  ;;  %v4285_v6 = vadd.f32 %v4284_v35, %v4271_v16 }
 0x68e   :  { %v4260_v49 = vpop.f32.mrf.mxu1  ;;  %v4273_v29 = vpop.f32.mrf.mxu2  ;;  %vm4436_vm13 = vweird.f32 %v11789_v62 }
 0x68f   :  { %9411 = vpow2.f32 %v7975_v39  ;;  %v4395_v45 = vadd.f32 %v4285_v6, %v13473_v3  ;;  %v11793_v40 = vpop.eup %9409  ;;  %v13475_v6 = vld [vmem:[#allocation182_spill] sm:$0xff] }
 0x690   :  { %v4297_v21 = vpop.f32.mrf.mxu0  ;;  %9413 = vrcp.f32 %v11789_v62  ;;  %v4417_v16 = vmul.f32 %v11793_v40, %v11784_v22  ;;  %v13476_v49 = vld [vmem:[#allocation186_spill] sm:$0xff]  ;;  %vm4422_vm8 = vweird.f32 %v11793_v40 }
 0x691   :  { %v4403_v24 = vadd.f32 %v4395_v45, %v13474_v30  ;;  %v1327_v29 = vadd.f32 %v13476_v49, %v13475_v6  ;;  %v1385_v6 = vadd.f32 %v13478_v17, %v13477_v42  ;;  %v13479_v17 = vld [vmem:[#allocation129_spill] sm:$0xff]  ;;  %vm11818_vm11 = vmor %vm4421_vm9, %vm4422_vm8 }
 0x692   :  { %v4418_v30 = vsub.f32 1.0, %v4417_v16 }
 0x693   :  { %v7976_v33 = vmul.f32 -1.442695, %v4403_v24 }
 0x694   :  { %v4286_v27 = vpop.f32.mrf.mxu3 }
 0x695   :  { %v9412_v2 = vpop.eup %9411  ;;  %9415 = vpow2.f32 %v7976_v33 }
 0x696   :  { %v4452_v23 = vadd.f32 1.0, %v9412_v2  ;;  %v4323_v54 = vpop.f32.mrf.mxu2  ;;  %v4310_v35 = vpop.f32.mrf.mxu1  ;;  %v4419_v2 = vmul.f32 %v11793_v40, %v4418_v30 }
 0x697   :  { %v11798_v39 = vpop.eup %9413  ;;  %v4311_v3 = vadd.f32 %v4310_v35, %v4297_v21 }
 0x698   :  { %9417 = vrcp.f32 %v4452_v23  ;;  %v4299_v45 = vpop.f32.mrf.mxu0  ;;  %v4432_v27 = vmul.f32 %v11798_v39, %v11789_v62  ;;  %v4420_v30 = vadd.f32 %v11793_v40, %v4419_v2  ;;  %vm4459_vm14 = vweird.f32 %v4452_v23 }
 0x699   :  { %v4396_v63 = vadd.f32 %v4311_v3, %v1327_v29  ;;  %v4425_v3 = vand.u32 2147483647, %v11784_v22  ;;  %v4427_v45 = vand.u32 2147483648, %v11784_v22  ;;  %v4440_v22 = vand.u32 2147483647, %v11789_v62 }
 0x69a   :  { %v4433_v35 = vsub.f32 1.0, %v4432_v27  ;;  %vm4437_vm0 = vweird.f32 %v11798_v39 }
 0x69b   :  { %v9416_v24 = vpop.eup %9415  ;;  %v4404_v33 = vadd.f32 %v4396_v63, %v13362_v41  ;;  %v4465_v41 = vand.u32 2147483648, %v4452_v23  ;;  %vm11822_vm12 = vcmp.eq.f32.partialorder %v4425_v3, 8.507059e+37  ;;  %v4428_v2 = vor.u32 1.1754944e-38, %v4427_v45  ;;  %vm4438_vm3 = vmor %vm4436_vm13, %vm4437_vm0 }
 0x69c   :  { %v11804_v18 = vadd.f32 1.0, %v9416_v24  ;;  %v4336_v47 = vpop.f32.mrf.mxu3  ;;  %v4434_v27 = vmul.f32 %v11798_v39, %v4433_v35  ;;  %v4442_v45 = vand.u32 2147483648, %v11789_v62  ;;  %vm4441_vm6 = vcmp.eq.f32.partialorder %v4440_v22, 8.507059e+37 }
 0x69d   :  { %v4337_v21 = vadd.f32 %v4336_v47, %v4323_v54  ;;  %v4463_v54 = vand.u32 2147483647, %v4452_v23  ;;  %v4466_v3 = vor.u32 1.1754944e-38, %v4465_v41 }
 0x69e   :  { %v9418_v19 = vpop.eup %9417  ;;  %9419 = vrcp.f32 %v11804_v18  ;;  %v4325_v16 = vpop.f32.mrf.mxu2  ;;  %v4480_v13 = vand.u32 2147483648, %v11804_v18  ;;  %vm4474_vm4 = vweird.f32 %v11804_v18 }
 0x69f   :  { %v4455_v49 = vmul.f32 %v9418_v19, %v4452_v23  ;;  %v4312_v29 = vpop.f32.mrf.mxu1  ;;  %9421 = vtanh.f32 %v4404_v33  ;;  %v4397_v63 = vadd.f32 %v4337_v21, %v1385_v6  ;;  %vm4460_vm10 = vweird.f32 %v9418_v19 }
 0x6a0   :  { %v4424_v21 = vsel %vm11818_vm11, %v11793_v40, %v4420_v30  ;;  %vm4461_vm15 = vmor %vm4459_vm14, %vm4460_vm10  ;;  %vm4464_vm1 = vcmp.eq.f32.partialorder %v4463_v54, 8.507059e+37  ;;  %v4435_v23 = vadd.f32 %v11798_v39, %v4434_v27  ;;  %v4481_v27 = vor.u32 1.1754944e-38, %v4480_v13 }
 0x6a1   :  { %v4456_v24 = vsub.f32 1.0, %v4455_v49  ;;  %v4405_v42 = vadd.f32 %v4397_v63, %v13479_v17  ;;  %v4429_v40 = vsel %vm11822_vm12, %v4428_v2, %v4424_v21  ;;  %v4443_v33 = vor.u32 1.1754944e-38, %v4442_v45  ;;  %v13486_v45 = vld [vmem:[#allocation230_spill] sm:$0xff] }
 0x6a3   :  { %v4457_v47 = vmul.f32 %v9418_v19, %v4456_v24  ;;  %9423 = vtanh.f32 %v4405_v42  ;;  %v4439_v42 = vsel %vm4438_vm3, %v11798_v39, %v4435_v23  ;;  %v13485_v39 = vld [vmem:[#allocation229_spill] sm:$0xff] }
 0x6a4   :  { %v9420_v16 = vpop.eup %9419  ;;  %v4338_v49 = vpop.f32.mrf.mxu3 }
 0x6a5   :  { %v4470_v6 = vmul.f32 %v9420_v16, %v11804_v18  ;;  %v4458_v35 = vadd.f32 %v9418_v19, %v4457_v47  ;;  %v9422_v63 = vpop.eup %9421  ;;  %v4478_v47 = vand.u32 2147483647, %v11804_v18  ;;  %vm4475_vm2 = vweird.f32 %v9420_v16 }
 0x6a6   :  { %v4526_v49 = vmul.f32 %v9422_v63, %v4429_v40  ;;  %vm4476_vm5 = vmor %vm4474_vm4, %vm4475_vm2 }
 0x6a7   :  { %v4471_v24 = vsub.f32 1.0, %v4470_v6  ;;  %v4462_v17 = vsel %vm4461_vm15, %v9418_v19, %v4458_v35  ;;  %vm4479_vm7 = vcmp.eq.f32.partialorder %v4478_v47, 8.507059e+37  ;;  %v4444_v6 = vsel %vm4441_vm6, %v4443_v33, %v4439_v42  ;;  %v13487_v47 = vld [vmem:[#allocation231_spill] sm:$0xff] }
 0x6a8   :  { %v4467_v30 = vsel %vm4464_vm1, %v4466_v3, %v4462_v17 }
 0x6a9   :  { %v4472_v29 = vmul.f32 %v9420_v16, %v4471_v24  ;;  %v4524_v41 = vmul.f32 %v4467_v30, %v11621_v60  ;;  %v9424_v17 = vpop.eup %9423  ;;  %v13484_v24 = vld [vmem:[#allocation227_spill] sm:$0xff] }
 0x6aa   :  { %v4527_v35 = vmul.f32 %v9424_v17, %v4444_v6  ;;  %v1443_v23 = vadd.f32 %v13485_v39, %v13484_v24 }
 0x6ab   :  { %v11846_v19 = vadd.f32 %v4526_v49, %v4524_v41  ;;  %v4473_v54 = vadd.f32 %v9420_v16, %v4472_v29  ;;  %v1501_v29 = vadd.f32 %v13487_v47, %v13486_v45 }
 0x6ad   :  { %v4477_v2 = vsel %vm4476_vm5, %v9420_v16, %v4473_v54 }
 0x6ae   :  { %v4482_v21 = vsel %vm4479_vm7, %v4481_v27, %v4477_v2 }
 0x6af   :  { %v4525_v62 = vmul.f32 %v4482_v21, %v11624_v25 }
 0x6b0   :  { %v4349_v60 = vpop.f32.mrf.mxu0 }
 0x6b1   :  { %v11850_v63 = vadd.f32 %v4527_v35, %v4525_v62 }
 0x6b6   :  { %v4362_v18 = vpop.f32.mrf.mxu1  ;;  %v4375_v3 = vpop.f32.mrf.mxu2 }
 0x6b7   :  { %v4363_v40 = vadd.f32 %v4362_v18, %v4349_v60 }
 0x6b8   :  { %v4351_v30 = vpop.f32.mrf.mxu0 }
 0x6b9   :  { %v4398_v13 = vadd.f32 %v4363_v40, %v1443_v23 }
 0x6bb   :  { %v4406_v22 = vadd.f32 %v4398_v13, %v10737_v5 }
 0x6bc   :  { %v4388_v16 = vpop.f32.mrf.mxu3 }
 0x6bd   :  { %v7977_v41 = vmul.f32 -1.442695, %v4406_v22  ;;  %v4389_v49 = vadd.f32 %v4388_v16, %v4375_v3 }
 0x6be   :  { %v4364_v25 = vpop.f32.mrf.mxu1  ;;  %v4377_v42 = vpop.f32.mrf.mxu2 }
 0x6bf   :  { %9425 = vpow2.f32 %v7977_v41  ;;  %v4399_v54 = vadd.f32 %v4389_v49, %v1501_v29 }
 0x6c1   :  { %v4407_v17 = vadd.f32 %v4399_v54, %v10742_v51 }
 0x6c3   :  { %v7978_v27 = vmul.f32 -1.442695, %v4407_v17 }
 0x6c4   :  { %v4390_v33 = vpop.f32.mrf.mxu3 }
 0x6c5   :  { %v9426_v2 = vpop.eup %9425  ;;  %9427 = vpow2.f32 %v7978_v27 }
 0x6c6   :  { %v4492_v60 = vadd.f32 1.0, %v9426_v2 }
 0x6c8   :  { %9429 = vrcp.f32 %v4492_v60  ;;  %v4505_v3 = vand.u32 2147483648, %v4492_v60  ;;  %v4503_v39 = vand.u32 2147483647, %v4492_v60  ;;  %vm4499_vm9 = vweird.f32 %v4492_v60 }
 0x6ca   :  { %v4506_v13 = vor.u32 1.1754944e-38, %v4505_v3  ;;  %vm4504_vm11 = vcmp.eq.f32.partialorder %v4503_v39, 8.507059e+37  ;;  %v13492_v3 = vld [vmem:[#allocation175_spill] sm:$0xff]  ;;  %v13494_v39 = vld [vmem:[#allocation184_spill] sm:$0xff] }
 0x6cb   :  { %v9428_v6 = vpop.eup %9427 }
 0x6cc   :  { %v4493_v21 = vadd.f32 1.0, %v9428_v6 }
 0x6ce   :  { %v9430_v62 = vpop.eup %9429  ;;  %9431 = vrcp.f32 %v4493_v21  ;;  %v4520_v29 = vand.u32 2147483648, %v4493_v21  ;;  %v4518_v25 = vand.u32 2147483647, %v4493_v21  ;;  %vm4514_vm13 = vweird.f32 %v4493_v21 }
 0x6cf   :  { %v4495_v35 = vmul.f32 %v9430_v62, %v4492_v60  ;;  %9433 = vtanh.f32 %v11846_v19  ;;  %vm4500_vm8 = vweird.f32 %v9430_v62 }
 0x6d0   :  { %vm4501_vm10 = vmor %vm4499_vm9, %vm4500_vm8  ;;  %9435 = vtanh.f32 %v11850_v63  ;;  %v4521_v17 = vor.u32 1.1754944e-38, %v4520_v29  ;;  %vm4519_vm15 = vcmp.eq.f32.partialorder %v4518_v25, 8.507059e+37  ;;  %v13503_v29 = vld [vmem:[#allocation189_spill] sm:$0xff] }
 0x6d1   :  { %v4496_v18 = vsub.f32 1.0, %v4495_v35  ;;  %v13490_v35 = vld [vmem:[#allocation170_spill] sm:$0xff]  ;;  %v13506_v25 = vld [vmem:[#allocation201_spill] sm:$0xff] }
 0x6d3   :  { %v4497_v24 = vmul.f32 %v9430_v62, %v4496_v18  ;;  %v13491_v18 = vld [vmem:[#allocation173_spill] sm:$0xff] }
 0x6d4   :  { %v9432_v23 = vpop.eup %9431 }
 0x6d5   :  { %v4498_v40 = vadd.f32 %v9430_v62, %v4497_v24  ;;  %v4510_v30 = vmul.f32 %v9432_v23, %v4493_v21  ;;  %v9434_v45 = vpop.eup %9433  ;;  %vm4515_vm12 = vweird.f32 %v9432_v23  ;;  %v13488_v21 = vld [vmem:[#allocation179_spill] sm:$0xff]  ;;  %v13493_v24 = vld [vmem:[#allocation181_spill] sm:$0xff] }
 0x6d6   :  { %vm4516_vm14 = vmor %vm4514_vm13, %vm4515_vm12  ;;  %v9436_v33 = vpop.eup %9435 }
 0x6d7   :  { %v4502_v22 = vsel %vm4501_vm10, %v9430_v62, %v4498_v40  ;;  %v4511_v16 = vsub.f32 1.0, %v4510_v30  ;;  %v13489_v62 = vld [vmem:[#allocation167_spill] sm:$0xff]  ;;  %v13496_v40 = vld [vmem:[#allocation180_spill] sm:$0xff] }
 0x6d8   :  { %v4507_v47 = vsel %vm4504_vm11, %v4506_v13, %v4502_v22  ;;  %v13497_v30 = vld [vmem:[#allocation188_spill] sm:$0xff]  ;;  %v13498_v13 = vld [vmem:[#allocation190_spill] sm:$0xff]  ;;  %v13499_v22 = vld [vmem:[#allocation183_spill] sm:$0xff] }
 0x6d9   :  { %v4532_v41 = vmul.f32 %v9434_v45, %v4507_v47  ;;  %v4512_v49 = vmul.f32 %v9432_v23, %v4511_v16  ;;  %v13500_v16 = vld [vmem:[#allocation187_spill] sm:$0xff]  ;;  %v13501_v45 = vld [vmem:[#allocation193_spill] sm:$0xff]  ;;  %v13502_v47 = vld [vmem:[#allocation196_spill] sm:$0xff] }
 0x6db   :  { %v11860_v42 = vpack.c.bf16 %v4532_v41, %v4532_v41  ;;  %v4513_v54 = vadd.f32 %v9432_v23, %v4512_v49  ;;  %v13504_v41 = vld [vmem:[#allocation191_spill] sm:$0xff] }
 0x6dc   :  { %v13505_v49 = vld [vmem:[#allocation199_spill] sm:$0xff] }
 0x6dd   :  { %v4517_v27 = vsel %vm4516_vm14, %v9432_v23, %v4513_v54  ;;  %4555 = vmatmul.bf16.vlgmr.msra.gmra.mxu0 %v11860_v42  ;;  %4581 = vmatmul.bf16.vlgmr.msra.gmra.mxu2 %v11860_v42  ;;  %v13495_v23 = vld [vmem:[#allocation178_spill] sm:$0xff]  ;;  %v13507_v54 = vld [vmem:[#allocation195_spill] sm:$0xff] }
 0x6de   :  { %v4522_v2 = vsel %vm4519_vm15, %v4521_v17, %v4517_v27  ;;  %4651 = vmatpush.bf16.msra.mxu0 %v12911_v61  ;;  %4677 = vmatpush.bf16.msra.mxu2 %v12912_v9  ;;  %v13508_v17 = vld [vmem:[#allocation197_spill] sm:$0xff]  ;;  %v13509_v27 = vld [vmem:[#allocation203_spill] sm:$0xff] }
 0x6df   :  { %v4533_v60 = vmul.f32 %v9436_v33, %v4522_v2  ;;  %v13510_v33 = vld [vmem:[#allocation206_spill] sm:$0xff]  ;;  %v13511_v2 = vld [vmem:[#allocation200_spill] sm:$0xff] }
 0x6e1   :  { %v11866_v6 = vpack.c.bf16 %v4533_v60, %v4533_v60  ;;  %v13512_v60 = vld [vmem:[#allocation202_spill] sm:$0xff] }
 0x6e2   :  { %4652 = vmatpush.bf16.msra.mxu0 %v12913_v26  ;;  %4678 = vmatpush.bf16.msra.mxu2 %v12914_v46 }
 0x6e3   :  { %4568 = vmatmul.bf16.vlgmr.msra.gmra.mxu1 %v11866_v6  ;;  %4594 = vmatmul.bf16.vlgmr.msra.gmra.mxu3 %v11866_v6 }
 0x6e4   :  { %4664 = vmatpush.bf16.msra.mxu1 %v12915_v38  ;;  %4690 = vmatpush.bf16.msra.mxu3 %v12916_v37 }
 0x6e6   :  { %4653 = vmatpush.bf16.msra.mxu0 %v12917_v36  ;;  %4679 = vmatpush.bf16.msra.mxu2 %v12918_v10 }
 0x6e8   :  { %4665 = vmatpush.bf16.msra.mxu1 %v12919_v32  ;;  %4691 = vmatpush.bf16.msra.mxu3 %v12920_v28 }
 0x6ea   :  { %4654 = vmatpush.bf16.msra.mxu0 %v12921_v31  ;;  %4680 = vmatpush.bf16.msra.mxu2 %v12922_v7 }
 0x6ec   :  { %4666 = vmatpush.bf16.msra.mxu1 %v12923_v57  ;;  %4692 = vmatpush.bf16.msra.mxu3 %v12924_v52 }
 0x6ed   :  { %4607 = vmatmul.bf16.vlgmr.msrb.gmra.mxu0 %v11860_v42  ;;  %4633 = vmatmul.bf16.vlgmr.msrb.gmra.mxu2 %v11860_v42 }
 0x6ee   :  { %4655 = vmatpush.bf16.msra.mxu0 %v12925_v4  ;;  %4681 = vmatpush.bf16.msra.mxu2 %v12926_v53 }
 0x6f0   :  { %4667 = vmatpush.bf16.msra.mxu1 %v13028_v55  ;;  %4693 = vmatpush.bf16.msra.mxu3 %v13029_v56 }
 0x6f2   :  { %4656 = vmatpush.bf16.msra.mxu0 %v13030_v0  ;;  %4682 = vmatpush.bf16.msra.mxu2 %v13031_v48 }
 0x6f3   :  { %4620 = vmatmul.bf16.vlgmr.msrb.gmra.mxu1 %v11866_v6  ;;  %4646 = vmatmul.bf16.vlgmr.msrb.gmra.mxu3 %v11866_v6 }
 0x6f4   :  { %4668 = vmatpush.bf16.msra.mxu1 %v13032_v43  ;;  %4694 = vmatpush.bf16.msra.mxu3 %v13033_v34 }
 0x6f6   :  { %4657 = vmatpush.bf16.msra.mxu0 %v13034_v15  ;;  %4683 = vmatpush.bf16.msra.mxu2 %v13035_v12 }
 0x6f8   :  { %4669 = vmatpush.bf16.msra.mxu1 %v13036_v1  ;;  %4695 = vmatpush.bf16.msra.mxu3 %v13037_v8 }
 0x6fa   :  { %4658 = vmatpush.bf16.msra.mxu0 %v13038_v20  ;;  %4684 = vmatpush.bf16.msra.mxu2 %v13039_v11 }
 0x6fc   :  { %4670 = vmatpush.bf16.msra.mxu1 %v13042_v58  ;;  %4696 = vmatpush.bf16.msra.mxu3 %v13043_v44 }
 0x6fd   :  { %4659 = vmatmul.bf16.vlgmr.msra.gmra.mxu0 %v11860_v42  ;;  %4685 = vmatmul.bf16.vlgmr.msra.gmra.mxu2 %v11860_v42 }
 0x6fe   :  { %4703 = vmatpush.bf16.msrb.mxu0 %v13040_v59  ;;  %4729 = vmatpush.bf16.msrb.mxu2 %v13041_v50 }
 0x700   :  { %4671 = vmatpush.bf16.msra.mxu1 %v13489_v62  ;;  %4697 = vmatpush.bf16.msra.mxu3 %v13490_v35 }
 0x702   :  { %4704 = vmatpush.bf16.msrb.mxu0 %v13143_v14  ;;  %4730 = vmatpush.bf16.msrb.mxu2 %v13488_v21 }
 0x703   :  { %4672 = vmatmul.bf16.vlgmr.msra.gmra.mxu1 %v11866_v6  ;;  %4698 = vmatmul.bf16.vlgmr.msra.gmra.mxu3 %v11866_v6 }
 0x704   :  { %4716 = vmatpush.bf16.msrb.mxu1 %v13491_v18  ;;  %4742 = vmatpush.bf16.msrb.mxu3 %v13492_v3 }
 0x706   :  { %4705 = vmatpush.bf16.msrb.mxu0 %v13493_v24  ;;  %4731 = vmatpush.bf16.msrb.mxu2 %v13494_v39 }
 0x708   :  { %4717 = vmatpush.bf16.msrb.mxu1 %v13495_v23  ;;  %4743 = vmatpush.bf16.msrb.mxu3 %v13496_v40  ;;  %v13586_v40 = vld [vmem:[#allocation30_spill] sm:$0xff] }
 0x70a   :  { %4706 = vmatpush.bf16.msrb.mxu0 %v13497_v30  ;;  %4732 = vmatpush.bf16.msrb.mxu2 %v13498_v13 }
 0x70c   :  { %4718 = vmatpush.bf16.msrb.mxu1 %v13499_v22  ;;  %4744 = vmatpush.bf16.msrb.mxu3 %v13500_v16 }
 0x70e   :  { %4707 = vmatpush.bf16.msrb.mxu0 %v13501_v45  ;;  %4733 = vmatpush.bf16.msrb.mxu2 %v13502_v47  ;;  %v13513_v47 = vld [vmem:[#allocation210_spill] sm:$0xff] }
 0x710   :  { %4719 = vmatpush.bf16.msrb.mxu1 %v13503_v29  ;;  %4745 = vmatpush.bf16.msrb.mxu3 %v13504_v41  ;;  %v13514_v29 = vld [vmem:[#allocation212_spill] sm:$0xff] }
 0x711   :  { %v13515_v41 = vld [vmem:[#allocation40_spill] sm:$0xff] }
 0x712   :  { %4708 = vmatpush.bf16.msrb.mxu0 %v13505_v49  ;;  %4734 = vmatpush.bf16.msrb.mxu2 %v13506_v25  ;;  %v13516_v49 = vld [vmem:[#allocation43_spill] sm:$0xff]  ;;  %v13517_v25 = vld [vmem:[#allocation205_spill] sm:$0xff] }
 0x714   :  { %4720 = vmatpush.bf16.msrb.mxu1 %v13507_v54  ;;  %4746 = vmatpush.bf16.msrb.mxu3 %v13508_v17  ;;  %v13518_v54 = vld [vmem:[#allocation209_spill] sm:$0xff] }
 0x716   :  { %4709 = vmatpush.bf16.msrb.mxu0 %v13509_v27  ;;  %4735 = vmatpush.bf16.msrb.mxu2 %v13510_v33  ;;  %v13519_v33 = vld [vmem:[#allocation45_spill] sm:$0xff] }
 0x718   :  { %4721 = vmatpush.bf16.msrb.mxu1 %v13511_v2  ;;  %4747 = vmatpush.bf16.msrb.mxu3 %v13512_v60  ;;  %v13520_v2 = vld [vmem:[#allocation47_spill] sm:$0xff] }
 0x719   :  { %v13521_v60 = vld [vmem:[#allocation211_spill] sm:$0xff] }
 0x71a   :  { %4710 = vmatpush.bf16.msrb.mxu0 %v13513_v47  ;;  %4736 = vmatpush.bf16.msrb.mxu2 %v13514_v29  ;;  %v13522_v47 = vld [vmem:[#allocation213_spill] sm:$0xff]  ;;  %v13523_v29 = vld [vmem:[#allocation42_spill] sm:$0xff] }
 0x71c   :  { %4722 = vmatpush.bf16.msrb.mxu1 %v13517_v25  ;;  %4748 = vmatpush.bf16.msrb.mxu3 %v13518_v54  ;;  %v13526_v54 = vld [vmem:[#allocation53_spill] sm:$0xff]  ;;  %v13534_v25 = vld [vmem:[#allocation63_spill] sm:$0xff] }
 0x71d   :  { %4711 = vmatmul.bf16.vlgmr.msrb.gmra.mxu0 %v11860_v42  ;;  %4737 = vmatmul.bf16.vlgmr.msrb.gmra.mxu2 %v11860_v42  ;;  %v13527_v42 = vld [vmem:[#allocation46_spill] sm:$0xff] }
 0x71e   :  { %4910 = vmatpush.bf16.msra.mxu0 %v13515_v41  ;;  %4936 = vmatpush.bf16.msra.mxu2 %v13516_v49  ;;  %v13524_v41 = vld [vmem:[#allocation44_spill] sm:$0xff]  ;;  %v13525_v49 = vld [vmem:[#allocation50_spill] sm:$0xff] }
 0x720   :  { %4723 = vmatpush.bf16.msrb.mxu1 %v13521_v60  ;;  %4749 = vmatpush.bf16.msrb.mxu3 %v13522_v47  ;;  %v13530_v60 = vld [vmem:[#allocation57_spill] sm:$0xff]  ;;  %v13531_v47 = vld [vmem:[#allocation52_spill] sm:$0xff] }
 0x722   :  { %4911 = vmatpush.bf16.msra.mxu0 %v13519_v33  ;;  %4937 = vmatpush.bf16.msra.mxu2 %v13520_v2  ;;  %v13528_v33 = vld [vmem:[#allocation48_spill] sm:$0xff]  ;;  %v13529_v2 = vld [vmem:[#allocation55_spill] sm:$0xff] }
 0x723   :  { %4724 = vmatmul.bf16.vlgmr.msrb.gmra.mxu1 %v11866_v6  ;;  %4750 = vmatmul.bf16.vlgmr.msrb.gmra.mxu3 %v11866_v6  ;;  %v13535_v6 = vld [vmem:[#allocation56_spill] sm:$0xff] }
 0x724   :  { %4923 = vmatpush.bf16.msra.mxu1 %v13523_v29  ;;  %4949 = vmatpush.bf16.msra.mxu3 %v13524_v41  ;;  %v13532_v29 = vld [vmem:[#allocation54_spill] sm:$0xff]  ;;  %v13533_v41 = vld [vmem:[#allocation60_spill] sm:$0xff] }
 0x726   :  { %4912 = vmatpush.bf16.msra.mxu0 %v13525_v49  ;;  %4938 = vmatpush.bf16.msra.mxu2 %v13526_v54  ;;  %v13536_v49 = vld [vmem:[#allocation58_spill] sm:$0xff]  ;;  %v13537_v54 = vld [vmem:[#allocation65_spill] sm:$0xff] }
 0x728   :  { %4924 = vmatpush.bf16.msra.mxu1 %v13527_v42  ;;  %4950 = vmatpush.bf16.msra.mxu3 %v13528_v33  ;;  %v13538_v42 = vld [vmem:[#allocation67_spill] sm:$0xff]  ;;  %v13539_v33 = vld [vmem:[#allocation62_spill] sm:$0xff] }
 0x72a   :  { %4913 = vmatpush.bf16.msra.mxu0 %v13529_v2  ;;  %4939 = vmatpush.bf16.msra.mxu2 %v13530_v60  ;;  %v13540_v2 = vld [vmem:[#allocation64_spill] sm:$0xff]  ;;  %v13541_v60 = vld [vmem:[#allocation70_spill] sm:$0xff] }
 0x72c   :  { %4925 = vmatpush.bf16.msra.mxu1 %v13531_v47  ;;  %4951 = vmatpush.bf16.msra.mxu3 %v13532_v29  ;;  %v13542_v47 = vld [vmem:[#allocation73_spill] sm:$0xff]  ;;  %v13543_v29 = vld [vmem:[#allocation66_spill] sm:$0xff] }
 0x72e   :  { %4914 = vmatpush.bf16.msra.mxu0 %v13533_v41  ;;  %4940 = vmatpush.bf16.msra.mxu2 %v13534_v25  ;;  %v13544_v41 = vld [vmem:[#allocation68_spill] sm:$0xff]  ;;  %v13545_v25 = vld [vmem:[#allocation75_spill] sm:$0xff] }
 0x730   :  { %4926 = vmatpush.bf16.msra.mxu1 %v13535_v6  ;;  %4952 = vmatpush.bf16.msra.mxu3 %v13536_v49  ;;  %v13546_v6 = vld [vmem:[#allocation77_spill] sm:$0xff]  ;;  %v13547_v49 = vld [vmem:[#allocation79_spill] sm:$0xff] }
 0x732   :  { %4915 = vmatpush.bf16.msra.mxu0 %v13537_v54  ;;  %4941 = vmatpush.bf16.msra.mxu2 %v13538_v42  ;;  %v13548_v54 = vld [vmem:[#allocation82_spill] sm:$0xff]  ;;  %v13549_v42 = vld [vmem:[#allocation72_spill] sm:$0xff] }
 0x734   :  { %4927 = vmatpush.bf16.msra.mxu1 %v13539_v33  ;;  %4953 = vmatpush.bf16.msra.mxu3 %v13540_v2  ;;  %v13550_v33 = vld [vmem:[#allocation74_spill] sm:$0xff]  ;;  %v13551_v2 = vld [vmem:[#allocation85_spill] sm:$0xff] }
 0x736   :  { %4916 = vmatpush.bf16.msra.mxu0 %v13541_v60  ;;  %4942 = vmatpush.bf16.msra.mxu2 %v13542_v47  ;;  %v13552_v60 = vld [vmem:[#allocation87_spill] sm:$0xff]  ;;  %v13553_v47 = vld [vmem:[#allocation76_spill] sm:$0xff] }
 0x738   :  { %4928 = vmatpush.bf16.msra.mxu1 %v13543_v29  ;;  %4954 = vmatpush.bf16.msra.mxu3 %v13544_v41  ;;  %v13554_v29 = vld [vmem:[#allocation78_spill] sm:$0xff]  ;;  %v13555_v41 = vld [vmem:[#allocation80_spill] sm:$0xff] }
 0x73a   :  { %4917 = vmatpush.bf16.msra.mxu0 %v13545_v25  ;;  %4943 = vmatpush.bf16.msra.mxu2 %v13546_v6  ;;  %v13556_v25 = vld [vmem:[#allocation84_spill] sm:$0xff]  ;;  %v13557_v6 = vld [vmem:[#allocation90_spill] sm:$0xff] }
 0x73c   :  { %4929 = vmatpush.bf16.msra.mxu1 %v13549_v42  ;;  %4955 = vmatpush.bf16.msra.mxu3 %v13550_v33  ;;  %v13560_v42 = vld [vmem:[#allocation88_spill] sm:$0xff]  ;;  %v13561_v33 = vld [vmem:[#allocation95_spill] sm:$0xff] }
 0x73e   :  { %4962 = vmatpush.bf16.msrb.mxu0 %v13547_v49  ;;  %4988 = vmatpush.bf16.msrb.mxu2 %v13548_v54  ;;  %v13558_v49 = vld [vmem:[#allocation93_spill] sm:$0xff]  ;;  %v13559_v54 = vld [vmem:[#allocation86_spill] sm:$0xff] }
 0x740   :  { %4930 = vmatpush.bf16.msra.mxu1 %v13553_v47  ;;  %4956 = vmatpush.bf16.msra.mxu3 %v13554_v29  ;;  %v13564_v47 = vld [vmem:[#allocation94_spill] sm:$0xff]  ;;  %v13565_v29 = vld [vmem:[#allocation100_spill] sm:$0xff] }
 0x742   :  { %4963 = vmatpush.bf16.msrb.mxu0 %v13551_v2  ;;  %4989 = vmatpush.bf16.msrb.mxu2 %v13552_v60  ;;  %v13562_v2 = vld [vmem:[#allocation97_spill] sm:$0xff]  ;;  %v13563_v60 = vld [vmem:[#allocation92_spill] sm:$0xff] }
 0x744   :  { %4975 = vmatpush.bf16.msrb.mxu1 %v13555_v41  ;;  %5001 = vmatpush.bf16.msrb.mxu3 %v13556_v25  ;;  %v13566_v41 = vld [vmem:[#allocation103_spill] sm:$0xff]  ;;  %v13567_v25 = vld [vmem:[#allocation96_spill] sm:$0xff] }
 0x746   :  { %4964 = vmatpush.bf16.msrb.mxu0 %v13557_v6  ;;  %4990 = vmatpush.bf16.msrb.mxu2 %v13558_v49  ;;  %v13568_v6 = vld [vmem:[#allocation98_spill] sm:$0xff]  ;;  %v13569_v49 = vld [vmem:[#allocation105_spill] sm:$0xff] }
 0x748   :  { %4976 = vmatpush.bf16.msrb.mxu1 %v13559_v54  ;;  %5002 = vmatpush.bf16.msrb.mxu3 %v13560_v42  ;;  %v13570_v54 = vld [vmem:[#allocation107_spill] sm:$0xff]  ;;  %v13571_v42 = vld [vmem:[#allocation102_spill] sm:$0xff] }
 0x74a   :  { %4965 = vmatpush.bf16.msrb.mxu0 %v13561_v33  ;;  %4991 = vmatpush.bf16.msrb.mxu2 %v13562_v2  ;;  %v13572_v33 = vld [vmem:[#allocation104_spill] sm:$0xff]  ;;  %v13573_v2 = vld [vmem:[#allocation110_spill] sm:$0xff] }
 0x74c   :  { %4977 = vmatpush.bf16.msrb.mxu1 %v13563_v60  ;;  %5003 = vmatpush.bf16.msrb.mxu3 %v13564_v47  ;;  %v13574_v60 = vld [vmem:[#allocation113_spill] sm:$0xff]  ;;  %v13575_v47 = vld [vmem:[#allocation106_spill] sm:$0xff] }
 0x74e   :  { %4966 = vmatpush.bf16.msrb.mxu0 %v13565_v29  ;;  %4992 = vmatpush.bf16.msrb.mxu2 %v13566_v41  ;;  %v13576_v29 = vld [vmem:[#allocation108_spill] sm:$0xff]  ;;  %v13577_v41 = vld [vmem:[#allocation115_spill] sm:$0xff] }
 0x750   :  { %4978 = vmatpush.bf16.msrb.mxu1 %v13567_v25  ;;  %5004 = vmatpush.bf16.msrb.mxu3 %v13568_v6  ;;  %v13578_v25 = vld [vmem:[#allocation117_spill] sm:$0xff]  ;;  %v13579_v6 = vld [vmem:[#allocation112_spill] sm:$0xff] }
 0x752   :  { %4967 = vmatpush.bf16.msrb.mxu0 %v13569_v49  ;;  %4993 = vmatpush.bf16.msrb.mxu2 %v13570_v54  ;;  %v13580_v49 = vld [vmem:[#allocation114_spill] sm:$0xff]  ;;  %v13581_v54 = vld [vmem:[#allocation116_spill] sm:$0xff] }
 0x754   :  { %4979 = vmatpush.bf16.msrb.mxu1 %v13571_v42  ;;  %5005 = vmatpush.bf16.msrb.mxu3 %v13572_v33  ;;  %v13582_v42 = vld [vmem:[#allocation118_spill] sm:$0xff] }
 0x756   :  { %4968 = vmatpush.bf16.msrb.mxu0 %v13573_v2  ;;  %4994 = vmatpush.bf16.msrb.mxu2 %v13574_v60 }
 0x758   :  { %4980 = vmatpush.bf16.msrb.mxu1 %v13575_v47  ;;  %5006 = vmatpush.bf16.msrb.mxu3 %v13576_v29  ;;  %v13583_v47 = vld [vmem:[#allocation51_spill] sm:$0xff]  ;;  %v13584_v29 = vld [vmem:[#allocation238_spill] sm:$0xff] }
 0x75a   :  { %4969 = vmatpush.bf16.msrb.mxu0 %v13577_v41  ;;  %4995 = vmatpush.bf16.msrb.mxu2 %v13578_v25  ;;  %v4556_v33 = vpop.f32.mrf.mxu0 }
 0x75c   :  { %4981 = vmatpush.bf16.msrb.mxu1 %v13579_v6  ;;  %5007 = vmatpush.bf16.msrb.mxu3 %v13580_v49  ;;  %v13585_v49 = vld [vmem:[#allocation59_spill] sm:$0xff] }
 0x760   :  { %4982 = vmatpush.bf16.msrb.mxu1 %v13581_v54  ;;  %5008 = vmatpush.bf16.msrb.mxu3 %v13582_v42  ;;  %v4569_v2 = vpop.f32.mrf.mxu1  ;;  %v4582_v27 = vpop.f32.mrf.mxu2 }
 0x761   :  { %v4570_v60 = vadd.f32 %v4569_v2, %v4556_v33 }
 0x762   :  { %v4558_v17 = vpop.f32.mrf.mxu0 }
 0x763   :  { %v4755_v45 = vadd.f32 %v4570_v60, %v13583_v47  ;;  %v13588_v47 = vld [vmem:[#allocation31_spill] sm:$0xff] }
 0x765   :  { %v4763_v16 = vadd.f32 %v4755_v45, %v13584_v29 }
 0x766   :  { %v4595_v41 = vpop.f32.mrf.mxu3 }
 0x767   :  { %v7979_v22 = vmul.f32 -1.442695, %v4763_v16  ;;  %v4596_v25 = vadd.f32 %v4595_v41, %v4582_v27  ;;  %v13587_v16 = vld [vmem:[#allocation122_spill] sm:$0xff] }
 0x768   :  { %v4571_v13 = vpop.f32.mrf.mxu1  ;;  %v4584_v6 = vpop.f32.mrf.mxu2 }
 0x769   :  { %9437 = vpow2.f32 %v7979_v22  ;;  %v4756_v30 = vadd.f32 %v4596_v25, %v13585_v49  ;;  %v13589_v49 = vld [vmem:[#allocation124_spill] sm:$0xff] }
 0x76a   :  { %v4608_v54 = vpop.f32.mrf.mxu0 }
 0x76b   :  { %v4764_v42 = vadd.f32 %v4756_v30, %v13586_v40 }
 0x76d   :  { %v7980_v23 = vmul.f32 -1.442695, %v4764_v42 }
 0x76e   :  { %v4597_v39 = vpop.f32.mrf.mxu3 }
 0x76f   :  { %v9438_v24 = vpop.eup %9437  ;;  %9439 = vpow2.f32 %v7980_v23 }
 0x770   :  { %v4777_v17 = vadd.f32 1.0, %v9438_v24  ;;  %v4621_v33 = vpop.f32.mrf.mxu1  ;;  %v4634_v2 = vpop.f32.mrf.mxu2 }
 0x771   :  { %v4622_v60 = vadd.f32 %v4621_v33, %v4608_v54  ;;  %v13590_v33 = vld [vmem:[#allocation71_spill] sm:$0xff] }
 0x772   :  { %v4610_v45 = vpop.f32.mrf.mxu0  ;;  %9441 = vrcp.f32 %v4777_v17  ;;  %vm4784_vm1 = vweird.f32 %v4777_v17 }
 0x773   :  { %v4757_v27 = vadd.f32 %v4622_v60, %v13587_v16 }
 0x775   :  { %v9440_v13 = vpop.eup %9439  ;;  %v4765_v22 = vadd.f32 %v4757_v27, %v13588_v47 }
 0x776   :  { %v12014_v41 = vadd.f32 1.0, %v9440_v13  ;;  %v4647_v25 = vpop.f32.mrf.mxu3 }
 0x777   :  { %v7981_v6 = vmul.f32 -1.442695, %v4765_v22  ;;  %v4648_v30 = vadd.f32 %v4647_v25, %v4634_v2 }
 0x778   :  { %9443 = vrcp.f32 %v12014_v41  ;;  %v4623_v39 = vpop.f32.mrf.mxu1  ;;  %v4636_v23 = vpop.f32.mrf.mxu2  ;;  %vm4799_vm6 = vweird.f32 %v12014_v41 }
 0x779   :  { %v9442_v24 = vpop.eup %9441  ;;  %9445 = vpow2.f32 %v7981_v6  ;;  %v4758_v54 = vadd.f32 %v4648_v30, %v13589_v49  ;;  %v13591_v49 = vld [vmem:[#allocation198_spill] sm:$0xff] }
 0x77a   :  { %v4660_v42 = vpop.f32.mrf.mxu0  ;;  %v4780_v60 = vmul.f32 %v9442_v24, %v4777_v17  ;;  %vm4785_vm0 = vweird.f32 %v9442_v24 }
 0x77b   :  { %v4766_v45 = vadd.f32 %v4758_v54, %v13590_v33  ;;  %vm12030_vm2 = vmor %vm4784_vm1, %vm4785_vm0 }
 0x77c   :  { %v4781_v22 = vsub.f32 1.0, %v4780_v60  ;;  %v4790_v60 = vand.u32 2147483648, %v4777_v17 }
 0x77d   :  { %v7982_v16 = vmul.f32 -1.442695, %v4766_v45 }
 0x77e   :  { %v12019_v40 = vpop.eup %9443  ;;  %v4649_v27 = vpop.f32.mrf.mxu3  ;;  %v4782_v54 = vmul.f32 %v9442_v24, %v4781_v22 }
 0x77f   :  { %v9446_v13 = vpop.eup %9445  ;;  %9447 = vpow2.f32 %v7982_v16  ;;  %v4795_v39 = vmul.f32 %v12019_v40, %v12014_v41  ;;  %v13592_v27 = vld [vmem:[#allocation81_spill] sm:$0xff]  ;;  %v4788_v16 = vand.u32 2147483647, %v4777_v17  ;;  %vm4800_vm4 = vweird.f32 %v12019_v40 }
 0x780   :  { %v4815_v2 = vadd.f32 1.0, %v9446_v13  ;;  %v4686_v25 = vpop.f32.mrf.mxu2  ;;  %v4673_v23 = vpop.f32.mrf.mxu1  ;;  %v4783_v35 = vadd.f32 %v9442_v24, %v4782_v54  ;;  %v4791_v54 = vor.u32 1.1754944e-38, %v4790_v60  ;;  %v4805_v60 = vand.u32 2147483648, %v12014_v41  ;;  %vm12051_vm8 = vmor %vm4799_vm6, %vm4800_vm4 }
 0x781   :  { %v4674_v6 = vadd.f32 %v4673_v23, %v4660_v42  ;;  %v4796_v45 = vsub.f32 1.0, %v4795_v39  ;;  %vm12034_vm3 = vcmp.eq.f32.partialorder %v4788_v16, 8.507059e+37  ;;  %v4803_v16 = vand.u32 2147483647, %v12014_v41 }
 0x782   :  { %9449 = vrcp.f32 %v4815_v2  ;;  %v4662_v30 = vpop.f32.mrf.mxu0  ;;  %vm4822_vm7 = vweird.f32 %v4815_v2 }
 0x783   :  { %v4759_v29 = vadd.f32 %v4674_v6, %v13591_v49  ;;  %v4797_v22 = vmul.f32 %v12019_v40, %v4796_v45  ;;  %vm4804_vm11 = vcmp.eq.f32.partialorder %v4803_v16, 8.507059e+37 }
 0x785   :  { %v9448_v33 = vpop.eup %9447  ;;  %v4767_v3 = vadd.f32 %v4759_v29, %v13592_v27 }
 0x786   :  { %v12024_v47 = vadd.f32 1.0, %v9448_v33  ;;  %v4699_v13 = vpop.f32.mrf.mxu3  ;;  %v13593_v33 = vld [vmem:[#allocation207_spill] sm:$0xff] }
 0x787   :  { %v4700_v62 = vadd.f32 %v4699_v13, %v4686_v25  ;;  %v4828_v25 = vand.u32 2147483648, %v4815_v2  ;;  %v13598_v13 = vld [vmem:[#allocation129_spill] sm:$0xff] }
 0x788   :  { %v9450_v18 = vpop.eup %9449  ;;  %9451 = vrcp.f32 %v12024_v47  ;;  %v4688_v42 = vpop.f32.mrf.mxu2  ;;  %v4843_v49 = vand.u32 2147483648, %v12024_v47  ;;  %vm4837_vm13 = vweird.f32 %v12024_v47 }
 0x789   :  { %v4818_v23 = vmul.f32 %v9450_v18, %v4815_v2  ;;  %9453 = vtanh.f32 %v4767_v3  ;;  %v4675_v6 = vpop.f32.mrf.mxu1  ;;  %v4760_v39 = vadd.f32 %v4700_v62, %v13593_v33  ;;  %v4787_v3 = vsel %vm12030_vm2, %v9442_v24, %v4783_v35 }
 0x78a   :  { %vm4823_vm5 = vweird.f32 %v9450_v18  ;;  %v4826_v62 = vand.u32 2147483647, %v4815_v2  ;;  %v4798_v42 = vadd.f32 %v12019_v40, %v4797_v22  ;;  %v4792_v24 = vsel %vm12034_vm3, %v4791_v54, %v4787_v3 }
 0x78b   :  { %v4819_v30 = vsub.f32 1.0, %v4818_v23  ;;  %v4768_v45 = vadd.f32 %v4760_v39, %v13598_v13  ;;  %vm4824_vm9 = vmor %vm4822_vm7, %vm4823_vm5  ;;  %v4806_v3 = vor.u32 1.1754944e-38, %v4805_v60  ;;  %v4841_v13 = vand.u32 2147483647, %v12024_v47 }
 0x78c   :  { %vm4827_vm10 = vcmp.eq.f32.partialorder %v4826_v62, 8.507059e+37  ;;  %v4802_v2 = vsel %vm12051_vm8, %v12019_v40, %v4798_v42  ;;  %v4844_v40 = vor.u32 1.1754944e-38, %v4843_v49 }
 0x78d   :  { %v4820_v17 = vmul.f32 %v9450_v18, %v4819_v30  ;;  %9455 = vtanh.f32 %v4768_v45  ;;  %v4829_v30 = vor.u32 1.1754944e-38, %v4828_v25  ;;  %vm4842_vm15 = vcmp.eq.f32.partialorder %v4841_v13, 8.507059e+37  ;;  %v13602_v13 = vld [vmem:[#allocation234_spill] sm:$0xff] }
 0x78e   :  { %v9452_v23 = vpop.eup %9451  ;;  %v4701_v39 = vpop.f32.mrf.mxu3 }
 0x78f   :  { %v9454_v6 = vpop.eup %9453  ;;  %v4833_v35 = vmul.f32 %v9452_v23, %v12024_v47  ;;  %v4821_v33 = vadd.f32 %v9450_v18, %v4820_v17  ;;  %vm4838_vm12 = vweird.f32 %v9452_v23 }
 0x790   :  { %v4889_v41 = vmul.f32 %v9454_v6, %v4792_v24  ;;  %v4807_v6 = vsel %vm4804_vm11, %v4806_v3, %v4802_v2  ;;  %vm4839_vm14 = vmor %vm4837_vm13, %vm4838_vm12 }
 0x791   :  { %v4834_v29 = vsub.f32 1.0, %v4833_v35  ;;  %v4825_v45 = vsel %vm4824_vm9, %v9450_v18, %v4821_v33 }
 0x792   :  { %v4830_v54 = vsel %vm4827_vm10, %v4829_v30, %v4825_v45  ;;  %v13601_v45 = vld [vmem:[#allocation232_spill] sm:$0xff] }
 0x793   :  { %v4835_v17 = vmul.f32 %v9452_v23, %v4834_v29  ;;  %v4887_v39 = vmul.f32 %v4830_v54, %v11846_v19  ;;  %v9456_v25 = vpop.eup %9455 }
 0x794   :  { %v4890_v35 = vmul.f32 %v9456_v25, %v4807_v6 }
 0x795   :  { %v12063_v18 = vadd.f32 %v4889_v41, %v4887_v39  ;;  %v4836_v62 = vadd.f32 %v9452_v23, %v4835_v17 }
 0x797   :  { %v4840_v42 = vsel %vm4839_vm14, %v9452_v23, %v4836_v62 }
 0x798   :  { %v4845_v60 = vsel %vm4842_vm15, %v4844_v40, %v4840_v42  ;;  %v9822_v42 = vmov 2  }
 0x799   :  { %v4888_v24 = vmul.f32 %v4845_v60, %v11850_v63  ;;  %9240 = vset.pattern.permute.xlu1 %v9822_v42 }
 0x79a   :  { %v4712_v16 = vpop.f32.mrf.mxu0 }
 0x79b   :  { %v12066_v33 = vadd.f32 %v4890_v35, %v4888_v24  ;;  %v12072_v35 = vld [vmem:[#allocation6] sm:$0xff] }
 0x79c   :  { %5265 = vperm.xlu0 %9238, %v12072_v35   ;;  %5300 = vperm.xlu1 %9240, %v12072_v35  }
 0x7a0   :  { %v4725_v19 = vpop.f32.mrf.mxu1  ;;  %v4738_v22 = vpop.f32.mrf.mxu2 }
 0x7a1   :  { %v4726_v30 = vadd.f32 %v4725_v19, %v4712_v16 }
 0x7a2   :  { %v4714_v29 = vpop.f32.mrf.mxu0 }
 0x7a3   :  { %v4761_v47 = vadd.f32 %v4726_v30, %v13601_v45 }
 0x7a5   :  { %v4769_v41 = vadd.f32 %v4761_v47, %v10737_v5 }
 0x7a6   :  { %v4751_v2 = vpop.f32.mrf.mxu3 }
 0x7a7   :  { %v7983_v54 = vmul.f32 -1.442695, %v4769_v41  ;;  %v4752_v3 = vadd.f32 %v4751_v2, %v4738_v22  ;;  %v9823_v22 = vmov 1  }
 0x7a8   :  { %v4727_v49 = vpop.f32.mrf.mxu1  ;;  %v4740_v23 = vpop.f32.mrf.mxu2  ;;  %9239 = vset.pattern.permute.xlu0 %v9823_v22 }
 0x7a9   :  { %9457 = vpow2.f32 %v7983_v54  ;;  %v4762_v17 = vadd.f32 %v4752_v3, %v13602_v13  ;;  %5285 = vperm.xlu0 %9239, %v12072_v35   ;;  %v9824_v54 = vmov 3  }
 0x7aa   :  { %9241 = vset.pattern.permute.xlu1 %v9824_v54 }
 0x7ab   :  { %v4770_v63 = vadd.f32 %v4762_v17, %v10742_v51  ;;  %5315 = vperm.xlu1 %9241, %v12072_v35  }
 0x7ad   :  { %v7984_v39 = vmul.f32 -1.442695, %v4770_v63 }
 0x7ae   :  { %v4753_v25 = vpop.f32.mrf.mxu3 }
 0x7af   :  { %v9458_v6 = vpop.eup %9457  ;;  %9459 = vpow2.f32 %v7984_v39 }
 0x7b0   :  { %v4855_v62 = vadd.f32 1.0, %v9458_v6 }
 0x7b2   :  { %9461 = vrcp.f32 %v4855_v62  ;;  %v4868_v30 = vand.u32 2147483648, %v4855_v62  ;;  %v4866_v45 = vand.u32 2147483647, %v4855_v62  ;;  %vm4862_vm1 = vweird.f32 %v4855_v62 }
 0x7b4   :  { %v4869_v3 = vor.u32 1.1754944e-38, %v4868_v30  ;;  %vm4867_vm3 = vcmp.eq.f32.partialorder %v4866_v45, 8.507059e+37  ;;  %v13628_v45 = vld [vmem:[#allocation212_spill] sm:$0xff] }
 0x7b5   :  { %v9460_v40 = vpop.eup %9459 }
 0x7b6   :  { %v4856_v16 = vadd.f32 1.0, %v9460_v40 }
 0x7b8   :  { %v9462_v60 = vpop.eup %9461  ;;  %9463 = vrcp.f32 %v4856_v16  ;;  %v4883_v63 = vand.u32 2147483648, %v4856_v16  ;;  %v4881_v6 = vand.u32 2147483647, %v4856_v16  ;;  %vm4877_vm5 = vweird.f32 %v4856_v16 }
 0x7b9   :  { %v4858_v24 = vmul.f32 %v9462_v60, %v4855_v62  ;;  %9465 = vtanh.f32 %v12063_v18  ;;  %vm4863_vm0 = vweird.f32 %v9462_v60 }
 0x7ba   :  { %vm4864_vm2 = vmor %vm4862_vm1, %vm4863_vm0  ;;  %9467 = vtanh.f32 %v12066_v33  ;;  %v4884_v42 = vor.u32 1.1754944e-38, %v4883_v63  ;;  %vm4882_vm7 = vcmp.eq.f32.partialorder %v4881_v6, 8.507059e+37  ;;  %v9107_v6 = vld [vmem:[#allocation20 + $0xa4] sm:$0xf] }
 0x7bb   :  { %v4859_v19 = vsub.f32 1.0, %v4858_v24 }
 0x7bd   :  { %v4860_v29 = vmul.f32 %v9462_v60, %v4859_v19 }
 0x7be   :  { %v9464_v47 = vpop.eup %9463 }
 0x7bf   :  { %v4861_v41 = vadd.f32 %v9462_v60, %v4860_v29  ;;  %v4873_v2 = vmul.f32 %v9464_v47, %v4856_v16  ;;  %v9466_v13 = vpop.eup %9465  ;;  %vm4878_vm4 = vweird.f32 %v9464_v47  ;;  %v8233_v16 = vld [vmem:[#allocation20 + $0x1e0] sm:$0xf] }
 0x7c0   :  { %vm4879_vm6 = vmor %vm4877_vm5, %vm4878_vm4  ;;  %v13627_v29 = vld [vmem:[#allocation210_spill] sm:$0xff] }
 0x7c1   :  { %v4865_v49 = vsel %vm4864_vm2, %v9462_v60, %v4861_v41  ;;  %v4874_v23 = vsub.f32 1.0, %v4873_v2  ;;  %v9468_v60 = vpop.eup %9467  ;;  %v9147_v41 = vld [vmem:[#allocation20 + $0x1e4] sm:$0xf]  ;;  %v8235_v2 = vld [vmem:[#allocation20 + $0x1f0] sm:$0xf0] }
 0x7c2   :  { %v4870_v17 = vsel %vm4867_vm3, %v4869_v3, %v4865_v49  ;;  %v13629_v49 = vld [vmem:[#allocation205_spill] sm:$0xff] }
 0x7c3   :  { %v4895_v39 = vmul.f32 %v9466_v13, %v4870_v17  ;;  %v4875_v25 = vmul.f32 %v9464_v47, %v4874_v23  ;;  %v13630_v23 = vld [vmem:[#allocation209_spill] sm:$0xff]  ;;  %v8217_v13 = vld [vmem:[#allocation20 + $0x1c0] sm:$0xf] }
 0x7c4   :  { %v8073_v17 = vld [vmem:[#allocation20 + $0xa0] sm:$0xf] }
 0x7c5   :  { %v12080_v62 = vpack.c.bf16 %v4895_v39, %v4895_v39  ;;  %v4876_v40 = vadd.f32 %v9464_v47, %v4875_v25  ;;  %v8238_v39 = vor.u32 %v9147_v41, %v8235_v2  ;;  %v9109_v25 = vld [vmem:[#allocation20 + $0xac] sm:$0xf0]  ;;  %v8153_v41 = vld [vmem:[#allocation20 + $0x140] sm:$0xf] }
 0x7c6   :  { %v9129_v2 = vld [vmem:[#allocation20 + $0x14c] sm:$0xf0] }
 0x7c7   :  { %v4880_v24 = vsel %vm4879_vm6, %v9464_v47, %v4876_v40  ;;  %4918 = vmatmul.bf16.vlgmr.msra.gmra.mxu0 %v12080_v62  ;;  %4944 = vmatmul.bf16.vlgmr.msra.gmra.mxu2 %v12080_v62  ;;  %v9149_v47 = vld [vmem:[#allocation20 + $0x1ec] sm:$0xf0]  ;;  %v8075_v40 = vld [vmem:[#allocation20 + $0xb0] sm:$0xf0] }
 0x7c8   :  { %v4885_v19 = vsel %vm4882_vm7, %v4884_v42, %v4880_v24  ;;  %5014 = vmatpush.bf16.msra.mxu0 %v12911_v61  ;;  %5040 = vmatpush.bf16.msra.mxu2 %v12912_v9  ;;  %v13603_v61 = vld [vmem:[#allocation167_spill] sm:$0xff]  ;;  %v13604_v9 = vld [vmem:[#allocation170_spill] sm:$0xff]  ;;  %v8234_v63 = vor.u32 %v9149_v47, %v8233_v16  ;;  %v9145_v42 = vld [vmem:[#allocation20 + $0x1cc] sm:$0xf0] }
 0x7c9   :  { %v4896_v22 = vmul.f32 %v9468_v60, %v4885_v19  ;;  %v9143_v24 = vld [vmem:[#allocation20 + $0x1c4] sm:$0xf]  ;;  %v8219_v60 = vld [vmem:[#allocation20 + $0x1d0] sm:$0xf0]  ;;  %v13631_v19 = vld [vmem:[#allocation211_spill] sm:$0xff] }
 0x7cb   :  { %v12086_v30 = vpack.c.bf16 %v4896_v22, %v4896_v22  ;;  %v13632_v22 = vld [vmem:[#allocation213_spill] sm:$0xff] }
 0x7cc   :  { %5015 = vmatpush.bf16.msra.mxu0 %v12913_v26  ;;  %5041 = vmatpush.bf16.msra.mxu2 %v12914_v46  ;;  %v13605_v26 = vld [vmem:[#allocation173_spill] sm:$0xff]  ;;  %v13606_v46 = vld [vmem:[#allocation175_spill] sm:$0xff] }
 0x7cd   :  { %4931 = vmatmul.bf16.vlgmr.msra.gmra.mxu1 %v12086_v30  ;;  %4957 = vmatmul.bf16.vlgmr.msra.gmra.mxu3 %v12086_v30 }
 0x7ce   :  { %5027 = vmatpush.bf16.msra.mxu1 %v12915_v38  ;;  %5053 = vmatpush.bf16.msra.mxu3 %v12916_v37  ;;  %v13607_v38 = vld [vmem:[#allocation181_spill] sm:$0xff]  ;;  %v13608_v37 = vld [vmem:[#allocation184_spill] sm:$0xff] }
 0x7d0   :  { %5016 = vmatpush.bf16.msra.mxu0 %v12917_v36  ;;  %5042 = vmatpush.bf16.msra.mxu2 %v12918_v10  ;;  %v13609_v36 = vld [vmem:[#allocation178_spill] sm:$0xff]  ;;  %v13610_v10 = vld [vmem:[#allocation180_spill] sm:$0xff] }
 0x7d2   :  { %5028 = vmatpush.bf16.msra.mxu1 %v12919_v32  ;;  %5054 = vmatpush.bf16.msra.mxu3 %v12920_v28  ;;  %v13611_v32 = vld [vmem:[#allocation188_spill] sm:$0xff]  ;;  %v13612_v28 = vld [vmem:[#allocation190_spill] sm:$0xff] }
 0x7d4   :  { %5017 = vmatpush.bf16.msra.mxu0 %v12921_v31  ;;  %5043 = vmatpush.bf16.msra.mxu2 %v12922_v7  ;;  %v13613_v31 = vld [vmem:[#allocation183_spill] sm:$0xff] }
 0x7d5   :  { %v13614_v7 = vld [vmem:[#allocation187_spill] sm:$0xff] }
 0x7d6   :  { %5029 = vmatpush.bf16.msra.mxu1 %v12923_v57  ;;  %5055 = vmatpush.bf16.msra.mxu3 %v12924_v52  ;;  %v13615_v57 = vld [vmem:[#allocation193_spill] sm:$0xff]  ;;  %v13616_v52 = vld [vmem:[#allocation196_spill] sm:$0xff] }
 0x7d7   :  { %4970 = vmatmul.bf16.vlgmr.msrb.gmra.mxu0 %v12080_v62  ;;  %4996 = vmatmul.bf16.vlgmr.msrb.gmra.mxu2 %v12080_v62 }
 0x7d8   :  { %5018 = vmatpush.bf16.msra.mxu0 %v12925_v4  ;;  %5044 = vmatpush.bf16.msra.mxu2 %v12926_v53  ;;  %v13617_v4 = vld [vmem:[#allocation189_spill] sm:$0xff]  ;;  %v13618_v53 = vld [vmem:[#allocation191_spill] sm:$0xff] }
 0x7da   :  { %5030 = vmatpush.bf16.msra.mxu1 %v13028_v55  ;;  %5056 = vmatpush.bf16.msra.mxu3 %v13029_v56  ;;  %v13619_v55 = vld [vmem:[#allocation199_spill] sm:$0xff]  ;;  %v13620_v56 = vld [vmem:[#allocation201_spill] sm:$0xff] }
 0x7dc   :  { %5019 = vmatpush.bf16.msra.mxu0 %v13030_v0  ;;  %5045 = vmatpush.bf16.msra.mxu2 %v13031_v48  ;;  %v8105_v0 = vld [vmem:[#allocation20 + $0xe0] sm:$0xf]  ;;  %v13621_v48 = vld [vmem:[#allocation195_spill] sm:$0xff] }
 0x7dd   :  { %4983 = vmatmul.bf16.vlgmr.msrb.gmra.mxu1 %v12086_v30  ;;  %5009 = vmatmul.bf16.vlgmr.msrb.gmra.mxu3 %v12086_v30 }
 0x7de   :  { %5031 = vmatpush.bf16.msra.mxu1 %v13032_v43  ;;  %5057 = vmatpush.bf16.msra.mxu3 %v13033_v34  ;;  %v13622_v43 = vld [vmem:[#allocation197_spill] sm:$0xff]  ;;  %v9117_v34 = vld [vmem:[#allocation20 + $0xec] sm:$0xf0] }
 0x7e0   :  { %5020 = vmatpush.bf16.msra.mxu0 %v13034_v15  ;;  %5046 = vmatpush.bf16.msra.mxu2 %v13035_v12  ;;  %v9115_v15 = vld [vmem:[#allocation20 + $0xe4] sm:$0xf]  ;;  %v8107_v12 = vld [vmem:[#allocation20 + $0xf0] sm:$0xf0] }
 0x7e2   :  { %5032 = vmatpush.bf16.msra.mxu1 %v13036_v1  ;;  %5058 = vmatpush.bf16.msra.mxu3 %v13037_v8  ;;  %v13623_v1 = vld [vmem:[#allocation203_spill] sm:$0xff]  ;;  %v13624_v8 = vld [vmem:[#allocation206_spill] sm:$0xff] }
 0x7e4   :  { %5021 = vmatpush.bf16.msra.mxu0 %v13038_v20  ;;  %5047 = vmatpush.bf16.msra.mxu2 %v13039_v11  ;;  %v8106_v20 = vor.u32 %v9117_v34, %v8105_v0  ;;  %v8110_v11 = vor.u32 %v9115_v15, %v8107_v12  ;;  %v9099_v0 = vld [vmem:[#allocation20 + $0x64] sm:$0xf]  ;;  %v8187_v15 = vld [vmem:[#allocation20 + $0x190] sm:$0xf0] }
 0x7e5   :  { %v9135_v34 = vld [vmem:[#allocation20 + $0x184] sm:$0xf] }
 0x7e6   :  { %5033 = vmatpush.bf16.msra.mxu1 %v13042_v58  ;;  %5059 = vmatpush.bf16.msra.mxu3 %v13043_v44  ;;  %v13626_v58 = vld [vmem:[#allocation202_spill] sm:$0xff]  ;;  %v9113_v44 = vld [vmem:[#allocation20 + $0xcc] sm:$0xf0] }
 0x7e7   :  { %5022 = vmatmul.bf16.vlgmr.msra.gmra.mxu0 %v12080_v62  ;;  %5048 = vmatmul.bf16.vlgmr.msra.gmra.mxu2 %v12080_v62 }
 0x7e8   :  { %5066 = vmatpush.bf16.msrb.mxu0 %v13040_v59  ;;  %5092 = vmatpush.bf16.msrb.mxu2 %v13041_v50  ;;  %v8089_v59 = vld [vmem:[#allocation20 + $0xc0] sm:$0xf]  ;;  %v13625_v50 = vld [vmem:[#allocation200_spill] sm:$0xff] }
 0x7e9   :  { %v8090_v54 = vor.u32 %v9113_v44, %v8089_v59  ;;  %v9097_v59 = vld [vmem:[#allocation20 + $0x4c] sm:$0xf0] }
 0x7ea   :  { %5034 = vmatpush.bf16.msra.mxu1 %v13603_v61  ;;  %5060 = vmatpush.bf16.msra.mxu3 %v13604_v9  ;;  %v8074_v61 = vor.u32 %v9109_v25, %v8073_v17  ;;  %v8201_v9 = vld [vmem:[#allocation20 + $0x1a0] sm:$0xf]  ;;  %v9133_v44 = vld [vmem:[#allocation20 + $0x16c] sm:$0xf0]  ;;  %v5261_v17 = vld [vmem:[#allocation14] sm:$0x3] }
 0x7eb   :  { %v8009_v25 = vld [vmem:[#allocation20 + $0x20] sm:$0xf] }
 0x7ec   :  { %5067 = vmatpush.bf16.msrb.mxu0 %v13143_v14  ;;  %5093 = vmatpush.bf16.msrb.mxu2 %v13488_v21  ;;  %v9111_v14 = vld [vmem:[#allocation20 + $0xc4] sm:$0xf]  ;;  %v8091_v21 = vld [vmem:[#allocation20 + $0xd0] sm:$0xf0] }
 0x7ed   :  { %5035 = vmatmul.bf16.vlgmr.msra.gmra.mxu1 %v12086_v30  ;;  %5061 = vmatmul.bf16.vlgmr.msra.gmra.mxu3 %v12086_v30  ;;  %v8094_v3 = vor.u32 %v9111_v14, %v8091_v21  ;;  %v9131_v14 = vld [vmem:[#allocation20 + $0x164] sm:$0xf]  ;;  %v8171_v21 = vld [vmem:[#allocation20 + $0x170] sm:$0xf0] }
 0x7ee   :  { %5079 = vmatpush.bf16.msrb.mxu1 %v13605_v26  ;;  %5105 = vmatpush.bf16.msrb.mxu3 %v13606_v46  ;;  %v8078_v26 = vor.u32 %v9107_v6, %v8075_v40  ;;  %v8057_v46 = vld [vmem:[#allocation20 + $0x80] sm:$0xf]  ;;  %v8174_v47 = vor.u32 %v9131_v14, %v8171_v21  ;;  %v9093_v6 = vld [vmem:[#allocation20 + $0x2c] sm:$0xf0]  ;;  %v8243_v14 = vld [vmem:[#allocation20 + $0x1f8] sm:$0xf0] }
 0x7ef   :  { %v8137_v40 = vld [vmem:[#allocation20 + $0x120] sm:$0xf] }
 0x7f0   :  { %5068 = vmatpush.bf16.msrb.mxu0 %v13607_v38  ;;  %5094 = vmatpush.bf16.msrb.mxu2 %v13608_v37  ;;  %v8222_v38 = vor.u32 %v9143_v24, %v8219_v60  ;;  %v9105_v37 = vld [vmem:[#allocation20 + $0x8c] sm:$0xf0]  ;;  %v8010_v24 = vor.u32 %v9093_v6, %v8009_v25  ;;  %v9112_v25 = vld [vmem:[#allocation20 + $0xcc] sm:$0xf]  ;;  %v8099_v6 = vld [vmem:[#allocation20 + $0xd8] sm:$0xf0] }
 0x7f2   :  { %5080 = vmatpush.bf16.msrb.mxu1 %v13609_v36  ;;  %5106 = vmatpush.bf16.msrb.mxu3 %v13610_v10  ;;  %v9103_v36 = vld [vmem:[#allocation20 + $0x84] sm:$0xf]  ;;  %v8059_v10 = vld [vmem:[#allocation20 + $0x90] sm:$0xf0] }
 0x7f4   :  { %5069 = vmatpush.bf16.msrb.mxu0 %v13611_v32  ;;  %5095 = vmatpush.bf16.msrb.mxu2 %v13612_v28  ;;  %v9141_v32 = vld [vmem:[#allocation20 + $0x1ac] sm:$0xf0]  ;;  %v9139_v28 = vld [vmem:[#allocation20 + $0x1a4] sm:$0xf] }
 0x7f6   :  { %5081 = vmatpush.bf16.msrb.mxu1 %v13613_v31  ;;  %5107 = vmatpush.bf16.msrb.mxu3 %v13614_v7  ;;  %v8203_v31 = vld [vmem:[#allocation20 + $0x1b0] sm:$0xf0]  ;;  %v8058_v7 = vor.u32 %v9105_v37, %v8057_v46  ;;  %v5277_v37 = vperm.slane %v5261_v17, 1 }
 0x7f7   :  { %v8139_v46 = vld [vmem:[#allocation20 + $0x130] sm:$0xf0] }
 0x7f8   :  { %5070 = vmatpush.bf16.msrb.mxu0 %v13615_v57  ;;  %5096 = vmatpush.bf16.msrb.mxu2 %v13616_v52  ;;  %v8185_v57 = vld [vmem:[#allocation20 + $0x180] sm:$0xf]  ;;  %v8062_v52 = vor.u32 %v9103_v36, %v8059_v10 }
 0x7fa   :  { %5082 = vmatpush.bf16.msrb.mxu1 %v13617_v4  ;;  %5108 = vmatpush.bf16.msrb.mxu3 %v13618_v53  ;;  %v8041_v4 = vld [vmem:[#allocation20 + $0x60] sm:$0xf]  ;;  %v8202_v53 = vor.u32 %v9141_v32, %v8201_v9 }
 0x7fb   :  { %v7993_v32 = vld [vmem:[#allocation20] sm:$0xf] }
 0x7fc   :  { %5071 = vmatpush.bf16.msrb.mxu0 %v13619_v55  ;;  %5097 = vmatpush.bf16.msrb.mxu2 %v13620_v56  ;;  %v8206_v55 = vor.u32 %v9139_v28, %v8203_v31  ;;  %v9101_v56 = vld [vmem:[#allocation20 + $0x6c] sm:$0xf0] }
 0x7fd   :  { %v8042_v12 = vor.u32 %v9101_v56, %v8041_v4  ;;  %v9089_v28 = vld [vmem:[#allocation20 + $0xc] sm:$0xf0]  ;;  %v7995_v56 = vld [vmem:[#allocation20 + $0x10] sm:$0xf0] }
 0x7fe   :  { %5083 = vmatpush.bf16.msrb.mxu1 %v13621_v48  ;;  %5109 = vmatpush.bf16.msrb.mxu3 %v13622_v43  ;;  %v8043_v48 = vld [vmem:[#allocation20 + $0x70] sm:$0xf0]  ;;  %v9137_v43 = vld [vmem:[#allocation20 + $0x18c] sm:$0xf0] }
 0x7ff   :  { %v9121_v4 = vld [vmem:[#allocation20 + $0x10c] sm:$0xf0] }
 0x800   :  { %5072 = vmatpush.bf16.msrb.mxu0 %v13623_v1  ;;  %5098 = vmatpush.bf16.msrb.mxu2 %v13624_v8  ;;  %v8046_v1 = vor.u32 %v9099_v0, %v8043_v48  ;;  %v8025_v8 = vld [vmem:[#allocation20 + $0x40] sm:$0xf]  ;;  %v9119_v0 = vld [vmem:[#allocation20 + $0x104] sm:$0xf] }
 0x801   :  { %v8026_v16 = vor.u32 %v9097_v59, %v8025_v8  ;;  %v9116_v59 = vld [vmem:[#allocation20 + $0xec] sm:$0xf] }
 0x802   :  { %5084 = vmatpush.bf16.msrb.mxu1 %v13625_v50  ;;  %5110 = vmatpush.bf16.msrb.mxu3 %v13626_v58  ;;  %v9095_v50 = vld [vmem:[#allocation20 + $0x44] sm:$0xf]  ;;  %v8027_v58 = vld [vmem:[#allocation20 + $0x50] sm:$0xf0] }
 0x804   :  { %5073 = vmatpush.bf16.msrb.mxu0 %v13627_v29  ;;  %5099 = vmatpush.bf16.msrb.mxu2 %v13628_v45  ;;  %v8030_v29 = vor.u32 %v9095_v50, %v8027_v58  ;;  %v8115_v58 = vld [vmem:[#allocation20 + $0xf8] sm:$0xf0] }
 0x805   :  { %v8118_v21 = vor.u32 %v9116_v59, %v8115_v58  ;;  %v8067_v58 = vld [vmem:[#allocation20 + $0x98] sm:$0xf0] }
 0x806   :  { %5085 = vmatpush.bf16.msrb.mxu1 %v13629_v49  ;;  %5111 = vmatpush.bf16.msrb.mxu3 %v13630_v23  ;;  %v8154_v49 = vor.u32 %v9129_v2, %v8153_v41 }
 0x807   :  { %5074 = vmatmul.bf16.vlgmr.msrb.gmra.mxu0 %v12080_v62  ;;  %5100 = vmatmul.bf16.vlgmr.msrb.gmra.mxu2 %v12080_v62  ;;  %v8218_v62 = vor.u32 %v9145_v42, %v8217_v13  ;;  %v5262_v13 = vld [vmem:[#allocation12] ss:$4 sm:$0x3] }
 0x808   :  { %5803 = vmatpush.bf16.msra.mxu0 %v8106_v20  ;;  %5829 = vmatpush.bf16.msra.mxu2 %v8110_v11  ;;  %v8186_v20 = vor.u32 %v9137_v43, %v8185_v57  ;;  %v8190_v11 = vor.u32 %v9135_v34, %v8187_v15  ;;  %v9125_v42 = vld [vmem:[#allocation20 + $0x12c] sm:$0xf0]  ;;  %v5270_v9 = vperm.slane %v5262_v13, 1  ;;  %v7994_v57 = vor.u32 %v9089_v28, %v7993_v32  ;;  %v8123_v15 = vld [vmem:[#allocation20 + $0x110] sm:$0xf0] }
 0x809   :  { %v8138_v60 = vor.u32 %v9125_v42, %v8137_v40  ;;  %v8209_v32 = vld [vmem:[#allocation20 + $0x1a8] sm:$0xf]  ;;  %v9142_v28 = vld [vmem:[#allocation20 + $0x1b4] sm:$0xf0] }
 0x80a   :  { %5086 = vmatpush.bf16.msrb.mxu1 %v13631_v19  ;;  %5112 = vmatpush.bf16.msrb.mxu3 %v13632_v22  ;;  %v9091_v19 = vld [vmem:[#allocation20 + $0x24] sm:$0xf]  ;;  %v8011_v22 = vld [vmem:[#allocation20 + $0x30] sm:$0xf0] }
 0x80c   :  { %5804 = vmatpush.bf16.msra.mxu0 %v8090_v54  ;;  %5830 = vmatpush.bf16.msra.mxu2 %v8094_v3  ;;  %v9127_v54 = vld [vmem:[#allocation20 + $0x144] sm:$0xf]  ;;  %v8155_v3 = vld [vmem:[#allocation20 + $0x150] sm:$0xf0] }
 0x80d   :  { %5087 = vmatmul.bf16.vlgmr.msrb.gmra.mxu1 %v12086_v30  ;;  %5113 = vmatmul.bf16.vlgmr.msrb.gmra.mxu3 %v12086_v30  ;;  %v8169_v30 = vld [vmem:[#allocation20 + $0x160] sm:$0xf]  ;;  %v8158_v23 = vor.u32 %v9127_v54, %v8155_v3 }
 0x80e   :  { %5816 = vmatpush.bf16.msra.mxu1 %v8234_v63  ;;  %5842 = vmatpush.bf16.msra.mxu3 %v8238_v39  ;;  %v8170_v45 = vor.u32 %v9133_v44, %v8169_v30  ;;  %v5269_v63 = vperm.slane %v5262_v13, 0  ;;  %v5266_v39 = vpop.permute.xlu0 %5265  ;;  %v5301_v10 = vpop.permute.xlu1 %5300  ;;  %v9118_v30 = vld [vmem:[#allocation20 + $0xf4] sm:$0xf0]  ;;  %v9148_v44 = vld [vmem:[#allocation20 + $0x1ec] sm:$0xf] }
 0x80f   :  { %v5274_v43 = vmul.f32 %v5270_v9, %v5266_v39 }
 0x810   :  { %5805 = vmatpush.bf16.msra.mxu0 %v8074_v61  ;;  %5831 = vmatpush.bf16.msra.mxu2 %v8078_v26  ;;  %v9123_v61 = vld [vmem:[#allocation20 + $0x124] sm:$0xf]  ;;  %v8014_v26 = vor.u32 %v9091_v19, %v8011_v22  ;;  %v5273_v48 = vmul.f32 %v5269_v63, %v5266_v39  ;;  %v9146_v39 = vld [vmem:[#allocation20 + $0x1d4] sm:$0xf0]  ;;  %v9144_v19 = vld [vmem:[#allocation20 + $0x1cc] sm:$0xf] }
 0x811   :  { %v8142_v36 = vor.u32 %v9123_v61, %v8139_v46  ;;  %v5281_v2 = vadd.f32 %v5277_v37, %v5274_v43  ;;  %v8227_v22 = vld [vmem:[#allocation20 + $0x1d8] sm:$0xf0]  ;;  %v8081_v61 = vld [vmem:[#allocation20 + $0xa8] sm:$0xf] }
 0x812   :  { %5817 = vmatpush.bf16.msra.mxu1 %v8218_v62  ;;  %5843 = vmatpush.bf16.msra.mxu3 %v8222_v38  ;;  %v5298_v62 = vld [vmem:[#allocation12 + $0x2] ss:$4 sm:$0x3]  ;;  %v5276_v38 = vperm.slane %v5261_v17, 0  ;;  %v8230_v9 = vor.u32 %v9144_v19, %v8227_v22  ;;  %v8065_v43 = vld [vmem:[#allocation20 + $0x88] sm:$0xf] }
 0x813   :  { %v5304_v31 = vperm.slane %v5298_v62, 0  ;;  %v9130_v19 = vld [vmem:[#allocation20 + $0x154] sm:$0xf0]  ;;  %v9096_v22 = vld [vmem:[#allocation20 + $0x4c] sm:$0xf] }
 0x814   :  { %5806 = vmatpush.bf16.msra.mxu0 %v8058_v7  ;;  %5832 = vmatpush.bf16.msra.mxu2 %v8062_v52  ;;  %v5305_v7 = vperm.slane %v5298_v62, 1  ;;  %v8121_v52 = vld [vmem:[#allocation20 + $0x100] sm:$0xf]  ;;  %v5280_v41 = vadd.f32 %v5276_v38, %v5273_v48  ;;  %v9110_v62 = vld [vmem:[#allocation20 + $0xb4] sm:$0xf0] }
 0x815   :  { %v5308_v13 = vmul.f32 %v5304_v31, %v5301_v10  ;;  %v8082_v31 = vor.u32 %v9110_v62, %v8081_v61  ;;  %v8211_v48 = vld [vmem:[#allocation20 + $0x1b8] sm:$0xf0] }
 0x816   :  { %5818 = vmatpush.bf16.msra.mxu1 %v8202_v53  ;;  %5844 = vmatpush.bf16.msra.mxu3 %v8206_v55  ;;  %v8122_v53 = vor.u32 %v9121_v4, %v8121_v52  ;;  %v9087_v55 = vld [vmem:[#allocation20 + $0x4] sm:$0xf]  ;;  %v5309_v17 = vmul.f32 %v5305_v7, %v5301_v10  ;;  %v8210_v7 = vor.u32 %v9142_v28, %v8209_v32  ;;  %v8083_v52 = vld [vmem:[#allocation20 + $0xb8] sm:$0xf0]  ;;  %v9140_v4 = vld [vmem:[#allocation20 + $0x1ac] sm:$0xf] }
 0x817   :  { %v7998_v34 = vor.u32 %v9087_v55, %v7995_v56  ;;  %v8035_v61 = vld [vmem:[#allocation20 + $0x58] sm:$0xf0]  ;;  %v8145_v32 = vld [vmem:[#allocation20 + $0x128] sm:$0xf]  ;;  %v9126_v28 = vld [vmem:[#allocation20 + $0x134] sm:$0xf0] }
 0x818   :  { %5807 = vmatpush.bf16.msra.mxu0 %v8042_v12  ;;  %5833 = vmatpush.bf16.msra.mxu2 %v8046_v1  ;;  %v8113_v12 = vld [vmem:[#allocation20 + $0xe8] sm:$0xf]  ;;  %v8126_v1 = vor.u32 %v9119_v0, %v8123_v15 }
 0x819   :  { %v8114_v8 = vor.u32 %v9118_v30, %v8113_v12  ;;  %v8214_v12 = vor.u32 %v9140_v4, %v8211_v48  ;;  %v8001_v48 = vld [vmem:[#allocation20 + $0x8] sm:$0xf] }
 0x81a   :  { %5819 = vmatpush.bf16.msra.mxu1 %v8186_v20  ;;  %5845 = vmatpush.bf16.msra.mxu3 %v8190_v11  ;;  %v8241_v20 = vld [vmem:[#allocation20 + $0x1e8] sm:$0xf]  ;;  %v9150_v11 = vld [vmem:[#allocation20 + $0x1f4] sm:$0xf0] }
 0x81b   :  { %v8242_v50 = vor.u32 %v9150_v11, %v8241_v20  ;;  %v9104_v20 = vld [vmem:[#allocation20 + $0x8c] sm:$0xf] }
 0x81c   :  { %5808 = vmatpush.bf16.msra.mxu0 %v8026_v16  ;;  %5834 = vmatpush.bf16.msra.mxu2 %v8030_v29  ;;  %v8246_v16 = vor.u32 %v9148_v44, %v8243_v14  ;;  %v5283_v29 = vld [vmem:[#allocation12 + $0x1] ss:$4 sm:$0x3]  ;;  %v9136_v44 = vld [vmem:[#allocation20 + $0x18c] sm:$0xf] }
 0x81d   :  { %v5289_v54 = vperm.slane %v5283_v29, 0  ;;  %v5290_v3 = vperm.slane %v5283_v29, 1  ;;  %v5316_v46 = vpop.permute.xlu1 %5315  ;;  %v8195_v14 = vld [vmem:[#allocation20 + $0x198] sm:$0xf0]  ;;  %v8049_v29 = vld [vmem:[#allocation20 + $0x68] sm:$0xf] }
 0x81e   :  { %5820 = vmatpush.bf16.msra.mxu1 %v8170_v45  ;;  %5846 = vmatpush.bf16.msra.mxu3 %v8174_v47  ;;  %v5286_v45 = vpop.permute.xlu0 %5285  ;;  %v8097_v47 = vld [vmem:[#allocation20 + $0xc8] sm:$0xf] }
 0x81f   :  { %v5293_v40 = vmul.f32 %v5289_v54, %v5286_v45  ;;  %v5294_v42 = vmul.f32 %v5290_v3, %v5286_v45  ;;  %v9102_v45 = vld [vmem:[#allocation20 + $0x74] sm:$0xf0]  ;;  %v9100_v3 = vld [vmem:[#allocation20 + $0x6c] sm:$0xf] }
 0x820   :  { %5809 = vmatpush.bf16.msra.mxu0 %v8010_v24  ;;  %5835 = vmatpush.bf16.msra.mxu2 %v8014_v26  ;;  %v5313_v26 = vld [vmem:[#allocation12 + $0x3] ss:$4 sm:$0x3] }
 0x821   :  { %v5295_v38 = vadd.f32 %v5293_v40, %v5280_v41  ;;  %v5296_v37 = vadd.f32 %v5294_v42, %v5281_v2  ;;  %v5320_v10 = vperm.slane %v5313_v26, 1  ;;  %v9134_v54 = vld [vmem:[#allocation20 + $0x174] sm:$0xf0]  ;;  %v8033_v42 = vld [vmem:[#allocation20 + $0x48] sm:$0xf] }
 0x822   :  { %5821 = vmatpush.bf16.msra.mxu1 %v8154_v49  ;;  %5847 = vmatpush.bf16.msra.mxu3 %v8158_v23  ;;  %v9114_v49 = vld [vmem:[#allocation20 + $0xd4] sm:$0xf0]  ;;  %v8225_v23 = vld [vmem:[#allocation20 + $0x1c8] sm:$0xf] }
 0x823   :  { %v8098_v63 = vor.u32 %v9114_v49, %v8097_v47  ;;  %v8226_v24 = vor.u32 %v9146_v39, %v8225_v23  ;;  %v5311_v55 = vadd.f32 %v5309_v17, %v5296_v37  ;;  %v5324_v0 = vmul.f32 %v5320_v10, %v5316_v46  ;;  %v8177_v47 = vld [vmem:[#allocation20 + $0x168] sm:$0xf]  ;;  %v8051_v49 = vld [vmem:[#allocation20 + $0x78] sm:$0xf0]  ;;  %v9132_v23 = vld [vmem:[#allocation20 + $0x16c] sm:$0xf] }
 0x824   :  { %5810 = vmatpush.bf16.msra.mxu0 %v7994_v57  ;;  %5836 = vmatpush.bf16.msra.mxu2 %v7998_v34  ;;  %v9108_v57 = vld [vmem:[#allocation20 + $0xac] sm:$0xf]  ;;  %v9106_v34 = vld [vmem:[#allocation20 + $0x94] sm:$0xf0]  ;;  %v8050_v39 = vor.u32 %v9102_v45, %v8049_v29 }
 0x825   :  { %v8086_v15 = vor.u32 %v9108_v57, %v8083_v52  ;;  %v8066_v30 = vor.u32 %v9106_v34, %v8065_v43  ;;  %v5326_v59 = vadd.f32 %v5324_v0, %v5311_v55  ;;  %v9094_v10 = vld [vmem:[#allocation20 + $0x34] sm:$0xf0]  ;;  %v9124_v57 = vld [vmem:[#allocation20 + $0x12c] sm:$0xf]  ;;  %v8147_v52 = vld [vmem:[#allocation20 + $0x138] sm:$0xf0]  ;;  %v8146_v55 = vor.u32 %v9126_v28, %v8145_v32 }
 0x826   :  { %5822 = vmatpush.bf16.msra.mxu1 %v8138_v60  ;;  %5848 = vmatpush.bf16.msra.mxu3 %v8142_v36  ;;  %v8102_v60 = vor.u32 %v9112_v25, %v8099_v6  ;;  %v5319_v36 = vperm.slane %v5313_v26, 0  ;;  %v8178_v25 = vor.u32 %v9134_v54, %v8177_v47  ;;  %v8054_v6 = vor.u32 %v9100_v3, %v8051_v49  ;;  %v8163_v26 = vld [vmem:[#allocation20 + $0x158] sm:$0xf0]  ;;  %v9090_v43 = vld [vmem:[#allocation20 + $0x14] sm:$0xf0] }
 0x827   :  { %v5328_v2 = vmax.f32 %v5326_v59, 0.0  ;;  %v8150_v0 = vor.u32 %v9124_v57, %v8147_v52  ;;  %v8129_v34 = vld [vmem:[#allocation20 + $0x108] sm:$0xf]  ;;  %v8361_v47 = vld [vmem:[#allocation18 + $0xe0] sm:$0xf] }
 0x828   :  { %5855 = vmatpush.bf16.msrb.mxu0 %v8114_v8  ;;  %5881 = vmatpush.bf16.msrb.mxu2 %v8118_v21  ;;  %v5323_v56 = vmul.f32 %v5319_v36, %v5316_v46  ;;  %v9138_v8 = vld [vmem:[#allocation20 + $0x194] sm:$0xf0]  ;;  %v8070_v21 = vor.u32 %v9104_v20, %v8067_v58  ;;  %v8017_v36 = vld [vmem:[#allocation20 + $0x28] sm:$0xf]  ;;  %v8002_v20 = vor.u32 %v9090_v43, %v8001_v48  ;;  %v8363_v3 = vld [vmem:[#allocation18 + $0xf0] sm:$0xf0] }
 0x829   :  { %v8475_v57 = vld [vmem:[#allocation18 + $0x1d0] sm:$0xf0]  ;;  %v13634_v48 = vld [vmem:[#allocation125_spill] sm:$0xff] }
 0x82a   :  { %5823 = vmatpush.bf16.msra.mxu1 %v8122_v53  ;;  %5849 = vmatpush.bf16.msra.mxu3 %v8126_v1  ;;  %v5310_v53 = vadd.f32 %v5308_v13, %v5295_v38  ;;  %v8193_v1 = vld [vmem:[#allocation20 + $0x188] sm:$0xf]  ;;  %v8179_v13 = vld [vmem:[#allocation20 + $0x178] sm:$0xf0]  ;;  %v8038_v38 = vor.u32 %v9096_v22, %v8035_v61 }
 0x82b   :  { %v8182_v40 = vor.u32 %v9132_v23, %v8179_v13  ;;  %v8345_v13 = vld [vmem:[#allocation18 + $0xc0] sm:$0xf] }
 0x82c   :  { %5856 = vmatpush.bf16.msrb.mxu0 %v8098_v63  ;;  %5882 = vmatpush.bf16.msrb.mxu2 %v8102_v60  ;;  %v5325_v11 = vadd.f32 %v5323_v56, %v5310_v53  ;;  %v12166_v63 = vpack.c.bf16 %v5328_v2, %v5328_v2  ;;  %v8161_v60 = vld [vmem:[#allocation20 + $0x148] sm:$0xf]  ;;  %v8018_v53 = vor.u32 %v9094_v10, %v8017_v36  ;;  %v9051_v2 = vld [vmem:[#allocation18 + $0xe4] sm:$0xf]  ;;  %v8473_v10 = vld [vmem:[#allocation18 + $0x1c0] sm:$0xf] }
 0x82d   :  { %v8162_v62 = vor.u32 %v9130_v19, %v8161_v60  ;;  %v8366_v23 = vor.u32 %v9051_v2, %v8363_v3  ;;  %v9083_v60 = vld [vmem:[#allocation18 + $0x1e4] sm:$0xf]  ;;  %v8491_v19 = vld [vmem:[#allocation18 + $0x1f0] sm:$0xf0] }
 0x82e   :  { %5868 = vmatpush.bf16.msrb.mxu1 %v8242_v50  ;;  %5894 = vmatpush.bf16.msrb.mxu3 %v8246_v16  ;;  %v8194_v50 = vor.u32 %v9138_v8, %v8193_v1  ;;  %v8198_v16 = vor.u32 %v9136_v44, %v8195_v14  ;;  %v5327_v41 = vmax.f32 %v5325_v11, 0.0  ;;  %v9120_v1 = vld [vmem:[#allocation20 + $0x10c] sm:$0xf]  ;;  %v8131_v8 = vld [vmem:[#allocation20 + $0x118] sm:$0xf0] }
 0x82f   :  { %5824 = vmatmul.bf16.vlgmr.msra.gmra.mxu1 %v12166_v63  ;;  %5850 = vmatmul.bf16.vlgmr.msra.gmra.mxu3 %v12166_v63  ;;  %v9035_v2 = vld [vmem:[#allocation18 + $0x64] sm:$0xf] }
 0x830   :  { %5857 = vmatpush.bf16.msrb.mxu0 %v8082_v31  ;;  %5883 = vmatpush.bf16.msrb.mxu2 %v8086_v15  ;;  %v12164_v17 = vpack.c.bf16 %v5327_v41, %v5327_v41  ;;  %v9092_v31 = vld [vmem:[#allocation20 + $0x2c] sm:$0xf]  ;;  %v9122_v15 = vld [vmem:[#allocation20 + $0x114] sm:$0xf0]  ;;  %v9053_v41 = vld [vmem:[#allocation18 + $0xec] sm:$0xf0] }
 0x831   :  { %v8130_v11 = vor.u32 %v9122_v15, %v8129_v34  ;;  %v8362_v54 = vor.u32 %v9053_v41, %v8361_v47  ;;  %v9039_v15 = vld [vmem:[#allocation18 + $0x84] sm:$0xf]  ;;  %v8297_v47 = vld [vmem:[#allocation18 + $0x60] sm:$0xf]  ;;  %v9037_v41 = vld [vmem:[#allocation18 + $0x6c] sm:$0xf0] }
 0x832   :  { %5869 = vmatpush.bf16.msrb.mxu1 %v8226_v24  ;;  %5895 = vmatpush.bf16.msrb.mxu3 %v8230_v9  ;;  %v9098_v24 = vld [vmem:[#allocation20 + $0x54] sm:$0xf0]  ;;  %v9128_v9 = vld [vmem:[#allocation20 + $0x14c] sm:$0xf] }
 0x833   :  { %5811 = vmatmul.bf16.vlgmr.msra.gmra.mxu0 %v12164_v17  ;;  %5837 = vmatmul.bf16.vlgmr.msra.gmra.mxu2 %v12164_v17  ;;  %v8034_v46 = vor.u32 %v9098_v24, %v8033_v42  ;;  %v8166_v37 = vor.u32 %v9128_v9, %v8163_v26  ;;  %v8489_v42 = vld [vmem:[#allocation18 + $0x1e0] sm:$0xf]  ;;  %v9085_v24 = vld [vmem:[#allocation18 + $0x1ec] sm:$0xf0]  ;;  %v8494_v9 = vor.u32 %v9083_v60, %v8491_v19  ;;  %v9031_v19 = vld [vmem:[#allocation18 + $0x44] sm:$0xf] }
 0x834   :  { %5858 = vmatpush.bf16.msrb.mxu0 %v8066_v30  ;;  %5884 = vmatpush.bf16.msrb.mxu2 %v8070_v21  ;;  %v8003_v30 = vld [vmem:[#allocation20 + $0x18] sm:$0xf0]  ;;  %v8329_v26 = vld [vmem:[#allocation18 + $0xa0] sm:$0xf] }
 0x836   :  { %5870 = vmatpush.bf16.msrb.mxu1 %v8210_v7  ;;  %5896 = vmatpush.bf16.msrb.mxu3 %v8214_v12  ;;  %v8019_v7 = vld [vmem:[#allocation20 + $0x38] sm:$0xf0]  ;;  %v9088_v12 = vld [vmem:[#allocation20 + $0xc] sm:$0xf] }
 0x837   :  { %v8022_v56 = vor.u32 %v9092_v31, %v8019_v7  ;;  %v8006_v59 = vor.u32 %v9088_v12, %v8003_v30  ;;  %v9081_v31 = vld [vmem:[#allocation18 + $0x1cc] sm:$0xf0]  ;;  %v9079_v7 = vld [vmem:[#allocation18 + $0x1c4] sm:$0xf]  ;;  %v8315_v12 = vld [vmem:[#allocation18 + $0x90] sm:$0xf0] }
 0x838   :  { %5859 = vmatpush.bf16.msrb.mxu0 %v8050_v39  ;;  %5885 = vmatpush.bf16.msrb.mxu2 %v8054_v6  ;;  %v9047_v39 = vld [vmem:[#allocation18 + $0xc4] sm:$0xf]  ;;  %v8474_v52 = vor.u32 %v9081_v31, %v8473_v10  ;;  %v8425_v10 = vld [vmem:[#allocation18 + $0x160] sm:$0xf] }
 0x83a   :  { %5871 = vmatpush.bf16.msrb.mxu1 %v8194_v50  ;;  %5897 = vmatpush.bf16.msrb.mxu3 %v8198_v16  ;;  %v8134_v50 = vor.u32 %v9120_v1, %v8131_v8  ;;  %v9825_v16 = vmov 4   ;;  %v8318_v1 = vor.u32 %v9039_v15, %v8315_v12  ;;  %v8457_v8 = vld [vmem:[#allocation18 + $0x1a0] sm:$0xf]  ;;  %v9027_v12 = vld [vmem:[#allocation18 + $0x24] sm:$0xf] }
 0x83b   :  { %9242 = vset.pattern.permute.xlu2 %v9825_v16  ;;  %9243 = vset.pattern.permute.xlu0 %v9825_v16 }
 0x83c   :  { %5860 = vmatpush.bf16.msrb.mxu0 %v8034_v46  ;;  %5886 = vmatpush.bf16.msrb.mxu2 %v8038_v38  ;;  %v9045_v46 = vld [vmem:[#allocation18 + $0xac] sm:$0xf0]  ;;  %v9043_v38 = vld [vmem:[#allocation18 + $0xa4] sm:$0xf] }
 0x83d   :  { %5331 = vperm.xlu2 %9242, %v12072_v35   ;;  %v8490_v35 = vor.u32 %v9085_v24, %v8489_v42  ;;  %v8443_v42 = vld [vmem:[#allocation18 + $0x190] sm:$0xf0]  ;;  %v13636_v24 = vld [vmem:[#allocation61_spill] sm:$0xff] }
 0x83e   :  { %5872 = vmatpush.bf16.msrb.mxu1 %v8178_v25  ;;  %5898 = vmatpush.bf16.msrb.mxu3 %v8182_v40  ;;  %v8347_v25 = vld [vmem:[#allocation18 + $0xd0] sm:$0xf0] }
 0x83f   :  { %v8350_v40 = vor.u32 %v9047_v39, %v8347_v25  ;;  %v9073_v39 = vld [vmem:[#allocation18 + $0x18c] sm:$0xf0] }
 0x840   :  { %5861 = vmatpush.bf16.msrb.mxu0 %v8018_v53  ;;  %5887 = vmatpush.bf16.msrb.mxu2 %v8022_v56  ;;  %v8478_v53 = vor.u32 %v9079_v7, %v8475_v57  ;;  %v9041_v56 = vld [vmem:[#allocation18 + $0x8c] sm:$0xf0]  ;;  %v8427_v57 = vld [vmem:[#allocation18 + $0x170] sm:$0xf0] }
 0x842   :  { %5873 = vmatpush.bf16.msrb.mxu1 %v8162_v62  ;;  %5899 = vmatpush.bf16.msrb.mxu3 %v8166_v37  ;;  %v8330_v62 = vor.u32 %v9045_v46, %v8329_v26  ;;  %v8331_v37 = vld [vmem:[#allocation18 + $0xb0] sm:$0xf0] }
 0x843   :  { %v8334_v28 = vor.u32 %v9043_v38, %v8331_v37  ;;  %v13639_v38 = vld [vmem:[#allocation69_spill] sm:$0xff] }
 0x844   :  { %v12172_v4 = vpop.f32.mrf.mxu0  ;;  %5862 = vmatpush.bf16.msrb.mxu0 %v8002_v20  ;;  %5888 = vmatpush.bf16.msrb.mxu2 %v8006_v59  ;;  %v9077_v20 = vld [vmem:[#allocation18 + $0x1ac] sm:$0xf0] }
 0x845   :  { %v8458_v59 = vor.u32 %v9077_v20, %v8457_v8 }
 0x846   :  { %5874 = vmatpush.bf16.msrb.mxu1 %v8146_v55  ;;  %5900 = vmatpush.bf16.msrb.mxu3 %v8150_v0  ;;  %v8313_v55 = vld [vmem:[#allocation18 + $0x80] sm:$0xf]  ;;  %v13633_v0 = vld [vmem:[#allocation123_spill] sm:$0xff] }
 0x847   :  { %5863 = vmatmul.bf16.vlgmr.msrb.gmra.mxu0 %v12164_v17  ;;  %5889 = vmatmul.bf16.vlgmr.msrb.gmra.mxu2 %v12164_v17  ;;  %v9049_v17 = vld [vmem:[#allocation18 + $0xcc] sm:$0xf0]  ;;  %v1216_v43 = vadd.f32 %v13634_v48, %v13633_v0  ;;  %v8314_v34 = vor.u32 %v9041_v56, %v8313_v55  ;;  %v8265_v48 = vld [vmem:[#allocation18 + $0x20] sm:$0xf] }
 0x848   :  { %6227 = vmatpush.bf16.msra.mxu0 %v8362_v54  ;;  %6253 = vmatpush.bf16.msra.mxu2 %v8366_v23  ;;  %v8299_v54 = vld [vmem:[#allocation18 + $0x70] sm:$0xf0] }
 0x84a   :  { %v12174_v58 = vpop.f32.mrf.mxu1  ;;  %v12176_v44 = vpop.f32.mrf.mxu2  ;;  %5875 = vmatpush.bf16.msrb.mxu1 %v8130_v11  ;;  %5901 = vmatpush.bf16.msrb.mxu3 %v8134_v50  ;;  %v9075_v50 = vld [vmem:[#allocation18 + $0x1a4] sm:$0xf] }
 0x84b   :  { %v4933_v16 = vadd.f32 %v12174_v58, %v12172_v4  ;;  %v8302_v58 = vor.u32 %v9035_v2, %v8299_v54  ;;  %v8249_v54 = vld [vmem:[#allocation18] sm:$0xf] }
 0x84c   :  { %v4921_v14 = vpop.f32.mrf.mxu0  ;;  %6254 = vmatpush.bf16.msra.mxu2 %v8350_v40  ;;  %v9071_v40 = vld [vmem:[#allocation18 + $0x184] sm:$0xf] }
 0x84d   :  { %5876 = vmatmul.bf16.vlgmr.msrb.gmra.mxu1 %v12166_v63  ;;  %5902 = vmatmul.bf16.vlgmr.msrb.gmra.mxu3 %v12166_v63  ;;  %v8346_v63 = vor.u32 %v9049_v17, %v8345_v13  ;;  %v8459_v14 = vld [vmem:[#allocation18 + $0x1b0] sm:$0xf0]  ;;  %v8298_v13 = vor.u32 %v9037_v41, %v8297_v47  ;;  %v8441_v17 = vld [vmem:[#allocation18 + $0x180] sm:$0xf]  ;;  %v5118_v60 = vadd.f32 %v4933_v16, %v13636_v24  ;;  %v8371_v24 = vld [vmem:[#allocation18 + $0xf8] sm:$0xf0] }
 0x84e   :  { %6240 = vmatpush.bf16.msra.mxu1 %v8490_v35  ;;  %6266 = vmatpush.bf16.msra.mxu3 %v8494_v9  ;;  %v8462_v23 = vor.u32 %v9075_v50, %v8459_v14  ;;  %v8446_v35 = vor.u32 %v9071_v40, %v8443_v42  ;;  %v13638_v9 = vld [vmem:[#allocation127_spill] sm:$0xff] }
 0x84f   :  { %6228 = vmatpush.bf16.msra.mxu0 %v8346_v63  ;;  %v13635_v63 = vld [vmem:[#allocation31_spill] sm:$0xff] }
 0x850   :  { %v12180_v21 = vpop.f32.mrf.mxu3  ;;  %6255 = vmatpush.bf16.msra.mxu2 %v8334_v28  ;;  %v9067_v28 = vld [vmem:[#allocation18 + $0x164] sm:$0xf]  ;;  %v13642_v50 = vld [vmem:[#allocation71_spill] sm:$0xff] }
 0x851   :  { %v4959_v3 = vadd.f32 %v12180_v21, %v12176_v44  ;;  %v8281_v44 = vld [vmem:[#allocation18 + $0x40] sm:$0xf]  ;;  %v9033_v21 = vld [vmem:[#allocation18 + $0x4c] sm:$0xf0]  ;;  %v8430_v0 = vor.u32 %v9067_v28, %v8427_v57  ;;  %v9052_v42 = vld [vmem:[#allocation18 + $0xec] sm:$0xf] }
 0x852   :  { %v4934_v29 = vpop.f32.mrf.mxu1  ;;  %v4947_v45 = vpop.f32.mrf.mxu2  ;;  %6241 = vmatpush.bf16.msra.mxu1 %v8474_v52  ;;  %6267 = vmatpush.bf16.msra.mxu3 %v8478_v53  ;;  %v8282_v46 = vor.u32 %v9033_v21, %v8281_v44  ;;  %v13640_v52 = vld [vmem:[#allocation238_spill] sm:$0xff]  ;;  %v9061_v44 = vld [vmem:[#allocation18 + $0x12c] sm:$0xf0] }
 0x853   :  { %6229 = vmatpush.bf16.msra.mxu0 %v8330_v62  ;;  %v8283_v62 = vld [vmem:[#allocation18 + $0x50] sm:$0xf0]  ;;  %v5126_v53 = vadd.f32 %v5118_v60, %v13640_v52  ;;  %v9059_v21 = vld [vmem:[#allocation18 + $0x124] sm:$0xf] }
 0x854   :  { %v4971_v49 = vpop.f32.mrf.mxu0  ;;  %6256 = vmatpush.bf16.msra.mxu2 %v8318_v1  ;;  %v13641_v1 = vld [vmem:[#allocation30_spill] sm:$0xff] }
 0x855   :  { %v7985_v47 = vmul.f32 -1.442695, %v5126_v53  ;;  %v9055_v57 = vld [vmem:[#allocation18 + $0x104] sm:$0xf]  ;;  %v8379_v53 = vld [vmem:[#allocation18 + $0x110] sm:$0xf0] }
 0x856   :  { %6242 = vmatpush.bf16.msra.mxu1 %v8458_v59  ;;  %6268 = vmatpush.bf16.msra.mxu3 %v8462_v23  ;;  %v9065_v59 = vld [vmem:[#allocation18 + $0x14c] sm:$0xf0] }
 0x857   :  { %6230 = vmatpush.bf16.msra.mxu0 %v8314_v34 }
 0x858   :  { %v4960_v6 = vpop.f32.mrf.mxu3  ;;  %6257 = vmatpush.bf16.msra.mxu2 %v8302_v58 }
 0x859   :  { %v8442_v6 = vor.u32 %v9073_v39, %v8441_v17  ;;  %v8251_v17 = vld [vmem:[#allocation18 + $0x10] sm:$0xf0] }
 0x85a   :  { %v4984_v22 = vpop.f32.mrf.mxu1  ;;  %v4997_v61 = vpop.f32.mrf.mxu2  ;;  %6269 = vmatpush.bf16.msra.mxu3 %v8446_v35  ;;  %v8393_v35 = vld [vmem:[#allocation18 + $0x120] sm:$0xf] }
 0x85b   :  { %v4985_v32 = vadd.f32 %v4984_v22, %v4971_v49  ;;  %6231 = vmatpush.bf16.msra.mxu0 %v8298_v13  ;;  %v13637_v22 = vld [vmem:[#allocation126_spill] sm:$0xff]  ;;  %6243 = vmatpush.bf16.msra.mxu1 %v8442_v6 }
 0x85c   :  { %v4973_v36 = vpop.f32.mrf.mxu0  ;;  %v1274_v26 = vadd.f32 %v13638_v9, %v13637_v22  ;;  %v9023_v13 = vld [vmem:[#allocation18 + $0x4] sm:$0xf]  ;;  %v8395_v9 = vld [vmem:[#allocation18 + $0x130] sm:$0xf0] }
 0x85d   :  { %v5120_v11 = vadd.f32 %v4985_v32, %v1216_v43  ;;  %v8286_v36 = vor.u32 %v9031_v19, %v8283_v62  ;;  %v9069_v32 = vld [vmem:[#allocation18 + $0x16c] sm:$0xf0]  ;;  %v8374_v62 = vor.u32 %v9052_v42, %v8371_v24 }
 0x85e   :  { %v8426_v56 = vor.u32 %v9069_v32, %v8425_v10  ;;  %v9029_v43 = vld [vmem:[#allocation18 + $0x2c] sm:$0xf0]  ;;  %6270 = vmatpush.bf16.msra.mxu3 %v8430_v0  ;;  %v8355_v10 = vld [vmem:[#allocation18 + $0xd8] sm:$0xf0]  ;;  %v8377_v32 = vld [vmem:[#allocation18 + $0x100] sm:$0xf] }
 0x85f   :  { %v5128_v25 = vadd.f32 %v5120_v11, %v13635_v63  ;;  %6232 = vmatpush.bf16.msra.mxu0 %v8282_v46  ;;  %6258 = vmatpush.bf16.msra.mxu2 %v8286_v36  ;;  %v8266_v15 = vor.u32 %v9029_v43, %v8265_v48  ;;  %v8409_v11 = vld [vmem:[#allocation18 + $0x140] sm:$0xf]  ;;  %v8254_v63 = vor.u32 %v9023_v13, %v8251_v17  ;;  %v9050_v46 = vld [vmem:[#allocation18 + $0xd4] sm:$0xf0]  ;;  %v8321_v13 = vld [vmem:[#allocation18 + $0x88] sm:$0xf] }
 0x860   :  { %v5010_v30 = vpop.f32.mrf.mxu3  ;;  %6244 = vmatpush.bf16.msra.mxu1 %v8426_v56  ;;  %v8410_v41 = vor.u32 %v9065_v59, %v8409_v11  ;;  %v8497_v56 = vld [vmem:[#allocation18 + $0x1e8] sm:$0xf]  ;;  %v9086_v0 = vld [vmem:[#allocation18 + $0x1f4] sm:$0xf0]  ;;  %v8382_v43 = vor.u32 %v9055_v57, %v8379_v53  ;;  %v9044_v59 = vld [vmem:[#allocation18 + $0xac] sm:$0xf] }
 0x861   :  { %v5011_v4 = vadd.f32 %v5010_v30, %v4997_v61  ;;  %v5119_v61 = vadd.f32 %v4959_v3, %v13639_v38  ;;  %v7987_v31 = vmul.f32 -1.442695, %v5128_v25  ;;  %v8267_v30 = vld [vmem:[#allocation18 + $0x30] sm:$0xf0]  ;;  %v9025_v3 = vld [vmem:[#allocation18 + $0xc] sm:$0xf0] }
 0x862   :  { %v4986_v29 = vpop.f32.mrf.mxu1  ;;  %v4999_v45 = vpop.f32.mrf.mxu2  ;;  %v8270_v16 = vor.u32 %v9027_v12, %v8267_v30  ;;  %v8250_v23 = vor.u32 %v9025_v3, %v8249_v54  ;;  %v8369_v25 = vld [vmem:[#allocation18 + $0xe8] sm:$0xf]  ;;  %v9048_v38 = vld [vmem:[#allocation18 + $0xcc] sm:$0xf]  ;;  %v8499_v30 = vld [vmem:[#allocation18 + $0x1f8] sm:$0xf0] }
 0x863   :  { %v5121_v7 = vadd.f32 %v5011_v4, %v1274_v26  ;;  %v5127_v8 = vadd.f32 %v5119_v61, %v13641_v1  ;;  %9469 = vpow2.f32 %v7987_v31  ;;  %v9063_v29 = vld [vmem:[#allocation18 + $0x144] sm:$0xf]  ;;  %v8411_v45 = vld [vmem:[#allocation18 + $0x150] sm:$0xf0]  ;;  %6233 = vmatpush.bf16.msra.mxu0 %v8266_v15  ;;  %v9054_v4 = vld [vmem:[#allocation18 + $0xf4] sm:$0xf0]  ;;  %v8394_v61 = vor.u32 %v9061_v44, %v8393_v35 }
 0x864   :  { %v12191_v49 = vpop.f32.mrf.mxu0  ;;  %v8414_v2 = vor.u32 %v9063_v29, %v8411_v45  ;;  %6259 = vmatpush.bf16.msra.mxu2 %v8270_v16  ;;  %6245 = vmatpush.bf16.msra.mxu1 %v8410_v41  ;;  %v8370_v40 = vor.u32 %v9054_v4, %v8369_v25  ;;  %9471 = vpow2.f32 %v7985_v47  ;;  %v8353_v26 = vld [vmem:[#allocation18 + $0xc8] sm:$0xf]  ;;  %v8358_v31 = vor.u32 %v9048_v38, %v8355_v10  ;;  %v9084_v12 = vld [vmem:[#allocation18 + $0x1ec] sm:$0xf]  ;;  %v9046_v11 = vld [vmem:[#allocation18 + $0xb4] sm:$0xf0] }
 0x865   :  { %v5129_v14 = vadd.f32 %v5121_v7, %v13642_v50  ;;  %v7986_v39 = vmul.f32 -1.442695, %v5127_v8  ;;  %v8354_v36 = vor.u32 %v9050_v46, %v8353_v26  ;;  %v9057_v7 = vld [vmem:[#allocation18 + $0x10c] sm:$0xf0]  ;;  %v8498_v15 = vor.u32 %v9086_v0, %v8497_v56  ;;  %v8337_v1 = vld [vmem:[#allocation18 + $0xa8] sm:$0xf] }
 0x866   :  { %6271 = vmatpush.bf16.msra.mxu3 %v8414_v2  ;;  %v8378_v52 = vor.u32 %v9057_v7, %v8377_v32  ;;  %v8339_v50 = vld [vmem:[#allocation18 + $0xb8] sm:$0xf0]  ;;  %v8481_v29 = vld [vmem:[#allocation18 + $0x1c8] sm:$0xf]  ;;  %v9082_v45 = vld [vmem:[#allocation18 + $0x1d4] sm:$0xf0] }
 0x867   :  { %v7988_v58 = vmul.f32 -1.442695, %v5129_v14  ;;  %6234 = vmatpush.bf16.msra.mxu0 %v8250_v23  ;;  %v8338_v14 = vor.u32 %v9046_v11, %v8337_v1  ;;  %v8342_v16 = vor.u32 %v9044_v59, %v8339_v50  ;;  %v9080_v2 = vld [vmem:[#allocation18 + $0x1cc] sm:$0xf]  ;;  %v8483_v54 = vld [vmem:[#allocation18 + $0x1d8] sm:$0xf0]  ;;  %v8482_v3 = vor.u32 %v9082_v45, %v8481_v29 }
 0x868   :  { %v5012_v37 = vpop.f32.mrf.mxu3  ;;  %6260 = vmatpush.bf16.msra.mxu2 %v8254_v63  ;;  %6246 = vmatpush.bf16.msra.mxu1 %v8394_v61  ;;  %v8486_v23 = vor.u32 %v9080_v2, %v8483_v54  ;;  %v9042_v17 = vld [vmem:[#allocation18 + $0x94] sm:$0xf0]  ;;  %v8323_v4 = vld [vmem:[#allocation18 + $0x98] sm:$0xf0]  ;;  %v8305_v44 = vld [vmem:[#allocation18 + $0x68] sm:$0xf] }
 0x869   :  { %v9470_v19 = vpop.eup %9469  ;;  %9473 = vpow2.f32 %v7988_v58  ;;  %v8398_v37 = vor.u32 %v9059_v21, %v8395_v9  ;;  %v8322_v25 = vor.u32 %v9042_v17, %v8321_v13  ;;  %v8465_v58 = vld [vmem:[#allocation18 + $0x1a8] sm:$0xf]  ;;  %v8467_v35 = vld [vmem:[#allocation18 + $0x1b8] sm:$0xf0]  ;;  %v9038_v21 = vld [vmem:[#allocation18 + $0x74] sm:$0xf0] }
 0x86a   :  { %v12199_v55 = vpop.f32.mrf.mxu2  ;;  %v12201_v34 = vpop.f32.mrf.mxu1  ;;  %v12207_v28 = vadd.f32 1.0, %v9470_v19  ;;  %9475 = vpow2.f32 %v7986_v39  ;;  %v9040_v39 = vld [vmem:[#allocation18 + $0x8c] sm:$0xf]  ;;  %v8307_v46 = vld [vmem:[#allocation18 + $0x78] sm:$0xf0]  ;;  %v8306_v61 = vor.u32 %v9038_v21, %v8305_v44 }
 0x86b   :  { %6279 = vmatpush.bf16.msrb.mxu0 %v8370_v40  ;;  %6272 = vmatpush.bf16.msra.mxu3 %v8398_v37  ;;  %v9472_v48 = vpop.eup %9471  ;;  %v9078_v40 = vld [vmem:[#allocation18 + $0x1b4] sm:$0xf0]  ;;  %v8326_v24 = vor.u32 %v9040_v39, %v8323_v4  ;;  %v9036_v19 = vld [vmem:[#allocation18 + $0x6c] sm:$0xf]  ;;  %v8449_v37 = vld [vmem:[#allocation18 + $0x188] sm:$0xf] }
 0x86c   :  { %v5025_v20 = vpop.f32.mrf.mxu0  ;;  %6305 = vmatpush.bf16.msrb.mxu2 %v8374_v62  ;;  %v12209_v41 = vadd.f32 1.0, %v9472_v48  ;;  %9477 = vrcp.f32 %v12207_v28  ;;  %6247 = vmatpush.bf16.msra.mxu1 %v8378_v52  ;;  %v8466_v9 = vor.u32 %v9078_v40, %v8465_v58  ;;  %v9072_v10 = vld [vmem:[#allocation18 + $0x18c] sm:$0xf]  ;;  %v8310_v32 = vor.u32 %v9036_v19, %v8307_v46  ;;  %v8289_v7 = vld [vmem:[#allocation18 + $0x48] sm:$0xf]  ;;  %v13643_v11 = vld [vmem:[#allocation233_spill] sm:$0xff] }
 0x86d   :  { %v8502_v20 = vor.u32 %v9084_v12, %v8499_v30  ;;  %v9034_v57 = vld [vmem:[#allocation18 + $0x54] sm:$0xf0]  ;;  %v9032_v52 = vld [vmem:[#allocation18 + $0x4c] sm:$0xf]  ;;  %v8291_v48 = vld [vmem:[#allocation18 + $0x58] sm:$0xf0]  ;;  %vm5185_vm10 = vweird.f32 %v12207_v28 }
 0x86e   :  { %9479 = vrcp.f32 %v12209_v41  ;;  %v9070_v12 = vld [vmem:[#allocation18 + $0x174] sm:$0xf0]  ;;  %v9068_v30 = vld [vmem:[#allocation18 + $0x16c] sm:$0xf]  ;;  %v8273_v45 = vld [vmem:[#allocation18 + $0x28] sm:$0xf]  ;;  %vm5147_vm9 = vweird.f32 %v12209_v41 }
 0x86f   :  { %6280 = vmatpush.bf16.msrb.mxu0 %v8354_v36  ;;  %v9474_v47 = vpop.eup %9473  ;;  %6273 = vmatpush.bf16.msra.mxu3 %v8382_v43  ;;  %v9074_v36 = vld [vmem:[#allocation18 + $0x194] sm:$0xf0]  ;;  %v8290_v43 = vor.u32 %v9034_v57, %v8289_v7  ;;  %v13644_v59 = vld [vmem:[#allocation235_spill] sm:$0xff]  ;;  %v8275_v39 = vld [vmem:[#allocation18 + $0x38] sm:$0xf0] }
 0x870   :  { %v12205_v6 = vpop.f32.mrf.mxu3  ;;  %6306 = vmatpush.bf16.msrb.mxu2 %v8358_v31  ;;  %6292 = vmatpush.bf16.msrb.mxu1 %v8498_v15  ;;  %v9476_v63 = vpop.eup %9475  ;;  %v12212_v42 = vadd.f32 1.0, %v9474_v47  ;;  %v8451_v31 = vld [vmem:[#allocation18 + $0x198] sm:$0xf0]  ;;  %v8450_v56 = vor.u32 %v9074_v36, %v8449_v37  ;;  %v8433_v15 = vld [vmem:[#allocation18 + $0x168] sm:$0xf]  ;;  %v1448_v50 = vadd.f32 %v13644_v59, %v13643_v11  ;;  %v13646_v4 = vld [vmem:[#allocation208_spill] sm:$0xff] }
 0x871   :  { %v8454_v0 = vor.u32 %v9072_v10, %v8451_v31  ;;  %v9030_v47 = vld [vmem:[#allocation18 + $0x34] sm:$0xf0]  ;;  %v9028_v2 = vld [vmem:[#allocation18 + $0x2c] sm:$0xf]  ;;  %v8434_v13 = vor.u32 %v9070_v12, %v8433_v15  ;;  %v13647_v46 = vld [vmem:[#allocation236_spill] sm:$0xff]  ;;  %v5063_v12 = vadd.f32 %v12205_v6, %v12199_v55 }
 0x872   :  { %v5051_v60 = vpop.f32.mrf.mxu2  ;;  %v5038_v22 = vpop.f32.mrf.mxu1  ;;  %9481 = vrcp.f32 %v12212_v42  ;;  %v8274_v40 = vor.u32 %v9030_v47, %v8273_v45  ;;  %v8278_v19 = vor.u32 %v9028_v2, %v8275_v39  ;;  %v9024_v10 = vld [vmem:[#allocation18 + $0xc] sm:$0xf]  ;;  %v9062_v15 = vld [vmem:[#allocation18 + $0x134] sm:$0xf0]  ;;  %v8403_v11 = vld [vmem:[#allocation18 + $0x138] sm:$0xf0]  ;;  %vm5200_vm0 = vweird.f32 %v12212_v42 }
 0x873   :  { %6318 = vmatpush.bf16.msrb.mxu3 %v8502_v20  ;;  %6281 = vmatpush.bf16.msrb.mxu0 %v8338_v14  ;;  %v9076_v60 = vld [vmem:[#allocation18 + $0x1ac] sm:$0xf]  ;;  %v12215_v22 = vadd.f32 1.0, %v9476_v63  ;;  %v12217_v62 = vpop.eup %9477  ;;  %v8435_v20 = vld [vmem:[#allocation18 + $0x178] sm:$0xf0]  ;;  %v5037_v14 = vadd.f32 %v12201_v34, %v12191_v49  ;;  %v13649_v59 = vld [vmem:[#allocation214_spill] sm:$0xff] }
 0x874   :  { %6307 = vmatpush.bf16.msrb.mxu2 %v8342_v16  ;;  %6293 = vmatpush.bf16.msrb.mxu1 %v8482_v3  ;;  %v8470_v26 = vor.u32 %v9076_v60, %v8467_v35  ;;  %v5181_v53 = vmul.f32 %v12217_v62, %v12207_v28  ;;  %v12223_v1 = vpop.eup %9479  ;;  %v8438_v17 = vor.u32 %v9068_v30, %v8435_v20  ;;  %v8417_v63 = vld [vmem:[#allocation18 + $0x148] sm:$0xf]  ;;  %v9064_v60 = vld [vmem:[#allocation18 + $0x14c] sm:$0xf]  ;;  %v8419_v35 = vld [vmem:[#allocation18 + $0x158] sm:$0xf0]  ;;  %vm5186_vm8 = vweird.f32 %v12217_v62 }
 0x875   :  { %9483 = vrcp.f32 %v12215_v22  ;;  %v5143_v49 = vmul.f32 %v12223_v1, %v12209_v41  ;;  %v8422_v57 = vor.u32 %v9064_v60, %v8419_v35  ;;  %v9060_v20 = vld [vmem:[#allocation18 + $0x12c] sm:$0xf]  ;;  %vm12262_vm11 = vmor %vm5185_vm10, %vm5186_vm8  ;;  %vm5148_vm12 = vweird.f32 %v12223_v1 }
 0x876   :  { %v5182_v3 = vsub.f32 1.0, %v5181_v53  ;;  %v8406_v55 = vor.u32 %v9060_v20, %v8403_v11  ;;  %vm12279_vm15 = vmor %vm5147_vm9, %vm5148_vm12  ;;  %vm5162_vm4 = vweird.f32 %v12215_v22 }
 0x877   :  { %6319 = vmatpush.bf16.msrb.mxu3 %v8486_v23  ;;  %6282 = vmatpush.bf16.msrb.mxu0 %v8322_v25  ;;  %v13645_v25 = vld [vmem:[#allocation204_spill] sm:$0xff] }
 0x878   :  { %v5064_v8 = vpop.f32.mrf.mxu3  ;;  %6308 = vmatpush.bf16.msrb.mxu2 %v8326_v24  ;;  %6294 = vmatpush.bf16.msrb.mxu1 %v8466_v9  ;;  %v12229_v54 = vpop.eup %9481  ;;  %v1332_v58 = vadd.f32 %v13646_v4, %v13645_v25  ;;  %v9066_v24 = vld [vmem:[#allocation18 + $0x154] sm:$0xf0]  ;;  %v8257_v9 = vld [vmem:[#allocation18 + $0x8] sm:$0xf] }
 0x879   :  { %v8294_v8 = vor.u32 %v9032_v52, %v8291_v48  ;;  %v5196_v37 = vmul.f32 %v12229_v54, %v12212_v42  ;;  %v8418_v7 = vor.u32 %v9066_v24, %v8417_v63  ;;  %v5144_v52 = vsub.f32 1.0, %v5143_v49 }
 0x87a   :  { %v5122_v36 = vadd.f32 %v5037_v14, %v1332_v58  ;;  %v5191_v63 = vand.u32 2147483648, %v12207_v28  ;;  %v8387_v58 = vld [vmem:[#allocation18 + $0x118] sm:$0xf0]  ;;  %vm5201_vm13 = vweird.f32 %v12229_v54 }
 0x87b   :  { %6320 = vmatpush.bf16.msrb.mxu3 %v8470_v26  ;;  %6283 = vmatpush.bf16.msrb.mxu0 %v8306_v61  ;;  %v12235_v44 = vpop.eup %9483  ;;  %v9026_v26 = vld [vmem:[#allocation18 + $0x14] sm:$0xf0]  ;;  %v5145_v6 = vmul.f32 %v12223_v1, %v5144_v52  ;;  %vm12288_vm1 = vmor %vm5200_vm0, %vm5201_vm13  ;;  %vm6867_vm0 = vcmask 7168  }
 0x87c   :  { %6309 = vmatpush.bf16.msrb.mxu2 %v8310_v32  ;;  %6295 = vmatpush.bf16.msrb.mxu1 %v8450_v56  ;;  %v8259_v32 = vld [vmem:[#allocation18 + $0x18] sm:$0xf0]  ;;  %v5158_v53 = vmul.f32 %v12235_v44, %v12215_v22  ;;  %v5183_v56 = vmul.f32 %v12217_v62, %v5182_v3  ;;  %v8258_v48 = vor.u32 %v9026_v26, %v8257_v9  ;;  %vm5163_vm3 = vweird.f32 %v12235_v44 }
 0x87d   :  { %v5130_v45 = vadd.f32 %v5122_v36, %v13592_v27  ;;  %v9056_v27 = vld [vmem:[#allocation18 + $0x10c] sm:$0xf]  ;;  %vm5164_vm6 = vmor %vm5162_vm4, %vm5163_vm3 }
 0x87e   :  { %v5159_v39 = vsub.f32 1.0, %v5158_v53  ;;  %v8390_v35 = vor.u32 %v9056_v27, %v8387_v58  ;;  %v9173_v53 = vld [vmem:[#allocation21 + $0xac] sm:$0xf0] }
 0x87f   :  { %6321 = vmatpush.bf16.msrb.mxu3 %v8454_v0  ;;  %6284 = vmatpush.bf16.msrb.mxu0 %v8290_v43  ;;  %v8401_v43 = vld [vmem:[#allocation18 + $0x128] sm:$0xf] }
 0x880   :  { %6310 = vmatpush.bf16.msrb.mxu2 %v8294_v8  ;;  %6296 = vmatpush.bf16.msrb.mxu1 %v8434_v13  ;;  %v8262_v8 = vor.u32 %v9024_v10, %v8259_v32  ;;  %v8385_v13 = vld [vmem:[#allocation18 + $0x108] sm:$0xf]  ;;  %v5206_v32 = vand.u32 2147483648, %v12212_v42 }
 0x883   :  { %6322 = vmatpush.bf16.msrb.mxu3 %v8438_v17  ;;  %6285 = vmatpush.bf16.msrb.mxu0 %v8274_v40  ;;  %v9058_v17 = vld [vmem:[#allocation18 + $0x114] sm:$0xf0]  ;;  %v5189_v40 = vand.u32 2147483647, %v12207_v28 }
 0x884   :  { %v5075_v38 = vpop.f32.mrf.mxu0  ;;  %6311 = vmatpush.bf16.msrb.mxu2 %v8278_v19  ;;  %6297 = vmatpush.bf16.msrb.mxu1 %v8418_v7  ;;  %v5153_v19 = vand.u32 2147483648, %v12209_v41 }
 0x885   :  { %vm5190_vm14 = vcmp.eq.f32.partialorder %v5189_v40, 8.507059e+37 }
 0x887   :  { %6323 = vmatpush.bf16.msrb.mxu3 %v8422_v57  ;;  %6286 = vmatpush.bf16.msrb.mxu0 %v8258_v48  ;;  %v5204_v57 = vand.u32 2147483647, %v12212_v42  ;;  %v5207_v48 = vor.u32 1.1754944e-38, %v5206_v32 }
 0x888   :  { %6312 = vmatpush.bf16.msrb.mxu2 %v8262_v8 }
 0x889   :  { %vm5205_vm5 = vcmp.eq.f32.partialorder %v5204_v57, 8.507059e+37  ;;  %v8585_v57 = vld [vmem:[#allocation21 + $0xa0] sm:$0xf] }
 0x88a   :  { %v5088_v16 = vpop.f32.mrf.mxu1  ;;  %v5101_v29 = vpop.f32.mrf.mxu2 }
 0x88b   :  { %v5089_v23 = vadd.f32 %v5088_v16, %v5075_v38  ;;  %v13648_v38 = vld [vmem:[#allocation237_spill] sm:$0xff]  ;;  %v5197_v16 = vsub.f32 1.0, %v5196_v37  ;;  %6324 = vmatpush.bf16.msrb.mxu3 %v8406_v55  ;;  %v5160_v37 = vmul.f32 %v12235_v44, %v5159_v39 }
 0x88c   :  { %v5077_v34 = vpop.f32.mrf.mxu0  ;;  %v1506_v61 = vadd.f32 %v13648_v38, %v13647_v46  ;;  %v5192_v46 = vor.u32 1.1754944e-38, %v5191_v63  ;;  %v13653_v38 = vld [vmem:[#allocation129_spill] sm:$0xff]  ;;  %v8619_v63 = vld [vmem:[#allocation21 + $0xf0] sm:$0xf0] }
 0x88d   :  { %v5124_v21 = vadd.f32 %v5089_v23, %v1448_v50  ;;  %v13650_v50 = vld [vmem:[#allocation215_spill] sm:$0xff]  ;;  %v8402_v23 = vor.u32 %v9062_v15, %v8401_v43  ;;  %v5198_v49 = vmul.f32 %v12229_v54, %v5197_v16  ;;  %v5151_v34 = vand.u32 2147483647, %v12209_v41 }
 0x88e   :  { %v1390_v14 = vadd.f32 %v13650_v50, %v13649_v59  ;;  %v5154_v41 = vor.u32 1.1754944e-38, %v5153_v19  ;;  %v5168_v15 = vand.u32 2147483648, %v12215_v22  ;;  %v9175_v19 = vld [vmem:[#allocation21 + $0xc4] sm:$0xf] }
 0x88f   :  { %v5132_v31 = vadd.f32 %v5124_v21, %v10737_v5  ;;  %6298 = vmatpush.bf16.msrb.mxu1 %v8402_v23  ;;  %v5146_v21 = vadd.f32 %v12223_v1, %v5145_v6  ;;  %v5199_v36 = vadd.f32 %v12229_v54, %v5198_v49  ;;  %6325 = vmatpush.bf16.msrb.mxu3 %v8390_v35  ;;  %vm5152_vm2 = vcmp.eq.f32.partialorder %v5151_v34, 8.507059e+37 }
 0x890   :  { %v5114_v0 = vpop.f32.mrf.mxu3  ;;  %v5123_v25 = vadd.f32 %v5063_v12, %v1390_v14  ;;  %v5169_v59 = vor.u32 1.1754944e-38, %v5168_v15  ;;  %v9207_v15 = vld [vmem:[#allocation21 + $0x1c4] sm:$0xf] }
 0x891   :  { %v7989_v30 = vmul.f32 -1.442695, %v5132_v31  ;;  %v5115_v5 = vadd.f32 %v5114_v0, %v5101_v29  ;;  %v5184_v29 = vadd.f32 %v12217_v62, %v5183_v56  ;;  %v5150_v7 = vsel %vm12279_vm15, %v12223_v1, %v5146_v21  ;;  %v9177_v21 = vld [vmem:[#allocation21 + $0xcc] sm:$0xf0] }
 0x892   :  { %v5090_v47 = vpop.f32.mrf.mxu1  ;;  %v5103_v2 = vpop.f32.mrf.mxu2  ;;  %v5161_v0 = vadd.f32 %v12235_v44, %v5160_v37  ;;  %v5203_v1 = vsel %vm12288_vm1, %v12229_v54, %v5199_v36  ;;  %v5155_v43 = vsel %vm5152_vm2, %v5154_v41, %v5150_v7  ;;  %v9211_v36 = vld [vmem:[#allocation21 + $0x1e4] sm:$0xf] }
 0x893   :  { %9485 = vpow2.f32 %v7989_v30  ;;  %v5125_v3 = vadd.f32 %v5115_v5, %v1506_v61  ;;  %v5188_v28 = vsel %vm12262_vm11, %v12217_v62, %v5184_v29  ;;  %v5131_v61 = vadd.f32 %v5123_v25, %v13653_v38  ;;  %v8745_v38 = vld [vmem:[#allocation21 + $0x1e0] sm:$0xf]  ;;  %v9171_v41 = vld [vmem:[#allocation21 + $0xa4] sm:$0xf] }
 0x894   :  { %9487 = vtanh.f32 %v5130_v45  ;;  %v5193_v31 = vsel %vm5190_vm14, %v5192_v46, %v5188_v28  ;;  %v5166_v30 = vand.u32 2147483647, %v12215_v22  ;;  %v5208_v5 = vsel %vm5205_vm5, %v5207_v48, %v5203_v1  ;;  %v8603_v28 = vld [vmem:[#allocation21 + $0xd0] sm:$0xf0] }
 0x895   :  { %v5133_v4 = vadd.f32 %v5125_v3, %v10742_v51  ;;  %v8386_v51 = vor.u32 %v9058_v17, %v8385_v13  ;;  %v5250_v56 = vmul.f32 %v5193_v31, %v12063_v18  ;;  %v5165_v11 = vsel %vm5164_vm6, %v12235_v44, %v5161_v0  ;;  %v8617_v13 = vld [vmem:[#allocation21 + $0xe0] sm:$0xf]  ;;  %v9181_v17 = vld [vmem:[#allocation21 + $0xec] sm:$0xf0] }
 0x896   :  { %vm5167_vm7 = vcmp.eq.f32.partialorder %v5166_v30, 8.507059e+37  ;;  %v5251_v14 = vmul.f32 %v5208_v5, %v12066_v33  ;;  %v9179_v33 = vld [vmem:[#allocation21 + $0xe4] sm:$0xf]  ;;  %v8618_v24 = vor.u32 %v9181_v17, %v8617_v13  ;;  %v8606_v31 = vor.u32 %v9175_v19, %v8603_v28  ;;  %v8569_v5 = vld [vmem:[#allocation21 + $0x80] sm:$0xf] }
 0x897   :  { %v7990_v60 = vmul.f32 -1.442695, %v5133_v4  ;;  %6299 = vmatpush.bf16.msrb.mxu1 %v8386_v51  ;;  %v5170_v16 = vsel %vm5167_vm7, %v5169_v59, %v5165_v11  ;;  %v8601_v51 = vld [vmem:[#allocation21 + $0xc0] sm:$0xf]  ;;  %v8586_v30 = vor.u32 %v9173_v53, %v8585_v57  ;;  %v8571_v11 = vld [vmem:[#allocation21 + $0x90] sm:$0xf0] }
 0x898   :  { %v5116_v9 = vpop.f32.mrf.mxu3  ;;  %v8602_v62 = vor.u32 %v9177_v21, %v8601_v51  ;;  %v8697_v13 = vld [vmem:[#allocation21 + $0x180] sm:$0xf]  ;;  %v9201_v17 = vld [vmem:[#allocation21 + $0x18c] sm:$0xf0]  ;;  %v8539_v51 = vld [vmem:[#allocation21 + $0x50] sm:$0xf0] }
 0x899   :  { %v9486_v26 = vpop.eup %9485  ;;  %9489 = vpow2.f32 %v7990_v60  ;;  %v8622_v60 = vor.u32 %v9179_v33, %v8619_v63  ;;  %v5332_v63 = vpop.permute.xlu2 %5331  ;;  %v8698_v19 = vor.u32 %v9201_v17, %v8697_v13 }
 0x89a   :  { %v5218_v10 = vadd.f32 1.0, %v9486_v26  ;;  %v9488_v52 = vpop.eup %9487  ;;  %v9197_v26 = vld [vmem:[#allocation21 + $0x16c] sm:$0xf0] }
 0x89b   :  { %v5252_v12 = vmul.f32 %v9488_v52, %v5155_v43  ;;  %v9209_v43 = vld [vmem:[#allocation21 + $0x1cc] sm:$0xf0] }
 0x89c   :  { %9491 = vrcp.f32 %v5218_v10  ;;  %v5231_v22 = vand.u32 2147483648, %v5218_v10  ;;  %v5229_v3 = vand.u32 2147483647, %v5218_v10  ;;  %vm5225_vm9 = vweird.f32 %v5218_v10 }
 0x89d   :  { %9493 = vtanh.f32 %v5131_v61  ;;  %v5254_v20 = vadd.f32 %v5252_v12, %v5250_v56  ;;  %v9213_v61 = vld [vmem:[#allocation21 + $0x1ec] sm:$0xf0]  ;;  %v8587_v56 = vld [vmem:[#allocation21 + $0xb0] sm:$0xf0] }
 0x89e   :  { %v5232_v44 = vor.u32 1.1754944e-38, %v5231_v22  ;;  %vm5230_vm11 = vcmp.eq.f32.partialorder %v5229_v3, 8.507059e+37  ;;  %v8746_v0 = vor.u32 %v9213_v61, %v8745_v38  ;;  %v8731_v12 = vld [vmem:[#allocation21 + $0x1d0] sm:$0xf0]  ;;  %v12317_v3 = vld [vmem:[#allocation15] sm:$0x3] }
 0x89f   :  { %v9490_v42 = vpop.eup %9489  ;;  %v8734_v59 = vor.u32 %v9207_v15, %v8731_v12  ;;  %v5335_v33 = vperm.slane %v12317_v3, 0  ;;  %v8683_v38 = vld [vmem:[#allocation21 + $0x170] sm:$0xf0]  ;;  %v5336_v57 = vperm.slane %v12317_v3, 1  ;;  %v8649_v3 = vld [vmem:[#allocation21 + $0x120] sm:$0xf] }
 0x8a0   :  { %v5219_v18 = vadd.f32 1.0, %v9490_v42  ;;  %v8729_v42 = vld [vmem:[#allocation21 + $0x1c0] sm:$0xf] }
 0x8a2   :  { %v9492_v8 = vpop.eup %9491  ;;  %9495 = vrcp.f32 %v5219_v18  ;;  %v5246_v58 = vand.u32 2147483648, %v5219_v18  ;;  %v5244_v40 = vand.u32 2147483647, %v5219_v18  ;;  %vm5240_vm13 = vweird.f32 %v5219_v18 }
 0x8a3   :  { %v9494_v54 = vpop.eup %9493  ;;  %v5221_v50 = vmul.f32 %v9492_v8, %v5218_v10  ;;  %9497 = vtanh.f32 %v5254_v20  ;;  %vm5226_vm8 = vweird.f32 %v9492_v8  ;;  %v8747_v10 = vld [vmem:[#allocation21 + $0x1f0] sm:$0xf0]  ;;  %v9167_v20 = vld [vmem:[#allocation21 + $0x84] sm:$0xf] }
 0x8a4   :  { %v5253_v47 = vmul.f32 %v9494_v54, %v5170_v16  ;;  %vm5227_vm10 = vmor %vm5225_vm9, %vm5226_vm8  ;;  %v5247_v46 = vor.u32 1.1754944e-38, %v5246_v58  ;;  %vm5245_vm15 = vcmp.eq.f32.partialorder %v5244_v40, 8.507059e+37  ;;  %v8750_v1 = vor.u32 %v9211_v36, %v8747_v10  ;;  %v9203_v16 = vld [vmem:[#allocation21 + $0x1a4] sm:$0xf]  ;;  %v8537_v58 = vld [vmem:[#allocation21 + $0x40] sm:$0xf] }
 0x8a5   :  { %v5222_v45 = vsub.f32 1.0, %v5221_v50  ;;  %v8730_v54 = vor.u32 %v9209_v43, %v8729_v42  ;;  %v8713_v50 = vld [vmem:[#allocation21 + $0x1a0] sm:$0xf]  ;;  %v8574_v22 = vor.u32 %v9167_v20, %v8571_v11  ;;  %v9153_v42 = vld [vmem:[#allocation21 + $0xc] sm:$0xf0] }
 0x8a6   :  { %v5255_v55 = vadd.f32 %v5253_v47, %v5251_v14  ;;  %v9205_v14 = vld [vmem:[#allocation21 + $0x1ac] sm:$0xf0]  ;;  %v8625_v20 = vld [vmem:[#allocation21 + $0xe8] sm:$0xf] }
 0x8a7   :  { %v5223_v2 = vmul.f32 %v9492_v8, %v5222_v45  ;;  %v8715_v45 = vld [vmem:[#allocation21 + $0x1b0] sm:$0xf0] }
 0x8a8   :  { %v9496_v23 = vpop.eup %9495  ;;  %9499 = vtanh.f32 %v5255_v55  ;;  %v9163_v55 = vld [vmem:[#allocation21 + $0x64] sm:$0xf] }
 0x8a9   :  { %v5236_v6 = vmul.f32 %v9496_v23, %v5219_v18  ;;  %v5224_v29 = vadd.f32 %v9492_v8, %v5223_v2  ;;  %v9498_v25 = vpop.eup %9497  ;;  %vm5241_vm12 = vweird.f32 %v9496_v23  ;;  %v8590_v18 = vor.u32 %v9171_v41, %v8587_v56  ;;  %v8553_v2 = vld [vmem:[#allocation21 + $0x60] sm:$0xf]  ;;  %v9193_v41 = vld [vmem:[#allocation21 + $0x14c] sm:$0xf0]  ;;  %v9191_v56 = vld [vmem:[#allocation21 + $0x144] sm:$0xf] }
 0x8aa   :  { %vm12305_vm14 = vmor %vm5240_vm13, %vm5241_vm12 }
 0x8ab   :  { %v5237_v27 = vsub.f32 1.0, %v5236_v6  ;;  %v5228_v39 = vsel %vm5227_vm10, %v9492_v8, %v5224_v29  ;;  %v9169_v8 = vld [vmem:[#allocation21 + $0x8c] sm:$0xf0]  ;;  %v8555_v6 = vld [vmem:[#allocation21 + $0x70] sm:$0xf0]  ;;  %v8714_v29 = vor.u32 %v9205_v14, %v8713_v50  ;;  %v5340_v14 = vmul.f32 %v5336_v57, %v5332_v63 }
 0x8ac   :  { %v5233_v4 = vsel %vm5230_vm11, %v5232_v44, %v5228_v39  ;;  %v8570_v47 = vor.u32 %v9169_v8, %v8569_v5  ;;  %v8718_v44 = vor.u32 %v9203_v16, %v8715_v45  ;;  %v8699_v39 = vld [vmem:[#allocation21 + $0x190] sm:$0xf0]  ;;  %v5825_v40 = vpop.f32.mrf.mxu1  ;;  %v9151_v5 = vld [vmem:[#allocation21 + $0x4] sm:$0xf]  ;;  %v9182_v16 = vld [vmem:[#allocation21 + $0xf4] sm:$0xf0] }
 0x8ad   :  { %v5258_v49 = vmul.f32 %v9498_v25, %v5233_v4  ;;  %v5238_v34 = vmul.f32 %v9496_v23, %v5237_v27  ;;  %v9199_v27 = vld [vmem:[#allocation21 + $0x184] sm:$0xf]  ;;  %v8558_v4 = vor.u32 %v9163_v55, %v8555_v6  ;;  %v8507_v8 = vld [vmem:[#allocation21 + $0x10] sm:$0xf0]  ;;  %v9180_v45 = vld [vmem:[#allocation21 + $0xec] sm:$0xf]  ;;  %v8626_v17 = vor.u32 %v9182_v16, %v8625_v20 }
 0x8ae   :  { %v9500_v32 = vpop.eup %9499  ;;  %v8702_v28 = vor.u32 %v9199_v27, %v8699_v39  ;;  %v9187_v6 = vld [vmem:[#allocation21 + $0x124] sm:$0xf]  ;;  %v8510_v13 = vor.u32 %v9151_v5, %v8507_v8  ;;  %v8609_v39 = vld [vmem:[#allocation21 + $0xc8] sm:$0xf]  ;;  %v9172_v57 = vld [vmem:[#allocation21 + $0xac] sm:$0xf] }
 0x8af   :  { %v12303_v35 = vpack.c.bf16 %v5258_v49, %v5258_v49  ;;  %v5239_v9 = vadd.f32 %v9496_v23, %v5238_v34  ;;  %v12320_v49 = vld [vmem:[#allocation17] sm:$0x3]  ;;  %v9168_v5 = vld [vmem:[#allocation21 + $0x8c] sm:$0xf] }
 0x8b0   :  { %v5812_v34 = vpop.f32.mrf.mxu0  ;;  %v5343_v61 = vperm.slane %v12320_v49, 0  ;;  %v5344_v50 = vperm.slane %v12320_v49, 1  ;;  %v8633_v49 = vld [vmem:[#allocation21 + $0x100] sm:$0xf]  ;;  %v8579_v8 = vld [vmem:[#allocation21 + $0x98] sm:$0xf0] }
 0x8b1   :  { %6235 = vmatmul.bf16.vlgmr.msra.gmra.mxu0 %v12303_v35  ;;  %6261 = vmatmul.bf16.vlgmr.msra.gmra.mxu2 %v12303_v35  ;;  %v5243_v37 = vsel %vm12305_vm14, %v9496_v23, %v5239_v9  ;;  %v9165_v23 = vld [vmem:[#allocation21 + $0x6c] sm:$0xf0]  ;;  %v12322_v21 = vadd.f32 %v5825_v40, %v5812_v34  ;;  %v8681_v9 = vld [vmem:[#allocation21 + $0x160] sm:$0xf]  ;;  %v8723_v16 = vld [vmem:[#allocation21 + $0x1b8] sm:$0xf0] }
 0x8b2   :  { %6717 = vmatpush.bf16.msra.mxu0 %v8618_v24  ;;  %6743 = vmatpush.bf16.msra.mxu2 %v8622_v60  ;;  %v5248_v7 = vsel %vm5245_vm15, %v5247_v46, %v5243_v37  ;;  %v8554_v25 = vor.u32 %v9165_v23, %v8553_v2  ;;  %v9161_v24 = vld [vmem:[#allocation21 + $0x4c] sm:$0xf0]  ;;  %v9159_v60 = vld [vmem:[#allocation21 + $0x44] sm:$0xf]  ;;  %v5339_v37 = vmul.f32 %v5335_v33, %v5332_v63  ;;  %v5851_v12 = vpop.f32.mrf.mxu3  ;;  %v8627_v2 = vld [vmem:[#allocation21 + $0xf8] sm:$0xf0] }
 0x8b3   :  { %v5259_v52 = vmul.f32 %v9500_v32, %v5248_v7  ;;  %v9195_v46 = vld [vmem:[#allocation21 + $0x164] sm:$0xf]  ;;  %v8538_v36 = vor.u32 %v9161_v24, %v8537_v58  ;;  %v8542_v10 = vor.u32 %v9159_v60, %v8539_v51  ;;  %v8521_v32 = vld [vmem:[#allocation21 + $0x20] sm:$0xf]  ;;  %v8523_v7 = vld [vmem:[#allocation21 + $0x30] sm:$0xf0]  ;;  %v8630_v27 = vor.u32 %v9180_v45, %v8627_v2 }
 0x8b4   :  { %v8686_v53 = vor.u32 %v9195_v46, %v8683_v38  ;;  %v5347_v43 = vadd.f32 %v5343_v61, %v5339_v37  ;;  %v9189_v23 = vld [vmem:[#allocation21 + $0x12c] sm:$0xf0]  ;;  %v9178_v33 = vld [vmem:[#allocation21 + $0xd4] sm:$0xf0]  ;;  %v9176_v63 = vld [vmem:[#allocation21 + $0xcc] sm:$0xf]  ;;  %v8582_v2 = vor.u32 %v9168_v5, %v8579_v8 }
 0x8b5   :  { %v12313_v48 = vpack.c.bf16 %v5259_v52, %v5259_v52  ;;  %v8682_v52 = vor.u32 %v9197_v26, %v8681_v9  ;;  %v8611_v58 = vld [vmem:[#allocation21 + $0xd8] sm:$0xf0]  ;;  %v9185_v34 = vld [vmem:[#allocation21 + $0x10c] sm:$0xf0]  ;;  %v9183_v24 = vld [vmem:[#allocation21 + $0x104] sm:$0xf]  ;;  %v8610_v61 = vor.u32 %v9178_v33, %v8609_v39 }
 0x8b6   :  { %6718 = vmatpush.bf16.msra.mxu0 %v8602_v62  ;;  %6744 = vmatpush.bf16.msra.mxu2 %v8606_v31  ;;  %v9157_v62 = vld [vmem:[#allocation21 + $0x2c] sm:$0xf0]  ;;  %v9155_v31 = vld [vmem:[#allocation21 + $0x24] sm:$0xf]  ;;  %v5838_v15 = vpop.f32.mrf.mxu2  ;;  %v5349_v55 = vmax.f32 %v5347_v43, 0.0  ;;  %v8614_v37 = vor.u32 %v9176_v63, %v8611_v58 }
 0x8b7   :  { %6248 = vmatmul.bf16.vlgmr.msra.gmra.mxu1 %v12313_v48  ;;  %6274 = vmatmul.bf16.vlgmr.msra.gmra.mxu3 %v12313_v48  ;;  %v12328_v11 = vadd.f32 %v5851_v12, %v5838_v15  ;;  %v8635_v60 = vld [vmem:[#allocation21 + $0x110] sm:$0xf0]  ;;  %v8753_v51 = vld [vmem:[#allocation21 + $0x1e8] sm:$0xf]  ;;  %v9214_v9 = vld [vmem:[#allocation21 + $0x1f4] sm:$0xf0] }
 0x8b8   :  { %6730 = vmatpush.bf16.msra.mxu1 %v8746_v0  ;;  %6756 = vmatpush.bf16.msra.mxu3 %v8750_v1  ;;  %v8667_v0 = vld [vmem:[#allocation21 + $0x150] sm:$0xf0]  ;;  %v8505_v1 = vld [vmem:[#allocation21] sm:$0xf]  ;;  %v12333_v40 = vpack.c.bf16 %v5349_v55, %v5349_v55  ;;  %v9212_v26 = vld [vmem:[#allocation21 + $0x1ec] sm:$0xf] }
 0x8b9   :  { %v8755_v46 = vld [vmem:[#allocation21 + $0x1f8] sm:$0xf0]  ;;  %v8577_v12 = vld [vmem:[#allocation21 + $0x88] sm:$0xf]  ;;  %v9202_v39 = vld [vmem:[#allocation21 + $0x194] sm:$0xf0] }
 0x8ba   :  { %6719 = vmatpush.bf16.msra.mxu0 %v8586_v30  ;;  %6745 = vmatpush.bf16.msra.mxu2 %v8590_v18  ;;  %v8522_v30 = vor.u32 %v9157_v62, %v8521_v32  ;;  %v8526_v18 = vor.u32 %v9155_v31, %v8523_v7  ;;  %v8634_v62 = vor.u32 %v9185_v34, %v8633_v49  ;;  %v9174_v7 = vld [vmem:[#allocation21 + $0xb4] sm:$0xf0]  ;;  %v9200_v33 = vld [vmem:[#allocation21 + $0x18c] sm:$0xf]  ;;  %v8707_v63 = vld [vmem:[#allocation21 + $0x198] sm:$0xf0] }
 0x8bb   :  { %v8638_v31 = vor.u32 %v9183_v24, %v8635_v60  ;;  %v8545_v58 = vld [vmem:[#allocation21 + $0x48] sm:$0xf]  ;;  %v9162_v49 = vld [vmem:[#allocation21 + $0x54] sm:$0xf0]  ;;  %v9160_v34 = vld [vmem:[#allocation21 + $0x4c] sm:$0xf] }
 0x8bc   :  { %6731 = vmatpush.bf16.msra.mxu1 %v8730_v54  ;;  %6757 = vmatpush.bf16.msra.mxu3 %v8734_v59  ;;  %v5814_v54 = vpop.f32.mrf.mxu0  ;;  %v5827_v59 = vpop.f32.mrf.mxu1  ;;  %v8547_v24 = vld [vmem:[#allocation21 + $0x58] sm:$0xf0]  ;;  %v8657_v5 = vld [vmem:[#allocation21 + $0x128] sm:$0xf]  ;;  %v9190_v8 = vld [vmem:[#allocation21 + $0x134] sm:$0xf0] }
 0x8bd   :  { %v8721_v59 = vld [vmem:[#allocation21 + $0x1a8] sm:$0xf] }
 0x8be   :  { %6720 = vmatpush.bf16.msra.mxu0 %v8570_v47  ;;  %6746 = vmatpush.bf16.msra.mxu2 %v8574_v22  ;;  %v8670_v22 = vor.u32 %v9191_v56, %v8667_v0  ;;  %v8737_v56 = vld [vmem:[#allocation21 + $0x1c8] sm:$0xf]  ;;  %v9210_v0 = vld [vmem:[#allocation21 + $0x1d4] sm:$0xf0] }
 0x8bf   :  { %v8738_v20 = vor.u32 %v9210_v0, %v8737_v56 }
 0x8c0   :  { %6732 = vmatpush.bf16.msra.mxu1 %v8714_v29  ;;  %6758 = vmatpush.bf16.msra.mxu3 %v8718_v44  ;;  %v8651_v29 = vld [vmem:[#allocation21 + $0x130] sm:$0xf0]  ;;  %v8506_v44 = vor.u32 %v9153_v42, %v8505_v1  ;;  %v9208_v1 = vld [vmem:[#allocation21 + $0x1cc] sm:$0xf]  ;;  %v8739_v42 = vld [vmem:[#allocation21 + $0x1d8] sm:$0xf0] }
 0x8c1   :  { %6287 = vmatmul.bf16.vlgmr.msrb.gmra.mxu0 %v12303_v35  ;;  %6313 = vmatmul.bf16.vlgmr.msrb.gmra.mxu2 %v12303_v35  ;;  %v8665_v35 = vld [vmem:[#allocation21 + $0x140] sm:$0xf]  ;;  %v8742_v54 = vor.u32 %v9208_v1, %v8739_v42  ;;  %v8513_v1 = vld [vmem:[#allocation21 + $0x8] sm:$0xf]  ;;  %v9154_v42 = vld [vmem:[#allocation21 + $0x14] sm:$0xf0] }
 0x8c2   :  { %6721 = vmatpush.bf16.msra.mxu0 %v8554_v25  ;;  %6747 = vmatpush.bf16.msra.mxu2 %v8558_v4  ;;  %v8666_v47 = vor.u32 %v9193_v41, %v8665_v35  ;;  %v8650_v25 = vor.u32 %v9189_v23, %v8649_v3  ;;  %v8654_v4 = vor.u32 %v9187_v6, %v8651_v29  ;;  %v8561_v3 = vld [vmem:[#allocation21 + $0x68] sm:$0xf]  ;;  %v9166_v29 = vld [vmem:[#allocation21 + $0x74] sm:$0xf0] }
 0x8c3   :  { %v8754_v35 = vor.u32 %v9214_v9, %v8753_v51  ;;  %v8758_v41 = vor.u32 %v9212_v26, %v8755_v46  ;;  %v8710_v51 = vor.u32 %v9200_v33, %v8707_v63  ;;  %v9196_v9 = vld [vmem:[#allocation21 + $0x16c] sm:$0xf]  ;;  %v8691_v26 = vld [vmem:[#allocation21 + $0x178] sm:$0xf0] }
 0x8c4   :  { %6733 = vmatpush.bf16.msra.mxu1 %v8698_v19  ;;  %6759 = vmatpush.bf16.msra.mxu3 %v8702_v28  ;;  %v5840_v19 = vpop.f32.mrf.mxu2  ;;  %v5853_v28 = vpop.f32.mrf.mxu3 }
 0x8c5   :  { %v8689_v19 = vld [vmem:[#allocation21 + $0x168] sm:$0xf]  ;;  %v9198_v28 = vld [vmem:[#allocation21 + $0x174] sm:$0xf0] }
 0x8c6   :  { %6722 = vmatpush.bf16.msra.mxu0 %v8538_v36  ;;  %6748 = vmatpush.bf16.msra.mxu2 %v8542_v10  ;;  %v8593_v36 = vld [vmem:[#allocation21 + $0xa8] sm:$0xf]  ;;  %v5864_v10 = vpop.f32.mrf.mxu0 }
 0x8c7   :  { %6300 = vmatmul.bf16.vlgmr.msrb.gmra.mxu1 %v12313_v48  ;;  %6326 = vmatmul.bf16.vlgmr.msrb.gmra.mxu3 %v12313_v48  ;;  %v5348_v48 = vadd.f32 %v5344_v50, %v5340_v14  ;;  %v8594_v43 = vor.u32 %v9174_v7, %v8593_v36  ;;  %v9206_v50 = vld [vmem:[#allocation21 + $0x1b4] sm:$0xf0]  ;;  %v9204_v14 = vld [vmem:[#allocation21 + $0x1ac] sm:$0xf]  ;;  %v8529_v36 = vld [vmem:[#allocation21 + $0x28] sm:$0xf]  ;;  %v8694_v7 = vor.u32 %v9196_v9, %v8691_v26 }
 0x8c8   :  { %6734 = vmatpush.bf16.msra.mxu1 %v8682_v52  ;;  %6760 = vmatpush.bf16.msra.mxu3 %v8686_v53  ;;  %v8595_v52 = vld [vmem:[#allocation21 + $0xb8] sm:$0xf0] }
 0x8c9   :  { %v5350_v38 = vmax.f32 %v5348_v48, 0.0  ;;  %v8598_v15 = vor.u32 %v9172_v57, %v8595_v52  ;;  %v8722_v48 = vor.u32 %v9206_v50, %v8721_v59  ;;  %v8673_v57 = vld [vmem:[#allocation21 + $0x148] sm:$0xf]  ;;  %v9194_v52 = vld [vmem:[#allocation21 + $0x154] sm:$0xf0]  ;;  %v8514_v59 = vor.u32 %v9154_v42, %v8513_v1 }
 0x8ca   :  { %6723 = vmatpush.bf16.msra.mxu0 %v8522_v30  ;;  %6749 = vmatpush.bf16.msra.mxu2 %v8526_v18  ;;  %v5877_v32 = vpop.f32.mrf.mxu1  ;;  %v9170_v18 = vld [vmem:[#allocation21 + $0x94] sm:$0xf0] }
 0x8cb   :  { %v12335_v53 = vadd.f32 %v5877_v32, %v5864_v10  ;;  %v12339_v30 = vpack.c.bf16 %v5350_v38, %v5350_v38  ;;  %v9158_v10 = vld [vmem:[#allocation21 + $0x34] sm:$0xf0]  ;;  %v9156_v32 = vld [vmem:[#allocation21 + $0x2c] sm:$0xf] }
 0x8cc   :  { %6735 = vmatpush.bf16.msra.mxu1 %v8666_v47  ;;  %6761 = vmatpush.bf16.msra.mxu3 %v8670_v22  ;;  %v5890_v45 = vpop.f32.mrf.mxu2  ;;  %v8578_v22 = vor.u32 %v9170_v18, %v8577_v12  ;;  %v8530_v56 = vor.u32 %v9158_v10, %v8529_v36  ;;  %v8674_v12 = vor.u32 %v9194_v52, %v8673_v57 }
 0x8ce   :  { %6724 = vmatpush.bf16.msra.mxu0 %v8506_v44  ;;  %6750 = vmatpush.bf16.msra.mxu2 %v8510_v13  ;;  %v5866_v55 = vpop.f32.mrf.mxu0  ;;  %v9164_v44 = vld [vmem:[#allocation21 + $0x6c] sm:$0xf]  ;;  %v8563_v13 = vld [vmem:[#allocation21 + $0x78] sm:$0xf0] }
 0x8d0   :  { %6736 = vmatpush.bf16.msra.mxu1 %v8650_v25  ;;  %6762 = vmatpush.bf16.msra.mxu3 %v8654_v4  ;;  %v5903_v47 = vpop.f32.mrf.mxu3  ;;  %v8562_v25 = vor.u32 %v9166_v29, %v8561_v3  ;;  %v8566_v4 = vor.u32 %v9164_v44, %v8563_v13 }
 0x8d1   :  { %6725 = vmatmul.bf16.vlgmr.msra.gmra.mxu0 %v12333_v40  ;;  %6751 = vmatmul.bf16.vlgmr.msra.gmra.mxu2 %v12333_v40  ;;  %v12341_v23 = vadd.f32 %v5903_v47, %v5890_v45  ;;  %v8641_v45 = vld [vmem:[#allocation21 + $0x108] sm:$0xf]  ;;  %v9186_v47 = vld [vmem:[#allocation21 + $0x114] sm:$0xf0] }
 0x8d2   :  { %6769 = vmatpush.bf16.msrb.mxu0 %v8626_v17  ;;  %6795 = vmatpush.bf16.msrb.mxu2 %v8630_v27  ;;  %v5879_v6 = vpop.f32.mrf.mxu1  ;;  %v8726_v17 = vor.u32 %v9204_v14, %v8723_v16  ;;  %v8705_v27 = vld [vmem:[#allocation21 + $0x188] sm:$0xf]  ;;  %v8658_v14 = vor.u32 %v9190_v8, %v8657_v5  ;;  %v8642_v3 = vor.u32 %v9186_v47, %v8641_v45 }
 0x8d3   :  { %v8706_v60 = vor.u32 %v9202_v39, %v8705_v27 }
 0x8d4   :  { %6737 = vmatpush.bf16.msra.mxu1 %v8634_v62  ;;  %6763 = vmatpush.bf16.msra.mxu3 %v8638_v31  ;;  %v5892_v46 = vpop.f32.mrf.mxu2  ;;  %v8531_v62 = vld [vmem:[#allocation21 + $0x38] sm:$0xf0]  ;;  %v8690_v31 = vor.u32 %v9198_v28, %v8689_v19 }
 0x8d5   :  { %v8534_v0 = vor.u32 %v9156_v32, %v8531_v62 }
 0x8d6   :  { %6770 = vmatpush.bf16.msrb.mxu0 %v8610_v61  ;;  %6796 = vmatpush.bf16.msrb.mxu2 %v8614_v37  ;;  %v8546_v61 = vor.u32 %v9162_v49, %v8545_v58  ;;  %v8550_v37 = vor.u32 %v9160_v34, %v8547_v24 }
 0x8d7   :  { %6738 = vmatmul.bf16.vlgmr.msra.gmra.mxu1 %v12339_v30  ;;  %6764 = vmatmul.bf16.vlgmr.msra.gmra.mxu3 %v12339_v30 }
 0x8d8   :  { %6782 = vmatpush.bf16.msrb.mxu1 %v8754_v35  ;;  %6808 = vmatpush.bf16.msrb.mxu3 %v8758_v41  ;;  %v5905_v38 = vpop.f32.mrf.mxu3  ;;  %v9192_v35 = vld [vmem:[#allocation21 + $0x14c] sm:$0xf]  ;;  %v8675_v41 = vld [vmem:[#allocation21 + $0x158] sm:$0xf0] }
 0x8d9   :  { %v8678_v18 = vor.u32 %v9192_v35, %v8675_v41 }
 0x8da   :  { %6771 = vmatpush.bf16.msrb.mxu0 %v8594_v43  ;;  %6797 = vmatpush.bf16.msrb.mxu2 %v8598_v15  ;;  %v9152_v43 = vld [vmem:[#allocation21 + $0xc] sm:$0xf]  ;;  %v8515_v15 = vld [vmem:[#allocation21 + $0x18] sm:$0xf0] }
 0x8db   :  { %v8518_v50 = vor.u32 %v9152_v43, %v8515_v15 }
 0x8dc   :  { %6783 = vmatpush.bf16.msrb.mxu1 %v8738_v20  ;;  %6809 = vmatpush.bf16.msrb.mxu3 %v8742_v54  ;;  %v9188_v20 = vld [vmem:[#allocation21 + $0x12c] sm:$0xf]  ;;  %v8659_v54 = vld [vmem:[#allocation21 + $0x138] sm:$0xf0] }
 0x8dd   :  { %v8662_v16 = vor.u32 %v9188_v20, %v8659_v54 }
 0x8de   :  { %6772 = vmatpush.bf16.msrb.mxu0 %v8578_v22  ;;  %6798 = vmatpush.bf16.msrb.mxu2 %v8582_v2  ;;  %v9184_v22 = vld [vmem:[#allocation21 + $0x10c] sm:$0xf]  ;;  %v8643_v2 = vld [vmem:[#allocation21 + $0x118] sm:$0xf0] }
 0x8df   :  { %v8646_v55 = vor.u32 %v9184_v22, %v8643_v2 }
 0x8e0   :  { %6784 = vmatpush.bf16.msrb.mxu1 %v8722_v48  ;;  %6810 = vmatpush.bf16.msrb.mxu3 %v8726_v17 }
 0x8e2   :  { %6773 = vmatpush.bf16.msrb.mxu0 %v8562_v25  ;;  %6799 = vmatpush.bf16.msrb.mxu2 %v8566_v4 }
 0x8e4   :  { %6785 = vmatpush.bf16.msrb.mxu1 %v8706_v60  ;;  %6811 = vmatpush.bf16.msrb.mxu3 %v8710_v51 }
 0x8e6   :  { %6774 = vmatpush.bf16.msrb.mxu0 %v8546_v61  ;;  %6800 = vmatpush.bf16.msrb.mxu2 %v8550_v37 }
 0x8e8   :  { %6786 = vmatpush.bf16.msrb.mxu1 %v8690_v31  ;;  %6812 = vmatpush.bf16.msrb.mxu3 %v8694_v7  ;;  %v6843_v31 = vld [vmem:[%s12375_s13] sm:$0xf] }
 0x8e9   :  { %v6845_v35 = vperm.slane %v6843_v31, 0  ;;  %v6847_v45 = vperm.slane %v6843_v31, 2 }
 0x8ea   :  { %6775 = vmatpush.bf16.msrb.mxu0 %v8530_v56  ;;  %6801 = vmatpush.bf16.msrb.mxu2 %v8534_v0  ;;  %v6846_v56 = vperm.slane %v6843_v31, 1 }
 0x8ec   :  { %6787 = vmatpush.bf16.msrb.mxu1 %v8674_v12  ;;  %6813 = vmatpush.bf16.msrb.mxu3 %v8678_v18 }
 0x8ee   :  { %6776 = vmatpush.bf16.msrb.mxu0 %v8514_v59  ;;  %6802 = vmatpush.bf16.msrb.mxu2 %v8518_v50 }
 0x8f0   :  { %6788 = vmatpush.bf16.msrb.mxu1 %v8658_v14  ;;  %6814 = vmatpush.bf16.msrb.mxu3 %v8662_v16 }
 0x8f1   :  { %6777 = vmatmul.bf16.vlgmr.msrb.gmra.mxu0 %v12333_v40  ;;  %6803 = vmatmul.bf16.vlgmr.msrb.gmra.mxu2 %v12333_v40 }
 0x8f4   :  { %6789 = vmatpush.bf16.msrb.mxu1 %v8642_v3  ;;  %6815 = vmatpush.bf16.msrb.mxu3 %v8646_v55 }
 0x8f7   :  { %6790 = vmatmul.bf16.vlgmr.msrb.gmra.mxu1 %v12339_v30  ;;  %6816 = vmatmul.bf16.vlgmr.msrb.gmra.mxu3 %v12339_v30 }
 0x92e   :  { %v6236_v6 = vpop.f32.mrf.mxu0 }
 0x92f   :  { %v6237_v29 = vadd.f32 %v6236_v6, %v12322_v21  ;;  %v6825_v21 = vld [vmem:[%s12374_s12] sm:$0xf] }
 0x930   :  { %v6827_v46 = vperm.slane %v6825_v21, 0  ;;  %v6828_v32 = vperm.slane %v6825_v21, 1  ;;  %v6829_v54 = vperm.slane %v6825_v21, 2  ;;  %v6830_v55 = vperm.slane %v6825_v21, 3 }
 0x934   :  { %v6249_v44 = vpop.f32.mrf.mxu1  ;;  %v6262_v13 = vpop.f32.mrf.mxu2 }
 0x935   :  { %v6250_v19 = vadd.f32 %v6249_v44, %v6237_v29  ;;  %v6263_v38 = vadd.f32 %v6262_v13, %v12328_v11 }
 0x936   :  { %v6238_v48 = vpop.f32.mrf.mxu0 }
 0x937   :  { %v6848_v48 = vperm.slane %v6843_v31, 3 }
 0x93a   :  { %v6275_v17 = vpop.f32.mrf.mxu3 }
 0x93b   :  { %v6276_v37 = vadd.f32 %v6275_v17, %v6263_v38 }
 0x93c   :  { %v6251_v27 = vpop.f32.mrf.mxu1  ;;  %v6264_v39 = vpop.f32.mrf.mxu2 }
 0x93e   :  { %v6288_v33 = vpop.f32.mrf.mxu0 }
 0x93f   :  { %v6289_v12 = vadd.f32 %v6288_v33, %v12335_v53 }
 0x942   :  { %v6277_v63 = vpop.f32.mrf.mxu3 }
 0x944   :  { %v6301_v25 = vpop.f32.mrf.mxu1  ;;  %v6314_v4 = vpop.f32.mrf.mxu2 }
 0x945   :  { %v6302_v8 = vadd.f32 %v6301_v25, %v6289_v12  ;;  %v6315_v14 = vadd.f32 %v6314_v4, %v12341_v23  ;;  %v9244_v23 = vld [vmem:[#allocation3] ss:$0 sm:$0xff] }
 0x946   :  { %v6290_v40 = vpop.f32.mrf.mxu0 }
 0x94a   :  { %v6327_v58 = vpop.f32.mrf.mxu3 }
 0x94b   :  { %v6328_v22 = vadd.f32 %v6327_v58, %v6315_v14 }
 0x94c   :  { %v6303_v49 = vpop.f32.mrf.mxu1  ;;  %v6316_v34 = vpop.f32.mrf.mxu2 }
 0x94e   :  { %v6726_v24 = vpop.f32.mrf.mxu0 }
 0x952   :  { %v6329_v60 = vpop.f32.mrf.mxu3 }
 0x954   :  { %v6752_v30 = vpop.f32.mrf.mxu2  ;;  %v6739_v51 = vpop.f32.mrf.mxu1 }
 0x955   :  { %v6740_v28 = vadd.f32 %v6739_v51, %v6726_v24 }
 0x956   :  { %v6728_v9 = vpop.f32.mrf.mxu0 }
 0x957   :  { %v6821_v26 = vadd.f32 %v6740_v28, %v6250_v19 }
 0x959   :  { %v6835_v36 = vadd.f32 %v6827_v46, %v6821_v26 }
 0x95a   :  { %v6765_v61 = vpop.f32.mrf.mxu3 }
 0x95b   :  { %v6766_v10 = vadd.f32 %v6765_v61, %v6752_v30  ;;  %v6839_v52 = vmax.f32 %v6835_v36, 0.0 }
 0x95c   :  { %v6754_v62 = vpop.f32.mrf.mxu2  ;;  %v6741_v7 = vpop.f32.mrf.mxu1 }
 0x95d   :  { %v6822_v57 = vadd.f32 %v6766_v10, %v6276_v37  ;;  %v6853_v42 = vmul.f32 %v6845_v35, %v6839_v52 }
 0x95f   :  { %v6836_v41 = vadd.f32 %v6828_v32, %v6822_v57 }
 0x961   :  { %v6840_v0 = vmax.f32 %v6836_v41, 0.0 }
 0x962   :  { %v6767_v1 = vpop.f32.mrf.mxu3 }
 0x963   :  { %v6854_v11 = vmul.f32 %v6846_v56, %v6840_v0 }
 0x965   :  { %v6857_v43 = vadd.f32 %v6854_v11, %v6853_v42 }
 0x96e   :  { %v6778_v15 = vpop.f32.mrf.mxu0 }
 0x974   :  { %v6791_v18 = vpop.f32.mrf.mxu1  ;;  %v6804_v5 = vpop.f32.mrf.mxu2 }
 0x975   :  { %v6792_v20 = vadd.f32 %v6791_v18, %v6778_v15 }
 0x976   :  { %v6780_v59 = vpop.f32.mrf.mxu0 }
 0x977   :  { %v6823_v50 = vadd.f32 %v6792_v20, %v6302_v8 }
 0x979   :  { %v6837_v16 = vadd.f32 %v6829_v54, %v6823_v50 }
 0x97a   :  { %v6817_v47 = vpop.f32.mrf.mxu3 }
 0x97b   :  { %v6841_v2 = vmax.f32 %v6837_v16, 0.0  ;;  %v6818_v3 = vadd.f32 %v6817_v47, %v6804_v5 }
 0x97c   :  { %v6793_v6 = vpop.f32.mrf.mxu1  ;;  %v6806_v29 = vpop.f32.mrf.mxu2 }
 0x97d   :  { %v6824_v44 = vadd.f32 %v6818_v3, %v6328_v22  ;;  %v6855_v53 = vmul.f32 %v6847_v45, %v6841_v2 }
 0x97f   :  { %v6838_v13 = vadd.f32 %v6830_v55, %v6824_v44  ;;  %v6858_v17 = vadd.f32 %v6857_v43, %v6855_v53 }
 0x981   :  { %v6842_v27 = vmax.f32 %v6838_v13, 0.0 }
 0x982   :  { %v6819_v39 = vpop.f32.mrf.mxu3 }
 0x983   :  { %v6856_v33 = vmul.f32 %v6848_v48, %v6842_v27 }
 0x985   :  { %v6859_v63 = vadd.f32 %v6858_v17, %v6856_v33 }
 0x987   :  { %6860 = vadd.xlane.f32.xlu2 %v6859_v63 }
 0x9fa   :  { %v6861_v25 = vpop.xlane.xlu2 %6860 }
 0x9fb   :  { %v6866_v4 = vadd.f32 %v9244_v23, %v6861_v25 }
 0x9fd   :  { %6868 = vst.msk [vmem:[%s12377_s15] sm:$0xff] %vm6867_vm0, %v6866_v4 }
 0x9fe   :  { %6873 = vsyncpa [#allocation5], 1 }
 0x9ff   :  { %6874 = vsyncpa [#allocation7], 1 }
 0xa00   :  { %6875 = vsyncpa [#allocation10], 1 }
 0xa01   :  { %6876 = vsyncpa [#allocation13], 1 }
 0xa02   :  { %6877 = vsyncpa [#allocation16], 1 }
 0xa03   :  { %6878 = vsyncpa [#allocation19], 1 }
 0xa04   :  { %6879 = vsyncpa [#allocation22], 1 }

</bundles_post_ra>
